<compile_context>
chip_gen: v7x
topology: tpu7x:2x2x1
jax: 0.10.0
libtpu: 0.0.40
codegen_flags: <defaults>
</compile_context>

<pallas_src>
import jax
import jax.numpy as jnp
from jax import lax
from jax.experimental import pallas as pl
from jax.experimental.pallas import tpu as pltpu

N_EMBD = 384
N_HEAD = 6
HEAD_SIZE = N_EMBD // N_HEAD   # 64
BLOCK_SIZE = 16                # Config.block_size (max T)
LN_EPS = 1e-5                  # torch nn.LayerNorm default


def _layer_norm(x, w, b):
    # x: (rows, C) f32 ; w, b: (1, C) f32
    mu = jnp.mean(x, axis=-1, keepdims=True)
    xc = x - mu
    var = jnp.mean(xc * xc, axis=-1, keepdims=True)
    return xc * lax.rsqrt(var + LN_EPS) * w + b


def _transformer_block_kernel(
        x_ref,
        ln1_w_ref, ln1_b_ref,
        wqkv_ref,
        wproj_ref, bproj_ref,
        ln2_w_ref, ln2_b_ref,
        w1_ref, b1_ref,
        w2_ref, b2_ref,
        o_ref):
    Bblk, T, C = x_ref.shape
    BT = Bblk * T
    D = HEAD_SIZE
    cd = wqkv_ref.dtype                                   # matmul-input dtype (bf16 default)
    f32 = jnp.float32

    x = x_ref[...].reshape(BT, C).astype(f32)             # (BT, C)

    # ---------------- x + MHA(LN1(x)) ----------------
    xn = _layer_norm(x, ln1_w_ref[...], ln1_b_ref[...])

    # Fused QKV projection: one (BT, C) @ (C, 3C) MXU matmul, f32 accumulation.
    # The n_embd**-0.5 score scale is already folded into the q columns of wqkv.
    qkv = jnp.dot(xn.astype(cd), wqkv_ref[...],
                  preferred_element_type=f32)              # (BT, 3C)

    # Causal mask hoisted once, shared by every (batch, head).
    row = lax.broadcasted_iota(jnp.int32, (1, T, T), 1)
    col = lax.broadcasted_iota(jnp.int32, (1, T, T), 2)
    causal = col <= row                                    # (1, T, T)

    # Per-head attention, batched over the Bblk batch rows; the out-projection is
    # accumulated per head so `sa` stays a lane-dense (BT, 384) accumulator and no
    # 64-wide concat is needed.
    sa = jnp.zeros((BT, C), f32)
    for h in range(N_HEAD):                                # static unroll over heads
        q_h = qkv[:, h * D:(h + 1) * D].reshape(Bblk, T, D)
        k_h = qkv[:, C + h * D:C + (h + 1) * D].reshape(Bblk, T, D)
        v_h = qkv[:, 2 * C + h * D:2 * C + (h + 1) * D].reshape(Bblk, T, D)

        s = jnp.einsum('bqd,bkd->bqk', q_h, k_h,
                       preferred_element_type=f32)         # (Bblk, T, T)
        s = jnp.where(causal, s, -jnp.inf)                 # causal rows never fully masked
        m = jnp.max(s, axis=-1, keepdims=True)
        e = jnp.exp(s - m)
        denom = jnp.sum(e, axis=-1, keepdims=True)
        p = e * pl.reciprocal(denom, approx=True)          # EUP reciprocal
        o_h = jnp.einsum('bqk,bkd->bqd', p, v_h,
                         preferred_element_type=f32)       # (Bblk, T, D)

        # Accumulate this head's slice of the output projection: (BT, D) @ (D, C).
        sa = sa + jnp.dot(o_h.reshape(BT, D).astype(cd),
                          wproj_ref[h * D:(h + 1) * D, :],
                          preferred_element_type=f32)

    x1 = x + sa + bproj_ref[...]

    # ---------------- x1 + FFN(LN2(x1)) ----------------
    yn = _layer_norm(x1, ln2_w_ref[...], ln2_b_ref[...])
    h1 = jnp.dot(yn.astype(cd), w1_ref[...],
                 preferred_element_type=f32) + b1_ref[...]                  # (BT, 4C)
    h1 = jnp.maximum(h1, 0.0)
    ff = jnp.dot(h1.astype(cd), w2_ref[...],
                 preferred_element_type=f32) + b2_ref[...]                  # (BT, C)

    o_ref[...] = (x1 + ff).reshape(Bblk, T, C).astype(o_ref.dtype)


def pack_transformer_block_params(params, compute_dtype=jnp.bfloat16):
    """One-time weight re-layout. Call ONCE at init, not per forward call.

    Returns (in, out)-layout weights with the per-head Q/K/V fused into a single
    (C, 3C) matrix, the n_embd**-0.5 attention scale folded into the q columns,
    and matmul weights cast to `compute_dtype` (bf16 by default for halved
    weight-DMA bytes; accumulation in the kernel is always f32).
    """
    C = N_EMBD
    f32 = jnp.float32
    scale = C ** -0.5                      # torch code scales by n_embd, not head_size

    wq = jnp.concatenate([h["wq"] for h in params["heads"]], axis=0).astype(f32)  # (C, C)
    wk = jnp.concatenate([h["wk"] for h in params["heads"]], axis=0).astype(f32)
    wv = jnp.concatenate([h["wv"] for h in params["heads"]], axis=0).astype(f32)
    wqkv = jnp.concatenate([wq.T * scale, wk.T, wv.T], axis=1)                     # (C, 3C)

    packed = {
        "wqkv": wqkv.astype(compute_dtype),
        "wproj": params["wproj"].T.astype(compute_dtype),          # (C, C)
        "bproj": params["bproj"].reshape(1, C).astype(f32),
        "w1": params["w1"].T.astype(compute_dtype),                # (C, 4C)
        "b1": params["b1"].reshape(1, 4 * C).astype(f32),
        "w2": params["w2"].T.astype(compute_dtype),                # (4C, C)
        "b2": params["b2"].reshape(1, C).astype(f32),
        "ln1_w": params["ln1_w"].reshape(1, C).astype(f32),
        "ln1_b": params["ln1_b"].reshape(1, C).astype(f32),
        "ln2_w": params["ln2_w"].reshape(1, C).astype(f32),
        "ln2_b": params["ln2_b"].reshape(1, C).astype(f32),
    }
    return jax.tree_util.tree_map(jnp.asarray, packed)


def _pick_block_b(B):
    # Largest power-of-two divisor of B capped at 8 (=> up to 128 MXU rows / step).
    for cand in (8, 4, 2, 1):
        if cand <= B and B % cand == 0:
            return cand
    return 1


@jax.jit
def transformer_block_forward(x, packed):
    """x: (B, T, C) float32. `packed` = output of pack_transformer_block_params."""
    B, T, C = x.shape
    H4 = 4 * C
    block_b = B if B <= 8 else _pick_block_b(B)
    grid_b = B // block_b

    def const2d(shape):
        return pl.BlockSpec(shape, lambda b: (0, 0))

    return pl.pallas_call(
        _transformer_block_kernel,
        out_shape=jax.ShapeDtypeStruct((B, T, C), x.dtype),
        grid_spec=pltpu.PrefetchScalarGridSpec(
            num_scalar_prefetch=0,
            grid=(grid_b,),
            in_specs=[
                pl.BlockSpec((block_b, T, C), lambda b: (b, 0, 0)),   # x
                const2d((1, C)), const2d((1, C)),                     # ln1 w, b
                const2d((C, 3 * C)),                                  # fused qkv (scale folded)
                const2d((C, C)), const2d((1, C)),                     # proj w, b
                const2d((1, C)), const2d((1, C)),                     # ln2 w, b
                const2d((C, H4)), const2d((1, H4)),                   # ffn w1, b1
                const2d((H4, C)), const2d((1, C)),                    # ffn w2, b2
            ],
            out_specs=pl.BlockSpec((block_b, T, C), lambda b: (b, 0, 0)),
        ),
        compiler_params=pltpu.CompilerParams(
            # Weight-DMA-bound at these sizes: do not shard the tiny batch across
            # v7x's two TensorCores (that duplicates the weight fetch).
            dimension_semantics=("arbitrary",),
            vmem_limit_bytes=40 * 1024 * 1024,
        ),
    )(x, packed["ln1_w"], packed["ln1_b"], packed["wqkv"],
      packed["wproj"], packed["bproj"], packed["ln2_w"], packed["ln2_b"],
      packed["w1"], packed["b1"], packed["w2"], packed["b2"])


def transformer_block_reference(x, params):
    """Pure-JAX f32 reference matching the PyTorch module (eval mode)."""
    def layer_norm(y, w, b):
        mu = y.mean(-1, keepdims=True)
        var = ((y - mu) ** 2).mean(-1, keepdims=True)
        return (y - mu) / jnp.sqrt(var + LN_EPS) * w + b

    B, T, C = x.shape
    xn = layer_norm(x, params["ln1_w"], params["ln1_b"])
    mask = jnp.tril(jnp.ones((T, T), dtype=bool))
    head_outs = []
    for hp in params["heads"]:
        k = xn @ hp["wk"].T
        q = xn @ hp["wq"].T
        v = xn @ hp["wv"].T
        scores = (q @ jnp.swapaxes(k, -2, -1)) * C ** -0.5
        scores = jnp.where(mask, scores, -jnp.inf)
        attn = jax.nn.softmax(scores, axis=-1)
        head_outs.append(attn @ v)
    sa = jnp.concatenate(head_outs, axis=-1) @ params["wproj"].T + params["bproj"]
    x1 = x + sa
    yn = layer_norm(x1, params["ln2_w"], params["ln2_b"])
    ff = jnp.maximum(yn @ params["w1"].T + params["b1"], 0.0) @ params["w2"].T + params["b2"]
    return x1 + ff


if __name__ == "__main__":
    key = jax.random.PRNGKey(0)
    keys = iter(jax.random.split(key, 32))

    B, T, C = 2, BLOCK_SIZE, N_EMBD
    H4 = 4 * C

    def lin_w(k, out_dim, in_dim):
        bound = 1.0 / (in_dim ** 0.5)
        return jax.random.uniform(k, (out_dim, in_dim), minval=-bound, maxval=bound,
                                  dtype=jnp.float32)

    def lin_b(k, out_dim, in_dim):
        bound = 1.0 / (in_dim ** 0.5)
        return jax.random.uniform(k, (out_dim,), minval=-bound, maxval=bound,
                                  dtype=jnp.float32)

    x = jax.random.normal(next(keys), (B, T, C), dtype=jnp.float32)

    params = {
        "ln1_w": 1.0 + 0.1 * jax.random.normal(next(keys), (C,), dtype=jnp.float32),
        "ln1_b": 0.1 * jax.random.normal(next(keys), (C,), dtype=jnp.float32),
        "ln2_w": 1.0 + 0.1 * jax.random.normal(next(keys), (C,), dtype=jnp.float32),
        "ln2_b": 0.1 * jax.random.normal(next(keys), (C,), dtype=jnp.float32),
        "heads": [
            {"wq": lin_w(next(keys), HEAD_SIZE, C),
             "wk": lin_w(next(keys), HEAD_SIZE, C),
             "wv": lin_w(next(keys), HEAD_SIZE, C)}
            for _ in range(N_HEAD)
        ],
        "wproj": lin_w(next(keys), C, C),
        "bproj": lin_b(next(keys), C, C),
        "w1": lin_w(next(keys), H4, C),
        "b1": lin_b(next(keys), H4, C),
        "w2": lin_w(next(keys), C, H4),
        "b2": lin_b(next(keys), C, H4),
    }

    ref = transformer_block_reference(x, params)

    # Default path: bf16 weight streaming (f32 accumulation) — fast MXU mode on
    # v5e / v6e / v7x and half the weight HBM->VMEM bytes.
    packed_bf16 = pack_transformer_block_params(params)          # pack ONCE at init
    out = jax.block_until_ready(transformer_block_forward(x, packed_bf16))
    assert out.shape == (B, T, C)
    assert bool(jnp.isfinite(out).all())
    err_bf16 = float(jnp.max(jnp.abs(out - ref)))
    assert err_bf16 < 3e-1, f"bf16 max abs err {err_bf16}"

    # f32 weight path: exact module math up to MXU accumulation order and the
    # approximate (EUP) softmax reciprocal.
    packed_f32 = pack_transformer_block_params(params, compute_dtype=jnp.float32)
    out_f32 = jax.block_until_ready(transformer_block_forward(x, packed_f32))
    err_f32 = float(jnp.max(jnp.abs(out_f32 - ref)))
    assert err_f32 < 1e-2, f"f32 max abs err {err_f32}"

    print("KERNEL_OK")
</pallas_src>

<mosaic_0001>
module attributes {stable_mosaic.version = 11 : i64} {
  func.func @_transformer_block_kernel(%arg0: i32, %arg1: memref<2x16x384xf32, #tpu.memory_space<vmem>>, %arg2: memref<1x384xf32, #tpu.memory_space<vmem>>, %arg3: memref<1x384xf32, #tpu.memory_space<vmem>>, %arg4: memref<384x1152xbf16, #tpu.memory_space<vmem>>, %arg5: memref<384x384xbf16, #tpu.memory_space<vmem>>, %arg6: memref<1x384xf32, #tpu.memory_space<vmem>>, %arg7: memref<1x384xf32, #tpu.memory_space<vmem>>, %arg8: memref<1x384xf32, #tpu.memory_space<vmem>>, %arg9: memref<384x1536xbf16, #tpu.memory_space<vmem>>, %arg10: memref<1x1536xf32, #tpu.memory_space<vmem>>, %arg11: memref<1536x384xbf16, #tpu.memory_space<vmem>>, %arg12: memref<1x384xf32, #tpu.memory_space<vmem>>, %arg13: memref<2x16x384xf32, #tpu.memory_space<vmem>>) attributes {dimension_semantics = [#tpu.dimension_semantics<arbitrary>], iteration_bounds = array<i64: 1>, scalar_prefetch = 0 : i64, scratch_operands = 0 : i64, tpu.core_type = #tpu.core_type<tc>, window_params = [{transform_indices = @transform_0, window_bounds = array<i64: 2, 16, 384>}, {pipeline_mode = #tpu.pipeline_mode<synchronous>, transform_indices = @transform_1, window_bounds = array<i64: 1, 384>}, {pipeline_mode = #tpu.pipeline_mode<synchronous>, transform_indices = @transform_2, window_bounds = array<i64: 1, 384>}, {pipeline_mode = #tpu.pipeline_mode<synchronous>, transform_indices = @transform_3, window_bounds = array<i64: 384, 1152>}, {pipeline_mode = #tpu.pipeline_mode<synchronous>, transform_indices = @transform_4, window_bounds = array<i64: 384, 384>}, {pipeline_mode = #tpu.pipeline_mode<synchronous>, transform_indices = @transform_5, window_bounds = array<i64: 1, 384>}, {pipeline_mode = #tpu.pipeline_mode<synchronous>, transform_indices = @transform_6, window_bounds = array<i64: 1, 384>}, {pipeline_mode = #tpu.pipeline_mode<synchronous>, transform_indices = @transform_7, window_bounds = array<i64: 1, 384>}, {pipeline_mode = #tpu.pipeline_mode<synchronous>, transform_indices = @transform_8, window_bounds = array<i64: 384, 1536>}, {pipeline_mode = #tpu.pipeline_mode<synchronous>, transform_indices = @transform_9, window_bounds = array<i64: 1, 1536>}, {pipeline_mode = #tpu.pipeline_mode<synchronous>, transform_indices = @transform_10, window_bounds = array<i64: 1536, 384>}, {pipeline_mode = #tpu.pipeline_mode<synchronous>, transform_indices = @transform_11, window_bounds = array<i64: 1, 384>}, {transform_indices = @transform_12, window_bounds = array<i64: 2, 16, 384>}]} {
    %c0 = arith.constant 0 : index
    %c0_0 = arith.constant 0 : index
    %c0_1 = arith.constant 0 : index
    %0 = vector.load %arg1[%c0, %c0_0, %c0_1] : memref<2x16x384xf32, #tpu.memory_space<vmem>>, vector<2x16x384xf32>
    %1 = vector.shape_cast %0 : vector<2x16x384xf32> to vector<32x384xf32>
    %c0_2 = arith.constant 0 : index
    %c0_3 = arith.constant 0 : index
    %2 = vector.load %arg2[%c0_2, %c0_3] : memref<1x384xf32, #tpu.memory_space<vmem>>, vector<1x384xf32>
    %c0_4 = arith.constant 0 : index
    %c0_5 = arith.constant 0 : index
    %3 = vector.load %arg3[%c0_4, %c0_5] : memref<1x384xf32, #tpu.memory_space<vmem>>, vector<1x384xf32>
    %cst = arith.constant dense<0.000000e+00> : vector<32xf32>
    %4 = vector.multi_reduction <add>, %1, %cst [1] : vector<32x384xf32> to vector<32xf32>
    %5 = vector.shape_cast %4 : vector<32xf32> to vector<32x1xf32>
    %cst_6 = arith.constant 3.840000e+02 : f32
    %6 = vector.broadcast %cst_6 : f32 to vector<32x1xf32>
    %7 = arith.divf %5, %6 : vector<32x1xf32>
    %8 = vector.broadcast %7 : vector<32x1xf32> to vector<32x384xf32>
    %9 = arith.subf %1, %8 : vector<32x384xf32>
    %10 = arith.mulf %9, %9 : vector<32x384xf32>
    %cst_7 = arith.constant dense<0.000000e+00> : vector<32xf32>
    %11 = vector.multi_reduction <add>, %10, %cst_7 [1] : vector<32x384xf32> to vector<32xf32>
    %12 = vector.shape_cast %11 : vector<32xf32> to vector<32x1xf32>
    %cst_8 = arith.constant 3.840000e+02 : f32
    %13 = vector.broadcast %cst_8 : f32 to vector<32x1xf32>
    %14 = arith.divf %12, %13 : vector<32x1xf32>
    %cst_9 = arith.constant 9.99999974E-6 : f32
    %15 = vector.broadcast %cst_9 : f32 to vector<32x1xf32>
    %16 = arith.addf %14, %15 : vector<32x1xf32>
    %17 = math.rsqrt %16 : vector<32x1xf32>
    %18 = vector.broadcast %17 : vector<32x1xf32> to vector<32x384xf32>
    %19 = arith.mulf %9, %18 : vector<32x384xf32>
    %20 = vector.broadcast %2 : vector<1x384xf32> to vector<32x384xf32>
    %21 = arith.mulf %19, %20 : vector<32x384xf32>
    %22 = vector.broadcast %3 : vector<1x384xf32> to vector<32x384xf32>
    %23 = arith.addf %21, %22 : vector<32x384xf32>
    %24 = arith.truncf %23 : vector<32x384xf32> to vector<32x384xbf16>
    %c0_10 = arith.constant 0 : index
    %c0_11 = arith.constant 0 : index
    %25 = vector.load %arg4[%c0_10, %c0_11] : memref<384x1152xbf16, #tpu.memory_space<vmem>>, vector<384x1152xbf16>
    %cst_12 = arith.constant dense<0.000000e+00> : vector<32x1152xf32>
    %26 = tpu.matmul %24, %25, %cst_12 {dimension_numbers = #tpu.dot_dimension_numbers<[1], [0], [0], [1], [0, 0, 1, 1], [], []>} : vector<32x384xbf16>, vector<384x1152xbf16>, vector<32x1152xf32> -> vector<32x1152xf32>
    %27 = tpu.iota {dimensions = array<i32: 1>} : vector<1x16x16xi32>
    %28 = tpu.iota {dimensions = array<i32: 2>} : vector<1x16x16xi32>
    %29 = arith.cmpi sle, %28, %27 : vector<1x16x16xi32>
    %cst_13 = arith.constant 0.000000e+00 : f32
    %30 = vector.broadcast %cst_13 : f32 to vector<32x384xf32>
    %31 = vector.extract_strided_slice %26 {offsets = [0, 0], sizes = [32, 64], strides = [1, 1]} : vector<32x1152xf32> to vector<32x64xf32>
    %32 = vector.shape_cast %31 : vector<32x64xf32> to vector<2x16x64xf32>
    %33 = vector.extract_strided_slice %26 {offsets = [0, 384], sizes = [32, 64], strides = [1, 1]} : vector<32x1152xf32> to vector<32x64xf32>
    %34 = vector.shape_cast %33 : vector<32x64xf32> to vector<2x16x64xf32>
    %35 = vector.extract_strided_slice %26 {offsets = [0, 768], sizes = [32, 64], strides = [1, 1]} : vector<32x1152xf32> to vector<32x64xf32>
    %36 = vector.shape_cast %35 : vector<32x64xf32> to vector<2x16x64xf32>
    "tpu.trace_start"() <{level = 10 : i32, message = "bqd,bkd->bqk"}> : () -> ()
    %cst_14 = arith.constant dense<0.000000e+00> : vector<2x16x16xf32>
    %37 = tpu.matmul %32, %34, %cst_14 {dimension_numbers = #tpu.dot_dimension_numbers<[2], [2], [1], [1], [0, 0, 0, 1, 1, 1], [0], [0]>} : vector<2x16x64xf32>, vector<2x16x64xf32>, vector<2x16x16xf32> -> vector<2x16x16xf32>
    %cst_15 = arith.constant 0xFF800000 : f32
    "tpu.trace_stop"() : () -> ()
    %38 = vector.shape_cast %29 : vector<1x16x16xi1> to vector<1x16x16xi1>
    %39 = vector.broadcast %38 : vector<1x16x16xi1> to vector<2x16x16xi1>
    %40 = vector.broadcast %cst_15 : f32 to vector<2x16x16xf32>
    %41 = arith.select %39, %37, %40 : vector<2x16x16xi1>, vector<2x16x16xf32>
    %cst_16 = arith.constant dense<0xFF800000> : vector<2x16xf32>
    %42 = vector.multi_reduction <maximumf>, %41, %cst_16 [2] : vector<2x16x16xf32> to vector<2x16xf32>
    %43 = vector.shape_cast %42 : vector<2x16xf32> to vector<2x16x1xf32>
    %44 = vector.broadcast %43 : vector<2x16x1xf32> to vector<2x16x16xf32>
    %45 = arith.subf %41, %44 : vector<2x16x16xf32>
    %46 = math.exp %45 : vector<2x16x16xf32>
    %cst_17 = arith.constant dense<0.000000e+00> : vector<2x16xf32>
    %47 = vector.multi_reduction <add>, %46, %cst_17 [2] : vector<2x16x16xf32> to vector<2x16xf32>
    %48 = vector.shape_cast %47 : vector<2x16xf32> to vector<2x16x1xf32>
    %49 = tpu.reciprocal %48 {approx = true} : vector<2x16x1xf32> -> vector<2x16x1xf32>
    %50 = vector.broadcast %49 : vector<2x16x1xf32> to vector<2x16x16xf32>
    %51 = arith.mulf %46, %50 : vector<2x16x16xf32>
    "tpu.trace_start"() <{level = 10 : i32, message = "bqk,bkd->bqd"}> : () -> ()
    %cst_18 = arith.constant dense<0.000000e+00> : vector<2x16x64xf32>
    %52 = tpu.matmul %51, %36, %cst_18 {dimension_numbers = #tpu.dot_dimension_numbers<[2], [1], [1], [2], [0, 0, 0, 1, 1, 2], [0], [0]>} : vector<2x16x16xf32>, vector<2x16x64xf32>, vector<2x16x64xf32> -> vector<2x16x64xf32>
    "tpu.trace_stop"() : () -> ()
    %53 = vector.shape_cast %52 : vector<2x16x64xf32> to vector<32x64xf32>
    %54 = arith.truncf %53 : vector<32x64xf32> to vector<32x64xbf16>
    %c0_19 = arith.constant 0 : index
    %c0_20 = arith.constant 0 : index
    %55 = vector.load %arg5[%c0_19, %c0_20] : memref<384x384xbf16, #tpu.memory_space<vmem>>, vector<64x384xbf16>
    %cst_21 = arith.constant dense<0.000000e+00> : vector<32x384xf32>
    %56 = tpu.matmul %54, %55, %cst_21 {dimension_numbers = #tpu.dot_dimension_numbers<[1], [0], [0], [1], [0, 0, 1, 1], [], []>} : vector<32x64xbf16>, vector<64x384xbf16>, vector<32x384xf32> -> vector<32x384xf32>
    %57 = arith.addf %30, %56 : vector<32x384xf32>
    %58 = vector.extract_strided_slice %26 {offsets = [0, 64], sizes = [32, 64], strides = [1, 1]} : vector<32x1152xf32> to vector<32x64xf32>
    %59 = vector.shape_cast %58 : vector<32x64xf32> to vector<2x16x64xf32>
    %60 = vector.extract_strided_slice %26 {offsets = [0, 448], sizes = [32, 64], strides = [1, 1]} : vector<32x1152xf32> to vector<32x64xf32>
    %61 = vector.shape_cast %60 : vector<32x64xf32> to vector<2x16x64xf32>
    %62 = vector.extract_strided_slice %26 {offsets = [0, 832], sizes = [32, 64], strides = [1, 1]} : vector<32x1152xf32> to vector<32x64xf32>
    %63 = vector.shape_cast %62 : vector<32x64xf32> to vector<2x16x64xf32>
    "tpu.trace_start"() <{level = 10 : i32, message = "bqd,bkd->bqk"}> : () -> ()
    %cst_22 = arith.constant dense<0.000000e+00> : vector<2x16x16xf32>
    %64 = tpu.matmul %59, %61, %cst_22 {dimension_numbers = #tpu.dot_dimension_numbers<[2], [2], [1], [1], [0, 0, 0, 1, 1, 1], [0], [0]>} : vector<2x16x64xf32>, vector<2x16x64xf32>, vector<2x16x16xf32> -> vector<2x16x16xf32>
    %cst_23 = arith.constant 0xFF800000 : f32
    "tpu.trace_stop"() : () -> ()
    %65 = vector.shape_cast %29 : vector<1x16x16xi1> to vector<1x16x16xi1>
    %66 = vector.broadcast %65 : vector<1x16x16xi1> to vector<2x16x16xi1>
    %67 = vector.broadcast %cst_23 : f32 to vector<2x16x16xf32>
    %68 = arith.select %66, %64, %67 : vector<2x16x16xi1>, vector<2x16x16xf32>
    %cst_24 = arith.constant dense<0xFF800000> : vector<2x16xf32>
    %69 = vector.multi_reduction <maximumf>, %68, %cst_24 [2] : vector<2x16x16xf32> to vector<2x16xf32>
    %70 = vector.shape_cast %69 : vector<2x16xf32> to vector<2x16x1xf32>
    %71 = vector.broadcast %70 : vector<2x16x1xf32> to vector<2x16x16xf32>
    %72 = arith.subf %68, %71 : vector<2x16x16xf32>
    %73 = math.exp %72 : vector<2x16x16xf32>
    %cst_25 = arith.constant dense<0.000000e+00> : vector<2x16xf32>
    %74 = vector.multi_reduction <add>, %73, %cst_25 [2] : vector<2x16x16xf32> to vector<2x16xf32>
    %75 = vector.shape_cast %74 : vector<2x16xf32> to vector<2x16x1xf32>
    %76 = tpu.reciprocal %75 {approx = true} : vector<2x16x1xf32> -> vector<2x16x1xf32>
    %77 = vector.broadcast %76 : vector<2x16x1xf32> to vector<2x16x16xf32>
    %78 = arith.mulf %73, %77 : vector<2x16x16xf32>
    "tpu.trace_start"() <{level = 10 : i32, message = "bqk,bkd->bqd"}> : () -> ()
    %cst_26 = arith.constant dense<0.000000e+00> : vector<2x16x64xf32>
    %79 = tpu.matmul %78, %63, %cst_26 {dimension_numbers = #tpu.dot_dimension_numbers<[2], [1], [1], [2], [0, 0, 0, 1, 1, 2], [0], [0]>} : vector<2x16x16xf32>, vector<2x16x64xf32>, vector<2x16x64xf32> -> vector<2x16x64xf32>
    "tpu.trace_stop"() : () -> ()
    %80 = vector.shape_cast %79 : vector<2x16x64xf32> to vector<32x64xf32>
    %81 = arith.truncf %80 : vector<32x64xf32> to vector<32x64xbf16>
    %c64 = arith.constant 64 : index
    %c0_27 = arith.constant 0 : index
    %82 = vector.load %arg5[%c64, %c0_27] : memref<384x384xbf16, #tpu.memory_space<vmem>>, vector<64x384xbf16>
    %cst_28 = arith.constant dense<0.000000e+00> : vector<32x384xf32>
    %83 = tpu.matmul %81, %82, %cst_28 {dimension_numbers = #tpu.dot_dimension_numbers<[1], [0], [0], [1], [0, 0, 1, 1], [], []>} : vector<32x64xbf16>, vector<64x384xbf16>, vector<32x384xf32> -> vector<32x384xf32>
    %84 = arith.addf %57, %83 : vector<32x384xf32>
    %85 = vector.extract_strided_slice %26 {offsets = [0, 128], sizes = [32, 64], strides = [1, 1]} : vector<32x1152xf32> to vector<32x64xf32>
    %86 = vector.shape_cast %85 : vector<32x64xf32> to vector<2x16x64xf32>
    %87 = vector.extract_strided_slice %26 {offsets = [0, 512], sizes = [32, 64], strides = [1, 1]} : vector<32x1152xf32> to vector<32x64xf32>
    %88 = vector.shape_cast %87 : vector<32x64xf32> to vector<2x16x64xf32>
    %89 = vector.extract_strided_slice %26 {offsets = [0, 896], sizes = [32, 64], strides = [1, 1]} : vector<32x1152xf32> to vector<32x64xf32>
    %90 = vector.shape_cast %89 : vector<32x64xf32> to vector<2x16x64xf32>
    "tpu.trace_start"() <{level = 10 : i32, message = "bqd,bkd->bqk"}> : () -> ()
    %cst_29 = arith.constant dense<0.000000e+00> : vector<2x16x16xf32>
    %91 = tpu.matmul %86, %88, %cst_29 {dimension_numbers = #tpu.dot_dimension_numbers<[2], [2], [1], [1], [0, 0, 0, 1, 1, 1], [0], [0]>} : vector<2x16x64xf32>, vector<2x16x64xf32>, vector<2x16x16xf32> -> vector<2x16x16xf32>
    %cst_30 = arith.constant 0xFF800000 : f32
    "tpu.trace_stop"() : () -> ()
    %92 = vector.shape_cast %29 : vector<1x16x16xi1> to vector<1x16x16xi1>
    %93 = vector.broadcast %92 : vector<1x16x16xi1> to vector<2x16x16xi1>
    %94 = vector.broadcast %cst_30 : f32 to vector<2x16x16xf32>
    %95 = arith.select %93, %91, %94 : vector<2x16x16xi1>, vector<2x16x16xf32>
    %cst_31 = arith.constant dense<0xFF800000> : vector<2x16xf32>
    %96 = vector.multi_reduction <maximumf>, %95, %cst_31 [2] : vector<2x16x16xf32> to vector<2x16xf32>
    %97 = vector.shape_cast %96 : vector<2x16xf32> to vector<2x16x1xf32>
    %98 = vector.broadcast %97 : vector<2x16x1xf32> to vector<2x16x16xf32>
    %99 = arith.subf %95, %98 : vector<2x16x16xf32>
    %100 = math.exp %99 : vector<2x16x16xf32>
    %cst_32 = arith.constant dense<0.000000e+00> : vector<2x16xf32>
    %101 = vector.multi_reduction <add>, %100, %cst_32 [2] : vector<2x16x16xf32> to vector<2x16xf32>
    %102 = vector.shape_cast %101 : vector<2x16xf32> to vector<2x16x1xf32>
    %103 = tpu.reciprocal %102 {approx = true} : vector<2x16x1xf32> -> vector<2x16x1xf32>
    %104 = vector.broadcast %103 : vector<2x16x1xf32> to vector<2x16x16xf32>
    %105 = arith.mulf %100, %104 : vector<2x16x16xf32>
    "tpu.trace_start"() <{level = 10 : i32, message = "bqk,bkd->bqd"}> : () -> ()
    %cst_33 = arith.constant dense<0.000000e+00> : vector<2x16x64xf32>
    %106 = tpu.matmul %105, %90, %cst_33 {dimension_numbers = #tpu.dot_dimension_numbers<[2], [1], [1], [2], [0, 0, 0, 1, 1, 2], [0], [0]>} : vector<2x16x16xf32>, vector<2x16x64xf32>, vector<2x16x64xf32> -> vector<2x16x64xf32>
    "tpu.trace_stop"() : () -> ()
    %107 = vector.shape_cast %106 : vector<2x16x64xf32> to vector<32x64xf32>
    %108 = arith.truncf %107 : vector<32x64xf32> to vector<32x64xbf16>
    %c128 = arith.constant 128 : index
    %c0_34 = arith.constant 0 : index
    %109 = vector.load %arg5[%c128, %c0_34] : memref<384x384xbf16, #tpu.memory_space<vmem>>, vector<64x384xbf16>
    %cst_35 = arith.constant dense<0.000000e+00> : vector<32x384xf32>
    %110 = tpu.matmul %108, %109, %cst_35 {dimension_numbers = #tpu.dot_dimension_numbers<[1], [0], [0], [1], [0, 0, 1, 1], [], []>} : vector<32x64xbf16>, vector<64x384xbf16>, vector<32x384xf32> -> vector<32x384xf32>
    %111 = arith.addf %84, %110 : vector<32x384xf32>
    %112 = vector.extract_strided_slice %26 {offsets = [0, 192], sizes = [32, 64], strides = [1, 1]} : vector<32x1152xf32> to vector<32x64xf32>
    %113 = vector.shape_cast %112 : vector<32x64xf32> to vector<2x16x64xf32>
    %114 = vector.extract_strided_slice %26 {offsets = [0, 576], sizes = [32, 64], strides = [1, 1]} : vector<32x1152xf32> to vector<32x64xf32>
    %115 = vector.shape_cast %114 : vector<32x64xf32> to vector<2x16x64xf32>
    %116 = vector.extract_strided_slice %26 {offsets = [0, 960], sizes = [32, 64], strides = [1, 1]} : vector<32x1152xf32> to vector<32x64xf32>
    %117 = vector.shape_cast %116 : vector<32x64xf32> to vector<2x16x64xf32>
    "tpu.trace_start"() <{level = 10 : i32, message = "bqd,bkd->bqk"}> : () -> ()
    %cst_36 = arith.constant dense<0.000000e+00> : vector<2x16x16xf32>
    %118 = tpu.matmul %113, %115, %cst_36 {dimension_numbers = #tpu.dot_dimension_numbers<[2], [2], [1], [1], [0, 0, 0, 1, 1, 1], [0], [0]>} : vector<2x16x64xf32>, vector<2x16x64xf32>, vector<2x16x16xf32> -> vector<2x16x16xf32>
    %cst_37 = arith.constant 0xFF800000 : f32
    "tpu.trace_stop"() : () -> ()
    %119 = vector.shape_cast %29 : vector<1x16x16xi1> to vector<1x16x16xi1>
    %120 = vector.broadcast %119 : vector<1x16x16xi1> to vector<2x16x16xi1>
    %121 = vector.broadcast %cst_37 : f32 to vector<2x16x16xf32>
    %122 = arith.select %120, %118, %121 : vector<2x16x16xi1>, vector<2x16x16xf32>
    %cst_38 = arith.constant dense<0xFF800000> : vector<2x16xf32>
    %123 = vector.multi_reduction <maximumf>, %122, %cst_38 [2] : vector<2x16x16xf32> to vector<2x16xf32>
    %124 = vector.shape_cast %123 : vector<2x16xf32> to vector<2x16x1xf32>
    %125 = vector.broadcast %124 : vector<2x16x1xf32> to vector<2x16x16xf32>
    %126 = arith.subf %122, %125 : vector<2x16x16xf32>
    %127 = math.exp %126 : vector<2x16x16xf32>
    %cst_39 = arith.constant dense<0.000000e+00> : vector<2x16xf32>
    %128 = vector.multi_reduction <add>, %127, %cst_39 [2] : vector<2x16x16xf32> to vector<2x16xf32>
    %129 = vector.shape_cast %128 : vector<2x16xf32> to vector<2x16x1xf32>
    %130 = tpu.reciprocal %129 {approx = true} : vector<2x16x1xf32> -> vector<2x16x1xf32>
    %131 = vector.broadcast %130 : vector<2x16x1xf32> to vector<2x16x16xf32>
    %132 = arith.mulf %127, %131 : vector<2x16x16xf32>
    "tpu.trace_start"() <{level = 10 : i32, message = "bqk,bkd->bqd"}> : () -> ()
    %cst_40 = arith.constant dense<0.000000e+00> : vector<2x16x64xf32>
    %133 = tpu.matmul %132, %117, %cst_40 {dimension_numbers = #tpu.dot_dimension_numbers<[2], [1], [1], [2], [0, 0, 0, 1, 1, 2], [0], [0]>} : vector<2x16x16xf32>, vector<2x16x64xf32>, vector<2x16x64xf32> -> vector<2x16x64xf32>
    "tpu.trace_stop"() : () -> ()
    %134 = vector.shape_cast %133 : vector<2x16x64xf32> to vector<32x64xf32>
    %135 = arith.truncf %134 : vector<32x64xf32> to vector<32x64xbf16>
    %c192 = arith.constant 192 : index
    %c0_41 = arith.constant 0 : index
    %136 = vector.load %arg5[%c192, %c0_41] : memref<384x384xbf16, #tpu.memory_space<vmem>>, vector<64x384xbf16>
    %cst_42 = arith.constant dense<0.000000e+00> : vector<32x384xf32>
    %137 = tpu.matmul %135, %136, %cst_42 {dimension_numbers = #tpu.dot_dimension_numbers<[1], [0], [0], [1], [0, 0, 1, 1], [], []>} : vector<32x64xbf16>, vector<64x384xbf16>, vector<32x384xf32> -> vector<32x384xf32>
    %138 = arith.addf %111, %137 : vector<32x384xf32>
    %139 = vector.extract_strided_slice %26 {offsets = [0, 256], sizes = [32, 64], strides = [1, 1]} : vector<32x1152xf32> to vector<32x64xf32>
    %140 = vector.shape_cast %139 : vector<32x64xf32> to vector<2x16x64xf32>
    %141 = vector.extract_strided_slice %26 {offsets = [0, 640], sizes = [32, 64], strides = [1, 1]} : vector<32x1152xf32> to vector<32x64xf32>
    %142 = vector.shape_cast %141 : vector<32x64xf32> to vector<2x16x64xf32>
    %143 = vector.extract_strided_slice %26 {offsets = [0, 1024], sizes = [32, 64], strides = [1, 1]} : vector<32x1152xf32> to vector<32x64xf32>
    %144 = vector.shape_cast %143 : vector<32x64xf32> to vector<2x16x64xf32>
    "tpu.trace_start"() <{level = 10 : i32, message = "bqd,bkd->bqk"}> : () -> ()
    %cst_43 = arith.constant dense<0.000000e+00> : vector<2x16x16xf32>
    %145 = tpu.matmul %140, %142, %cst_43 {dimension_numbers = #tpu.dot_dimension_numbers<[2], [2], [1], [1], [0, 0, 0, 1, 1, 1], [0], [0]>} : vector<2x16x64xf32>, vector<2x16x64xf32>, vector<2x16x16xf32> -> vector<2x16x16xf32>
    %cst_44 = arith.constant 0xFF800000 : f32
    "tpu.trace_stop"() : () -> ()
    %146 = vector.shape_cast %29 : vector<1x16x16xi1> to vector<1x16x16xi1>
    %147 = vector.broadcast %146 : vector<1x16x16xi1> to vector<2x16x16xi1>
    %148 = vector.broadcast %cst_44 : f32 to vector<2x16x16xf32>
    %149 = arith.select %147, %145, %148 : vector<2x16x16xi1>, vector<2x16x16xf32>
    %cst_45 = arith.constant dense<0xFF800000> : vector<2x16xf32>
    %150 = vector.multi_reduction <maximumf>, %149, %cst_45 [2] : vector<2x16x16xf32> to vector<2x16xf32>
    %151 = vector.shape_cast %150 : vector<2x16xf32> to vector<2x16x1xf32>
    %152 = vector.broadcast %151 : vector<2x16x1xf32> to vector<2x16x16xf32>
    %153 = arith.subf %149, %152 : vector<2x16x16xf32>
    %154 = math.exp %153 : vector<2x16x16xf32>
    %cst_46 = arith.constant dense<0.000000e+00> : vector<2x16xf32>
    %155 = vector.multi_reduction <add>, %154, %cst_46 [2] : vector<2x16x16xf32> to vector<2x16xf32>
    %156 = vector.shape_cast %155 : vector<2x16xf32> to vector<2x16x1xf32>
    %157 = tpu.reciprocal %156 {approx = true} : vector<2x16x1xf32> -> vector<2x16x1xf32>
    %158 = vector.broadcast %157 : vector<2x16x1xf32> to vector<2x16x16xf32>
    %159 = arith.mulf %154, %158 : vector<2x16x16xf32>
    "tpu.trace_start"() <{level = 10 : i32, message = "bqk,bkd->bqd"}> : () -> ()
    %cst_47 = arith.constant dense<0.000000e+00> : vector<2x16x64xf32>
    %160 = tpu.matmul %159, %144, %cst_47 {dimension_numbers = #tpu.dot_dimension_numbers<[2], [1], [1], [2], [0, 0, 0, 1, 1, 2], [0], [0]>} : vector<2x16x16xf32>, vector<2x16x64xf32>, vector<2x16x64xf32> -> vector<2x16x64xf32>
    "tpu.trace_stop"() : () -> ()
    %161 = vector.shape_cast %160 : vector<2x16x64xf32> to vector<32x64xf32>
    %162 = arith.truncf %161 : vector<32x64xf32> to vector<32x64xbf16>
    %c256 = arith.constant 256 : index
    %c0_48 = arith.constant 0 : index
    %163 = vector.load %arg5[%c256, %c0_48] : memref<384x384xbf16, #tpu.memory_space<vmem>>, vector<64x384xbf16>
    %cst_49 = arith.constant dense<0.000000e+00> : vector<32x384xf32>
    %164 = tpu.matmul %162, %163, %cst_49 {dimension_numbers = #tpu.dot_dimension_numbers<[1], [0], [0], [1], [0, 0, 1, 1], [], []>} : vector<32x64xbf16>, vector<64x384xbf16>, vector<32x384xf32> -> vector<32x384xf32>
    %165 = arith.addf %138, %164 : vector<32x384xf32>
    %166 = vector.extract_strided_slice %26 {offsets = [0, 320], sizes = [32, 64], strides = [1, 1]} : vector<32x1152xf32> to vector<32x64xf32>
    %167 = vector.shape_cast %166 : vector<32x64xf32> to vector<2x16x64xf32>
    %168 = vector.extract_strided_slice %26 {offsets = [0, 704], sizes = [32, 64], strides = [1, 1]} : vector<32x1152xf32> to vector<32x64xf32>
    %169 = vector.shape_cast %168 : vector<32x64xf32> to vector<2x16x64xf32>
    %170 = vector.extract_strided_slice %26 {offsets = [0, 1088], sizes = [32, 64], strides = [1, 1]} : vector<32x1152xf32> to vector<32x64xf32>
    %171 = vector.shape_cast %170 : vector<32x64xf32> to vector<2x16x64xf32>
    "tpu.trace_start"() <{level = 10 : i32, message = "bqd,bkd->bqk"}> : () -> ()
    %cst_50 = arith.constant dense<0.000000e+00> : vector<2x16x16xf32>
    %172 = tpu.matmul %167, %169, %cst_50 {dimension_numbers = #tpu.dot_dimension_numbers<[2], [2], [1], [1], [0, 0, 0, 1, 1, 1], [0], [0]>} : vector<2x16x64xf32>, vector<2x16x64xf32>, vector<2x16x16xf32> -> vector<2x16x16xf32>
    %cst_51 = arith.constant 0xFF800000 : f32
    "tpu.trace_stop"() : () -> ()
    %173 = vector.shape_cast %29 : vector<1x16x16xi1> to vector<1x16x16xi1>
    %174 = vector.broadcast %173 : vector<1x16x16xi1> to vector<2x16x16xi1>
    %175 = vector.broadcast %cst_51 : f32 to vector<2x16x16xf32>
    %176 = arith.select %174, %172, %175 : vector<2x16x16xi1>, vector<2x16x16xf32>
    %cst_52 = arith.constant dense<0xFF800000> : vector<2x16xf32>
    %177 = vector.multi_reduction <maximumf>, %176, %cst_52 [2] : vector<2x16x16xf32> to vector<2x16xf32>
    %178 = vector.shape_cast %177 : vector<2x16xf32> to vector<2x16x1xf32>
    %179 = vector.broadcast %178 : vector<2x16x1xf32> to vector<2x16x16xf32>
    %180 = arith.subf %176, %179 : vector<2x16x16xf32>
    %181 = math.exp %180 : vector<2x16x16xf32>
    %cst_53 = arith.constant dense<0.000000e+00> : vector<2x16xf32>
    %182 = vector.multi_reduction <add>, %181, %cst_53 [2] : vector<2x16x16xf32> to vector<2x16xf32>
    %183 = vector.shape_cast %182 : vector<2x16xf32> to vector<2x16x1xf32>
    %184 = tpu.reciprocal %183 {approx = true} : vector<2x16x1xf32> -> vector<2x16x1xf32>
    %185 = vector.broadcast %184 : vector<2x16x1xf32> to vector<2x16x16xf32>
    %186 = arith.mulf %181, %185 : vector<2x16x16xf32>
    "tpu.trace_start"() <{level = 10 : i32, message = "bqk,bkd->bqd"}> : () -> ()
    %cst_54 = arith.constant dense<0.000000e+00> : vector<2x16x64xf32>
    %187 = tpu.matmul %186, %171, %cst_54 {dimension_numbers = #tpu.dot_dimension_numbers<[2], [1], [1], [2], [0, 0, 0, 1, 1, 2], [0], [0]>} : vector<2x16x16xf32>, vector<2x16x64xf32>, vector<2x16x64xf32> -> vector<2x16x64xf32>
    "tpu.trace_stop"() : () -> ()
    %188 = vector.shape_cast %187 : vector<2x16x64xf32> to vector<32x64xf32>
    %189 = arith.truncf %188 : vector<32x64xf32> to vector<32x64xbf16>
    %c320 = arith.constant 320 : index
    %c0_55 = arith.constant 0 : index
    %190 = vector.load %arg5[%c320, %c0_55] : memref<384x384xbf16, #tpu.memory_space<vmem>>, vector<64x384xbf16>
    %cst_56 = arith.constant dense<0.000000e+00> : vector<32x384xf32>
    %191 = tpu.matmul %189, %190, %cst_56 {dimension_numbers = #tpu.dot_dimension_numbers<[1], [0], [0], [1], [0, 0, 1, 1], [], []>} : vector<32x64xbf16>, vector<64x384xbf16>, vector<32x384xf32> -> vector<32x384xf32>
    %192 = arith.addf %165, %191 : vector<32x384xf32>
    %193 = arith.addf %1, %192 : vector<32x384xf32>
    %c0_57 = arith.constant 0 : index
    %c0_58 = arith.constant 0 : index
    %194 = vector.load %arg6[%c0_57, %c0_58] : memref<1x384xf32, #tpu.memory_space<vmem>>, vector<1x384xf32>
    %195 = vector.broadcast %194 : vector<1x384xf32> to vector<32x384xf32>
    %196 = arith.addf %193, %195 : vector<32x384xf32>
    %c0_59 = arith.constant 0 : index
    %c0_60 = arith.constant 0 : index
    %197 = vector.load %arg7[%c0_59, %c0_60] : memref<1x384xf32, #tpu.memory_space<vmem>>, vector<1x384xf32>
    %c0_61 = arith.constant 0 : index
    %c0_62 = arith.constant 0 : index
    %198 = vector.load %arg8[%c0_61, %c0_62] : memref<1x384xf32, #tpu.memory_space<vmem>>, vector<1x384xf32>
    %cst_63 = arith.constant dense<0.000000e+00> : vector<32xf32>
    %199 = vector.multi_reduction <add>, %196, %cst_63 [1] : vector<32x384xf32> to vector<32xf32>
    %200 = vector.shape_cast %199 : vector<32xf32> to vector<32x1xf32>
    %cst_64 = arith.constant 3.840000e+02 : f32
    %201 = vector.broadcast %cst_64 : f32 to vector<32x1xf32>
    %202 = arith.divf %200, %201 : vector<32x1xf32>
    %203 = vector.broadcast %202 : vector<32x1xf32> to vector<32x384xf32>
    %204 = arith.subf %196, %203 : vector<32x384xf32>
    %205 = arith.mulf %204, %204 : vector<32x384xf32>
    %cst_65 = arith.constant dense<0.000000e+00> : vector<32xf32>
    %206 = vector.multi_reduction <add>, %205, %cst_65 [1] : vector<32x384xf32> to vector<32xf32>
    %207 = vector.shape_cast %206 : vector<32xf32> to vector<32x1xf32>
    %cst_66 = arith.constant 3.840000e+02 : f32
    %208 = vector.broadcast %cst_66 : f32 to vector<32x1xf32>
    %209 = arith.divf %207, %208 : vector<32x1xf32>
    %cst_67 = arith.constant 9.99999974E-6 : f32
    %210 = vector.broadcast %cst_67 : f32 to vector<32x1xf32>
    %211 = arith.addf %209, %210 : vector<32x1xf32>
    %212 = math.rsqrt %211 : vector<32x1xf32>
    %213 = vector.broadcast %212 : vector<32x1xf32> to vector<32x384xf32>
    %214 = arith.mulf %204, %213 : vector<32x384xf32>
    %215 = vector.broadcast %197 : vector<1x384xf32> to vector<32x384xf32>
    %216 = arith.mulf %214, %215 : vector<32x384xf32>
    %217 = vector.broadcast %198 : vector<1x384xf32> to vector<32x384xf32>
    %218 = arith.addf %216, %217 : vector<32x384xf32>
    %219 = arith.truncf %218 : vector<32x384xf32> to vector<32x384xbf16>
    %c0_68 = arith.constant 0 : index
    %c0_69 = arith.constant 0 : index
    %220 = vector.load %arg9[%c0_68, %c0_69] : memref<384x1536xbf16, #tpu.memory_space<vmem>>, vector<384x1536xbf16>
    %cst_70 = arith.constant dense<0.000000e+00> : vector<32x1536xf32>
    %221 = tpu.matmul %219, %220, %cst_70 {dimension_numbers = #tpu.dot_dimension_numbers<[1], [0], [0], [1], [0, 0, 1, 1], [], []>} : vector<32x384xbf16>, vector<384x1536xbf16>, vector<32x1536xf32> -> vector<32x1536xf32>
    %c0_71 = arith.constant 0 : index
    %c0_72 = arith.constant 0 : index
    %222 = vector.load %arg10[%c0_71, %c0_72] : memref<1x1536xf32, #tpu.memory_space<vmem>>, vector<1x1536xf32>
    %223 = vector.broadcast %222 : vector<1x1536xf32> to vector<32x1536xf32>
    %224 = arith.addf %221, %223 : vector<32x1536xf32>
    %cst_73 = arith.constant 0.000000e+00 : f32
    %225 = vector.broadcast %cst_73 : f32 to vector<32x1536xf32>
    %226 = arith.maximumf %224, %225 : vector<32x1536xf32>
    %227 = arith.truncf %226 : vector<32x1536xf32> to vector<32x1536xbf16>
    %c0_74 = arith.constant 0 : index
    %c0_75 = arith.constant 0 : index
    %228 = vector.load %arg11[%c0_74, %c0_75] : memref<1536x384xbf16, #tpu.memory_space<vmem>>, vector<1536x384xbf16>
    %cst_76 = arith.constant dense<0.000000e+00> : vector<32x384xf32>
    %229 = tpu.matmul %227, %228, %cst_76 {dimension_numbers = #tpu.dot_dimension_numbers<[1], [0], [0], [1], [0, 0, 1, 1], [], []>} : vector<32x1536xbf16>, vector<1536x384xbf16>, vector<32x384xf32> -> vector<32x384xf32>
    %c0_77 = arith.constant 0 : index
    %c0_78 = arith.constant 0 : index
    %230 = vector.load %arg12[%c0_77, %c0_78] : memref<1x384xf32, #tpu.memory_space<vmem>>, vector<1x384xf32>
    %231 = vector.broadcast %230 : vector<1x384xf32> to vector<32x384xf32>
    %232 = arith.addf %229, %231 : vector<32x384xf32>
    %233 = arith.addf %196, %232 : vector<32x384xf32>
    %234 = vector.shape_cast %233 : vector<32x384xf32> to vector<2x16x384xf32>
    %c0_79 = arith.constant 0 : index
    %c0_80 = arith.constant 0 : index
    %c0_81 = arith.constant 0 : index
    %235 = vector.load %arg13[%c0_79, %c0_80, %c0_81] : memref<2x16x384xf32, #tpu.memory_space<vmem>>, vector<2x16x384xf32>
    tpu.vector_store %arg13[%c0_79, %c0_80, %c0_81], %234 {strides = array<i32>} : memref<2x16x384xf32, #tpu.memory_space<vmem>>, vector<2x16x384xf32>,
    return
  }
  func.func @transform_0(%arg0: i32) -> (i32, i32, i32) {
    %c0_i32 = arith.constant 0 : i32
    %c0_i32_0 = arith.constant 0 : i32
    %c0_i32_1 = arith.constant 0 : i32
    return %arg0, %c0_i32, %c0_i32_0 : i32, i32, i32
  }
  func.func @transform_1(%arg0: i32) -> (i32, i32) {
    %c0_i32 = arith.constant 0 : i32
    %c0_i32_0 = arith.constant 0 : i32
    %c0_i32_1 = arith.constant 0 : i32
    return %c0_i32, %c0_i32_0 : i32, i32
  }
  func.func @transform_2(%arg0: i32) -> (i32, i32) {
    %c0_i32 = arith.constant 0 : i32
    %c0_i32_0 = arith.constant 0 : i32
    %c0_i32_1 = arith.constant 0 : i32
    return %c0_i32, %c0_i32_0 : i32, i32
  }
  func.func @transform_3(%arg0: i32) -> (i32, i32) {
    %c0_i32 = arith.constant 0 : i32
    %c0_i32_0 = arith.constant 0 : i32
    %c0_i32_1 = arith.constant 0 : i32
    return %c0_i32, %c0_i32_0 : i32, i32
  }
  func.func @transform_4(%arg0: i32) -> (i32, i32) {
    %c0_i32 = arith.constant 0 : i32
    %c0_i32_0 = arith.constant 0 : i32
    %c0_i32_1 = arith.constant 0 : i32
    return %c0_i32, %c0_i32_0 : i32, i32
  }
  func.func @transform_5(%arg0: i32) -> (i32, i32) {
    %c0_i32 = arith.constant 0 : i32
    %c0_i32_0 = arith.constant 0 : i32
    %c0_i32_1 = arith.constant 0 : i32
    return %c0_i32, %c0_i32_0 : i32, i32
  }
  func.func @transform_6(%arg0: i32) -> (i32, i32) {
    %c0_i32 = arith.constant 0 : i32
    %c0_i32_0 = arith.constant 0 : i32
    %c0_i32_1 = arith.constant 0 : i32
    return %c0_i32, %c0_i32_0 : i32, i32
  }
  func.func @transform_7(%arg0: i32) -> (i32, i32) {
    %c0_i32 = arith.constant 0 : i32
    %c0_i32_0 = arith.constant 0 : i32
    %c0_i32_1 = arith.constant 0 : i32
    return %c0_i32, %c0_i32_0 : i32, i32
  }
  func.func @transform_8(%arg0: i32) -> (i32, i32) {
    %c0_i32 = arith.constant 0 : i32
    %c0_i32_0 = arith.constant 0 : i32
    %c0_i32_1 = arith.constant 0 : i32
    return %c0_i32, %c0_i32_0 : i32, i32
  }
  func.func @transform_9(%arg0: i32) -> (i32, i32) {
    %c0_i32 = arith.constant 0 : i32
    %c0_i32_0 = arith.constant 0 : i32
    %c0_i32_1 = arith.constant 0 : i32
    return %c0_i32, %c0_i32_0 : i32, i32
  }
  func.func @transform_10(%arg0: i32) -> (i32, i32) {
    %c0_i32 = arith.constant 0 : i32
    %c0_i32_0 = arith.constant 0 : i32
    %c0_i32_1 = arith.constant 0 : i32
    return %c0_i32, %c0_i32_0 : i32, i32
  }
  func.func @transform_11(%arg0: i32) -> (i32, i32) {
    %c0_i32 = arith.constant 0 : i32
    %c0_i32_0 = arith.constant 0 : i32
    %c0_i32_1 = arith.constant 0 : i32
    return %c0_i32, %c0_i32_0 : i32, i32
  }
  func.func @transform_12(%arg0: i32) -> (i32, i32, i32) {
    %c0_i32 = arith.constant 0 : i32
    %c0_i32_0 = arith.constant 0 : i32
    %c0_i32_1 = arith.constant 0 : i32
    return %arg0, %c0_i32, %c0_i32_0 : i32, i32, i32
  }
}

</mosaic_0001>

<bundles_post_ra>
// kernel: transformer_block_forward.1
= control target key start
LH: loop header
LB: loop body
LE: loop exit
PB: predicated region body
PF: predicated region fallthrough
CT: control target
= control target key end

     0   :  { %17 = vsyncpa [#allocation3], 0  ;;  %s16085_s0 = inlined_call_operand.hbm [shape: f32[2,16,384], index: 0, kind: input, shape index: {}]   ;;  %s16086_s1 = inlined_call_operand.hbm [shape: f32[1,384], index: 1, kind: input, shape index: {}]   ;;  %s16087_s2 = inlined_call_operand.hbm [shape: f32[1,384], index: 2, kind: input, shape index: {}]   ;;  %s16088_s3 = inlined_call_operand.hbm [shape: bf16[384,1152], index: 3, kind: input, shape index: {}]   ;;  %s16089_s4 = inlined_call_operand.hbm [shape: bf16[384,384], index: 4, kind: input, shape index: {}]   ;;  %s16090_s5 = inlined_call_operand.hbm [shape: f32[1,384], index: 5, kind: input, shape index: {}]   ;;  %s16091_s6 = inlined_call_operand.hbm [shape: f32[1,384], index: 6, kind: input, shape index: {}]   ;;  %s16092_s7 = inlined_call_operand.hbm [shape: f32[1,384], index: 7, kind: input, shape index: {}]   ;;  %s16093_s8 = inlined_call_operand.hbm [shape: bf16[384,1536], index: 8, kind: input, shape index: {}]   ;;  %s16094_s9 = inlined_call_operand.hbm [shape: f32[1,1536], index: 9, kind: input, shape index: {}]   ;;  %s16095_s10 = inlined_call_operand.hbm [shape: bf16[1536,384], index: 10, kind: input, shape index: {}]   ;;  %s16096_s11 = inlined_call_operand.hbm [shape: f32[1,384], index: 11, kind: input, shape index: {}]   ;;  %s16097_s12 = inlined_call_operand.hbm [shape: f32[2,16,384], index: 12, kind: output, shape index: {}]  }
   0x1   :  { %18 = vsyncpa [#allocation6], 0 }
   0x2   :  { %19 = vsyncpa [#allocation9], 0 }
   0x3   :  { %20 = vsyncpa [#allocation12], 0 }
   0x4   :  { %21 = vsyncpa [#allocation15], 0 }
   0x5   :  { %22 = vsyncpa [#allocation18], 0 }
   0x6   :  { %23 = vsyncpa [#allocation21], 0 }
   0x7   :  { %24 = vsyncpa [#allocation4], 0  ;;  %s14734_s21 = smov [#allocation5]   ;;  %s14735_s23 = smov [#allocation8]  }
   0x8   :  { %s43_s22 = sshll.u32 %s14734_s21, 4  ;;  %s62_s24 = sshll.u32 %s14735_s23, 4  ;;  %s44_s22 = int_to_ptr.vmem [resolvable:$true] %s43_s22  ;;  %s14822_s24 = int_to_ptr.vmem [resolvable:$true] %s62_s24 }
   0x9   :  { %s14432_s27 = scalar_lea.hbm %s16086_s1, 48 }
   0xa   :  { %p14433_p0 = scmp.ne.s32.totalorder %s16086_s1, %s14432_s27  ;;  %p14436_p1 = scmp.lt.u32.totalorder %s14432_s27, %s16086_s1 }
   0xc   :  { %p14438_p2 = pnand %p14436_p1, %p14433_p0 }
   0xe   :  { %14441 = shalt.err (!%p14438_p2)
}
   0xf   :  { %s14442_s14 = scalar_lea.vmem %s44_s22, 48  ;;  %s14446_s15 = scalar_lea.vmem %s44_s22, 64 }
  0x10   :  { %p14443_p3 = scmp.ne.s32.totalorder %s44_s22, %s14442_s14  ;;  %p14447_p4 = scmp.lt.s32.totalorder %s44_s22, %s44_s22 }
  0x11   :  { %p14448_p5 = scmp.lt.s32.totalorder %s14446_s15, %s14442_s14 }
  0x13   :  { %p14449_p6 = por %p14448_p5, %p14447_p4 }
  0x15   :  { %p14450_p7 = pnand %p14449_p6, %p14443_p3 }
  0x17   :  { %14453 = shalt.err (!%p14450_p7)
}
  0x18   :  { %46 = dma.hbm_to_vmem [thread:$0]  %s16086_s1, 48, %s44_s22, [#allocation6]  }
  0x19   :  { %s14454_s20 = scalar_lea.hbm %s16088_s3, 27648 }
  0x1a   :  { %p14455_p8 = scmp.ne.s32.totalorder %s16088_s3, %s14454_s20  ;;  %p14458_p9 = scmp.lt.u32.totalorder %s14454_s20, %s16088_s3 }
  0x1c   :  { %p14460_p10 = pnand %p14458_p9, %p14455_p8 }
  0x1e   :  { %14463 = shalt.err (!%p14460_p10)
}
  0x1f   :  { %s14464_s27 = scalar_lea.vmem %s14822_s24, 27648  ;;  %p14469_p12 = scmp.lt.s32.totalorder %s14822_s24, %s14822_s24 }
  0x20   :  { %p14465_p11 = scmp.ne.s32.totalorder %s14822_s24, %s14464_s27  ;;  %p14470_p13 = scmp.lt.s32.totalorder %s14464_s27, %s14464_s27 }
  0x22   :  { %p14471_p0 = por %p14470_p13, %p14469_p12 }
  0x24   :  { %p14472_p1 = pnand %p14471_p0, %p14465_p11 }
  0x26   :  { %14475 = shalt.err (!%p14472_p1)
}
  0x27   :  { %s14736_s1 = smov 576   ;;  %s14737_s22 = smov 36  }
  0x28   :  { %68 = dma.hbm_to_vmem [thread:$0]  %s16088_s3, 27648, %s14822_s24, [#allocation9], %s14736_s1, %s14736_s1, %s14737_s22  }
  0x29   :  { %s14738_s30 = smov [#allocation11]   ;;  %s14739_s14 = smov [#allocation14]  }
  0x2a   :  { %s87_s13 = sshll.u32 %s14738_s30, 4  ;;  %s107_s15 = sshll.u32 %s14739_s14, 4  ;;  %s88_s13 = int_to_ptr.vmem [resolvable:$true] %s87_s13  ;;  %s108_s15 = int_to_ptr.vmem [resolvable:$true] %s107_s15 }
  0x2b   :  { %s14476_s18 = scalar_lea.hbm %s16090_s5, 48 }
  0x2c   :  { %p14477_p2 = scmp.ne.s32.totalorder %s16090_s5, %s14476_s18  ;;  %p14480_p3 = scmp.lt.u32.totalorder %s14476_s18, %s16090_s5 }
  0x2e   :  { %p14482_p4 = pnand %p14480_p3, %p14477_p2 }
  0x30   :  { %14485 = shalt.err (!%p14482_p4)
}
  0x31   :  { %s14486_s3 = scalar_lea.vmem %s88_s13, 48  ;;  %s14490_s24 = scalar_lea.vmem %s88_s13, 64 }
  0x32   :  { %p14487_p5 = scmp.ne.s32.totalorder %s88_s13, %s14486_s3  ;;  %p14491_p6 = scmp.lt.s32.totalorder %s88_s13, %s88_s13 }
  0x33   :  { %p14492_p7 = scmp.lt.s32.totalorder %s14490_s24, %s14486_s3 }
  0x35   :  { %p14493_p8 = por %p14492_p7, %p14491_p6 }
  0x37   :  { %p14494_p9 = pnand %p14493_p8, %p14487_p5 }
  0x39   :  { %14497 = shalt.err (!%p14494_p9)
}
  0x3a   :  { %90 = dma.hbm_to_vmem [thread:$0]  %s16090_s5, 48, %s88_s13, [#allocation12]  }
  0x3b   :  { %s14498_s22 = scalar_lea.hbm %s16092_s7, 48 }
  0x3c   :  { %p14499_p10 = scmp.ne.s32.totalorder %s16092_s7, %s14498_s22  ;;  %p14502_p11 = scmp.lt.u32.totalorder %s14498_s22, %s16092_s7 }
  0x3e   :  { %p14504_p12 = pnand %p14502_p11, %p14499_p10 }
  0x40   :  { %14507 = shalt.err (!%p14504_p12)
}
  0x41   :  { %s14508_s16 = scalar_lea.vmem %s108_s15, 48  ;;  %s14512_s17 = scalar_lea.vmem %s108_s15, 64 }
  0x42   :  { %p14509_p13 = scmp.ne.s32.totalorder %s108_s15, %s14508_s16  ;;  %p14513_p0 = scmp.lt.s32.totalorder %s108_s15, %s108_s15 }
  0x43   :  { %p14514_p1 = scmp.lt.s32.totalorder %s14512_s17, %s14508_s16 }
  0x45   :  { %p14515_p2 = por %p14514_p1, %p14513_p0 }
  0x47   :  { %p14516_p3 = pnand %p14515_p2, %p14509_p13 }
  0x49   :  { %14519 = shalt.err (!%p14516_p3)
}
  0x4a   :  { %110 = dma.hbm_to_vmem [thread:$0]  %s16092_s7, 48, %s108_s15, [#allocation15]  }
  0x4b   :  { %s14740_s18 = smov [#allocation17]   ;;  %s14741_s20 = smov [#allocation2]  }
  0x4c   :  { %s129_s19 = sshll.u32 %s14740_s18, 4  ;;  %s30_s21 = sshll.u32 %s14741_s20, 4  ;;  %s130_s19 = int_to_ptr.vmem [resolvable:$true] %s129_s19  ;;  %s14877_s21 = int_to_ptr.vmem [resolvable:$true] %s30_s21 }
  0x4d   :  { %s14520_s24 = scalar_lea.hbm %s16094_s9, 192 }
  0x4e   :  { %p14521_p4 = scmp.ne.s32.totalorder %s16094_s9, %s14520_s24  ;;  %p14524_p5 = scmp.lt.u32.totalorder %s14520_s24, %s16094_s9 }
  0x50   :  { %p14526_p6 = pnand %p14524_p5, %p14521_p4 }
  0x52   :  { %14529 = shalt.err (!%p14526_p6)
}
  0x53   :  { %s14530_s7 = scalar_lea.vmem %s130_s19, 192  ;;  %p14535_p8 = scmp.lt.s32.totalorder %s130_s19, %s130_s19 }
  0x54   :  { %p14531_p7 = scmp.ne.s32.totalorder %s130_s19, %s14530_s7  ;;  %p14536_p9 = scmp.lt.s32.totalorder %s14530_s7, %s14530_s7 }
  0x56   :  { %p14537_p10 = por %p14536_p9, %p14535_p8 }
  0x58   :  { %p14538_p11 = pnand %p14537_p10, %p14531_p7 }
  0x5a   :  { %14541 = shalt.err (!%p14538_p11)
}
  0x5b   :  { %132 = dma.hbm_to_vmem [thread:$0]  %s16094_s9, 192, %s130_s19, [#allocation18]  }
  0x5c   :  { %s14542_s30 = scalar_lea.hbm %s16085_s0, 1536 }
  0x5d   :  { %p14543_p12 = scmp.ne.s32.totalorder %s16085_s0, %s14542_s30  ;;  %p14546_p13 = scmp.lt.u32.totalorder %s14542_s30, %s16085_s0 }
  0x5f   :  { %p14548_p0 = pnand %p14546_p13, %p14543_p12 }
  0x61   :  { %14551 = shalt.err (!%p14548_p0)
}
  0x62   :  { %s14552_s13 = scalar_lea.vmem %s14877_s21, 1536  ;;  %p14557_p2 = scmp.lt.s32.totalorder %s14877_s21, %s14877_s21 }
  0x63   :  { %p14553_p1 = scmp.ne.s32.totalorder %s14877_s21, %s14552_s13  ;;  %p14558_p3 = scmp.lt.s32.totalorder %s14552_s13, %s14552_s13 }
  0x65   :  { %p14559_p4 = por %p14558_p3, %p14557_p2 }
  0x67   :  { %p14560_p5 = pnand %p14559_p4, %p14553_p1 }
  0x69   :  { %14563 = shalt.err (!%p14560_p5)
}
  0x6a   :  { %s14742_s9 = smov 384   ;;  %s14743_s18 = smov 24  }
  0x6b   :  { %36 = dma.hbm_to_vmem [thread:$0]  %s16085_s0, 1536, %s14877_s21, [#allocation3], %s14742_s9, %s14742_s9, %s14743_s18  }
  0x6c   :  { %s14744_s23 = smov [#allocation7]   ;;  %s14745_s24 = smov [#allocation10]  }
  0x6d   :  { %s53_s3 = sshll.u32 %s14744_s23, 4  ;;  %s74_s25 = sshll.u32 %s14745_s24, 4  ;;  %s54_s3 = int_to_ptr.vmem [resolvable:$true] %s53_s3  ;;  %s14911_s25 = int_to_ptr.vmem [resolvable:$true] %s74_s25 }
  0x6e   :  { %s14564_s1 = scalar_lea.hbm %s16087_s2, 48 }
  0x6f   :  { %p14565_p6 = scmp.ne.s32.totalorder %s16087_s2, %s14564_s1  ;;  %p14568_p7 = scmp.lt.u32.totalorder %s14564_s1, %s16087_s2 }
  0x71   :  { %p14570_p8 = pnand %p14568_p7, %p14565_p6 }
  0x73   :  { %14573 = shalt.err (!%p14570_p8)
}
  0x74   :  { %s14574_s0 = scalar_lea.vmem %s54_s3, 48  ;;  %s14578_s21 = scalar_lea.vmem %s54_s3, 64 }
  0x75   :  { %p14575_p9 = scmp.ne.s32.totalorder %s54_s3, %s14574_s0  ;;  %p14579_p10 = scmp.lt.s32.totalorder %s54_s3, %s54_s3 }
  0x76   :  { %p14580_p11 = scmp.lt.s32.totalorder %s14578_s21, %s14574_s0 }
  0x78   :  { %p14581_p12 = por %p14580_p11, %p14579_p10 }
  0x7a   :  { %p14582_p13 = pnand %p14581_p12, %p14575_p9 }
  0x7c   :  { %14585 = shalt.err (!%p14582_p13)
}
  0x7d   :  { %56 = dma.hbm_to_vmem [thread:$0]  %s16087_s2, 48, %s54_s3, [#allocation6]  }
  0x7e   :  { %s14586_s17 = scalar_lea.hbm %s16089_s4, 9216 }
  0x7f   :  { %p14587_p0 = scmp.ne.s32.totalorder %s16089_s4, %s14586_s17  ;;  %p14590_p1 = scmp.lt.u32.totalorder %s14586_s17, %s16089_s4 }
  0x81   :  { %p14592_p2 = pnand %p14590_p1, %p14587_p0 }
  0x83   :  { %14595 = shalt.err (!%p14592_p2)
}
  0x84   :  { %s14596_s23 = scalar_lea.vmem %s14911_s25, 9216  ;;  %p14601_p4 = scmp.lt.s32.totalorder %s14911_s25, %s14911_s25 }
  0x85   :  { %p14597_p3 = scmp.ne.s32.totalorder %s14911_s25, %s14596_s23  ;;  %p14602_p5 = scmp.lt.s32.totalorder %s14596_s23, %s14596_s23 }
  0x87   :  { %p14603_p6 = por %p14602_p5, %p14601_p4 }
  0x89   :  { %p14604_p7 = pnand %p14603_p6, %p14597_p3 }
  0x8b   :  { %14607 = shalt.err (!%p14604_p7)
}
  0x8c   :  { %s14746_s2 = smov 192   ;;  %s14747_s3 = smov 12  }
  0x8d   :  { %80 = dma.hbm_to_vmem [thread:$0]  %s16089_s4, 9216, %s14911_s25, [#allocation9], %s14746_s2, %s14746_s2, %s14747_s3  }
  0x8e   :  { %s14748_s27 = smov [#allocation13]   ;;  %s14749_s7 = smov [#allocation16]  }
  0x8f   :  { %s97_s1 = sshll.u32 %s14748_s27, 4  ;;  %s116_s15 = sshll.u32 %s14749_s7, 4  ;;  %s98_s1 = int_to_ptr.vmem [resolvable:$true] %s97_s1  ;;  %s14945_s15 = int_to_ptr.vmem [resolvable:$true] %s116_s15 }
  0x90   :  { %s14608_s0 = scalar_lea.hbm %s16091_s6, 48 }
  0x91   :  { %p14609_p8 = scmp.ne.s32.totalorder %s16091_s6, %s14608_s0  ;;  %p14612_p9 = scmp.lt.u32.totalorder %s14608_s0, %s16091_s6 }
  0x93   :  { %p14614_p10 = pnand %p14612_p9, %p14609_p8 }
  0x95   :  { %14617 = shalt.err (!%p14614_p10)
}
  0x96   :  { %s14618_s4 = scalar_lea.vmem %s98_s1, 48  ;;  %s14622_s25 = scalar_lea.vmem %s98_s1, 64 }
  0x97   :  { %p14619_p11 = scmp.ne.s32.totalorder %s98_s1, %s14618_s4  ;;  %p14623_p12 = scmp.lt.s32.totalorder %s98_s1, %s98_s1 }
  0x98   :  { %p14624_p13 = scmp.lt.s32.totalorder %s14622_s25, %s14618_s4 }
  0x9a   :  { %p14625_p0 = por %p14624_p13, %p14623_p12 }
  0x9c   :  { %p14626_p1 = pnand %p14625_p0, %p14619_p11 }
  0x9e   :  { %14629 = shalt.err (!%p14626_p1)
}
  0x9f   :  { %100 = dma.hbm_to_vmem [thread:$0]  %s16091_s6, 48, %s98_s1, [#allocation12]  }
  0xa0   :  { %s14630_s19 = scalar_lea.hbm %s16093_s8, 36864 }
  0xa1   :  { %p14631_p2 = scmp.ne.s32.totalorder %s16093_s8, %s14630_s19  ;;  %p14634_p3 = scmp.lt.u32.totalorder %s14630_s19, %s16093_s8 }
  0xa3   :  { %p14636_p4 = pnand %p14634_p3, %p14631_p2 }
  0xa5   :  { %14639 = shalt.err (!%p14636_p4)
}
  0xa6   :  { %s14640_s27 = scalar_lea.vmem %s14945_s15, 36864  ;;  %p14645_p6 = scmp.lt.s32.totalorder %s14945_s15, %s14945_s15 }
  0xa7   :  { %p14641_p5 = scmp.ne.s32.totalorder %s14945_s15, %s14640_s27  ;;  %p14646_p7 = scmp.lt.s32.totalorder %s14640_s27, %s14640_s27 }
  0xa9   :  { %p14647_p8 = por %p14646_p7, %p14645_p6 }
  0xab   :  { %p14648_p9 = pnand %p14647_p8, %p14641_p5 }
  0xad   :  { %14651 = shalt.err (!%p14648_p9)
}
  0xae   :  { %s14750_s6 = smov 768   ;;  %s14751_s1 = smov 48  }
  0xaf   :  { %122 = dma.hbm_to_vmem [thread:$0]  %s16093_s8, 36864, %s14945_s15, [#allocation15], %s14750_s6, %s14750_s6, %s14751_s1  }
  0xb0   :  { %s14752_s28 = smov [#allocation19]   ;;  %s14753_s21 = smov [#allocation20]  }
  0xb1   :  { %s138_s0 = sshll.u32 %s14752_s28, 4  ;;  %s151_s29 = sshll.u32 %s14753_s21, 4  ;;  %s139_s0 = int_to_ptr.vmem [resolvable:$true] %s138_s0  ;;  %s152_s29 = int_to_ptr.vmem [resolvable:$true] %s151_s29 }
  0xb2   :  { %s14652_s4 = scalar_lea.hbm %s16095_s10, 36864 }
  0xb3   :  { %p14653_p10 = scmp.ne.s32.totalorder %s16095_s10, %s14652_s4  ;;  %p14656_p11 = scmp.lt.u32.totalorder %s14652_s4, %s16095_s10 }
  0xb5   :  { %p14658_p12 = pnand %p14656_p11, %p14653_p10 }
  0xb7   :  { %14661 = shalt.err (!%p14658_p12)
}
  0xb8   :  { %s14662_s8 = scalar_lea.vmem %s139_s0, 36864  ;;  %p14667_p0 = scmp.lt.s32.totalorder %s139_s0, %s139_s0 }
  0xb9   :  { %p14663_p13 = scmp.ne.s32.totalorder %s139_s0, %s14662_s8  ;;  %p14668_p1 = scmp.lt.s32.totalorder %s14662_s8, %s14662_s8 }
  0xbb   :  { %p14669_p2 = por %p14668_p1, %p14667_p0 }
  0xbd   :  { %p14670_p3 = pnand %p14669_p2, %p14663_p13 }
  0xbf   :  { %14673 = shalt.err (!%p14670_p3)
}
  0xc0   :  { %144 = dma.hbm_to_vmem [thread:$0]  %s16095_s10, 36864, %s139_s0, [#allocation18], %s14746_s2, %s14746_s2, %s14747_s3  }
  0xc1   :  { %s14674_s23 = scalar_lea.hbm %s16096_s11, 48 }
  0xc2   :  { %p14675_p4 = scmp.ne.s32.totalorder %s16096_s11, %s14674_s23  ;;  %p14678_p5 = scmp.lt.u32.totalorder %s14674_s23, %s16096_s11 }
  0xc4   :  { %p14680_p6 = pnand %p14678_p5, %p14675_p4 }
  0xc6   :  { %14683 = shalt.err (!%p14680_p6)
}
  0xc7   :  { %s14684_s1 = scalar_lea.vmem %s152_s29, 48  ;;  %s14688_s7 = scalar_lea.vmem %s152_s29, 64 }
  0xc8   :  { %p14685_p7 = scmp.ne.s32.totalorder %s152_s29, %s14684_s1  ;;  %p14689_p8 = scmp.lt.s32.totalorder %s152_s29, %s152_s29 }
  0xc9   :  { %p14690_p9 = scmp.lt.s32.totalorder %s14688_s7, %s14684_s1 }
  0xcb   :  { %p14691_p10 = por %p14690_p9, %p14689_p8 }
  0xcd   :  { %p14692_p11 = pnand %p14691_p10, %p14685_p7 }
  0xcf   :  { %14695 = shalt.err (!%p14692_p11)
}
  0xd0   :  { %154 = dma.hbm_to_vmem [thread:$0]  %s16096_s11, 48, %s152_s29, [#allocation21]  }
  0xd1   :  { %14718 = dma.done.wait [#allocation3], 1536  }
  0xd2   :  { %14719 = vsyncadd [#allocation3], 4294965760 }
  0xd3   :  { %14720 = dma.done.wait [#allocation6], 96  }
  0xd4   :  { %14721 = vsyncadd [#allocation6], 4294967200 }
  0xd5   :  { %14722 = dma.done.wait [#allocation9], 36864  }
  0xd6   :  { %14723 = vsyncadd [#allocation9], 4294930432 }
  0xd7   :  { %14724 = dma.done.wait [#allocation12], 96  }
  0xd8   :  { %14725 = vsyncadd [#allocation12], 4294967200 }
  0xd9   :  { %14726 = dma.done.wait [#allocation15], 36912  }
  0xda   :  { %14727 = vsyncadd [#allocation15], 4294930384 }
  0xdb   :  { %14728 = dma.done.wait [#allocation18], 37056  }
  0xdc   :  { %14729 = vsyncadd [#allocation18], 4294930240 }
  0xdd   :  { %14730 = dma.done.wait [#allocation21], 48  }
  0xde   :  { %14731 = vsyncadd [#allocation21], 4294967248  ;;  %v15003_v0 = vld [vmem:[#allocation2] sm:$0xff]  ;;  %v15005_v1 = vld [vmem:[#allocation2 + $0x8] sm:$0xff]  ;;  %vm2226_vm0 = vcmask 523264   ;;  %vm2409_vm4 = vcmask 130048  }
  0xdf   :  { %v15007_v2 = vld [vmem:[#allocation2 + $0x10] sm:$0xff]  ;;  %v206_v3 = vadd.f32 %v15005_v1, %v15003_v0  ;;  %v15013_v5 = vld [vmem:[#allocation2 + $0x38] sm:$0xff]  ;;  %v15015_v6 = vld [vmem:[#allocation2 + $0x40] sm:$0xff]  ;;  %s14755_s11 = smov 64   ;;  %s14756_s3 = smov [#allocation22]  }
  0xe0   :  { %v15011_v4 = vld [vmem:[#allocation2 + $0x30] sm:$0xff]  ;;  %v195_v8 = vld [vmem:[#allocation2 + $0x18] sm:$0xff]  ;;  %v196_v9 = vld [vmem:[#allocation2 + $0x20] sm:$0xff]  ;;  %s11063_s22 = sshll.u32 %s14756_s3, 4  ;;  %s11064_s22 = int_to_ptr.vmem [resolvable:$true] %s11063_s22 }
  0xe1   :  { %v214_v7 = vadd.f32 %v15013_v5, %v15011_v4  ;;  %v197_v10 = vld [vmem:[#allocation2 + $0x28] sm:$0xff]  ;;  %v207_v11 = vadd.f32 %v206_v3, %v15007_v2  ;;  %v210_v12 = vadd.f32 %v196_v9, %v195_v8  ;;  %v202_v14 = vld [vmem:[#allocation2 + $0x50] sm:$0xff]  ;;  %v203_v15 = vld [vmem:[#allocation2 + $0x58] sm:$0xff]  ;;  %s14696_s28 = scalar_lea.vmem %s11064_s22, 1536  ;;  %p14701_p13 = scmp.lt.s32.totalorder %s11064_s22, %s11064_s22 }
  0xe2   :  { %v201_v13 = vld [vmem:[#allocation2 + $0x48] sm:$0xff]  ;;  %v13080_v21 = vld [vmem:[#allocation8 + $0x14] ss:$36 sps:$4 sm:$0xff]   ;;  %v13084_v24 = vld [vmem:[#allocation8 + $0x4c] ss:$36 sps:$4 sm:$0xff]   ;;  %p14697_p12 = scmp.ne.s32.totalorder %s11064_s22, %s14696_s28  ;;  %p14702_p0 = scmp.lt.s32.totalorder %s14696_s28, %s14696_s28 }
  0xe3   :  { %v215_v16 = vadd.f32 %v214_v7, %v15015_v6  ;;  %v218_v17 = vadd.f32 %v202_v14, %v201_v13  ;;  %208 = vadd.xlane.f32.xlu0 %v207_v11  ;;  %v211_v18 = vadd.f32 %v210_v12, %v197_v10  ;;  %v13078_v20 = vld [vmem:[#allocation8 + $0x4] ss:$36 sps:$4 sm:$0xff]   ;;  %v13083_v23 = vld [vmem:[#allocation8 + $0x10] ss:$36 sps:$4 sm:$0xff]   ;;  %v13086_v25 = vld [vmem:[#allocation8 + $0x5c] ss:$36 sps:$4 sm:$0xff]   ;;  %1909 = vmatprep.subr.bf16.mxu0 %v13080_v21 }
  0xe4   :  { %v13082_v22 = vld [vmem:[#allocation8] ss:$36 sps:$4 sm:$0xff]   ;;  %1697 = vmatprep.subr.bf16.mxu1 %v13078_v20  ;;  %1910 = vmatpush1.bf16.msra.mxu0 %v13083_v23  ;;  %v13088_v26 = vld [vmem:[#allocation8 + $0x48] ss:$36 sps:$4 sm:$0xff]   ;;  %v13089_v27 = vld [vmem:[#allocation8 + $0x58] ss:$36 sps:$4 sm:$0xff]   ;;  %p14703_p1 = por %p14702_p0, %p14701_p13 }
  0xe5   :  { %216 = vadd.xlane.f32.xlu1 %v215_v16  ;;  %v219_v19 = vadd.f32 %v218_v17, %v203_v15  ;;  %1698 = vmatpush1.bf16.msra.mxu1 %v13082_v22  ;;  %v13090_v28 = vld [vmem:[#allocation8 + $0x94] ss:$36 sps:$4 sm:$0xff]   ;;  %v13092_v29 = vld [vmem:[#allocation8 + $0xa4] ss:$36 sps:$4 sm:$0xff]   ;;  %v13096_v32 = vld [vmem:[#allocation8 + $0xdc] ss:$36 sps:$4 sm:$0xff]  }
  0xe6   :  { %1699 = vmatprep.subr.bf16.mxu1 %v13084_v24  ;;  %1911 = vmatprep.subr.bf16.mxu0 %v13086_v25  ;;  %v13094_v30 = vld [vmem:[#allocation8 + $0x90] ss:$36 sps:$4 sm:$0xff]   ;;  %v13095_v31 = vld [vmem:[#allocation8 + $0xa0] ss:$36 sps:$4 sm:$0xff]   ;;  %v13100_v34 = vld [vmem:[#allocation8 + $0xd8] ss:$36 sps:$4 sm:$0xff]   ;;  %p14704_p2 = pnand %p14703_p1, %p14697_p12 }
  0xe7   :  { %212 = vadd.xlane.f32.xlu0 %v211_v18  ;;  %v13098_v33 = vld [vmem:[#allocation8 + $0xec] ss:$36 sps:$4 sm:$0xff]   ;;  %v13102_v36 = vld [vmem:[#allocation8 + $0x124] ss:$36 sps:$4 sm:$0xff]   ;;  %v13104_v37 = vld [vmem:[#allocation8 + $0x134] ss:$36 sps:$4 sm:$0xff]  }
  0xe8   :  { %1912 = vmatpush1.bf16.msra.mxu0 %v13089_v27  ;;  %v13101_v35 = vld [vmem:[#allocation8 + $0xe8] ss:$36 sps:$4 sm:$0xff]   ;;  %v13106_v38 = vld [vmem:[#allocation8 + $0x120] ss:$36 sps:$4 sm:$0xff]   ;;  %v13107_v39 = vld [vmem:[#allocation8 + $0x130] ss:$36 sps:$4 sm:$0xff]  }
  0xe9   :  { %220 = vadd.xlane.f32.xlu1 %v219_v19  ;;  %1700 = vmatpush1.bf16.msra.mxu1 %v13088_v26  ;;  %v13108_v40 = vld [vmem:[#allocation8 + $0x16c] ss:$36 sps:$4 sm:$0xff]   ;;  %v13110_v41 = vld [vmem:[#allocation8 + $0x17c] ss:$36 sps:$4 sm:$0xff]   ;;  %v13114_v44 = vld [vmem:[#allocation8 + $0x1b4] ss:$36 sps:$4 sm:$0xff]  }
  0xea   :  { %1701 = vmatprep.subr.bf16.mxu1 %v13090_v28  ;;  %1913 = vmatprep.subr.bf16.mxu0 %v13092_v29  ;;  %v13112_v42 = vld [vmem:[#allocation8 + $0x168] ss:$36 sps:$4 sm:$0xff]   ;;  %v13113_v43 = vld [vmem:[#allocation8 + $0x178] ss:$36 sps:$4 sm:$0xff]   ;;  %v13118_v46 = vld [vmem:[#allocation8 + $0x1b0] ss:$36 sps:$4 sm:$0xff]  }
  0xeb   :  { %v13116_v45 = vld [vmem:[#allocation8 + $0x1c4] ss:$36 sps:$4 sm:$0xff]   ;;  %v13120_v48 = vld [vmem:[#allocation8 + $0x1fc] ss:$36 sps:$4 sm:$0xff]   ;;  %v13122_v49 = vld [vmem:[#allocation8 + $0x20c] ss:$36 sps:$4 sm:$0xff]  }
  0xec   :  { %1914 = vmatpush1.bf16.msra.mxu0 %v13095_v31  ;;  %v13119_v47 = vld [vmem:[#allocation8 + $0x1c0] ss:$36 sps:$4 sm:$0xff]   ;;  %v13124_v50 = vld [vmem:[#allocation8 + $0x1f8] ss:$36 sps:$4 sm:$0xff]   ;;  %v13125_v51 = vld [vmem:[#allocation8 + $0x208] ss:$36 sps:$4 sm:$0xff]  }
  0xed   :  { %1702 = vmatpush1.bf16.msra.mxu1 %v13094_v30  ;;  %1915 = vmatprep.subr.bf16.mxu0 %v13098_v33  ;;  %v13126_v52 = vld [vmem:[#allocation8 + $0x244] ss:$36 sps:$4 sm:$0xff]   ;;  %v13128_v53 = vld [vmem:[#allocation8 + $0x254] ss:$36 sps:$4 sm:$0xff]   ;;  %v13132_v56 = vld [vmem:[#allocation8 + $0x28c] ss:$36 sps:$4 sm:$0xff]  }
  0xee   :  { %1703 = vmatprep.subr.bf16.mxu1 %v13096_v32  ;;  %v13130_v54 = vld [vmem:[#allocation8 + $0x240] ss:$36 sps:$4 sm:$0xff]   ;;  %v13131_v55 = vld [vmem:[#allocation8 + $0x250] ss:$36 sps:$4 sm:$0xff]   ;;  %v14415_v16 = vld [vmem:[#allocation2 + $0x20] sm:$0xff] }
  0xef   :  { %v13134_v57 = vld [vmem:[#allocation8 + $0x29c] ss:$36 sps:$4 sm:$0xff]   ;;  %v14414_v14 = vld [vmem:[#allocation2 + $0x18] sm:$0xff]  ;;  %v14418_v23 = vld [vmem:[#allocation2 + $0x50] sm:$0xff] }
  0xf0   :  { %1916 = vmatpush1.bf16.msra.mxu0 %v13101_v35  ;;  %v14416_v18 = vld [vmem:[#allocation2 + $0x28] sm:$0xff]  ;;  %v14419_v25 = vld [vmem:[#allocation2 + $0x58] sm:$0xff]  ;;  %vm15255_vm1 = vmpackc.low %vm2226_vm0, %vm2226_vm0 }
  0xf1   :  { %1704 = vmatpush1.bf16.msra.mxu1 %v13100_v34  ;;  %1917 = vmatprep.subr.bf16.mxu0 %v13104_v37  ;;  %v14417_v21 = vld [vmem:[#allocation2 + $0x48] sm:$0xff] }
  0xf2   :  { %1705 = vmatprep.subr.bf16.mxu1 %v13102_v36 }
  0xf4   :  { %1918 = vmatpush1.bf16.msra.mxu0 %v13107_v39 }
  0xf5   :  { %1706 = vmatpush1.bf16.msra.mxu1 %v13106_v38  ;;  %1919 = vmatprep.subr.bf16.mxu0 %v13110_v41  ;;  %v13137_v41 = vld [vmem:[#allocation8 + $0x298] ss:$36 sps:$4 sm:$0xff]  }
  0xf6   :  { %1707 = vmatprep.subr.bf16.mxu1 %v13108_v40  ;;  %v13136_v40 = vld [vmem:[#allocation8 + $0x288] ss:$36 sps:$4 sm:$0xff]  }
  0xf8   :  { %1920 = vmatpush1.bf16.msra.mxu0 %v13113_v43  ;;  %v13140_v43 = vld [vmem:[#allocation8 + $0x2e4] ss:$36 sps:$4 sm:$0xff]  }
  0xf9   :  { %1708 = vmatpush1.bf16.msra.mxu1 %v13112_v42  ;;  %1921 = vmatprep.subr.bf16.mxu0 %v13116_v45  ;;  %v13138_v42 = vld [vmem:[#allocation8 + $0x2d4] ss:$36 sps:$4 sm:$0xff]   ;;  %v13143_v45 = vld [vmem:[#allocation8 + $0x2e0] ss:$36 sps:$4 sm:$0xff]  }
  0xfa   :  { %1709 = vmatprep.subr.bf16.mxu1 %v13114_v44  ;;  %v13142_v44 = vld [vmem:[#allocation8 + $0x2d0] ss:$36 sps:$4 sm:$0xff]  }
  0xfc   :  { %1922 = vmatpush1.bf16.msra.mxu0 %v13119_v47  ;;  %v13146_v47 = vld [vmem:[#allocation8 + $0x32c] ss:$36 sps:$4 sm:$0xff]  }
  0xfd   :  { %1710 = vmatpush1.bf16.msra.mxu1 %v13118_v46  ;;  %1923 = vmatprep.subr.bf16.mxu0 %v13122_v49  ;;  %v13144_v46 = vld [vmem:[#allocation8 + $0x31c] ss:$36 sps:$4 sm:$0xff]   ;;  %v13149_v49 = vld [vmem:[#allocation8 + $0x328] ss:$36 sps:$4 sm:$0xff]  }
  0xfe   :  { %1711 = vmatprep.subr.bf16.mxu1 %v13120_v48  ;;  %v13148_v48 = vld [vmem:[#allocation8 + $0x318] ss:$36 sps:$4 sm:$0xff]  }
 0x100   :  { %1924 = vmatpush1.bf16.msra.mxu0 %v13125_v51  ;;  %v13152_v51 = vld [vmem:[#allocation8 + $0x374] ss:$36 sps:$4 sm:$0xff]  }
 0x101   :  { %1712 = vmatpush1.bf16.msra.mxu1 %v13124_v50  ;;  %1925 = vmatprep.subr.bf16.mxu0 %v13128_v53  ;;  %v13150_v50 = vld [vmem:[#allocation8 + $0x364] ss:$36 sps:$4 sm:$0xff]   ;;  %v13155_v53 = vld [vmem:[#allocation8 + $0x370] ss:$36 sps:$4 sm:$0xff]  }
 0x102   :  { %1713 = vmatprep.subr.bf16.mxu1 %v13126_v52  ;;  %v13154_v52 = vld [vmem:[#allocation8 + $0x360] ss:$36 sps:$4 sm:$0xff]  }
 0x104   :  { %1926 = vmatpush1.bf16.msra.mxu0 %v13131_v55  ;;  %v13158_v55 = vld [vmem:[#allocation8 + $0x3bc] ss:$36 sps:$4 sm:$0xff]  }
 0x105   :  { %1714 = vmatpush1.bf16.msra.mxu1 %v13130_v54  ;;  %1927 = vmatprep.subr.bf16.mxu0 %v13134_v57  ;;  %v13156_v54 = vld [vmem:[#allocation8 + $0x3ac] ss:$36 sps:$4 sm:$0xff]   ;;  %v13161_v57 = vld [vmem:[#allocation8 + $0x3b8] ss:$36 sps:$4 sm:$0xff]  }
 0x106   :  { %1715 = vmatprep.subr.bf16.mxu1 %v13132_v56  ;;  %v13160_v56 = vld [vmem:[#allocation8 + $0x3a8] ss:$36 sps:$4 sm:$0xff]  }
 0x108   :  { %1928 = vmatpush1.bf16.msra.mxu0 %v13137_v41 }
 0x109   :  { %1716 = vmatpush1.bf16.msra.mxu1 %v13136_v40  ;;  %1929 = vmatprep.subr.bf16.mxu0 %v13140_v43 }
 0x10a   :  { %1717 = vmatprep.subr.bf16.mxu1 %v13138_v42 }
 0x10c   :  { %1930 = vmatpush1.bf16.msra.mxu0 %v13143_v45 }
 0x10d   :  { %1718 = vmatpush1.bf16.msra.mxu1 %v13142_v44  ;;  %1931 = vmatprep.subr.bf16.mxu0 %v13146_v47 }
 0x10e   :  { %1719 = vmatprep.subr.bf16.mxu1 %v13144_v46 }
 0x110   :  { %1932 = vmatpush1.bf16.msra.mxu0 %v13149_v49 }
 0x111   :  { %1720 = vmatpush1.bf16.msra.mxu1 %v13148_v48  ;;  %1933 = vmatprep.subr.bf16.mxu0 %v13152_v51 }
 0x112   :  { %1721 = vmatprep.subr.bf16.mxu1 %v13150_v50 }
 0x114   :  { %1934 = vmatpush1.bf16.msra.mxu0 %v13155_v53  ;;  %v13174_v53 = vld [vmem:[#allocation8 + $0x480] ss:$36 sps:$4 sm:$0xff]  }
 0x115   :  { %1722 = vmatpush1.bf16.msra.mxu1 %v13154_v52  ;;  %1935 = vmatprep.subr.bf16.mxu0 %v13158_v55 }
 0x116   :  { %1723 = vmatprep.subr.bf16.mxu1 %v13156_v54  ;;  %v13177_v54 = vld [vmem:[#allocation8 + $0x490] ss:$36 sps:$4 sm:$0xff]  }
 0x118   :  { %1936 = vmatpush1.bf16.msra.mxu0 %v13161_v57  ;;  %v13185_v57 = vld [vmem:[#allocation8 + $0x4dc] ss:$36 sps:$4 sm:$0xff]  }
 0x119   :  { %1724 = vmatpush1.bf16.msra.mxu1 %v13160_v56  ;;  %v13182_v56 = vld [vmem:[#allocation8 + $0x4cc] ss:$36 sps:$4 sm:$0xff]  }
 0x170   :  { %v209_v58 = vpop.xlane.xlu0 %208 }
 0x171   :  { %v223_v59 = vmul.f32 0.0026041667, %v209_v58  ;;  %v13162_v58 = vld [vmem:[#allocation8 + $0x3f4] ss:$36 sps:$4 sm:$0xff]  }
 0x172   :  { %v217_v60 = vpop.xlane.xlu1 %216  ;;  %1725 = vmatprep.subr.bf16.mxu1 %v13162_v58 }
 0x173   :  { %v225_v61 = vmul.f32 0.0026041667, %v217_v60  ;;  %v15022_v62 = vsub.f32 %v15003_v0, %v223_v59  ;;  %v15025_v63 = vsub.f32 %v15005_v1, %v223_v59  ;;  %v15028_v3 = vsub.f32 %v15007_v2, %v223_v59  ;;  %v13164_v59 = vld [vmem:[#allocation8 + $0x404] ss:$36 sps:$4 sm:$0xff]   ;;  %v13166_v60 = vld [vmem:[#allocation8 + $0x3f0] ss:$36 sps:$4 sm:$0xff]  }
 0x174   :  { %v213_v10 = vpop.xlane.xlu0 %212  ;;  %1937 = vmatprep.subr.bf16.mxu0 %v13164_v59  ;;  %1726 = vmatpush1.bf16.msra.mxu1 %v13166_v60 }
 0x175   :  { %v15031_v7 = vsub.f32 %v15011_v4, %v225_v61  ;;  %v15034_v8 = vsub.f32 %v15013_v5, %v225_v61  ;;  %v15037_v9 = vsub.f32 %v15015_v6, %v225_v61  ;;  %v224_v11 = vmul.f32 0.0026041667, %v213_v10  ;;  %v13167_v61 = vld [vmem:[#allocation8 + $0x400] ss:$36 sps:$4 sm:$0xff]  }
 0x176   :  { %v221_v12 = vpop.xlane.xlu1 %220  ;;  %v239_v0 = vmul.f32 %v15022_v62, %v15022_v62  ;;  %v240_v1 = vmul.f32 %v15025_v63, %v15025_v63  ;;  %v241_v2 = vmul.f32 %v15028_v3, %v15028_v3  ;;  %v13168_v10 = vld [vmem:[#allocation8 + $0x43c] ss:$36 sps:$4 sm:$0xff]   ;;  %1938 = vmatpush1.bf16.msra.mxu0 %v13167_v61 }
 0x177   :  { %v226_v4 = vmul.f32 0.0026041667, %v221_v12  ;;  %v245_v5 = vmul.f32 %v15031_v7, %v15031_v7  ;;  %v246_v6 = vmul.f32 %v15034_v8, %v15034_v8  ;;  %v247_v13 = vmul.f32 %v15037_v9, %v15037_v9  ;;  %v13172_v12 = vld [vmem:[#allocation8 + $0x438] ss:$36 sps:$4 sm:$0xff]   ;;  %1727 = vmatprep.subr.bf16.mxu1 %v13168_v10 }
 0x178   :  { %v15051_v15 = vsub.f32 %v14414_v14, %v224_v11  ;;  %v15053_v17 = vsub.f32 %v14415_v16, %v224_v11  ;;  %v15055_v19 = vsub.f32 %v14416_v18, %v224_v11  ;;  %v251_v20 = vadd.f32 %v240_v1, %v239_v0  ;;  %v13170_v11 = vld [vmem:[#allocation8 + $0x44c] ss:$36 sps:$4 sm:$0xff]   ;;  %1728 = vmatpush1.bf16.msra.mxu1 %v13172_v12  ;;  %v13176_v1 = vld [vmem:[#allocation8 + $0x484] ss:$36 sps:$4 sm:$0xff]  }
 0x179   :  { %v15057_v22 = vsub.f32 %v14417_v21, %v226_v4  ;;  %v15059_v24 = vsub.f32 %v14418_v23, %v226_v4  ;;  %v15061_v26 = vsub.f32 %v14419_v25, %v226_v4  ;;  %v259_v27 = vadd.f32 %v246_v6, %v245_v5  ;;  %v13173_v0 = vld [vmem:[#allocation8 + $0x448] ss:$36 sps:$4 sm:$0xff]   ;;  %1939 = vmatprep.subr.bf16.mxu0 %v13170_v11  ;;  %v13183_v11 = vld [vmem:[#allocation8 + $0x4d8] ss:$36 sps:$4 sm:$0xff]  }
 0x17a   :  { %v252_v28 = vadd.f32 %v251_v20, %v241_v2  ;;  %v242_v29 = vmul.f32 %v15051_v15, %v15051_v15  ;;  %v243_v30 = vmul.f32 %v15053_v17, %v15053_v17  ;;  %v244_v34 = vmul.f32 %v15055_v19, %v15055_v19  ;;  %1940 = vmatpush1.bf16.msra.mxu0 %v13173_v0  ;;  %v13179_v2 = vld [vmem:[#allocation8 + $0x494] ss:$36 sps:$4 sm:$0xff]  }
 0x17b   :  { %v248_v31 = vmul.f32 %v15057_v22, %v15057_v22  ;;  %v249_v32 = vmul.f32 %v15059_v24, %v15059_v24  ;;  %v260_v33 = vadd.f32 %v259_v27, %v247_v13  ;;  %v250_v36 = vmul.f32 %v15061_v26, %v15061_v26  ;;  %1750 = vmatprep.subr.bf16.mxu1 %v13176_v1  ;;  %v13188_v0 = vld [vmem:[#allocation8 + $0x514] ss:$36 sps:$4 sm:$0xff]   ;;  %v13191_v1 = vld [vmem:[#allocation8 + $0x524] ss:$36 sps:$4 sm:$0xff]  }
 0x17c   :  { %253 = vadd.xlane.f32.xlu0 %v252_v28  ;;  %v255_v35 = vadd.f32 %v243_v30, %v242_v29  ;;  %1962 = vmatprep.subr.bf16.mxu0 %v13179_v2  ;;  %v292_v6 = vlaneseq  ;;  %v15078_v29 = vld [vmem:[#allocation5] sm:$0x7] }
 0x17d   :  { %v263_v37 = vadd.f32 %v249_v32, %v248_v31 }
 0x17e   :  { %v256_v38 = vadd.f32 %v255_v35, %v244_v34  ;;  %v15076_v21 = vshrl.u32 %v292_v6, 7 }
 0x17f   :  { %v264_v39 = vadd.f32 %v263_v37, %v250_v36 }
 0x180   :  { %261 = vadd.xlane.f32.xlu0 %v260_v33  ;;  %257 = vadd.xlane.f32.xlu1 %v256_v38  ;;  %16111 = vst [vmem:[#allocation31_spill] sm:$0xff] %v15076_v21  ;;  %v15081_v30 = vsub.s32 1, %v15076_v21  ;;  %v15084_v31 = vsub.s32 0, %v15076_v21  ;;  %v15086_v33 = vld [vmem:[#allocation7] sm:$0x7] }
 0x182   :  { %16112 = vst [vmem:[#allocation32_spill] sm:$0xff] %v15081_v30  ;;  %16113 = vst [vmem:[#allocation33_spill] sm:$0xff] %v15084_v31  ;;  %v299_v35 = vrot.slane %v15078_v29, %v15081_v30  ;;  %v295_v36 = vrot.slane %v15078_v29, %v15084_v31  ;;  %v327_v41 = vrot.slane %v15086_v33, %v15081_v30 }
 0x183   :  { %v323_v43 = vrot.slane %v15086_v33, %v15084_v31 }
 0x184   :  { %265 = vadd.xlane.f32.xlu1 %v264_v39 }
 0x209   :  { %v254_v4 = vpop.xlane.xlu0 %253 }
 0x20a   :  { %v267_v5 = vmul.f32 0.0026041667, %v254_v4  ;;  %v13186_v4 = vld [vmem:[#allocation8 + $0x510] ss:$36 sps:$4 sm:$0xff]  }
 0x20c   :  { %v271_v13 = vadd.f32 1e-05, %v267_v5  ;;  %v13189_v5 = vld [vmem:[#allocation8 + $0x520] ss:$36 sps:$4 sm:$0xff]  }
 0x20d   :  { %v258_v14 = vpop.xlane.xlu1 %257  ;;  %v262_v16 = vpop.xlane.xlu0 %261 }
 0x20e   :  { %14302 = vrsqrt.f32 %v271_v13  ;;  %v268_v18 = vmul.f32 0.0026041667, %v258_v14  ;;  %v269_v20 = vmul.f32 0.0026041667, %v262_v16  ;;  %v13194_v14 = vld [vmem:[#allocation8 + $0x55c] ss:$36 sps:$4 sm:$0xff]  }
 0x20f   :  { %v13197_v16 = vld [vmem:[#allocation8 + $0x56c] ss:$36 sps:$4 sm:$0xff]  }
 0x210   :  { %v272_v23 = vadd.f32 1e-05, %v268_v18  ;;  %v273_v25 = vadd.f32 1e-05, %v269_v20  ;;  %v13192_v20 = vld [vmem:[#allocation8 + $0x558] ss:$36 sps:$4 sm:$0xff]  }
 0x211   :  { %v266_v27 = vpop.xlane.xlu1 %265 }
 0x212   :  { %14304 = vrsqrt.f32 %v272_v23  ;;  %v270_v28 = vmul.f32 0.0026041667, %v266_v27  ;;  %v13195_v23 = vld [vmem:[#allocation8 + $0x568] ss:$36 sps:$4 sm:$0xff]   ;;  %v13203_v27 = vld [vmem:[#allocation8 + $0x5b4] ss:$36 sps:$4 sm:$0xff]  }
 0x213   :  { %14306 = vrsqrt.f32 %v273_v25  ;;  %v13200_v25 = vld [vmem:[#allocation8 + $0x5a4] ss:$36 sps:$4 sm:$0xff]  }
 0x214   :  { %v274_v32 = vadd.f32 1e-05, %v270_v28  ;;  %v13198_v28 = vld [vmem:[#allocation8 + $0x5a0] ss:$36 sps:$4 sm:$0xff]  }
 0x216   :  { %14308 = vrsqrt.f32 %v274_v32  ;;  %v13201_v32 = vld [vmem:[#allocation8 + $0x5b0] ss:$36 sps:$4 sm:$0xff]  }
 0x218   :  { %v15088_v34 = vpop.eup %14302 }
 0x219   :  { %v280_v37 = vmul.f32 %v15088_v34, %v15025_v63  ;;  %v279_v38 = vmul.f32 %v15088_v34, %v15022_v62 }
 0x21b   :  { %v308_v40 = vmul.f32 %v299_v35, %v280_v37  ;;  %v307_v42 = vmul.f32 %v295_v36, %v279_v38  ;;  %v13209_v37 = vld [vmem:[#allocation8 + $0x5fc] ss:$36 sps:$4 sm:$0xff]   ;;  %v13204_v38 = vld [vmem:[#allocation8 + $0x5e8] ss:$36 sps:$4 sm:$0xff]  }
 0x21c   :  { %v15098_v39 = vpop.eup %14304 }
 0x21d   :  { %v15104_v44 = vpop.eup %14306  ;;  %v283_v45 = vmul.f32 %v15098_v39, %v15053_v17  ;;  %v282_v63 = vmul.f32 %v15098_v39, %v15051_v15  ;;  %v336_v49 = vadd.f32 %v327_v41, %v308_v40  ;;  %v335_v50 = vadd.f32 %v323_v43, %v307_v42  ;;  %v13207_v40 = vld [vmem:[#allocation8 + $0x5f8] ss:$36 sps:$4 sm:$0xff]  }
 0x21e   :  { %v286_v62 = vmul.f32 %v15104_v44, %v15034_v8  ;;  %v285_v8 = vmul.f32 %v15104_v44, %v15031_v7  ;;  %v13212_v42 = vld [vmem:[#allocation8 + $0x634] ss:$36 sps:$4 sm:$0xff]  }
 0x21f   :  { %v311_v46 = vmul.f32 %v299_v35, %v283_v45  ;;  %v310_v47 = vmul.f32 %v295_v36, %v282_v63  ;;  %v284_v45 = vmul.f32 %v15098_v39, %v15055_v19  ;;  %v13210_v63 = vld [vmem:[#allocation8 + $0x630] ss:$36 sps:$4 sm:$0xff]  }
 0x220   :  { %v15112_v48 = vpop.eup %14308  ;;  %v314_v51 = vmul.f32 %v299_v35, %v286_v62  ;;  %v313_v12 = vmul.f32 %v295_v36, %v285_v8  ;;  %v13213_v62 = vld [vmem:[#allocation8 + $0x640] ss:$36 sps:$4 sm:$0xff]   ;;  %v13224_v39 = vld [vmem:[#allocation8 + $0xc] ss:$36 sps:$4 sm:$0xff]  }
 0x221   :  { %v339_v52 = vadd.f32 %v327_v41, %v311_v46  ;;  %v338_v55 = vadd.f32 %v323_v43, %v310_v47  ;;  %v289_v17 = vmul.f32 %v15112_v48, %v15059_v24  ;;  %v288_v15 = vmul.f32 %v15112_v48, %v15057_v22  ;;  %v13180_v22 = vld [vmem:[#allocation8 + $0x4c8] ss:$36 sps:$4 sm:$0xff]  }
 0x222   :  { %v342_v10 = vadd.f32 %v327_v41, %v314_v51  ;;  %v341_v13 = vadd.f32 %v323_v43, %v313_v12  ;;  %v281_v46 = vmul.f32 %v15088_v34, %v15028_v3  ;;  %v13225_v3 = vld [vmem:[#allocation8 + $0x260] ss:$36 sps:$4 sm:$0xff]   ;;  %v290_v34 = vmul.f32 %v15112_v48, %v15061_v26 }
 0x223   :  { %v15120_v58 = vpack.c.bf16 %v339_v52, %v336_v49  ;;  %v15122_v59 = vpack.c.bf16 %v338_v55, %v335_v50  ;;  %v317_v60 = vmul.f32 %v299_v35, %v289_v17  ;;  %v316_v61 = vmul.f32 %v295_v36, %v288_v15  ;;  %v13206_v36 = vld [vmem:[#allocation8 + $0x5ec] ss:$36 sps:$4 sm:$0xff]   ;;  %v13218_v49 = vld [vmem:[#allocation8 + $0x67c] ss:$36 sps:$4 sm:$0xff]   ;;  %v13239_v12 = vld [vmem:[#allocation8 + $0xe4] ss:$36 sps:$4 sm:$0xff]  }
 0x224   :  { %v16098_v35 = vmov 0   ;;  %v13221_v50 = vld [vmem:[#allocation8 + $0x68c] ss:$36 sps:$4 sm:$0xff]   ;;  %v13216_v52 = vld [vmem:[#allocation8 + $0x678] ss:$36 sps:$4 sm:$0xff]  }
 0x225   :  { %1729 = vmatprep.mubr.bf16.mxu1 %v15120_v58  ;;  %1941 = vmatprep.mubr.bf16.mxu0 %v15120_v58  ;;  %v345_v24 = vadd.f32 %v327_v41, %v317_v60  ;;  %v344_v2 = vadd.f32 %v323_v43, %v316_v61  ;;  %v15139_v41 = vsub.s32 2, %v15076_v21  ;;  %v13215_v43 = vld [vmem:[#allocation8 + $0x644] ss:$36 sps:$4 sm:$0xff]   ;;  %v13227_v61 = vld [vmem:[#allocation8 + $0x50] ss:$36 sps:$4 sm:$0xff]  }
 0x226   :  { %1730 = vmatmul.mubr.bf16.vlgmr.msra.gmra.mrb[0].mxu1 %v15122_v59  ;;  %1942 = vmatmul.mubr.bf16.vlgmr.msra.gmra.mrb[0].mxu0 %v15122_v59  ;;  %v13222_v55 = vld [vmem:[#allocation8 + $0x8] ss:$36 sps:$4 sm:$0xff]   ;;  %v13226_v17 = vld [vmem:[#allocation8 + $0x20] ss:$36 sps:$4 sm:$0xff]  }
 0x227   :  { %1751 = vmatpush1.bf16.msra.mxu1 %v13174_v53  ;;  %1963 = vmatpush1.bf16.msra.mxu0 %v13177_v54  ;;  %v15128_v7 = vpack.c.bf16 %v345_v24, %v342_v10  ;;  %v15132_v18 = vpack.c.bf16 %v344_v2, %v341_v13  ;;  %16114 = vst [vmem:[#allocation34_spill] sm:$0xff] %v15139_v41  ;;  %v13219_v53 = vld [vmem:[#allocation8 + $0x688] ss:$36 sps:$4 sm:$0xff]   ;;  %v13234_v48 = vld [vmem:[#allocation8 + $0x9c] ss:$36 sps:$4 sm:$0xff]  }
 0x228   :  { %1752 = vmatprep.subr.bf16.mxu1 %v13182_v56  ;;  %1964 = vmatprep.subr.bf16.mxu0 %v13185_v57  ;;  %v303_v47 = vrot.slane %v15078_v29, %v15139_v41  ;;  %v331_v19 = vrot.slane %v15086_v33, %v15139_v41  ;;  %v287_v56 = vmul.f32 %v15104_v44, %v15037_v9  ;;  %v13229_v57 = vld [vmem:[#allocation8 + $0x54] ss:$36 sps:$4 sm:$0xff]   ;;  %v13230_v33 = vld [vmem:[#allocation8 + $0x2a8] ss:$36 sps:$4 sm:$0xff]   ;;  %v13237_v2 = vld [vmem:[#allocation8 + $0xe0] ss:$36 sps:$4 sm:$0xff]  }
 0x229   :  { %1739 = vmatprep.mubr.bf16.mxu1 %v15128_v7  ;;  %1951 = vmatprep.mubr.bf16.mxu0 %v15128_v7  ;;  %v13231_v10 = vld [vmem:[#allocation8 + $0x68] ss:$36 sps:$4 sm:$0xff]   ;;  %v13235_v9 = vld [vmem:[#allocation8 + $0x2f0] ss:$36 sps:$4 sm:$0xff]   ;;  %v13232_v24 = vld [vmem:[#allocation8 + $0x98] ss:$36 sps:$4 sm:$0xff]  }
 0x22a   :  { %v312_v51 = vmul.f32 %v303_v47, %v284_v45  ;;  %v309_v54 = vmul.f32 %v303_v47, %v281_v46  ;;  %v318_v60 = vmul.f32 %v303_v47, %v290_v34  ;;  %v315_v26 = vmul.f32 %v303_v47, %v287_v56  ;;  %v13245_v13 = vld [vmem:[#allocation8 + $0x380] ss:$36 sps:$4 sm:$0xff]   ;;  %v13264_v45 = vld [vmem:[#allocation8 + $0x24c] ss:$36 sps:$4 sm:$0xff]  }
 0x22b   :  { %1753 = vmatpush1.bf16.msra.mxu1 %v13180_v22  ;;  %1965 = vmatpush1.bf16.msra.mxu0 %v13183_v11  ;;  %v13236_v11 = vld [vmem:[#allocation8 + $0xb0] ss:$36 sps:$4 sm:$0xff]   ;;  %v13270_v47 = vld [vmem:[#allocation8 + $0x2dc] ss:$36 sps:$4 sm:$0xff]  }
 0x22c   :  { %1754 = vmatprep.subr.bf16.mxu1 %v13188_v0  ;;  %1966 = vmatprep.subr.bf16.mxu0 %v13191_v1  ;;  %v340_v29 = vadd.f32 %v331_v19, %v312_v51  ;;  %v337_v15 = vadd.f32 %v331_v19, %v309_v54  ;;  %v346_v44 = vadd.f32 %v331_v19, %v318_v60  ;;  %v13240_v0 = vld [vmem:[#allocation8 + $0x338] ss:$36 sps:$4 sm:$0xff]   ;;  %v13265_v46 = vld [vmem:[#allocation8 + $0x290] ss:$36 sps:$4 sm:$0xff]   ;;  %v13271_v51 = vld [vmem:[#allocation8 + $0x320] ss:$36 sps:$4 sm:$0xff]  }
 0x22d   :  { %v343_v22 = vadd.f32 %v331_v19, %v315_v26  ;;  %v13279_v54 = vld [vmem:[#allocation8 + $0x3b4] ss:$36 sps:$4 sm:$0xff]   ;;  %v13283_v34 = vld [vmem:[#allocation8 + $0x440] ss:$36 sps:$4 sm:$0xff]   ;;  %v13298_v26 = vld [vmem:[#allocation8 + $0x5a8] ss:$36 sps:$4 sm:$0xff]  }
 0x22e   :  { %1740 = vmatmul.mubr.bf16.gmra.mrb[4].mxu1 %v15132_v18  ;;  %1952 = vmatmul.mubr.bf16.gmra.mrb[4].mxu0 %v15132_v18  ;;  %v15153_v8 = vpack.c.bf16 %v340_v29, %v337_v15  ;;  %v13277_v19 = vld [vmem:[#allocation8 + $0x3b0] ss:$36 sps:$4 sm:$0xff]   ;;  %v13285_v29 = vld [vmem:[#allocation8 + $0x444] ss:$36 sps:$4 sm:$0xff]  }
 0x22f   :  { %1755 = vmatpush1.bf16.msra.mxu1 %v13186_v4  ;;  %1967 = vmatpush1.bf16.msra.mxu0 %v13189_v5  ;;  %v15159_v1 = vpack.c.bf16 %v346_v44, %v343_v22  ;;  %v13241_v4 = vld [vmem:[#allocation8 + $0xf8] ss:$36 sps:$4 sm:$0xff]   ;;  %v13244_v5 = vld [vmem:[#allocation8 + $0x12c] ss:$36 sps:$4 sm:$0xff]   ;;  %v13297_v60 = vld [vmem:[#allocation8 + $0x564] ss:$36 sps:$4 sm:$0xff]  }
 0x230   :  { %1756 = vmatprep.subr.bf16.mxu1 %v13194_v14  ;;  %1968 = vmatprep.subr.bf16.mxu0 %v13197_v16  ;;  %v13242_v14 = vld [vmem:[#allocation8 + $0x128] ss:$36 sps:$4 sm:$0xff]   ;;  %v13246_v16 = vld [vmem:[#allocation8 + $0x140] ss:$36 sps:$4 sm:$0xff]   ;;  %v13291_v15 = vld [vmem:[#allocation8 + $0x4d4] ss:$36 sps:$4 sm:$0xff]  }
 0x231   :  { %1782 = vmatprep.mubr.bf16.mxu1 %v16098_v35  ;;  %1994 = vmatprep.mubr.bf16.mxu0 %v16098_v35  ;;  %v13289_v56 = vld [vmem:[#allocation8 + $0x4d0] ss:$36 sps:$4 sm:$0xff]   ;;  %v13306_v44 = vld [vmem:[#allocation8 + $0x63c] ss:$36 sps:$4 sm:$0xff]   ;;  %v13309_v22 = vld [vmem:[#allocation8 + $0x684] ss:$36 sps:$4 sm:$0xff]  }
 0x233   :  { %1757 = vmatpush1.bf16.msra.mxu1 %v13192_v20  ;;  %1969 = vmatpush1.bf16.msra.mxu0 %v13195_v23  ;;  %v13249_v20 = vld [vmem:[#allocation8 + $0x174] ss:$36 sps:$4 sm:$0xff]   ;;  %v13250_v23 = vld [vmem:[#allocation8 + $0x3c8] ss:$36 sps:$4 sm:$0xff]  }
 0x234   :  { %1758 = vmatprep.subr.bf16.mxu1 %v13200_v25  ;;  %1970 = vmatprep.subr.bf16.mxu0 %v13203_v27  ;;  %v13247_v25 = vld [vmem:[#allocation8 + $0x170] ss:$36 sps:$4 sm:$0xff]   ;;  %v13251_v27 = vld [vmem:[#allocation8 + $0x188] ss:$36 sps:$4 sm:$0xff]  }
 0x237   :  { %1759 = vmatpush1.bf16.msra.mxu1 %v13198_v28  ;;  %1971 = vmatpush1.bf16.msra.mxu0 %v13201_v32  ;;  %v13254_v28 = vld [vmem:[#allocation8 + $0x1bc] ss:$36 sps:$4 sm:$0xff]   ;;  %v13255_v32 = vld [vmem:[#allocation8 + $0x410] ss:$36 sps:$4 sm:$0xff]  }
 0x238   :  { %1760 = vmatprep.subr.bf16.mxu1 %v13206_v36  ;;  %1972 = vmatprep.subr.bf16.mxu0 %v13209_v37  ;;  %v13252_v36 = vld [vmem:[#allocation8 + $0x1b8] ss:$36 sps:$4 sm:$0xff]   ;;  %v13256_v37 = vld [vmem:[#allocation8 + $0x1d0] ss:$36 sps:$4 sm:$0xff]  }
 0x23b   :  { %1761 = vmatpush1.bf16.msra.mxu1 %v13204_v38  ;;  %1973 = vmatpush1.bf16.msra.mxu0 %v13207_v40  ;;  %v13259_v38 = vld [vmem:[#allocation8 + $0x204] ss:$36 sps:$4 sm:$0xff]   ;;  %v13260_v40 = vld [vmem:[#allocation8 + $0x458] ss:$36 sps:$4 sm:$0xff]  }
 0x23c   :  { %1762 = vmatprep.subr.bf16.mxu1 %v13212_v42  ;;  %1974 = vmatprep.subr.bf16.mxu0 %v13215_v43  ;;  %v13257_v42 = vld [vmem:[#allocation8 + $0x200] ss:$36 sps:$4 sm:$0xff]   ;;  %v13261_v43 = vld [vmem:[#allocation8 + $0x218] ss:$36 sps:$4 sm:$0xff]  }
 0x23f   :  { %1763 = vmatpush1.bf16.msra.mxu1 %v13210_v63  ;;  %1975 = vmatpush1.bf16.msra.mxu0 %v13213_v62  ;;  %v13262_v63 = vld [vmem:[#allocation8 + $0x248] ss:$36 sps:$4 sm:$0xff]   ;;  %v13267_v62 = vld [vmem:[#allocation8 + $0x294] ss:$36 sps:$4 sm:$0xff]  }
 0x240   :  { %1764 = vmatprep.subr.bf16.mxu1 %v13218_v49  ;;  %1976 = vmatprep.subr.bf16.mxu0 %v13221_v50  ;;  %v13268_v49 = vld [vmem:[#allocation8 + $0x2d8] ss:$36 sps:$4 sm:$0xff]   ;;  %v13273_v50 = vld [vmem:[#allocation8 + $0x324] ss:$36 sps:$4 sm:$0xff]  }
 0x243   :  { %1765 = vmatpush1.bf16.msra.mxu1 %v13216_v52  ;;  %1977 = vmatpush1.bf16.msra.mxu0 %v13219_v53  ;;  %v13276_v52 = vld [vmem:[#allocation8 + $0x36c] ss:$36 sps:$4 sm:$0xff]  }
 0x244   :  { %1803 = vmatprep.subr.bf16.mxu1 %v13224_v39  ;;  %12041 = vmatprep.subr.bf16.mxu0 %v13225_v3  ;;  %v13274_v53 = vld [vmem:[#allocation8 + $0x368] ss:$36 sps:$4 sm:$0xff]   ;;  %v13282_v39 = vld [vmem:[#allocation8 + $0x3fc] ss:$36 sps:$4 sm:$0xff]  }
 0x245   :  { %v13280_v3 = vld [vmem:[#allocation8 + $0x3f8] ss:$36 sps:$4 sm:$0xff]  }
 0x246   :  { %1783 = vmatmul.mubr.bf16.vlgmr.msra.gmra.mrb[0].mxu1 %v15153_v8  ;;  %1995 = vmatmul.mubr.bf16.vlgmr.msra.gmra.mrb[0].mxu0 %v15153_v8 }
 0x247   :  { %1804 = vmatpush1.bf16.msra.mxu1 %v13222_v55  ;;  %12042 = vmatpush3.bf16.msra.mxu0 %v13226_v17  ;;  %v13288_v55 = vld [vmem:[#allocation8 + $0x48c] ss:$36 sps:$4 sm:$0xff]  }
 0x248   :  { %1805 = vmatprep.subr.bf16.mxu1 %v13229_v57  ;;  %12043 = vmatprep.subr.bf16.mxu0 %v13230_v33  ;;  %v13286_v17 = vld [vmem:[#allocation8 + $0x488] ss:$36 sps:$4 sm:$0xff]   ;;  %v13294_v57 = vld [vmem:[#allocation8 + $0x51c] ss:$36 sps:$4 sm:$0xff]  }
 0x249   :  { %1792 = vmatprep.mubr.bf16.mxu1 %v16098_v35  ;;  %2004 = vmatprep.mubr.bf16.mxu0 %v16098_v35  ;;  %v13292_v33 = vld [vmem:[#allocation8 + $0x518] ss:$36 sps:$4 sm:$0xff]  }
 0x24b   :  { %1806 = vmatpush1.bf16.msra.mxu1 %v13227_v61  ;;  %12044 = vmatpush3.bf16.msra.mxu0 %v13231_v10  ;;  %v13295_v61 = vld [vmem:[#allocation8 + $0x560] ss:$36 sps:$4 sm:$0xff]   ;;  %v13300_v10 = vld [vmem:[#allocation8 + $0x5ac] ss:$36 sps:$4 sm:$0xff]  }
 0x24c   :  { %1807 = vmatprep.subr.bf16.mxu1 %v13234_v48  ;;  %12045 = vmatprep.subr.bf16.mxu0 %v13235_v9  ;;  %v13303_v48 = vld [vmem:[#allocation8 + $0x5f4] ss:$36 sps:$4 sm:$0xff]  }
 0x24d   :  { %v13301_v9 = vld [vmem:[#allocation8 + $0x5f0] ss:$36 sps:$4 sm:$0xff]  }
 0x24e   :  { %1793 = vmatmul.mubr.bf16.gmra.mrb[4].mxu1 %v15159_v1  ;;  %2005 = vmatmul.mubr.bf16.gmra.mrb[4].mxu0 %v15159_v1 }
 0x24f   :  { %1808 = vmatpush1.bf16.msra.mxu1 %v13232_v24  ;;  %1835 = vmatprep.mubr.bf16.mxu1 %v15120_v58  ;;  %v13304_v24 = vld [vmem:[#allocation8 + $0x638] ss:$36 sps:$4 sm:$0xff]  }
 0x250   :  { %12046 = vmatpush3.bf16.msra.mxu0 %v13236_v11  ;;  %2153 = vmatprep.mubr.bf16.mxu0 %v15120_v58  ;;  %v13307_v11 = vld [vmem:[#allocation8 + $0x680] ss:$36 sps:$4 sm:$0xff]  }
 0x251   :  { %1809 = vmatprep.subr.bf16.mxu1 %v13239_v12  ;;  %12047 = vmatprep.subr.bf16.mxu0 %v13240_v0  ;;  %v13312_v12 = vld [vmem:[#allocation8 + $0x1c] ss:$36 sps:$4 sm:$0xff]  }
 0x252   :  { %v13310_v0 = vld [vmem:[#allocation8 + $0x18] ss:$36 sps:$4 sm:$0xff]  }
 0x253   :  { %1810 = vmatpush1.bf16.msra.mxu1 %v13237_v2  ;;  %v13315_v2 = vld [vmem:[#allocation8 + $0x64] ss:$36 sps:$4 sm:$0xff]  }
 0x254   :  { %12048 = vmatpush3.bf16.msra.mxu0 %v13241_v4  ;;  %1811 = vmatprep.subr.bf16.mxu1 %v13244_v5  ;;  %v13313_v4 = vld [vmem:[#allocation8 + $0x60] ss:$36 sps:$4 sm:$0xff]   ;;  %v13318_v5 = vld [vmem:[#allocation8 + $0xac] ss:$36 sps:$4 sm:$0xff]  }
 0x255   :  { %12049 = vmatprep.subr.bf16.mxu0 %v13245_v13  ;;  %v13316_v13 = vld [vmem:[#allocation8 + $0xa8] ss:$36 sps:$4 sm:$0xff]  }
 0x257   :  { %1812 = vmatpush1.bf16.msra.mxu1 %v13242_v14  ;;  %v13321_v14 = vld [vmem:[#allocation8 + $0xf4] ss:$36 sps:$4 sm:$0xff]  }
 0x258   :  { %12050 = vmatpush3.bf16.msra.mxu0 %v13246_v16  ;;  %1813 = vmatprep.subr.bf16.mxu1 %v13249_v20  ;;  %v13319_v16 = vld [vmem:[#allocation8 + $0xf0] ss:$36 sps:$4 sm:$0xff]   ;;  %v13324_v20 = vld [vmem:[#allocation8 + $0x13c] ss:$36 sps:$4 sm:$0xff]  }
 0x259   :  { %12051 = vmatprep.subr.bf16.mxu0 %v13250_v23  ;;  %v13322_v23 = vld [vmem:[#allocation8 + $0x138] ss:$36 sps:$4 sm:$0xff]  }
 0x25b   :  { %1814 = vmatpush1.bf16.msra.mxu1 %v13247_v25  ;;  %v13327_v25 = vld [vmem:[#allocation8 + $0x184] ss:$36 sps:$4 sm:$0xff]  }
 0x25c   :  { %12052 = vmatpush3.bf16.msra.mxu0 %v13251_v27  ;;  %1815 = vmatprep.subr.bf16.mxu1 %v13254_v28  ;;  %v13325_v27 = vld [vmem:[#allocation8 + $0x180] ss:$36 sps:$4 sm:$0xff]   ;;  %v13330_v28 = vld [vmem:[#allocation8 + $0x1cc] ss:$36 sps:$4 sm:$0xff]  }
 0x25d   :  { %12053 = vmatprep.subr.bf16.mxu0 %v13255_v32  ;;  %v13328_v32 = vld [vmem:[#allocation8 + $0x1c8] ss:$36 sps:$4 sm:$0xff]  }
 0x25f   :  { %1816 = vmatpush1.bf16.msra.mxu1 %v13252_v36  ;;  %v13333_v36 = vld [vmem:[#allocation8 + $0x214] ss:$36 sps:$4 sm:$0xff]  }
 0x260   :  { %12054 = vmatpush3.bf16.msra.mxu0 %v13256_v37  ;;  %1817 = vmatprep.subr.bf16.mxu1 %v13259_v38  ;;  %v13331_v37 = vld [vmem:[#allocation8 + $0x210] ss:$36 sps:$4 sm:$0xff]   ;;  %v13336_v38 = vld [vmem:[#allocation8 + $0x25c] ss:$36 sps:$4 sm:$0xff]  }
 0x261   :  { %12055 = vmatprep.subr.bf16.mxu0 %v13260_v40  ;;  %v13339_v40 = vld [vmem:[#allocation8 + $0x2a4] ss:$36 sps:$4 sm:$0xff]  }
 0x263   :  { %1818 = vmatpush1.bf16.msra.mxu1 %v13257_v42  ;;  %v13337_v42 = vld [vmem:[#allocation8 + $0x2a0] ss:$36 sps:$4 sm:$0xff]  }
 0x264   :  { %12056 = vmatpush3.bf16.msra.mxu0 %v13261_v43  ;;  %1819 = vmatprep.subr.bf16.mxu1 %v13264_v45  ;;  %v13342_v43 = vld [vmem:[#allocation8 + $0x2ec] ss:$36 sps:$4 sm:$0xff]  }
 0x265   :  { %v13340_v45 = vld [vmem:[#allocation8 + $0x2e8] ss:$36 sps:$4 sm:$0xff]  }
 0x267   :  { %2154 = vmatmul.mubr.bf16.vlgmr.msra.gmra.mrb[8].mxu0 %v15122_v59  ;;  %1820 = vmatpush1.bf16.msra.mxu1 %v13262_v63  ;;  %v13345_v63 = vld [vmem:[#allocation8 + $0x334] ss:$36 sps:$4 sm:$0xff]  }
 0x268   :  { %2161 = vmatprep.mubr.bf16.mxu0 %v15128_v7  ;;  %1821 = vmatprep.subr.bf16.mxu1 %v13267_v62  ;;  %v13343_v62 = vld [vmem:[#allocation8 + $0x330] ss:$36 sps:$4 sm:$0xff]  }
 0x26b   :  { %1822 = vmatpush1.bf16.msra.mxu1 %v13265_v46  ;;  %v13348_v46 = vld [vmem:[#allocation8 + $0x37c] ss:$36 sps:$4 sm:$0xff]  }
 0x26c   :  { %1823 = vmatprep.subr.bf16.mxu1 %v13270_v47  ;;  %v13346_v47 = vld [vmem:[#allocation8 + $0x378] ss:$36 sps:$4 sm:$0xff]  }
 0x26f   :  { %2162 = vmatmul.mubr.bf16.gmra.mrb[12].mxu0 %v15132_v18  ;;  %1824 = vmatpush1.bf16.msra.mxu1 %v13268_v49  ;;  %v13351_v49 = vld [vmem:[#allocation8 + $0x3c4] ss:$36 sps:$4 sm:$0xff]  }
 0x270   :  { %1825 = vmatprep.subr.bf16.mxu1 %v13273_v50  ;;  %v13349_v50 = vld [vmem:[#allocation8 + $0x3c0] ss:$36 sps:$4 sm:$0xff]  }
 0x273   :  { %1826 = vmatpush1.bf16.msra.mxu1 %v13271_v51  ;;  %v13354_v51 = vld [vmem:[#allocation8 + $0x40c] ss:$36 sps:$4 sm:$0xff]  }
 0x274   :  { %1827 = vmatprep.subr.bf16.mxu1 %v13276_v52  ;;  %v13352_v52 = vld [vmem:[#allocation8 + $0x408] ss:$36 sps:$4 sm:$0xff]  }
 0x277   :  { %1828 = vmatpush1.bf16.msra.mxu1 %v13274_v53  ;;  %v13357_v53 = vld [vmem:[#allocation8 + $0x454] ss:$36 sps:$4 sm:$0xff]  }
 0x278   :  { %1829 = vmatprep.subr.bf16.mxu1 %v13279_v54  ;;  %v13355_v54 = vld [vmem:[#allocation8 + $0x450] ss:$36 sps:$4 sm:$0xff]  }
 0x27b   :  { %1830 = vmatpush1.bf16.msra.mxu1 %v13277_v19  ;;  %v13360_v19 = vld [vmem:[#allocation8 + $0x49c] ss:$36 sps:$4 sm:$0xff]  }
 0x27c   :  { %1831 = vmatprep.subr.bf16.mxu1 %v13282_v39  ;;  %v13358_v39 = vld [vmem:[#allocation8 + $0x498] ss:$36 sps:$4 sm:$0xff]  }
 0x27f   :  { %1832 = vmatpush1.bf16.msra.mxu1 %v13280_v3  ;;  %v13363_v3 = vld [vmem:[#allocation8 + $0x4e4] ss:$36 sps:$4 sm:$0xff]  }
 0x280   :  { %1833 = vmatprep.subr.bf16.mxu1 %v13285_v29  ;;  %v13361_v29 = vld [vmem:[#allocation8 + $0x4e0] ss:$36 sps:$4 sm:$0xff]  }
 0x283   :  { %1834 = vmatpush1.bf16.msra.mxu1 %v13283_v34  ;;  %v13366_v34 = vld [vmem:[#allocation8 + $0x52c] ss:$36 sps:$4 sm:$0xff]  }
 0x284   :  { %1856 = vmatprep.subr.bf16.mxu1 %v13288_v55  ;;  %v13364_v55 = vld [vmem:[#allocation8 + $0x528] ss:$36 sps:$4 sm:$0xff]  }
 0x286   :  { %1836 = vmatmul.mubr.bf16.vlgmr.msra.gmra.mrb[8].mxu1 %v15122_v59 }
 0x287   :  { %1845 = vmatprep.mubr.bf16.mxu1 %v15128_v7  ;;  %1857 = vmatpush1.bf16.msra.mxu1 %v13286_v17  ;;  %v13369_v17 = vld [vmem:[#allocation8 + $0x574] ss:$36 sps:$4 sm:$0xff]  }
 0x288   :  { %1858 = vmatprep.subr.bf16.mxu1 %v13291_v15  ;;  %v13367_v15 = vld [vmem:[#allocation8 + $0x570] ss:$36 sps:$4 sm:$0xff]  }
 0x28b   :  { %1859 = vmatpush1.bf16.msra.mxu1 %v13289_v56  ;;  %v13372_v56 = vld [vmem:[#allocation8 + $0x5bc] ss:$36 sps:$4 sm:$0xff]  }
 0x28c   :  { %1860 = vmatprep.subr.bf16.mxu1 %v13294_v57  ;;  %v13373_v57 = vld [vmem:[#allocation8 + $0x600] ss:$36 sps:$4 sm:$0xff]  }
 0x28e   :  { %1846 = vmatmul.mubr.bf16.gmra.mrb[12].mxu1 %v15132_v18 }
 0x28f   :  { %1861 = vmatpush1.bf16.msra.mxu1 %v13292_v33  ;;  %1888 = vmatprep.mubr.bf16.mxu1 %v16098_v35  ;;  %v13378_v33 = vld [vmem:[#allocation8 + $0x64c] ss:$36 sps:$4 sm:$0xff]  }
 0x290   :  { %1862 = vmatprep.subr.bf16.mxu1 %v13297_v60  ;;  %v13376_v60 = vld [vmem:[#allocation8 + $0x648] ss:$36 sps:$4 sm:$0xff]  }
 0x293   :  { %1863 = vmatpush1.bf16.msra.mxu1 %v13295_v61  ;;  %v13381_v61 = vld [vmem:[#allocation8 + $0x694] ss:$36 sps:$4 sm:$0xff]  }
 0x294   :  { %1864 = vmatprep.subr.bf16.mxu1 %v13300_v10  ;;  %v13382_v10 = vld [vmem:[#allocation8 + $0x4a0] ss:$36 sps:$4 sm:$0xff]  }
 0x297   :  { %1865 = vmatpush1.bf16.msra.mxu1 %v13298_v26  ;;  %v13383_v26 = vld [vmem:[#allocation8 + $0x4e8] ss:$36 sps:$4 sm:$0xff]  }
 0x298   :  { %1866 = vmatprep.subr.bf16.mxu1 %v13303_v48  ;;  %v13384_v48 = vld [vmem:[#allocation8 + $0x530] ss:$36 sps:$4 sm:$0xff]  }
 0x29b   :  { %1867 = vmatpush1.bf16.msra.mxu1 %v13301_v9  ;;  %v13385_v9 = vld [vmem:[#allocation8 + $0x578] ss:$36 sps:$4 sm:$0xff]  }
 0x29c   :  { %1868 = vmatprep.subr.bf16.mxu1 %v13306_v44  ;;  %v13386_v44 = vld [vmem:[#allocation8 + $0x5c0] ss:$36 sps:$4 sm:$0xff]  }
 0x29f   :  { %1869 = vmatpush1.bf16.msra.mxu1 %v13304_v24  ;;  %v13387_v24 = vld [vmem:[#allocation8 + $0x608] ss:$36 sps:$4 sm:$0xff]  }
 0x2a0   :  { %1870 = vmatprep.subr.bf16.mxu1 %v13309_v22  ;;  %v13388_v22 = vld [vmem:[#allocation8 + $0x650] ss:$36 sps:$4 sm:$0xff]  }
 0x2a3   :  { %1871 = vmatpush1.bf16.msra.mxu1 %v13307_v11 }
 0x2a4   :  { %2015 = vmatprep.subr.bf16.mxu1 %v13312_v12 }
 0x2a6   :  { %1889 = vmatmul.mubr.bf16.vlgmr.msra.gmra.mrb[8].mxu1 %v15153_v8 }
 0x2a7   :  { %2016 = vmatpush1.bf16.msra.mxu1 %v13310_v0  ;;  %1898 = vmatprep.mubr.bf16.mxu1 %v16098_v35 }
 0x2a8   :  { %2017 = vmatprep.subr.bf16.mxu1 %v13315_v2 }
 0x2ab   :  { %2018 = vmatpush1.bf16.msra.mxu1 %v13313_v4 }
 0x2ac   :  { %2019 = vmatprep.subr.bf16.mxu1 %v13318_v5 }
 0x2ae   :  { %1899 = vmatmul.mubr.bf16.gmra.mrb[12].mxu1 %v15159_v1 }
 0x2af   :  { %2020 = vmatpush1.bf16.msra.mxu1 %v13316_v13  ;;  %2047 = vmatprep.mubr.bf16.mxu1 %v15120_v58  ;;  %v13334_v58 = vld [vmem:[#allocation8 + $0x258] ss:$36 sps:$4 sm:$0xff]  }
 0x2b0   :  { %2021 = vmatprep.subr.bf16.mxu1 %v13321_v14 }
 0x2b3   :  { %2022 = vmatpush1.bf16.msra.mxu1 %v13319_v16 }
 0x2b4   :  { %2023 = vmatprep.subr.bf16.mxu1 %v13324_v20  ;;  %v13389_v20 = vld [vmem:[#allocation8 + $0x698] ss:$36 sps:$4 sm:$0xff]  }
 0x2b7   :  { %2024 = vmatpush1.bf16.msra.mxu1 %v13322_v23 }
 0x2b8   :  { %2025 = vmatprep.subr.bf16.mxu1 %v13327_v25 }
 0x2bb   :  { %2026 = vmatpush1.bf16.msra.mxu1 %v13325_v27 }
 0x2bc   :  { %2027 = vmatprep.subr.bf16.mxu1 %v13330_v28 }
 0x2bf   :  { %2028 = vmatpush1.bf16.msra.mxu1 %v13328_v32 }
 0x2c0   :  { %2029 = vmatprep.subr.bf16.mxu1 %v13333_v36 }
 0x2c3   :  { %2030 = vmatpush1.bf16.msra.mxu1 %v13331_v37 }
 0x2c4   :  { %2031 = vmatprep.subr.bf16.mxu1 %v13336_v38 }
 0x2c7   :  { %2032 = vmatpush1.bf16.msra.mxu1 %v13334_v58 }
 0x2c8   :  { %2033 = vmatprep.subr.bf16.mxu1 %v13339_v40 }
 0x2cb   :  { %2034 = vmatpush1.bf16.msra.mxu1 %v13337_v42 }
 0x2cc   :  { %2035 = vmatprep.subr.bf16.mxu1 %v13342_v43 }
 0x2cf   :  { %2036 = vmatpush1.bf16.msra.mxu1 %v13340_v45 }
 0x2d0   :  { %2037 = vmatprep.subr.bf16.mxu1 %v13345_v63 }
 0x2d3   :  { %2038 = vmatpush1.bf16.msra.mxu1 %v13343_v62 }
 0x2d4   :  { %2039 = vmatprep.subr.bf16.mxu1 %v13348_v46 }
 0x2d7   :  { %2040 = vmatpush1.bf16.msra.mxu1 %v13346_v47 }
 0x2d8   :  { %2041 = vmatprep.subr.bf16.mxu1 %v13351_v49 }
 0x2db   :  { %2042 = vmatpush1.bf16.msra.mxu1 %v13349_v50 }
 0x2dc   :  { %2043 = vmatprep.subr.bf16.mxu1 %v13354_v51 }
 0x2df   :  { %2044 = vmatpush1.bf16.msra.mxu1 %v13352_v52 }
 0x2e0   :  { %2045 = vmatprep.subr.bf16.mxu1 %v13357_v53 }
 0x2e3   :  { %2046 = vmatpush1.bf16.msra.mxu1 %v13355_v54 }
 0x2e4   :  { %2068 = vmatprep.subr.bf16.mxu1 %v13360_v19 }
 0x2e6   :  { %2048 = vmatmul.mubr.bf16.vlgmr.msra.gmra.mrb[16].mxu1 %v15122_v59  ;;  %v13370_v59 = vld [vmem:[#allocation8 + $0x5b8] ss:$36 sps:$4 sm:$0xff]  }
 0x2e7   :  { %2057 = vmatprep.mubr.bf16.mxu1 %v15128_v7  ;;  %2069 = vmatpush1.bf16.msra.mxu1 %v13358_v39  ;;  %v13375_v7 = vld [vmem:[#allocation8 + $0x604] ss:$36 sps:$4 sm:$0xff]  }
 0x2e8   :  { %2070 = vmatprep.subr.bf16.mxu1 %v13363_v3 }
 0x2eb   :  { %2071 = vmatpush1.bf16.msra.mxu1 %v13361_v29 }
 0x2ec   :  { %2072 = vmatprep.subr.bf16.mxu1 %v13366_v34 }
 0x2ee   :  { %2058 = vmatmul.mubr.bf16.gmra.mrb[20].mxu1 %v15132_v18  ;;  %v13379_v18 = vld [vmem:[#allocation8 + $0x690] ss:$36 sps:$4 sm:$0xff]  }
 0x2ef   :  { %2073 = vmatpush1.bf16.msra.mxu1 %v13364_v55  ;;  %2100 = vmatprep.mubr.bf16.mxu1 %v16098_v35 }
 0x2f0   :  { %2074 = vmatprep.subr.bf16.mxu1 %v13369_v17 }
 0x2f3   :  { %2075 = vmatpush1.bf16.msra.mxu1 %v13367_v15 }
 0x2f4   :  { %2076 = vmatprep.subr.bf16.mxu1 %v13372_v56 }
 0x2f7   :  { %2077 = vmatpush1.bf16.msra.mxu1 %v13370_v59 }
 0x2f8   :  { %2078 = vmatprep.subr.bf16.mxu1 %v13375_v7 }
 0x2fb   :  { %2079 = vmatpush1.bf16.msra.mxu1 %v13373_v57 }
 0x2fc   :  { %2080 = vmatprep.subr.bf16.mxu1 %v13378_v33 }
 0x2ff   :  { %2081 = vmatpush1.bf16.msra.mxu1 %v13376_v60 }
 0x300   :  { %2082 = vmatprep.subr.bf16.mxu1 %v13381_v61 }
 0x303   :  { %2083 = vmatpush1.bf16.msra.mxu1 %v13379_v18 }
 0x304   :  { %12379 = vmatprep.subr.bf16.mxu1 %v13382_v10 }
 0x306   :  { %2101 = vmatmul.mubr.bf16.vlgmr.msra.gmra.mrb[16].mxu1 %v15153_v8 }
 0x307   :  { %12380 = vmatpush3.bf16.msra.mxu1 %v13382_v10  ;;  %2110 = vmatprep.mubr.bf16.mxu1 %v16098_v35 }
 0x308   :  { %12381 = vmatprep.subr.bf16.mxu1 %v13383_v26 }
 0x30b   :  { %12382 = vmatpush3.bf16.msra.mxu1 %v13383_v26 }
 0x30c   :  { %12383 = vmatprep.subr.bf16.mxu1 %v13384_v48 }
 0x30e   :  { %2111 = vmatmul.mubr.bf16.gmra.mrb[20].mxu1 %v15159_v1 }
 0x30f   :  { %12384 = vmatpush3.bf16.msra.mxu1 %v13384_v48  ;;  %12395 = vmatprep.mubr.bf16.mxu1 %v15153_v8 }
 0x310   :  { %12385 = vmatprep.subr.bf16.mxu1 %v13385_v9 }
 0x313   :  { %12386 = vmatpush3.bf16.msra.mxu1 %v13385_v9 }
 0x314   :  { %12387 = vmatprep.subr.bf16.mxu1 %v13386_v44 }
 0x317   :  { %12388 = vmatpush3.bf16.msra.mxu1 %v13386_v44 }
 0x318   :  { %12389 = vmatprep.subr.bf16.mxu1 %v13387_v24 }
 0x319   :  { %v15184_v11 = vpop.f32.mrb[0].mxu1  ;;  %v15186_v12 = vpop.f32.mrb[0].mxu0 }
 0x31a   :  { %v15188_v0 = vpop.f32.mrb[1].mxu1  ;;  %v15190_v2 = vpop.f32.mrb[1].mxu0 }
 0x31b   :  { %v15192_v4 = vpop.f32.mrb[2].mxu1  ;;  %v15194_v5 = vpop.f32.mrb[2].mxu0  ;;  %12390 = vmatpush3.bf16.msra.mxu1 %v13387_v24 }
 0x31c   :  { %v15200_v13 = vpack.c.bf16 %v15194_v5, %v15186_v12  ;;  %v15202_v14 = vpop.f32.mrb[3].mxu1  ;;  %v15204_v16 = vpop.f32.mrb[3].mxu0  ;;  %12391 = vmatprep.subr.bf16.mxu1 %v13388_v22 }
 0x31d   :  { %v15210_v25 = vpack.c.bf16 %v15204_v16, %v15190_v2 }
 0x31f   :  { %12392 = vmatpush3.bf16.msra.mxu1 %v13388_v22 }
 0x320   :  { %12393 = vmatprep.subr.bf16.mxu1 %v13389_v20 }
 0x321   :  { %v15212_v27 = vpop.f32.mrb[4].mxu1  ;;  %v15214_v28 = vpop.f32.mrb[4].mxu0 }
 0x322   :  { %v15216_v32 = vpop.f32.mrb[5].mxu1  ;;  %v15218_v36 = vpop.f32.mrb[5].mxu0  ;;  %12410 = vmatprep.mubr.msk.f32.mxu0 %vm2226_vm0, %v15212_v27 }
 0x323   :  { %v15222_v37 = vpop.f32.mrb[6].mxu1  ;;  %v15224_v38 = vpop.f32.mrb[6].mxu0  ;;  %12394 = vmatpush3.bf16.msra.mxu1 %v13389_v20 }
 0x324   :  { %v15230_v40 = vpack.c.bf16 %v15224_v38, %v15214_v28  ;;  %v15232_v42 = vpop.f32.mrb[7].mxu1  ;;  %v15234_v43 = vpop.f32.mrb[7].mxu0 }
 0x325   :  { %v15240_v63 = vpack.c.bf16 %v15234_v43, %v15218_v36 }
 0x326   :  { %12396 = vmatmul.mubr.bf16.vlgmr.msra.gmra.mrb[24].mxu1 %v15159_v1 }
 0x327   :  { %12403 = vmatprep.mubr.msk.f32.mxu1 %vm2226_vm0, %v15184_v11 }
 0x33a   :  { %v12057_v62 = vpop.f32.mrb[8].mxu0 }
 0x33b   :  { %v12058_v46 = vpop.f32.mrb[9].mxu0 }
 0x33c   :  { %v12059_v47 = vadd.f32 %v12058_v46, %v12057_v62  ;;  %v12060_v49 = vpop.f32.mrb[10].mxu0 }
 0x33d   :  { %v12061_v50 = vpop.f32.mrb[11].mxu0 }
 0x33e   :  { %v12062_v51 = vadd.f32 %v12061_v50, %v12060_v49 }
 0x342   :  { %v12063_v52 = vpop.f32.mrb[12].mxu0 }
 0x343   :  { %v12064_v53 = vpop.f32.mrb[13].mxu0 }
 0x344   :  { %v12065_v54 = vadd.f32 %v12064_v53, %v12063_v52  ;;  %v12066_v19 = vpop.f32.mrb[14].mxu0 }
 0x345   :  { %v12067_v39 = vpop.f32.mrb[15].mxu0 }
 0x346   :  { %v12068_v3 = vadd.f32 %v12067_v39, %v12066_v19 }
 0x379   :  { %v15245_v29 = vpop.f32.mrb[8].mxu1 }
 0x37a   :  { %v15247_v34 = vpop.f32.mrb[9].mxu1 }
 0x37b   :  { %v15249_v1 = vpop.f32.mrb[10].mxu1 }
 0x37c   :  { %v15251_v55 = vpop.f32.mrb[11].mxu1 }
 0x37d   :  { %v12639_v56 = vpack.c.bf16 %v15251_v55, %v15247_v34 }
 0x37f   :  { %12641 = vmatprep.subr.msk.bf16.mxu1 %vm15255_vm1, %v12639_v56 }
 0x380   :  { %12644 = vmatpush3.bf16.xpose.msk.msra.mxu1 %vm15255_vm1, %v12639_v56 }
 0x381   :  { %v15267_v59 = vpop.f32.mrb[12].mxu1 }
 0x382   :  { %v15269_v7 = vpop.f32.mrb[13].mxu1 }
 0x383   :  { %v15271_v57 = vpop.f32.mrb[14].mxu1 }
 0x384   :  { %v15273_v33 = vpop.f32.mrb[15].mxu1 }
 0x385   :  { %v12645_v61 = vpack.c.bf16 %v15273_v33, %v15269_v7 }
 0x387   :  { %12404 = vmatmul.mubr.msk.f32.vlgmr.msra.gmra.mrb[28].mxu1 %vm2226_vm0, %v15192_v4  ;;  %12647 = vmatprep.subr.msk.bf16.mxu0 %vm15255_vm1, %v12645_v61 }
 0x388   :  { %12650 = vmatpush3.bf16.xpose.msk.msra.mxu0 %vm15255_vm1, %v12645_v61 }
 0x38f   :  { %12411 = vmatmul.mubr.msk.f32.vlgmr.msra.gmra.mrb[16].mxu0 %vm2226_vm0, %v15222_v37 }
 0x3d9   :  { %v15287_v18 = vpop.f32.mrb[16].mxu1 }
 0x3da   :  { %v15289_v10 = vpop.f32.mrb[17].mxu1 }
 0x3db   :  { %v15291_v26 = vpop.f32.mrb[18].mxu1 }
 0x3dc   :  { %v12651_v9 = vpack.c.bf16 %v15291_v26, %v15287_v18  ;;  %v15297_v44 = vpop.f32.mrb[19].mxu1 }
 0x3dd   :  { %v15303_v22 = vpack.c.bf16 %v15297_v44, %v15289_v10 }
 0x3de   :  { %12652 = vmatprep.subr.bf16.mxu1 %v12651_v9 }
 0x3df   :  { %12654 = vmatpush3.bf16.msra.mxu1 %v12651_v9 }
 0x3e1   :  { %v15305_v20 = vpop.f32.mrb[20].mxu1 }
 0x3e2   :  { %v15307_v62 = vpop.f32.mrb[21].mxu1 }
 0x3e3   :  { %v15309_v46 = vpop.f32.mrb[22].mxu1 }
 0x3e4   :  { %v15315_v50 = vpack.c.bf16 %v15309_v46, %v15305_v20  ;;  %v15317_v52 = vpop.f32.mrb[23].mxu1 }
 0x3e5   :  { %v15323_v19 = vpack.c.bf16 %v15317_v52, %v15307_v62 }
 0x3e6   :  { %12656 = vmatprep.subr.bf16.mxu1 %v15315_v50 }
 0x3f9   :  { %v12397_v39 = vpop.f32.mrb[24].mxu1 }
 0x3fa   :  { %v15326_v56 = vadd.f32 %v12397_v39, %v12065_v54  ;;  %v2204_v61 = vpop.f32.mrb[25].mxu1 }
 0x3fb   :  { %v15328_v9 = vadd.f32 %v12059_v47, %v2204_v61  ;;  %v12398_v23 = vpop.f32.mrb[26].mxu1 }
 0x3fc   :  { %16117 = vst [vmem:[#allocation35_spill] sm:$0xff] %v15326_v56  ;;  %v15330_v45 = vadd.f32 %v12398_v23, %v12068_v3  ;;  %v2207_v24 = vpop.f32.mrb[27].mxu1  ;;  %v2221_v23 = vadd.s32 8, %v15076_v21  ;;  %v2223_v3 = vand.u32 127, %v292_v6 }
 0x3fd   :  { %16118 = vst [vmem:[#allocation36_spill] sm:$0xff] %v15328_v9  ;;  %v15332_v8 = vadd.f32 %v12062_v51, %v2207_v24 }
 0x3fe   :  { %v15338_v58 = vpack.c.bf16 %v15330_v45, %v15326_v56  ;;  %vm15348_vm2 = vcmp.le.s32.totalorder %v2223_v3, %v2221_v23  ;;  %vm15353_vm3 = vcmp.le.s32.totalorder %v2223_v3, %v15076_v21 }
 0x3ff   :  { %16119 = vst [vmem:[#allocation37_spill] sm:$0xff] %v15332_v8  ;;  %v15344_v47 = vpack.c.bf16 %v15332_v8, %v15328_v9 }
 0x45a   :  { %v12405_v39 = vpop.f32.mrb[28].mxu1 }
 0x45b   :  { %v2406_v61 = vsel %vm15348_vm2, %v12405_v39, -inf  ;;  %v2305_v54 = vpop.f32.mrb[29].mxu1 }
 0x45c   :  { %v2405_v53 = vsel %vm15353_vm3, %v2305_v54, -inf  ;;  %v2413_v6 = vsel %vm2409_vm4, %v2406_v61, -inf }
 0x45d   :  { %2414 = vmax.xlane.f32.xlu1 %v2413_v6  ;;  %v2410_v23 = vsel %vm2409_vm4, %v2405_v53, -inf }
 0x45e   :  { %2411 = vmax.xlane.f32.xlu0 %v2410_v23 }
 0x462   :  { %v12412_v35 = vpop.f32.mrb[16].mxu0 }
 0x463   :  { %v2408_v3 = vsel %vm15348_vm2, %v12412_v35, -inf  ;;  %v2392_v48 = vpop.f32.mrb[17].mxu0 }
 0x464   :  { %v2407_v49 = vsel %vm15353_vm3, %v2392_v48, -inf  ;;  %v2419_v39 = vsel %vm2409_vm4, %v2408_v3, -inf }
 0x465   :  { %2420 = vmax.xlane.f32.xlu1 %v2419_v39  ;;  %v2416_v15 = vsel %vm2409_vm4, %v2407_v49, -inf }
 0x466   :  { %2417 = vmax.xlane.f32.xlu0 %v2416_v15 }
 0x4ea   :  { %v2415_v54 = vpop.xlane.xlu1 %2414 }
 0x4eb   :  { %v2423_v60 = vsub.f32 %v2406_v61, %v2415_v54  ;;  %v2412_v6 = vpop.xlane.xlu0 %2411 }
 0x4ec   :  { %v2422_v21 = vsub.f32 %v2405_v53, %v2412_v6 }
 0x4ed   :  { %v2428_v41 = vmul.f32 1.442695, %v2423_v60 }
 0x4ee   :  { %v2426_v23 = vmul.f32 1.442695, %v2422_v21 }
 0x4ef   :  { %14310 = vpow2.f32 %v2428_v41 }
 0x4f0   :  { %14312 = vpow2.f32 %v2426_v23 }
 0x4f2   :  { %v2421_v30 = vpop.xlane.xlu1 %2420 }
 0x4f3   :  { %v2425_v35 = vsub.f32 %v2408_v3, %v2421_v30  ;;  %v2418_v31 = vpop.xlane.xlu0 %2417 }
 0x4f4   :  { %v2424_v9 = vsub.f32 %v2407_v49, %v2418_v31  ;;  %v16124_v31 = vpack.i.bf16 %v15273_v33, %v15269_v7 }
 0x4f5   :  { %v2432_v8 = vmul.f32 1.442695, %v2425_v35 }
 0x4f6   :  { %v2430_v48 = vmul.f32 1.442695, %v2424_v9 }
 0x4f7   :  { %14314 = vpow2.f32 %v2432_v8  ;;  %v16125_v8 = vpack.i.bf16 %v15251_v55, %v15247_v34 }
 0x4f8   :  { %14316 = vpow2.f32 %v2430_v48 }
 0x4f9   :  { %v14311_v39 = vpop.eup %14310 }
 0x4fa   :  { %v14313_v56 = vpop.eup %14312  ;;  %v2437_v15 = vsel %vm2409_vm4, %v14311_v39, 0.0 }
 0x4fb   :  { %2438 = vadd.xlane.f32.xlu1 %v2437_v15  ;;  %v2434_v61 = vsel %vm2409_vm4, %v14313_v56, 0.0 }
 0x4fc   :  { %2435 = vadd.xlane.f32.xlu0 %v2434_v61 }
 0x501   :  { %v14315_v60 = vpop.eup %14314 }
 0x502   :  { %v14317_v21 = vpop.eup %14316  ;;  %v2443_v41 = vsel %vm2409_vm4, %v14315_v60, 0.0 }
 0x503   :  { %2444 = vadd.xlane.f32.xlu1 %v2443_v41  ;;  %v2440_v30 = vsel %vm2409_vm4, %v14317_v21, 0.0 }
 0x504   :  { %2441 = vadd.xlane.f32.xlu0 %v2440_v30 }
 0x514   :  { %13024 = vrot.lane.b32.xlu1 %v16124_v31, %s14755_s11 }
 0x518   :  { %2634 = vrot.lane.b32.xlu1 %v15184_v11, %s14755_s11 }
 0x51a   :  { %13019 = vrot.lane.b32.xlu0 %v16125_v8, %s14755_s11 }
 0x51c   :  { %2636 = vrot.lane.b32.xlu1 %v15192_v4, %s14755_s11 }
 0x51e   :  { %2725 = vrot.lane.b32.xlu0 %v15212_v27, %s14755_s11 }
 0x520   :  { %2727 = vrot.lane.b32.xlu1 %v15222_v37, %s14755_s11 }
 0x588   :  { %v2439_v49 = vpop.xlane.xlu1 %2438 }
 0x589   :  { %14318 = vrcp.f32 %v2439_v49  ;;  %v2436_v7 = vpop.xlane.xlu0 %2435 }
 0x58a   :  { %14320 = vrcp.f32 %v2436_v7 }
 0x590   :  { %v2445_v33 = vpop.xlane.xlu1 %2444 }
 0x591   :  { %14322 = vrcp.f32 %v2445_v33  ;;  %v2442_v11 = vpop.xlane.xlu0 %2441 }
 0x592   :  { %14324 = vrcp.f32 %v2442_v11 }
 0x593   :  { %v14319_v53 = vpop.eup %14318 }
 0x594   :  { %v14321_v34 = vpop.eup %14320  ;;  %v13025_v55 = vpop.permute.xlu1 %13024  ;;  %v2451_v6 = vmul.f32 %v14319_v53, %v14311_v39 }
 0x595   :  { %v13027_v9 = vunpack.i.h.bf16 %v13025_v55  ;;  %v13026_v3 = vunpack.i.l.bf16 %v13025_v55  ;;  %v13020_v4 = vpop.permute.xlu0 %13019  ;;  %v2450_v54 = vmul.f32 %v14321_v34, %v14313_v56 }
 0x596   :  { %v13022_v27 = vunpack.i.h.bf16 %v13020_v4  ;;  %v13021_v23 = vunpack.i.l.bf16 %v13020_v4 }
 0x597   :  { %v12665_v35 = vpack.c.bf16 %v13027_v9, %v13026_v3  ;;  %12417 = vmatprep.mubr.msk.f32.mxu1 %vm2409_vm4, %v2450_v54 }
 0x598   :  { %v12659_v37 = vpack.c.bf16 %v13022_v27, %v13021_v23  ;;  %v2635_v48 = vpop.permute.xlu1 %2634  ;;  %12418 = vmatmul.mubr.msk.f32.vlgmr.msra.gmra.mrb[30].mxu1 %vm2409_vm4, %v2451_v6 }
 0x599   :  { %12658 = vmatpush3.bf16.msra.mxu1 %v15315_v50  ;;  %12431 = vmatprep.mubr.msk.f32.mxu0 %vm2226_vm0, %v2635_v48  ;;  %v2726_v41 = vpop.permute.xlu0 %2725 }
 0x59a   :  { %12667 = vmatprep.subr.msk.bf16.mxu1 %vm15255_vm1, %v12665_v35  ;;  %12661 = vmatprep.subr.msk.bf16.mxu0 %vm15255_vm1, %v12659_v37 }
 0x59b   :  { %v14323_v56 = vpop.eup %14322  ;;  %12664 = vmatpush3.bf16.xpose.msk.msra.mxu0 %vm15255_vm1, %v12659_v37 }
 0x59c   :  { %v14325_v39 = vpop.eup %14324  ;;  %v2453_v61 = vmul.f32 %v14323_v56, %v14315_v60  ;;  %v2637_v50 = vpop.permute.xlu1 %2636 }
 0x59d   :  { %v2452_v15 = vmul.f32 %v14325_v39, %v14317_v21 }
 0x59f   :  { %12424 = vmatprep.mubr.msk.f32.mxu1 %vm2409_vm4, %v2452_v15 }
 0x5a0   :  { %12425 = vmatmul.mubr.msk.f32.vlgmr.msra.gmra.mrb[32].mxu1 %vm2409_vm4, %v2453_v61  ;;  %v2728_v30 = vpop.permute.xlu1 %2727 }
 0x5a1   :  { %12438 = vmatprep.mubr.msk.f32.mxu1 %vm2226_vm0, %v2726_v41 }
 0x5a2   :  { %12670 = vmatpush3.bf16.xpose.msk.msra.mxu1 %vm15255_vm1, %v12665_v35  ;;  %12432 = vmatmul.mubr.msk.f32.vlgmr.msra.gmra.mrb[18].mxu0 %vm2226_vm0, %v2637_v50 }
 0x5a9   :  { %12439 = vmatmul.mubr.msk.f32.vlgmr.msra.gmra.mrb[34].mxu1 %vm2226_vm0, %v2728_v30 }
 0x66b   :  { %v12419_v31 = vpop.f32.mrb[30].mxu1 }
 0x66c   :  { %v2526_v8 = vpop.f32.mrb[31].mxu1 }
 0x66d   :  { %v15406_v21 = vpack.c.bf16 %v12419_v31, %v2526_v8 }
 0x673   :  { %v12426_v60 = vpop.f32.mrb[32].mxu1 }
 0x674   :  { %v2607_v49 = vpop.f32.mrb[33].mxu1 }
 0x675   :  { %v15408_v7 = vpack.c.bf16 %v12426_v60, %v2607_v49  ;;  %v12433_v33 = vpop.f32.mrb[18].mxu0 }
 0x676   :  { %v2817_v11 = vsel %vm15348_vm2, %v12433_v33, -inf  ;;  %v2716_v53 = vpop.f32.mrb[19].mxu0 }
 0x677   :  { %v2816_v34 = vsel %vm15353_vm3, %v2716_v53, -inf  ;;  %v2823_v55 = vsel %vm2409_vm4, %v2817_v11, -inf }
 0x678   :  { %2824 = vmax.xlane.f32.xlu1 %v2823_v55  ;;  %v2820_v9 = vsel %vm2409_vm4, %v2816_v34, -inf }
 0x679   :  { %2821 = vmax.xlane.f32.xlu0 %v2820_v9 }
 0x67c   :  { %v12440_v3 = vpop.f32.mrb[34].mxu1 }
 0x67d   :  { %v2807_v4 = vpop.f32.mrb[35].mxu1  ;;  %v2819_v27 = vsel %vm15348_vm2, %v12440_v3, -inf  ;;  %v16126_v3 = vpack.i.bf16 %v15309_v46, %v15305_v20  ;;  %v13392_v46 = vld [vmem:[#allocation10 + $0x64] ss:$12 sps:$4 sm:$0xff]  }
 0x67e   :  { %v2818_v54 = vsel %vm15353_vm3, %v2807_v4, -inf  ;;  %v2829_v23 = vsel %vm2409_vm4, %v2819_v27, -inf  ;;  %v16127_v4 = vpack.i.bf16 %v15291_v26, %v15287_v18 }
 0x67f   :  { %v2826_v6 = vsel %vm2409_vm4, %v2818_v54, -inf }
 0x680   :  { %2827 = vmax.xlane.f32.xlu0 %v2826_v6 }
 0x684   :  { %2830 = vmax.xlane.f32.xlu0 %v2829_v23 }
 0x705   :  { %v2825_v35 = vpop.xlane.xlu1 %2824 }
 0x706   :  { %v2833_v37 = vsub.f32 %v2817_v11, %v2825_v35  ;;  %v2822_v48 = vpop.xlane.xlu0 %2821 }
 0x707   :  { %v2832_v56 = vsub.f32 %v2816_v34, %v2822_v48 }
 0x708   :  { %v2838_v39 = vmul.f32 1.442695, %v2833_v37 }
 0x709   :  { %v2836_v15 = vmul.f32 1.442695, %v2832_v56 }
 0x70a   :  { %14326 = vpow2.f32 %v2838_v39 }
 0x70b   :  { %14328 = vpow2.f32 %v2836_v15 }
 0x70d   :  { %v2828_v61 = vpop.xlane.xlu0 %2827 }
 0x70e   :  { %v2834_v41 = vsub.f32 %v2818_v54, %v2828_v61 }
 0x710   :  { %v2840_v50 = vmul.f32 1.442695, %v2834_v41 }
 0x711   :  { %v2831_v30 = vpop.xlane.xlu0 %2830 }
 0x712   :  { %14330 = vpow2.f32 %v2840_v50  ;;  %v2835_v31 = vsub.f32 %v2819_v27, %v2831_v30 }
 0x714   :  { %v14327_v8 = vpop.eup %14326  ;;  %v2842_v60 = vmul.f32 1.442695, %v2835_v31  ;;  %v13390_v31 = vld [vmem:[#allocation10 + $0x60] ss:$12 sps:$4 sm:$0xff]  }
 0x715   :  { %v14329_v49 = vpop.eup %14328  ;;  %v2847_v33 = vsel %vm2409_vm4, %v14327_v8, 0.0 }
 0x716   :  { %14332 = vpow2.f32 %v2842_v60  ;;  %2848 = vadd.xlane.f32.xlu1 %v2847_v33  ;;  %v2844_v11 = vsel %vm2409_vm4, %v14329_v49, 0.0  ;;  %v13396_v60 = vld [vmem:[#allocation10 + $0x68] ss:$12 sps:$4 sm:$0xff]  }
 0x717   :  { %2845 = vadd.xlane.f32.xlu0 %v2844_v11  ;;  %v13395_v11 = vld [vmem:[#allocation10 + $0x7c] ss:$12 sps:$4 sm:$0xff]  }
 0x71c   :  { %v14331_v53 = vpop.eup %14330 }
 0x71d   :  { %v2850_v34 = vsel %vm2409_vm4, %v14331_v53, 0.0 }
 0x71e   :  { %2851 = vadd.xlane.f32.xlu0 %v2850_v34  ;;  %v13393_v34 = vld [vmem:[#allocation10 + $0x78] ss:$12 sps:$4 sm:$0xff]  }
 0x720   :  { %v14333_v55 = vpop.eup %14332 }
 0x721   :  { %v2853_v9 = vsel %vm2409_vm4, %v14333_v55, 0.0 }
 0x722   :  { %2854 = vadd.xlane.f32.xlu1 %v2853_v9 }
 0x733   :  { %13034 = vrot.lane.b32.xlu1 %v16126_v3, %s14755_s11  ;;  %v13399_v3 = vld [vmem:[#allocation10 + $0x94] ss:$12 sps:$4 sm:$0xff]  }
 0x734   :  { %13029 = vrot.lane.b32.xlu0 %v16127_v4, %s14755_s11  ;;  %v16128_v4 = vmov 0  }
 0x7a3   :  { %v2849_v6 = vpop.xlane.xlu1 %2848 }
 0x7a4   :  { %v2846_v54 = vpop.xlane.xlu0 %2845 }
 0x7a5   :  { %14334 = vrcp.f32 %v2846_v54  ;;  %v13403_v54 = vld [vmem:[#allocation10 + $0xac] ss:$12 sps:$4 sm:$0xff]  }
 0x7a6   :  { %14336 = vrcp.f32 %v2849_v6  ;;  %v13401_v6 = vld [vmem:[#allocation10 + $0xa8] ss:$12 sps:$4 sm:$0xff]  }
 0x7ab   :  { %v2852_v27 = vpop.xlane.xlu0 %2851 }
 0x7ac   :  { %14338 = vrcp.f32 %v2852_v27  ;;  %v13404_v27 = vld [vmem:[#allocation10 + $0x98] ss:$12 sps:$4 sm:$0xff]  }
 0x7af   :  { %v14335_v23 = vpop.eup %14334  ;;  %v2855_v35 = vpop.xlane.xlu1 %2854 }
 0x7b0   :  { %v13030_v37 = vpop.permute.xlu0 %13029  ;;  %14340 = vrcp.f32 %v2855_v35  ;;  %v2860_v39 = vmul.f32 %v14335_v23, %v14329_v49  ;;  %v14337_v15 = vpop.eup %14336  ;;  %v13408_v23 = vld [vmem:[#allocation10 + $0xb0] ss:$12 sps:$4 sm:$0xff]   ;;  %v13412_v35 = vld [vmem:[#allocation10 + $0x8] ss:$12 sps:$4 sm:$0xff]  }
 0x7b1   :  { %v13032_v48 = vunpack.i.h.bf16 %v13030_v37  ;;  %v13031_v56 = vunpack.i.l.bf16 %v13030_v37  ;;  %v2861_v50 = vmul.f32 %v14337_v15, %v14327_v8  ;;  %v13400_v8 = vld [vmem:[#allocation10 + $0x80] ss:$12 sps:$4 sm:$0xff]   ;;  %v13409_v15 = vld [vmem:[#allocation10 + $0x18] ss:$12 sps:$4 sm:$0xff]  }
 0x7b2   :  { %12445 = vmatprep.mubr.msk.f32.mxu0 %vm2409_vm4, %v2860_v39 }
 0x7b3   :  { %v12671_v20 = vpack.c.bf16 %v13032_v48, %v13031_v56  ;;  %v13035_v18 = vpop.permute.xlu1 %13034  ;;  %v13405_v56 = vld [vmem:[#allocation10] ss:$12 sps:$4 sm:$0xff]  }
 0x7b4   :  { %v13037_v26 = vunpack.i.h.bf16 %v13035_v18  ;;  %v13036_v61 = vunpack.i.l.bf16 %v13035_v18 }
 0x7b5   :  { %12672 = vmatprep.subr.bf16.mxu0 %v12671_v20 }
 0x7b6   :  { %12674 = vmatpush3.bf16.msra.mxu0 %v12671_v20  ;;  %v14339_v41 = vpop.eup %14338  ;;  %v12675_v30 = vpack.c.bf16 %v13037_v26, %v13036_v61  ;;  %v13411_v20 = vld [vmem:[#allocation10 + $0x1c] ss:$12 sps:$4 sm:$0xff]   ;;  %v13415_v61 = vld [vmem:[#allocation10 + $0x34] ss:$12 sps:$4 sm:$0xff]  }
 0x7b7   :  { %3130 = vmatprep.subr.bf16.mxu0 %v13392_v46  ;;  %v2862_v33 = vmul.f32 %v14339_v41, %v14331_v53  ;;  %v13397_v53 = vld [vmem:[#allocation10 + $0x90] ss:$12 sps:$4 sm:$0xff]   ;;  %v13416_v41 = vld [vmem:[#allocation10 + $0x20] ss:$12 sps:$4 sm:$0xff]  }
 0x7b8   :  { %12676 = vmatprep.subr.bf16.mxu1 %v12675_v30 }
 0x7b9   :  { %12446 = vmatmul.mubr.msk.f32.vlgmr.msra.gmra.mrb[20].mxu0 %vm2409_vm4, %v2861_v50  ;;  %12678 = vmatpush3.bf16.msra.mxu1 %v12675_v30  ;;  %v13413_v50 = vld [vmem:[#allocation10 + $0x30] ss:$12 sps:$4 sm:$0xff]   ;;  %v13419_v30 = vld [vmem:[#allocation10 + $0x4c] ss:$12 sps:$4 sm:$0xff]  }
 0x7ba   :  { %12452 = vmatprep.mubr.msk.f32.mxu1 %vm2409_vm4, %v2862_v33  ;;  %v14341_v49 = vpop.eup %14340  ;;  %3131 = vmatpush1.bf16.msra.mxu0 %v13390_v31  ;;  %v13420_v31 = vld [vmem:[#allocation10 + $0x38] ss:$12 sps:$4 sm:$0xff]   ;;  %v13421_v33 = vld [vmem:[#allocation10 + $0x50] ss:$12 sps:$4 sm:$0xff]  }
 0x7bb   :  { %12455 = vmatprep.subr.bf16.mxu1 %v13396_v60  ;;  %v2863_v9 = vmul.f32 %v14341_v49, %v14333_v55  ;;  %3132 = vmatprep.subr.bf16.mxu0 %v13395_v11  ;;  %v13407_v55 = vld [vmem:[#allocation10 + $0x4] ss:$12 sps:$4 sm:$0xff]  }
 0x7bc   :  { %3162 = vmatprep.mubr.bf16.mxu0 %v16128_v4 }
 0x7bd   :  { %12453 = vmatmul.mubr.msk.f32.vlgmr.msra.gmra.mrb[36].mxu1 %vm2409_vm4, %v2863_v9 }
 0x7be   :  { %3133 = vmatpush1.bf16.msra.mxu0 %v13393_v34  ;;  %12456 = vmatpush3.bf16.msra.mxu1 %v13396_v60  ;;  %v13417_v60 = vld [vmem:[#allocation10 + $0x48] ss:$12 sps:$4 sm:$0xff]  }
 0x7bf   :  { %3134 = vmatprep.subr.bf16.mxu0 %v13399_v3  ;;  %12457 = vmatprep.subr.bf16.mxu1 %v13400_v8 }
 0x7c2   :  { %3135 = vmatpush1.bf16.msra.mxu0 %v13397_v53  ;;  %12458 = vmatpush3.bf16.msra.mxu1 %v13400_v8 }
 0x7c3   :  { %3136 = vmatprep.subr.bf16.mxu0 %v13403_v54  ;;  %12459 = vmatprep.subr.bf16.mxu1 %v13404_v27  ;;  %v13422_v54 = vld [vmem:[#allocation10 + $0xc0] ss:$12 sps:$4 sm:$0xff]  }
 0x7c6   :  { %3137 = vmatpush1.bf16.msra.mxu0 %v13401_v6  ;;  %12460 = vmatpush3.bf16.msra.mxu1 %v13404_v27  ;;  %v13424_v6 = vld [vmem:[#allocation10 + $0xc4] ss:$12 sps:$4 sm:$0xff]  }
 0x7c7   :  { %3302 = vmatprep.subr.bf16.mxu0 %v13407_v55  ;;  %12461 = vmatprep.subr.bf16.mxu1 %v13408_v23 }
 0x7ca   :  { %12462 = vmatpush3.bf16.msra.mxu1 %v13408_v23 }
 0x7cb   :  { %12467 = vmatprep.subr.bf16.mxu1 %v13412_v35 }
 0x88c   :  { %v12447_v37 = vpop.f32.mrb[20].mxu0 }
 0x88d   :  { %v2944_v48 = vpop.f32.mrb[21].mxu0 }
 0x88e   :  { %v3042_v39 = vpack.c.bf16 %v12447_v37, %v2944_v48 }
 0x890   :  { %11333 = vmatmul.mubr.msk.bf16.vlgmr.msra.gmra.mrb[24].mxu0 %vm2226_vm0, %v3042_v39  ;;  %12463 = vmatprep.mubr.msk.bf16.mxu1 %vm2226_vm0, %v3042_v39  ;;  %v12454_v46 = vpop.f32.mrb[36].mxu1 }
 0x891   :  { %3303 = vmatpush1.bf16.msra.mxu0 %v13405_v56  ;;  %3172 = vmatprep.mubr.bf16.mxu0 %v16128_v4  ;;  %v3033_v18 = vpop.f32.mrb[37].mxu1 }
 0x892   :  { %3304 = vmatprep.subr.bf16.mxu0 %v13411_v20  ;;  %v3043_v26 = vpack.c.bf16 %v12454_v46, %v3033_v18 }
 0x894   :  { %12464 = vmatmul.mubr.msk.bf16.vlgmr.msra.gmra.mrb[40].mxu1 %vm2226_vm0, %v3043_v26 }
 0x895   :  { %3305 = vmatpush1.bf16.msra.mxu0 %v13409_v15  ;;  %12468 = vmatpush3.bf16.msra.mxu1 %v13412_v35 }
 0x896   :  { %12475 = vmatprep.mubr.msk.bf16.mxu1 %vm2226_vm0, %v15406_v21  ;;  %3306 = vmatprep.subr.bf16.mxu0 %v13415_v61 }
 0x897   :  { %12469 = vmatprep.subr.bf16.mxu1 %v13416_v41 }
 0x898   :  { %11334 = vmatmul.mubr.msk.bf16.gmra.mrb[28].mxu0 %vm2226_vm0, %v3043_v26 }
 0x899   :  { %3307 = vmatpush1.bf16.msra.mxu0 %v13413_v50  ;;  %3334 = vmatprep.mubr.bf16.mxu0 %v16128_v4 }
 0x89a   :  { %12470 = vmatpush3.bf16.msra.mxu1 %v13416_v41  ;;  %3308 = vmatprep.subr.bf16.mxu0 %v13419_v30 }
 0x89b   :  { %12471 = vmatprep.subr.bf16.mxu1 %v13420_v31 }
 0x89d   :  { %3309 = vmatpush1.bf16.msra.mxu0 %v13417_v60 }
 0x89e   :  { %12472 = vmatpush3.bf16.msra.mxu1 %v13420_v31  ;;  %12687 = vmatprep.subr.msk.bf16.mxu0 %vm15255_vm1, %v15230_v40 }
 0x89f   :  { %12473 = vmatprep.subr.bf16.mxu1 %v13421_v33 }
 0x8a0   :  { %11349 = vmatmul.mubr.msk.bf16.vlgmr.msra.gmra.mrb[24].mxu0 %vm2226_vm0, %v15406_v21 }
 0x8a1   :  { %3344 = vmatprep.mubr.bf16.mxu0 %v16128_v4 }
 0x8a2   :  { %12474 = vmatpush3.bf16.msra.mxu1 %v13421_v33 }
 0x8a3   :  { %12681 = vmatprep.subr.msk.bf16.mxu1 %vm15255_vm1, %v15200_v13 }
 0x8a5   :  { %12476 = vmatmul.mubr.msk.bf16.vlgmr.msra.gmra.mrb[40].mxu1 %vm2226_vm0, %v15408_v7 }
 0x8a6   :  { %12483 = vmatprep.mubr.msk.f32.mxu1 %vm2226_vm0, %v15188_v0  ;;  %12690 = vmatpush3.bf16.xpose.msk.msra.mxu0 %vm15255_vm1, %v15230_v40 }
 0x8a7   :  { %3876 = vmatprep.subr.bf16.mxu0 %v13424_v6 }
 0x8a8   :  { %11350 = vmatmul.mubr.msk.bf16.gmra.mrb[28].mxu0 %vm2226_vm0, %v15408_v7 }
 0x8a9   :  { %12490 = vmatprep.mubr.msk.f32.mxu0 %vm2226_vm0, %v15216_v32 }
 0x8ab   :  { %12684 = vmatpush3.bf16.xpose.msk.msra.mxu1 %vm15255_vm1, %v15200_v13 }
 0x8ac   :  { %12692 = vmatprep.subr.bf16.mxu1 %v15303_v22 }
 0x8b0   :  { %12491 = vmatmul.mubr.msk.f32.vlgmr.msra.gmra.mrb[22].mxu0 %vm2226_vm0, %v15232_v42 }
 0x8b1   :  { %3908 = vmatprep.mubr.bf16.mxu0 %v16128_v4  ;;  %3877 = vmatpush1.bf16.msra.mxu0 %v13422_v54 }
 0x8b2   :  { %12484 = vmatmul.mubr.msk.f32.vlgmr.msra.gmra.mrb[38].mxu1 %vm2226_vm0, %v15202_v14 }
 0x8b3   :  { %12694 = vmatpush3.bf16.msra.mxu1 %v15303_v22 }
 0x8b4   :  { %12696 = vmatprep.subr.bf16.mxu1 %v15323_v19 }
 0x983   :  { %v12492_v40 = vpop.f32.mrb[22].mxu0 }
 0x984   :  { %v3569_v21 = vpop.f32.mrb[23].mxu0  ;;  %v3581_v3 = vsel %vm15348_vm2, %v12492_v40, -inf  ;;  %v13427_v40 = vld [vmem:[#allocation10 + $0xdc] ss:$12 sps:$4 sm:$0xff]  }
 0x985   :  { %v12485_v7 = vpop.f32.mrb[38].mxu1  ;;  %v3580_v9 = vsel %vm15353_vm3, %v3569_v21, -inf  ;;  %v3591_v53 = vsel %vm2409_vm4, %v3581_v3, -inf  ;;  %v13425_v21 = vld [vmem:[#allocation10 + $0xd8] ss:$12 sps:$4 sm:$0xff]   ;;  %3878 = vmatprep.subr.bf16.mxu0 %v13427_v40 }
 0x986   :  { %v3579_v13 = vsel %vm15348_vm2, %v12485_v7, -inf  ;;  %v3482_v11 = vpop.f32.mrb[39].mxu1  ;;  %v3588_v8 = vsel %vm2409_vm4, %v3580_v9, -inf  ;;  %3879 = vmatpush1.bf16.msra.mxu0 %v13425_v21  ;;  %v13430_v7 = vld [vmem:[#allocation10 + $0xf4] ss:$12 sps:$4 sm:$0xff]  }
 0x987   :  { %v3578_v49 = vsel %vm15353_vm3, %v3482_v11, -inf  ;;  %v3585_v34 = vsel %vm2409_vm4, %v3579_v13, -inf  ;;  %v13428_v11 = vld [vmem:[#allocation10 + $0xf0] ss:$12 sps:$4 sm:$0xff]   ;;  %3880 = vmatprep.subr.bf16.mxu0 %v13430_v7  ;;  %v13441_v7 = vld [vmem:[#allocation10 + $0x138] ss:$12 sps:$4 sm:$0xff]  }
 0x988   :  { %3586 = vmax.xlane.f32.xlu0 %v3585_v34  ;;  %v3582_v22 = vsel %vm2409_vm4, %v3578_v49, -inf  ;;  %v13431_v34 = vld [vmem:[#allocation10 + $0x108] ss:$12 sps:$4 sm:$0xff]  }
 0x989   :  { %3583 = vmax.xlane.f32.xlu1 %v3582_v22  ;;  %v13443_v40 = vld [vmem:[#allocation10 + $0x13c] ss:$12 sps:$4 sm:$0xff]  }
 0x98a   :  { %3881 = vmatpush1.bf16.msra.mxu0 %v13428_v11  ;;  %v13444_v11 = vld [vmem:[#allocation10 + $0x150] ss:$12 sps:$4 sm:$0xff]  }
 0x98c   :  { %3589 = vmax.xlane.f32.xlu0 %v3588_v8 }
 0x98d   :  { %3592 = vmax.xlane.f32.xlu1 %v3591_v53 }
 0xa15   :  { %v3587_v27 = vpop.xlane.xlu0 %3586 }
 0xa16   :  { %v3595_v55 = vsub.f32 %v3579_v13, %v3587_v27  ;;  %v3584_v23 = vpop.xlane.xlu1 %3583  ;;  %v16129_v13 = vpack.i.bf16 %v15224_v38, %v15214_v28 }
 0xa17   :  { %v3594_v35 = vsub.f32 %v3578_v49, %v3584_v23  ;;  %v13433_v49 = vld [vmem:[#allocation10 + $0x10c] ss:$12 sps:$4 sm:$0xff]  }
 0xa18   :  { %v3600_v37 = vmul.f32 1.442695, %v3595_v55  ;;  %3882 = vmatprep.subr.bf16.mxu0 %v13433_v49  ;;  %v13449_v49 = vld [vmem:[#allocation10 + $0x16c] ss:$12 sps:$4 sm:$0xff]  }
 0xa19   :  { %v3598_v48 = vmul.f32 1.442695, %v3594_v35  ;;  %v3590_v56 = vpop.xlane.xlu0 %3589  ;;  %3883 = vmatpush1.bf16.msra.mxu0 %v13431_v34  ;;  %v13435_v35 = vld [vmem:[#allocation10 + $0xe0] ss:$12 sps:$4 sm:$0xff]   ;;  %v13447_v34 = vld [vmem:[#allocation10 + $0x168] ss:$12 sps:$4 sm:$0xff]  }
 0xa1a   :  { %14342 = vpow2.f32 %v3600_v37  ;;  %v3596_v39 = vsub.f32 %v3580_v9, %v3590_v56  ;;  %v3593_v20 = vpop.xlane.xlu1 %3592  ;;  %v16130_v9 = vpack.i.bf16 %v15194_v5, %v15186_v12  ;;  %v13436_v37 = vld [vmem:[#allocation10 + $0xf8] ss:$12 sps:$4 sm:$0xff]   ;;  %v13437_v56 = vld [vmem:[#allocation10 + $0x110] ss:$12 sps:$4 sm:$0xff]  }
 0xa1b   :  { %14344 = vpow2.f32 %v3598_v48  ;;  %v3597_v46 = vsub.f32 %v3581_v3, %v3593_v20 }
 0xa1c   :  { %v3602_v15 = vmul.f32 1.442695, %v3596_v39 }
 0xa1d   :  { %v3604_v18 = vmul.f32 1.442695, %v3597_v46 }
 0xa1e   :  { %14346 = vpow2.f32 %v3602_v15 }
 0xa1f   :  { %14348 = vpow2.f32 %v3604_v18 }
 0xa24   :  { %v14343_v26 = vpop.eup %14342 }
 0xa25   :  { %v14345_v61 = vpop.eup %14344  ;;  %v3609_v41 = vsel %vm2409_vm4, %v14343_v26, 0.0 }
 0xa26   :  { %3610 = vadd.xlane.f32.xlu1 %v3609_v41  ;;  %v3606_v50 = vsel %vm2409_vm4, %v14345_v61, 0.0 }
 0xa27   :  { %3607 = vadd.xlane.f32.xlu0 %v3606_v50 }
 0xa28   :  { %v14347_v30 = vpop.eup %14346 }
 0xa29   :  { %v14349_v31 = vpop.eup %14348  ;;  %v3612_v60 = vsel %vm2409_vm4, %v14347_v30, 0.0 }
 0xa2a   :  { %v3615_v33 = vsel %vm2409_vm4, %v14349_v31, 0.0 }
 0xa2b   :  { %3616 = vadd.xlane.f32.xlu1 %v3615_v33  ;;  %3613 = vadd.xlane.f32.xlu0 %v3612_v60  ;;  %v13438_v33 = vld [vmem:[#allocation10 + $0x120] ss:$12 sps:$4 sm:$0xff]  }
 0xa3c   :  { %13044 = vrot.lane.b32.xlu1 %v16129_v13, %s14755_s11  ;;  %v13446_v13 = vld [vmem:[#allocation10 + $0x154] ss:$12 sps:$4 sm:$0xff]  }
 0xa40   :  { %3990 = vrot.lane.b32.xlu1 %v15188_v0, %s14755_s11 }
 0xa41   :  { %13039 = vrot.lane.b32.xlu0 %v16130_v9, %s14755_s11 }
 0xa44   :  { %3992 = vrot.lane.b32.xlu1 %v15202_v14, %s14755_s11 }
 0xa45   :  { %4081 = vrot.lane.b32.xlu0 %v15216_v32, %s14755_s11  ;;  %v13434_v32 = vld [vmem:[#allocation10 + $0xc8] ss:$12 sps:$4 sm:$0xff]  }
 0xa48   :  { %4083 = vrot.lane.b32.xlu1 %v15232_v42, %s14755_s11 }
 0xab3   :  { %v3611_v28 = vpop.xlane.xlu1 %3610 }
 0xab4   :  { %14350 = vrcp.f32 %v3611_v28  ;;  %v3608_v0 = vpop.xlane.xlu0 %3607 }
 0xab5   :  { %14352 = vrcp.f32 %v3608_v0 }
 0xab8   :  { %v3617_v38 = vpop.xlane.xlu1 %3616  ;;  %v3614_v22 = vpop.xlane.xlu0 %3613 }
 0xab9   :  { %14354 = vrcp.f32 %v3617_v38 }
 0xaba   :  { %14356 = vrcp.f32 %v3614_v22 }
 0xabc   :  { %v13045_v12 = vpop.permute.xlu1 %13044  ;;  %v13040_v48 = vpop.permute.xlu0 %13039 }
 0xabd   :  { %v13047_v5 = vunpack.i.h.bf16 %v13045_v12  ;;  %v13046_v3 = vunpack.i.l.bf16 %v13045_v12  ;;  %v13042_v39 = vunpack.i.h.bf16 %v13040_v48  ;;  %v13041_v20 = vunpack.i.l.bf16 %v13040_v48 }
 0xabe   :  { %v14351_v8 = vpop.eup %14350 }
 0xabf   :  { %v14353_v53 = vpop.eup %14352  ;;  %v12705_v14 = vpack.c.bf16 %v13047_v5, %v13046_v3  ;;  %v3623_v6 = vmul.f32 %v14351_v8, %v14343_v26  ;;  %v12699_v46 = vpack.c.bf16 %v13042_v39, %v13041_v20  ;;  %v13440_v26 = vld [vmem:[#allocation10 + $0x124] ss:$12 sps:$4 sm:$0xff]  }
 0xac0   :  { %v3622_v54 = vmul.f32 %v14353_v53, %v14345_v61  ;;  %v3991_v50 = vpop.permute.xlu1 %3990 }
 0xac1   :  { %12707 = vmatprep.subr.msk.bf16.mxu0 %vm15255_vm1, %v12705_v14 }
 0xac2   :  { %12497 = vmatprep.mubr.msk.f32.mxu1 %vm2409_vm4, %v3622_v54 }
 0xac3   :  { %v14355_v42 = vpop.eup %14354  ;;  %12498 = vmatmul.mubr.msk.f32.vlgmr.msra.gmra.mrb[44].mxu1 %vm2409_vm4, %v3623_v6 }
 0xac4   :  { %v14357_v27 = vpop.eup %14356  ;;  %v3625_v55 = vmul.f32 %v14355_v42, %v14349_v31  ;;  %12698 = vmatpush3.bf16.msra.mxu1 %v15323_v19  ;;  %v4082_v31 = vpop.permute.xlu0 %4081 }
 0xac5   :  { %v3624_v23 = vmul.f32 %v14357_v27, %v14347_v30  ;;  %12507 = vmatprep.subr.bf16.mxu1 %v13434_v32  ;;  %v3993_v60 = vpop.permute.xlu1 %3992 }
 0xac7   :  { %12504 = vmatprep.mubr.msk.f32.mxu1 %vm2409_vm4, %v3624_v23 }
 0xac8   :  { %12505 = vmatmul.mubr.msk.f32.vlgmr.msra.gmra.mrb[46].mxu1 %vm2409_vm4, %v3625_v55 }
 0xac9   :  { %12508 = vmatpush3.bf16.msra.mxu1 %v13434_v32  ;;  %v4084_v21 = vpop.permute.xlu1 %4083 }
 0xaca   :  { %12509 = vmatprep.subr.bf16.mxu1 %v13435_v35 }
 0xacd   :  { %12510 = vmatpush3.bf16.msra.mxu1 %v13435_v35 }
 0xace   :  { %12511 = vmatprep.subr.bf16.mxu1 %v13436_v37 }
 0xad1   :  { %12512 = vmatpush3.bf16.msra.mxu1 %v13436_v37 }
 0xad2   :  { %12513 = vmatprep.subr.bf16.mxu1 %v13437_v56 }
 0xad5   :  { %12514 = vmatpush3.bf16.msra.mxu1 %v13437_v56 }
 0xad6   :  { %12701 = vmatprep.subr.msk.bf16.mxu1 %vm15255_vm1, %v12699_v46 }
 0xb96   :  { %v12499_v19 = vpop.f32.mrb[44].mxu1 }
 0xb97   :  { %v3698_v15 = vpop.f32.mrb[45].mxu1 }
 0xb98   :  { %v3788_v18 = vpack.c.bf16 %v12499_v19, %v3698_v15 }
 0xb9a   :  { %11377 = vmatmul.mubr.msk.bf16.vlgmr.msra.gmra.mrb[24].mxu0 %vm2226_vm0, %v3788_v18  ;;  %12515 = vmatprep.mubr.msk.bf16.mxu1 %vm2226_vm0, %v3788_v18 }
 0xb9b   :  { %v12506_v61 = vpop.f32.mrb[46].mxu1  ;;  %12710 = vmatpush3.bf16.xpose.msk.msra.mxu0 %vm15255_vm1, %v12705_v14  ;;  %3918 = vmatprep.mubr.bf16.mxu0 %v16128_v4 }
 0xb9c   :  { %v3779_v41 = vpop.f32.mrb[47].mxu1  ;;  %4486 = vmatprep.subr.bf16.mxu0 %v13440_v26 }
 0xb9d   :  { %v3789_v30 = vpack.c.bf16 %v12506_v61, %v3779_v41 }
 0xb9f   :  { %12516 = vmatmul.mubr.msk.bf16.vlgmr.msra.gmra.mrb[40].mxu1 %vm2226_vm0, %v3789_v30 }
 0xba0   :  { %12704 = vmatpush3.bf16.xpose.msk.msra.mxu1 %vm15255_vm1, %v12699_v46  ;;  %12523 = vmatprep.mubr.msk.f32.mxu1 %vm2226_vm0, %v3991_v50 }
 0xba2   :  { %11378 = vmatmul.mubr.msk.bf16.gmra.mrb[28].mxu0 %vm2226_vm0, %v3789_v30  ;;  %v16131_v30 = vpack.i.bf16 %v15317_v52, %v15307_v62 }
 0xba3   :  { %12530 = vmatprep.mubr.msk.f32.mxu0 %vm2226_vm0, %v4082_v31  ;;  %v16132_v31 = vpack.i.bf16 %v15297_v44, %v15289_v10 }
 0xba7   :  { %12524 = vmatmul.mubr.msk.f32.vlgmr.msra.gmra.mrb[48].mxu1 %vm2226_vm0, %v3993_v60 }
 0xbaa   :  { %12531 = vmatmul.mubr.msk.f32.vlgmr.msra.gmra.mrb[32].mxu0 %vm2226_vm0, %v4084_v21 }
 0xbab   :  { %4487 = vmatpush1.bf16.msra.mxu0 %v13438_v33  ;;  %4518 = vmatprep.mubr.bf16.mxu0 %v16128_v4 }
 0xbac   :  { %4488 = vmatprep.subr.bf16.mxu0 %v13443_v40 }
 0xbaf   :  { %4489 = vmatpush1.bf16.msra.mxu0 %v13441_v7 }
 0xbb0   :  { %4490 = vmatprep.subr.bf16.mxu0 %v13446_v13 }
 0xbb3   :  { %4491 = vmatpush1.bf16.msra.mxu0 %v13444_v11 }
 0xbb4   :  { %4492 = vmatprep.subr.bf16.mxu0 %v13449_v49 }
 0xbb7   :  { %4493 = vmatpush1.bf16.msra.mxu0 %v13447_v34 }
 0xbb8   :  { %12727 = vmatprep.subr.msk.bf16.mxu0 %vm15255_vm1, %v15240_v63 }
 0xc7a   :  { %v12525_v9 = vpop.f32.mrb[48].mxu1 }
 0xc7b   :  { %v4173_v28 = vsel %vm15348_vm2, %v12525_v9, -inf  ;;  %v4072_v0 = vpop.f32.mrb[49].mxu1 }
 0xc7c   :  { %v4172_v38 = vsel %vm15353_vm3, %v4072_v0, -inf  ;;  %v4179_v22 = vsel %vm2409_vm4, %v4173_v28, -inf }
 0xc7d   :  { %4180 = vmax.xlane.f32.xlu1 %v4179_v22  ;;  %v12532_v12 = vpop.f32.mrb[32].mxu0  ;;  %v4176_v5 = vsel %vm2409_vm4, %v4172_v38, -inf  ;;  %v13450_v22 = vld [vmem:[#allocation10 + $0x128] ss:$12 sps:$4 sm:$0xff]  }
 0xc7e   :  { %4177 = vmax.xlane.f32.xlu0 %v4176_v5  ;;  %v4163_v3 = vpop.f32.mrb[33].mxu0  ;;  %v4175_v14 = vsel %vm15348_vm2, %v12532_v12, -inf }
 0xc7f   :  { %v4174_v8 = vsel %vm15353_vm3, %v4163_v3, -inf  ;;  %v4185_v54 = vsel %vm2409_vm4, %v4175_v14, -inf }
 0xc80   :  { %v4182_v53 = vsel %vm2409_vm4, %v4174_v8, -inf }
 0xc82   :  { %4183 = vmax.xlane.f32.xlu0 %v4182_v53  ;;  %v13452_v53 = vld [vmem:[#allocation10 + $0x158] ss:$12 sps:$4 sm:$0xff]  }
 0xc86   :  { %4186 = vmax.xlane.f32.xlu0 %v4185_v54 }
 0xd0a   :  { %v4181_v6 = vpop.xlane.xlu1 %4180 }
 0xd0b   :  { %v4189_v32 = vsub.f32 %v4173_v28, %v4181_v6  ;;  %v4178_v42 = vpop.xlane.xlu0 %4177 }
 0xd0c   :  { %v4188_v27 = vsub.f32 %v4172_v38, %v4178_v42 }
 0xd0d   :  { %v4194_v55 = vmul.f32 1.442695, %v4189_v32 }
 0xd0e   :  { %v4192_v23 = vmul.f32 1.442695, %v4188_v27 }
 0xd0f   :  { %14358 = vpow2.f32 %v4194_v55  ;;  %v4184_v35 = vpop.xlane.xlu0 %4183 }
 0xd10   :  { %14360 = vpow2.f32 %v4192_v23  ;;  %v4190_v37 = vsub.f32 %v4174_v8, %v4184_v35  ;;  %v13451_v8 = vld [vmem:[#allocation10 + $0x140] ss:$12 sps:$4 sm:$0xff]  }
 0xd12   :  { %v4196_v48 = vmul.f32 1.442695, %v4190_v37 }
 0xd13   :  { %v4187_v56 = vpop.xlane.xlu0 %4186 }
 0xd14   :  { %14362 = vpow2.f32 %v4196_v48  ;;  %v4191_v39 = vsub.f32 %v4175_v14, %v4187_v56  ;;  %v13453_v14 = vld [vmem:[#allocation10 + $0x170] ss:$12 sps:$4 sm:$0xff]  }
 0xd16   :  { %v4198_v20 = vmul.f32 1.442695, %v4191_v39 }
 0xd18   :  { %14364 = vpow2.f32 %v4198_v20 }
 0xd19   :  { %v14359_v46 = vpop.eup %14358 }
 0xd1a   :  { %v14361_v19 = vpop.eup %14360  ;;  %v4203_v15 = vsel %vm2409_vm4, %v14359_v46, 0.0 }
 0xd1b   :  { %4204 = vadd.xlane.f32.xlu1 %v4203_v15  ;;  %v4200_v18 = vsel %vm2409_vm4, %v14361_v19, 0.0  ;;  %v13454_v15 = vld [vmem:[#allocation10 + $0x180] ss:$12 sps:$4 sm:$0xff]  }
 0xd1c   :  { %4201 = vadd.xlane.f32.xlu0 %v4200_v18  ;;  %v13456_v18 = vld [vmem:[#allocation10 + $0x184] ss:$12 sps:$4 sm:$0xff]  }
 0xd1e   :  { %v14363_v26 = vpop.eup %14362 }
 0xd1f   :  { %v4206_v61 = vsel %vm2409_vm4, %v14363_v26, 0.0 }
 0xd20   :  { %4207 = vadd.xlane.f32.xlu0 %v4206_v61 }
 0xd22   :  { %v14365_v41 = vpop.eup %14364 }
 0xd23   :  { %v4209_v50 = vsel %vm2409_vm4, %v14365_v41, 0.0 }
 0xd24   :  { %4210 = vadd.xlane.f32.xlu1 %v4209_v50 }
 0xd35   :  { %13054 = vrot.lane.b32.xlu1 %v16131_v30, %s14755_s11 }
 0xd36   :  { %13049 = vrot.lane.b32.xlu0 %v16132_v31, %s14755_s11 }
 0xda8   :  { %v4205_v60 = vpop.xlane.xlu1 %4204 }
 0xda9   :  { %v4202_v33 = vpop.xlane.xlu0 %4201 }
 0xdaa   :  { %14366 = vrcp.f32 %v4202_v33 }
 0xdab   :  { %14368 = vrcp.f32 %v4205_v60 }
 0xdad   :  { %v4208_v40 = vpop.xlane.xlu0 %4207 }
 0xdae   :  { %14370 = vrcp.f32 %v4208_v40 }
 0xdb1   :  { %v4211_v21 = vpop.xlane.xlu1 %4210  ;;  %v13050_v7 = vpop.permute.xlu0 %13049 }
 0xdb2   :  { %14372 = vrcp.f32 %v4211_v21  ;;  %v13052_v13 = vunpack.i.h.bf16 %v13050_v7  ;;  %v13051_v11 = vunpack.i.l.bf16 %v13050_v7 }
 0xdb4   :  { %v14367_v49 = vpop.eup %14366  ;;  %v12711_v34 = vpack.c.bf16 %v13052_v13, %v13051_v11 }
 0xdb5   :  { %v14369_v62 = vpop.eup %14368  ;;  %v13055_v52 = vpop.permute.xlu1 %13054  ;;  %v4216_v9 = vmul.f32 %v14367_v49, %v14361_v19 }
 0xdb6   :  { %v13057_v28 = vunpack.i.h.bf16 %v13055_v52  ;;  %v13056_v0 = vunpack.i.l.bf16 %v13055_v52  ;;  %12712 = vmatprep.subr.bf16.mxu1 %v12711_v34  ;;  %v4217_v44 = vmul.f32 %v14369_v62, %v14359_v46 }
 0xdb7   :  { %12714 = vmatpush3.bf16.msra.mxu1 %v12711_v34  ;;  %12537 = vmatprep.mubr.msk.f32.mxu1 %vm2409_vm4, %v4216_v9 }
 0xdb8   :  { %v14371_v10 = vpop.eup %14370  ;;  %v12715_v38 = vpack.c.bf16 %v13057_v28, %v13056_v0 }
 0xdb9   :  { %v4218_v12 = vmul.f32 %v14371_v10, %v14363_v26  ;;  %v13459_v10 = vld [vmem:[#allocation10 + $0x19c] ss:$12 sps:$4 sm:$0xff]  }
 0xdba   :  { %12538 = vmatmul.mubr.msk.f32.vlgmr.msra.gmra.mrb[50].mxu1 %vm2409_vm4, %v4217_v44  ;;  %12716 = vmatprep.subr.bf16.mxu1 %v12715_v38  ;;  %v13457_v44 = vld [vmem:[#allocation10 + $0x198] ss:$12 sps:$4 sm:$0xff]  }
 0xdbb   :  { %12718 = vmatpush3.bf16.msra.mxu1 %v12715_v38  ;;  %12544 = vmatprep.mubr.msk.f32.mxu1 %vm2409_vm4, %v4218_v12  ;;  %v13462_v38 = vld [vmem:[#allocation10 + $0x1b4] ss:$12 sps:$4 sm:$0xff]   ;;  %v16133_v12 = vpack.i.bf16 %v15234_v43, %v15218_v36 }
 0xdbc   :  { %v14373_v5 = vpop.eup %14372  ;;  %12547 = vmatprep.subr.bf16.mxu1 %v13450_v22 }
 0xdbd   :  { %v4219_v3 = vmul.f32 %v14373_v5, %v14365_v41  ;;  %v13465_v5 = vld [vmem:[#allocation10 + $0x1cc] ss:$12 sps:$4 sm:$0xff]  }
 0xdbf   :  { %12545 = vmatmul.mubr.msk.f32.vlgmr.msra.gmra.mrb[52].mxu1 %vm2409_vm4, %v4219_v3  ;;  %v13463_v3 = vld [vmem:[#allocation10 + $0x1c8] ss:$12 sps:$4 sm:$0xff]  }
 0xdc0   :  { %12548 = vmatpush3.bf16.msra.mxu1 %v13450_v22  ;;  %v13460_v22 = vld [vmem:[#allocation10 + $0x1b0] ss:$12 sps:$4 sm:$0xff]  }
 0xdc1   :  { %12549 = vmatprep.subr.bf16.mxu1 %v13451_v8 }
 0xdc4   :  { %12550 = vmatpush3.bf16.msra.mxu1 %v13451_v8  ;;  %v16134_v8 = vpack.i.bf16 %v15204_v16, %v15190_v2 }
 0xdc5   :  { %12551 = vmatprep.subr.bf16.mxu1 %v13452_v53 }
 0xdc8   :  { %12552 = vmatpush3.bf16.msra.mxu1 %v13452_v53 }
 0xdc9   :  { %12553 = vmatprep.subr.bf16.mxu1 %v13453_v14 }
 0xdcc   :  { %12554 = vmatpush3.bf16.msra.mxu1 %v13453_v14 }
 0xdcd   :  { %12721 = vmatprep.subr.msk.bf16.mxu1 %vm15255_vm1, %v15210_v25 }
 0xe8d   :  { %v12539_v54 = vpop.f32.mrb[50].mxu1 }
 0xe8e   :  { %v4300_v6 = vpop.f32.mrb[51].mxu1 }
 0xe8f   :  { %v4398_v32 = vpack.c.bf16 %v12539_v54, %v4300_v6 }
 0xe91   :  { %11405 = vmatmul.mubr.msk.bf16.vlgmr.msra.gmra.mrb[24].mxu0 %vm2226_vm0, %v4398_v32  ;;  %12555 = vmatprep.mubr.msk.bf16.mxu1 %vm2226_vm0, %v4398_v32 }
 0xe92   :  { %12730 = vmatpush3.bf16.xpose.msk.msra.mxu0 %vm15255_vm1, %v15240_v63  ;;  %v12546_v42 = vpop.f32.mrb[52].mxu1  ;;  %4528 = vmatprep.mubr.bf16.mxu0 %v16128_v4 }
 0xe93   :  { %v4389_v27 = vpop.f32.mrb[53].mxu1  ;;  %5072 = vmatprep.subr.bf16.mxu0 %v13456_v18 }
 0xe94   :  { %v4399_v55 = vpack.c.bf16 %v12546_v42, %v4389_v27 }
 0xe96   :  { %12556 = vmatmul.mubr.msk.bf16.vlgmr.msra.gmra.mrb[40].mxu1 %vm2226_vm0, %v4399_v55 }
 0xe97   :  { %12724 = vmatpush3.bf16.xpose.msk.msra.mxu1 %vm15255_vm1, %v15210_v25  ;;  %12563 = vmatprep.mubr.msk.f32.mxu1 %vm2226_vm0, %v15245_v29 }
 0xe98   :  { %12732 = vmatprep.subr.bf16.mxu1 %v15344_v47 }
 0xe99   :  { %11406 = vmatmul.mubr.msk.bf16.gmra.mrb[28].mxu0 %vm2226_vm0, %v4399_v55 }
 0xe9a   :  { %12570 = vmatprep.mubr.msk.f32.mxu0 %vm2226_vm0, %v15267_v59 }
 0xe9e   :  { %12564 = vmatmul.mubr.msk.f32.vlgmr.msra.gmra.mrb[54].mxu1 %vm2226_vm0, %v15249_v1 }
 0xe9f   :  { %12734 = vmatpush3.bf16.msra.mxu1 %v15344_v47 }
 0xea0   :  { %12736 = vmatprep.subr.bf16.mxu1 %v15338_v58 }
 0xea1   :  { %12571 = vmatmul.mubr.msk.f32.vlgmr.msra.gmra.mrb[34].mxu0 %vm2226_vm0, %v15271_v57 }
 0xea2   :  { %5104 = vmatprep.mubr.bf16.mxu0 %v16128_v4  ;;  %5073 = vmatpush1.bf16.msra.mxu0 %v13454_v15 }
 0xea3   :  { %5074 = vmatprep.subr.bf16.mxu0 %v13459_v10 }
 0xea6   :  { %5075 = vmatpush1.bf16.msra.mxu0 %v13457_v44 }
 0xea7   :  { %5076 = vmatprep.subr.bf16.mxu0 %v13462_v38 }
 0xeaa   :  { %5077 = vmatpush1.bf16.msra.mxu0 %v13460_v22 }
 0xeab   :  { %5078 = vmatprep.subr.bf16.mxu0 %v13465_v5 }
 0xeae   :  { %5079 = vmatpush1.bf16.msra.mxu0 %v13463_v3 }
 0xf71   :  { %v12565_v25 = vpop.f32.mrb[54].mxu1 }
 0xf72   :  { %v4775_v63 = vsel %vm15348_vm2, %v12565_v25, -inf  ;;  %v4678_v23 = vpop.f32.mrb[55].mxu1 }
 0xf73   :  { %v4774_v35 = vsel %vm15353_vm3, %v4678_v23, -inf  ;;  %v4781_v37 = vsel %vm2409_vm4, %v4775_v63, -inf  ;;  %v13468_v23 = vld [vmem:[#allocation10 + $0x1b8] ss:$12 sps:$4 sm:$0xff]  }
 0xf74   :  { %4782 = vmax.xlane.f32.xlu0 %v4781_v37  ;;  %v12572_v48 = vpop.f32.mrb[34].mxu0  ;;  %v4778_v47 = vsel %vm2409_vm4, %v4774_v35, -inf  ;;  %v13469_v37 = vld [vmem:[#allocation10 + $0x1d0] ss:$12 sps:$4 sm:$0xff]  }
 0xf75   :  { %v4777_v56 = vsel %vm15348_vm2, %v12572_v48, -inf  ;;  %4779 = vmax.xlane.f32.xlu1 %v4778_v47  ;;  %v4765_v39 = vpop.f32.mrb[35].mxu0 }
 0xf76   :  { %v4776_v20 = vsel %vm15353_vm3, %v4765_v39, -inf  ;;  %v4787_v19 = vsel %vm2409_vm4, %v4777_v56, -inf }
 0xf77   :  { %v4784_v46 = vsel %vm2409_vm4, %v4776_v20, -inf }
 0xf78   :  { %4785 = vmax.xlane.f32.xlu0 %v4784_v46 }
 0xf79   :  { %4788 = vmax.xlane.f32.xlu1 %v4787_v19 }
0x1001   :  { %v4783_v26 = vpop.xlane.xlu0 %4782 }
0x1002   :  { %v4791_v61 = vsub.f32 %v4775_v63, %v4783_v26  ;;  %v4780_v41 = vpop.xlane.xlu1 %4779  ;;  %v13467_v63 = vld [vmem:[#allocation10 + $0x1a0] ss:$12 sps:$4 sm:$0xff]  }
0x1003   :  { %v4790_v50 = vsub.f32 %v4774_v35, %v4780_v41 }
0x1004   :  { %v4796_v30 = vmul.f32 1.442695, %v4791_v61 }
0x1005   :  { %v4794_v31 = vmul.f32 1.442695, %v4790_v50  ;;  %v4786_v60 = vpop.xlane.xlu0 %4785 }
0x1006   :  { %14374 = vpow2.f32 %v4796_v30  ;;  %v4792_v33 = vsub.f32 %v4776_v20, %v4786_v60  ;;  %v4789_v40 = vpop.xlane.xlu1 %4788 }
0x1007   :  { %14376 = vpow2.f32 %v4794_v31  ;;  %v4793_v21 = vsub.f32 %v4777_v56, %v4789_v40 }
0x1008   :  { %v4798_v7 = vmul.f32 1.442695, %v4792_v33 }
0x1009   :  { %v4800_v13 = vmul.f32 1.442695, %v4793_v21 }
0x100a   :  { %14378 = vpow2.f32 %v4798_v7 }
0x100b   :  { %14380 = vpow2.f32 %v4800_v13 }
0x1010   :  { %v14375_v11 = vpop.eup %14374 }
0x1011   :  { %v14377_v49 = vpop.eup %14376  ;;  %v4805_v34 = vsel %vm2409_vm4, %v14375_v11, 0.0 }
0x1012   :  { %4806 = vadd.xlane.f32.xlu1 %v4805_v34  ;;  %v4802_v62 = vsel %vm2409_vm4, %v14377_v49, 0.0 }
0x1013   :  { %4803 = vadd.xlane.f32.xlu0 %v4802_v62 }
0x1014   :  { %v14379_v52 = vpop.eup %14378 }
0x1015   :  { %v14381_v9 = vpop.eup %14380  ;;  %v4808_v28 = vsel %vm2409_vm4, %v14379_v52, 0.0 }
0x1016   :  { %v4811_v0 = vsel %vm2409_vm4, %v14381_v9, 0.0 }
0x1017   :  { %4812 = vadd.xlane.f32.xlu1 %v4811_v0  ;;  %4809 = vadd.xlane.f32.xlu0 %v4808_v28 }
0x1028   :  { %13064 = vrot.lane.b32.xlu1 %v16133_v12, %s14755_s11 }
0x102c   :  { %5186 = vrot.lane.b32.xlu1 %v15245_v29, %s14755_s11 }
0x102d   :  { %13059 = vrot.lane.b32.xlu0 %v16134_v8, %s14755_s11 }
0x1030   :  { %5188 = vrot.lane.b32.xlu1 %v15249_v1, %s14755_s11 }
0x1031   :  { %5277 = vrot.lane.b32.xlu0 %v15267_v59, %s14755_s11  ;;  %v13466_v59 = vld [vmem:[#allocation10 + $0x188] ss:$12 sps:$4 sm:$0xff]  }
0x1034   :  { %5279 = vrot.lane.b32.xlu1 %v15271_v57, %s14755_s11 }
0x109f   :  { %v4807_v36 = vpop.xlane.xlu1 %4806 }
0x10a0   :  { %14382 = vrcp.f32 %v4807_v36  ;;  %v4804_v43 = vpop.xlane.xlu0 %4803 }
0x10a1   :  { %14384 = vrcp.f32 %v4804_v43 }
0x10a4   :  { %v4813_v29 = vpop.xlane.xlu1 %4812  ;;  %v4810_v53 = vpop.xlane.xlu0 %4809 }
0x10a5   :  { %14386 = vrcp.f32 %v4813_v29 }
0x10a6   :  { %14388 = vrcp.f32 %v4810_v53 }
0x10a8   :  { %v13065_v2 = vpop.permute.xlu1 %13064  ;;  %v13060_v35 = vpop.permute.xlu0 %13059 }
0x10a9   :  { %v13067_v16 = vunpack.i.h.bf16 %v13065_v2  ;;  %v13066_v14 = vunpack.i.l.bf16 %v13065_v2  ;;  %v13062_v48 = vunpack.i.h.bf16 %v13060_v35  ;;  %v13061_v47 = vunpack.i.l.bf16 %v13060_v35  ;;  %v16135_v2 = vld [vmem:[#allocation35_spill] sm:$0xff] }
0x10aa   :  { %v14383_v54 = vpop.eup %14382 }
0x10ab   :  { %v14385_v6 = vpop.eup %14384  ;;  %v12745_v1 = vpack.c.bf16 %v13067_v16, %v13066_v14  ;;  %v4819_v42 = vmul.f32 %v14383_v54, %v14375_v11  ;;  %v12739_v56 = vpack.c.bf16 %v13062_v48, %v13061_v47  ;;  %v16136_v16 = vpack.i.bf16 %v15330_v45, %v16135_v2  ;;  %v16137_v14 = vld [vmem:[#allocation37_spill] sm:$0xff]  ;;  %v16138_v54 = vld [vmem:[#allocation36_spill] sm:$0xff]  ;;  %v16142_v2 = vld [vmem:[#allocation34_spill] sm:$0xff] }
0x10ac   :  { %v4818_v32 = vmul.f32 %v14385_v6, %v14377_v49  ;;  %v5187_v15 = vpop.permute.xlu1 %5186  ;;  %v5278_v26 = vpop.permute.xlu0 %5277  ;;  %v16139_v6 = vpack.i.bf16 %v16137_v14, %v16138_v54 }
0x10ad   :  { %12747 = vmatprep.subr.msk.bf16.mxu0 %vm15255_vm1, %v12745_v1 }
0x10ae   :  { %12577 = vmatprep.mubr.msk.f32.mxu1 %vm2409_vm4, %v4818_v32  ;;  %v13472_v32 = vld [vmem:[#allocation10 + $0x1e4] ss:$12 sps:$4 sm:$0xff]  }
0x10af   :  { %v14387_v57 = vpop.eup %14386  ;;  %12578 = vmatmul.mubr.msk.f32.vlgmr.msra.gmra.mrb[56].mxu1 %vm2409_vm4, %v4819_v42  ;;  %v13475_v42 = vld [vmem:[#allocation10 + $0x1fc] ss:$12 sps:$4 sm:$0xff]  }
0x10b0   :  { %v14389_v27 = vpop.eup %14388  ;;  %v4821_v55 = vmul.f32 %v14387_v57, %v14381_v9  ;;  %12738 = vmatpush3.bf16.msra.mxu1 %v15338_v58  ;;  %v5189_v61 = vpop.permute.xlu1 %5188  ;;  %v13479_v57 = vld [vmem:[#allocation10 + $0x214] ss:$12 sps:$4 sm:$0xff]  }
0x10b1   :  { %v4820_v25 = vmul.f32 %v14389_v27, %v14379_v52  ;;  %12587 = vmatprep.subr.bf16.mxu1 %v13466_v59  ;;  %v13477_v27 = vld [vmem:[#allocation10 + $0x210] ss:$12 sps:$4 sm:$0xff]  }
0x10b3   :  { %12584 = vmatprep.mubr.msk.f32.mxu1 %vm2409_vm4, %v4820_v25 }
0x10b4   :  { %12585 = vmatmul.mubr.msk.f32.vlgmr.msra.gmra.mrb[58].mxu1 %vm2409_vm4, %v4821_v55  ;;  %v5280_v41 = vpop.permute.xlu1 %5279 }
0x10b5   :  { %12588 = vmatpush3.bf16.msra.mxu1 %v13466_v59  ;;  %v13473_v59 = vld [vmem:[#allocation10 + $0x1f8] ss:$12 sps:$4 sm:$0xff]  }
0x10b6   :  { %12589 = vmatprep.subr.bf16.mxu1 %v13467_v63 }
0x10b9   :  { %12590 = vmatpush3.bf16.msra.mxu1 %v13467_v63 }
0x10ba   :  { %12591 = vmatprep.subr.bf16.mxu1 %v13468_v23 }
0x10bd   :  { %12592 = vmatpush3.bf16.msra.mxu1 %v13468_v23 }
0x10be   :  { %12593 = vmatprep.subr.bf16.mxu1 %v13469_v37 }
0x10c1   :  { %12594 = vmatpush3.bf16.msra.mxu1 %v13469_v37 }
0x10c2   :  { %12741 = vmatprep.subr.msk.bf16.mxu1 %vm15255_vm1, %v12739_v56 }
0x1182   :  { %v12579_v58 = vpop.f32.mrb[56].mxu1 }
0x1183   :  { %v4894_v39 = vpop.f32.mrb[57].mxu1 }
0x1184   :  { %v4984_v20 = vpack.c.bf16 %v12579_v58, %v4894_v39 }
0x1186   :  { %11433 = vmatmul.mubr.msk.bf16.vlgmr.msra.gmra.mrb[24].mxu0 %vm2226_vm0, %v4984_v20  ;;  %12595 = vmatprep.mubr.msk.bf16.mxu1 %vm2226_vm0, %v4984_v20 }
0x1187   :  { %v12586_v46 = vpop.f32.mrb[58].mxu1  ;;  %12750 = vmatpush3.bf16.xpose.msk.msra.mxu0 %vm15255_vm1, %v12745_v1  ;;  %5114 = vmatprep.mubr.bf16.mxu0 %v16128_v4  ;;  %v13470_v1 = vld [vmem:[#allocation10 + $0x1e0] ss:$12 sps:$4 sm:$0xff]  }
0x1188   :  { %v4975_v19 = vpop.f32.mrb[59].mxu1  ;;  %5682 = vmatprep.subr.bf16.mxu0 %v13472_v32 }
0x1189   :  { %v4985_v18 = vpack.c.bf16 %v12586_v46, %v4975_v19 }
0x118b   :  { %12596 = vmatmul.mubr.msk.bf16.vlgmr.msra.gmra.mrb[40].mxu1 %vm2226_vm0, %v4985_v18 }
0x118c   :  { %12744 = vmatpush3.bf16.xpose.msk.msra.mxu1 %vm15255_vm1, %v12739_v56  ;;  %12603 = vmatprep.mubr.msk.f32.mxu1 %vm2226_vm0, %v5187_v15 }
0x118e   :  { %11434 = vmatmul.mubr.msk.bf16.gmra.mrb[28].mxu0 %vm2226_vm0, %v4985_v18 }
0x118f   :  { %12610 = vmatprep.mubr.msk.f32.mxu0 %vm2226_vm0, %v5278_v26  ;;  %v13476_v26 = vld [vmem:[#allocation10 + $0x1e8] ss:$12 sps:$4 sm:$0xff]  }
0x1193   :  { %12604 = vmatmul.mubr.msk.f32.vlgmr.msra.gmra.mrb[60].mxu1 %vm2226_vm0, %v5189_v61 }
0x1196   :  { %12611 = vmatmul.mubr.msk.f32.vlgmr.msra.gmra.mrb[36].mxu0 %vm2226_vm0, %v5280_v41 }
0x1197   :  { %5714 = vmatprep.mubr.bf16.mxu0 %v16128_v4  ;;  %5683 = vmatpush1.bf16.msra.mxu0 %v13470_v1  ;;  %v14424_v1 = vld [vmem:[#allocation2 + $0x10] sm:$0xff] }
0x1198   :  { %5684 = vmatprep.subr.bf16.mxu0 %v13475_v42 }
0x119b   :  { %5685 = vmatpush1.bf16.msra.mxu0 %v13473_v59 }
0x119c   :  { %5686 = vmatprep.subr.bf16.mxu0 %v13479_v57 }
0x119f   :  { %5687 = vmatpush1.bf16.msra.mxu0 %v13477_v27 }
0x1266   :  { %v12605_v50 = vpop.f32.mrb[60].mxu1 }
0x1267   :  { %v5369_v17 = vsel %vm15348_vm2, %v12605_v50, -inf  ;;  %v5268_v30 = vpop.f32.mrb[61].mxu1 }
0x1268   :  { %v5368_v31 = vsel %vm15353_vm3, %v5268_v30, -inf  ;;  %v5375_v60 = vsel %vm2409_vm4, %v5369_v17, -inf  ;;  %v13483_v30 = vld [vmem:[#allocation10 + $0x22c] ss:$12 sps:$4 sm:$0xff]  }
0x1269   :  { %5376 = vmax.xlane.f32.xlu1 %v5375_v60  ;;  %v5372_v33 = vsel %vm2409_vm4, %v5368_v31, -inf  ;;  %v12612_v40 = vpop.f32.mrb[36].mxu0  ;;  %v13484_v60 = vld [vmem:[#allocation10 + $0x218] ss:$12 sps:$4 sm:$0xff]   ;;  %5688 = vmatprep.subr.bf16.mxu0 %v13483_v30 }
0x126a   :  { %5373 = vmax.xlane.f32.xlu0 %v5372_v33  ;;  %v5359_v21 = vpop.f32.mrb[37].mxu0  ;;  %v5371_v11 = vsel %vm15348_vm2, %v12612_v40, -inf  ;;  %v13485_v33 = vld [vmem:[#allocation10 + $0x230] ss:$12 sps:$4 sm:$0xff]  }
0x126b   :  { %v5370_v7 = vsel %vm15353_vm3, %v5359_v21, -inf  ;;  %v5381_v49 = vsel %vm2409_vm4, %v5371_v11, -inf }
0x126c   :  { %v5378_v13 = vsel %vm2409_vm4, %v5370_v7, -inf }
0x126e   :  { %5379 = vmax.xlane.f32.xlu0 %v5378_v13 }
0x1272   :  { %5382 = vmax.xlane.f32.xlu0 %v5381_v49 }
0x12f6   :  { %v5377_v34 = vpop.xlane.xlu1 %5376 }
0x12f7   :  { %v5385_v62 = vsub.f32 %v5369_v17, %v5377_v34  ;;  %v5374_v52 = vpop.xlane.xlu0 %5373  ;;  %v13480_v17 = vld [vmem:[#allocation10 + $0x200] ss:$12 sps:$4 sm:$0xff]  }
0x12f8   :  { %v5384_v9 = vsub.f32 %v5368_v31, %v5374_v52  ;;  %v13481_v31 = vld [vmem:[#allocation10 + $0x228] ss:$12 sps:$4 sm:$0xff]   ;;  %v5808_v34 = vld [vmem:[#allocation11] sm:$0x7]  ;;  %v14420_v52 = vld [vmem:[#allocation2] sm:$0xff] }
0x12f9   :  { %v5390_v28 = vmul.f32 1.442695, %v5385_v62  ;;  %5689 = vmatpush1.bf16.msra.mxu0 %v13481_v31 }
0x12fa   :  { %v5388_v0 = vmul.f32 1.442695, %v5384_v9 }
0x12fb   :  { %14390 = vpow2.f32 %v5390_v28  ;;  %v5380_v10 = vpop.xlane.xlu0 %5379  ;;  %v16140_v28 = vld [vmem:[#allocation33_spill] sm:$0xff] }
0x12fc   :  { %14392 = vpow2.f32 %v5388_v0  ;;  %v5386_v24 = vsub.f32 %v5370_v7, %v5380_v10  ;;  %v5813_v0 = vrot.slane %v5808_v34, %v16140_v28 }
0x12fe   :  { %v5392_v44 = vmul.f32 1.442695, %v5386_v24  ;;  %v16141_v24 = vld [vmem:[#allocation32_spill] sm:$0xff] }
0x12ff   :  { %v5383_v38 = vpop.xlane.xlu0 %5382 }
0x1300   :  { %14394 = vpow2.f32 %v5392_v44  ;;  %v5387_v22 = vsub.f32 %v5371_v11, %v5383_v38  ;;  %v5817_v44 = vrot.slane %v5808_v34, %v16141_v24  ;;  %v14421_v38 = vld [vmem:[#allocation2 + $0x8] sm:$0xff] }
0x1302   :  { %v5394_v51 = vmul.f32 1.442695, %v5387_v22 }
0x1304   :  { %14396 = vpow2.f32 %v5394_v51 }
0x1305   :  { %v14391_v12 = vpop.eup %14390 }
0x1306   :  { %v14393_v5 = vpop.eup %14392  ;;  %v5399_v3 = vsel %vm2409_vm4, %v14391_v12, 0.0 }
0x1307   :  { %5400 = vadd.xlane.f32.xlu1 %v5399_v3  ;;  %v5396_v8 = vsel %vm2409_vm4, %v14393_v5, 0.0 }
0x1308   :  { %5397 = vadd.xlane.f32.xlu0 %v5396_v8  ;;  %v14423_v8 = vld [vmem:[#allocation2 + $0x20] sm:$0xff] }
0x130a   :  { %v14395_v36 = vpop.eup %14394 }
0x130b   :  { %v5402_v43 = vsel %vm2409_vm4, %v14395_v36, 0.0 }
0x130c   :  { %5403 = vadd.xlane.f32.xlu0 %v5402_v43 }
0x130e   :  { %v14397_v29 = vpop.eup %14396 }
0x130f   :  { %v5405_v53 = vsel %vm2409_vm4, %v14397_v29, 0.0 }
0x1310   :  { %5406 = vadd.xlane.f32.xlu1 %v5405_v53 }
0x1321   :  { %13074 = vrot.lane.b32.xlu1 %v16136_v16, %s14755_s11  ;;  %v5821_v16 = vrot.slane %v5808_v34, %v16142_v2  ;;  %v13486_v34 = vld [vmem:[#allocation16] ss:$48 sps:$4 sm:$0xff]  }
0x1322   :  { %13069 = vrot.lane.b32.xlu0 %v16139_v6, %s14755_s11 }
0x1394   :  { %v5401_v55 = vpop.xlane.xlu1 %5400 }
0x1395   :  { %v5398_v45 = vpop.xlane.xlu0 %5397 }
0x1396   :  { %14398 = vrcp.f32 %v5398_v45 }
0x1397   :  { %14400 = vrcp.f32 %v5401_v55  ;;  %v14425_v55 = vld [vmem:[#allocation2 + $0x30] sm:$0xff] }
0x1399   :  { %v5404_v25 = vpop.xlane.xlu0 %5403 }
0x139a   :  { %14402 = vrcp.f32 %v5404_v25  ;;  %v14426_v25 = vld [vmem:[#allocation2 + $0x28] sm:$0xff] }
0x139d   :  { %v5407_v63 = vpop.xlane.xlu1 %5406  ;;  %v13070_v23 = vpop.permute.xlu0 %13069 }
0x139e   :  { %14404 = vrcp.f32 %v5407_v63  ;;  %v13072_v35 = vunpack.i.h.bf16 %v13070_v23  ;;  %v13071_v37 = vunpack.i.l.bf16 %v13070_v23 }
0x13a0   :  { %v14399_v48 = vpop.eup %14398  ;;  %v12751_v47 = vpack.c.bf16 %v13072_v35, %v13071_v37  ;;  %v14427_v37 = vld [vmem:[#allocation2 + $0x40] sm:$0xff] }
0x13a1   :  { %v14401_v56 = vpop.eup %14400  ;;  %v13075_v58 = vpop.permute.xlu1 %13074  ;;  %v5412_v39 = vmul.f32 %v14399_v48, %v14393_v5 }
0x13a2   :  { %v13077_v20 = vunpack.i.h.bf16 %v13075_v58  ;;  %v13076_v46 = vunpack.i.l.bf16 %v13075_v58  ;;  %12752 = vmatprep.subr.bf16.mxu1 %v12751_v47  ;;  %v5413_v15 = vmul.f32 %v14401_v56, %v14391_v12  ;;  %v14422_v12 = vld [vmem:[#allocation2 + $0x18] sm:$0xff] }
0x13a3   :  { %12754 = vmatpush3.bf16.msra.mxu1 %v12751_v47  ;;  %12617 = vmatprep.mubr.msk.f32.mxu1 %vm2409_vm4, %v5412_v39  ;;  %v14428_v47 = vld [vmem:[#allocation2 + $0x38] sm:$0xff] }
0x13a4   :  { %v14403_v19 = vpop.eup %14402  ;;  %v12755_v18 = vpack.c.bf16 %v13077_v20, %v13076_v46 }
0x13a5   :  { %v5414_v61 = vmul.f32 %v14403_v19, %v14395_v36  ;;  %v14429_v19 = vld [vmem:[#allocation2 + $0x48] sm:$0xff] }
0x13a6   :  { %12618 = vmatmul.mubr.msk.f32.vlgmr.msra.gmra.mrb[62].mxu1 %vm2409_vm4, %v5413_v15  ;;  %12756 = vmatprep.subr.bf16.mxu1 %v12755_v18 }
0x13a7   :  { %12758 = vmatpush3.bf16.msra.mxu1 %v12755_v18  ;;  %12624 = vmatprep.mubr.msk.f32.mxu1 %vm2409_vm4, %v5414_v61  ;;  %v14430_v61 = vld [vmem:[#allocation2 + $0x58] sm:$0xff] }
0x13a8   :  { %v14405_v41 = vpop.eup %14404  ;;  %12627 = vmatprep.subr.bf16.mxu1 %v13476_v26 }
0x13a9   :  { %v5415_v50 = vmul.f32 %v14405_v41, %v14397_v29 }
0x13ab   :  { %12625 = vmatmul.mubr.msk.f32.vlgmr.msra.gmra.mrb[64].mxu1 %vm2409_vm4, %v5415_v50 }
0x13ac   :  { %12628 = vmatpush3.bf16.msra.mxu1 %v13476_v26 }
0x13ad   :  { %12629 = vmatprep.subr.bf16.mxu1 %v13480_v17 }
0x13b0   :  { %12630 = vmatpush3.bf16.msra.mxu1 %v13480_v17  ;;  %v14431_v17 = vld [vmem:[#allocation2 + $0x50] sm:$0xff] }
0x13b1   :  { %12631 = vmatprep.subr.bf16.mxu1 %v13484_v60 }
0x13b4   :  { %12632 = vmatpush3.bf16.msra.mxu1 %v13484_v60 }
0x13b5   :  { %12633 = vmatprep.subr.bf16.mxu1 %v13485_v33 }
0x13b8   :  { %12634 = vmatpush3.bf16.msra.mxu1 %v13485_v33 }
0x1479   :  { %v12619_v40 = vpop.f32.mrb[62].mxu1 }
0x147a   :  { %v5496_v21 = vpop.f32.mrb[63].mxu1 }
0x147b   :  { %v5594_v7 = vpack.c.bf16 %v12619_v40, %v5496_v21 }
0x147d   :  { %11461 = vmatmul.mubr.msk.bf16.vlgmr.msra.gmra.mrb[24].mxu0 %vm2226_vm0, %v5594_v7  ;;  %12635 = vmatprep.mubr.msk.bf16.mxu1 %vm2226_vm0, %v5594_v7 }
0x147e   :  { %v12626_v13 = vpop.f32.mrb[64].mxu1  ;;  %5724 = vmatprep.mubr.bf16.mxu0 %v16128_v4 }
0x147f   :  { %v5585_v11 = vpop.f32.mrb[65].mxu1 }
0x1480   :  { %v5595_v49 = vpack.c.bf16 %v12626_v13, %v5585_v11 }
0x1482   :  { %12636 = vmatmul.mubr.msk.bf16.vlgmr.msra.gmra.mrb[40].mxu1 %vm2226_vm0, %v5595_v49 }
0x1485   :  { %11462 = vmatmul.mubr.msk.bf16.gmra.mrb[28].mxu0 %vm2226_vm0, %v5595_v49 }
0x1550   :  { %v5716_v62 = vpop.f32.mrb[24].mxu0 }
0x1551   :  { %v5796_v9 = vadd.f32 %v14420_v52, %v5716_v62  ;;  %v5718_v10 = vpop.f32.mrb[25].mxu0  ;;  %v13488_v62 = vld [vmem:[#allocation16 + $0x4] ss:$48 sps:$4 sm:$0xff]   ;;  %v13489_v52 = vld [vmem:[#allocation16 + $0x8] ss:$48 sps:$4 sm:$0xff]  }
0x1552   :  { %v5797_v22 = vadd.f32 %v14421_v38, %v5718_v10  ;;  %v5720_v51 = vpop.f32.mrb[26].mxu0  ;;  %7777 = vmatprep.subr.bf16.mxu0 %v13488_v62  ;;  %v13497_v10 = vld [vmem:[#allocation16 + $0x6c] ss:$48 sps:$4 sm:$0xff]   ;;  %v13495_v38 = vld [vmem:[#allocation16 + $0x68] ss:$48 sps:$4 sm:$0xff]  }
0x1553   :  { %v5799_v5 = vadd.f32 %v14422_v12, %v5720_v51  ;;  %v5722_v3 = vpop.f32.mrb[27].mxu0  ;;  %v15680_v43 = vadd.f32 %v5813_v0, %v5796_v9  ;;  %v13491_v9 = vld [vmem:[#allocation16 + $0xc] ss:$48 sps:$4 sm:$0xff]   ;;  %7778 = vmatpush1.bf16.msra.mxu0 %v13486_v34  ;;  %v13498_v12 = vld [vmem:[#allocation16 + $0xc0] ss:$48 sps:$4 sm:$0xff]  }
0x1554   :  { %v5800_v36 = vadd.f32 %v14423_v8, %v5722_v3  ;;  %v15682_v29 = vadd.f32 %v5817_v44, %v5797_v22  ;;  %7883 = vmatprep.subr.bf16.mxu1 %v13491_v9  ;;  %v13500_v22 = vld [vmem:[#allocation16 + $0xc4] ss:$48 sps:$4 sm:$0xff]   ;;  %v13503_v51 = vld [vmem:[#allocation16 + $0xcc] ss:$48 sps:$4 sm:$0xff]  }
0x1555   :  { %v12637_v53 = vpop.f32.mrb[40].mxu1  ;;  %v15685_v14 = vadd.f32 %v5813_v0, %v5799_v5  ;;  %7884 = vmatpush1.bf16.msra.mxu1 %v13489_v52  ;;  %v13501_v5 = vld [vmem:[#allocation16 + $0xc8] ss:$48 sps:$4 sm:$0xff]   ;;  %v13506_v3 = vld [vmem:[#allocation16 + $0x124] ss:$48 sps:$4 sm:$0xff]  }
0x1556   :  { %v15687_v54 = vadd.f32 %v5817_v44, %v5800_v36  ;;  %v5769_v6 = vpop.f32.mrb[41].mxu1  ;;  %v5839_v35 = vadd.f32 %v15682_v29, %v15680_v43  ;;  %v5804_v48 = vadd.f32 %v14427_v37, %v12637_v53  ;;  %7885 = vmatprep.subr.bf16.mxu1 %v13497_v10  ;;  %v13509_v8 = vld [vmem:[#allocation16 + $0x12c] ss:$48 sps:$4 sm:$0xff]   ;;  %v13504_v36 = vld [vmem:[#allocation16 + $0x120] ss:$48 sps:$4 sm:$0xff]  }
0x1557   :  { %v5798_v32 = vadd.f32 %v14424_v1, %v5769_v6  ;;  %v12638_v42 = vpop.f32.mrb[42].mxu1  ;;  %v13507_v53 = vld [vmem:[#allocation16 + $0x128] ss:$48 sps:$4 sm:$0xff]   ;;  %v13515_v6 = vld [vmem:[#allocation16 + $0x18c] ss:$48 sps:$4 sm:$0xff]  }
0x1558   :  { %v5726_v59 = vpop.f32.mrb[28].mxu0  ;;  %v5772_v57 = vpop.f32.mrb[43].mxu1  ;;  %v5843_v39 = vadd.f32 %v15687_v54, %v15685_v14  ;;  %v5807_v41 = vadd.f32 %v14430_v61, %v12638_v42  ;;  %v15705_v33 = vadd.f32 %v5821_v16, %v5804_v48  ;;  %v13510_v1 = vld [vmem:[#allocation16 + $0x180] ss:$48 sps:$4 sm:$0xff]   ;;  %v13518_v42 = vld [vmem:[#allocation16 + $0x1e4] ss:$48 sps:$4 sm:$0xff]  }
0x1559   :  { %v15689_v27 = vadd.f32 %v5821_v16, %v5798_v32  ;;  %v5802_v45 = vadd.f32 %v14425_v55, %v5726_v59  ;;  %v5801_v63 = vadd.f32 %v14426_v25, %v5772_v57  ;;  %v5728_v23 = vpop.f32.mrb[29].mxu0  ;;  %7886 = vmatpush1.bf16.msra.mxu1 %v13495_v38  ;;  %v13513_v32 = vld [vmem:[#allocation16 + $0x188] ss:$48 sps:$4 sm:$0xff]   ;;  %v13521_v59 = vld [vmem:[#allocation16 + $0x1ec] ss:$48 sps:$4 sm:$0xff]  }
0x155a   :  { %v5803_v56 = vadd.f32 %v14428_v47, %v5728_v23  ;;  %v5730_v58 = vpop.f32.mrb[30].mxu0  ;;  %v15711_v7 = vadd.f32 %v5821_v16, %v5807_v41  ;;  %7887 = vmatprep.subr.bf16.mxu1 %v13503_v51  ;;  %v13516_v57 = vld [vmem:[#allocation16 + $0x1e0] ss:$48 sps:$4 sm:$0xff]   ;;  %v13519_v55 = vld [vmem:[#allocation16 + $0x1e8] ss:$48 sps:$4 sm:$0xff]  }
0x155b   :  { %v15695_v20 = vadd.f32 %v5813_v0, %v5802_v45  ;;  %v15697_v46 = vadd.f32 %v5821_v16, %v5801_v63  ;;  %v5805_v15 = vadd.f32 %v14429_v19, %v5730_v58  ;;  %v5732_v18 = vpop.f32.mrb[31].mxu0  ;;  %v5840_v26 = vadd.f32 %v5839_v35, %v15689_v27  ;;  %v13512_v16 = vld [vmem:[#allocation16 + $0x184] ss:$48 sps:$4 sm:$0xff]   ;;  %v13527_v25 = vld [vmem:[#allocation16 + $0x24c] ss:$48 sps:$4 sm:$0xff]  }
0x155c   :  { %v15700_v50 = vadd.f32 %v5817_v44, %v5803_v56  ;;  %v5806_v30 = vadd.f32 %v14431_v17, %v5732_v18  ;;  %v13524_v45 = vld [vmem:[#allocation16 + $0x244] ss:$48 sps:$4 sm:$0xff]   ;;  %v13522_v63 = vld [vmem:[#allocation16 + $0x240] ss:$48 sps:$4 sm:$0xff]   ;;  %v13525_v23 = vld [vmem:[#allocation16 + $0x248] ss:$48 sps:$4 sm:$0xff]  }
0x155d   :  { %v15702_v31 = vadd.f32 %v5813_v0, %v5805_v15  ;;  %5841 = vadd.xlane.f32.xlu1 %v5840_v26  ;;  %v5844_v60 = vadd.f32 %v5843_v39, %v15697_v46  ;;  %v13494_v0 = vld [vmem:[#allocation16 + $0x64] ss:$48 sps:$4 sm:$0xff]   ;;  %7888 = vmatpush1.bf16.msra.mxu1 %v13501_v5  ;;  %v13533_v37 = vld [vmem:[#allocation16 + $0x2ac] ss:$48 sps:$4 sm:$0xff]   ;;  %v13528_v48 = vld [vmem:[#allocation16 + $0x2a0] ss:$48 sps:$4 sm:$0xff]  }
0x155e   :  { %v15707_v40 = vadd.f32 %v5817_v44, %v5806_v30  ;;  %v5847_v21 = vadd.f32 %v15700_v50, %v15695_v20  ;;  %v13492_v44 = vld [vmem:[#allocation16 + $0x60] ss:$48 sps:$4 sm:$0xff]   ;;  %7779 = vmatprep.subr.bf16.mxu0 %v13494_v0  ;;  %7889 = vmatprep.subr.bf16.mxu1 %v13509_v8  ;;  %v13530_v35 = vld [vmem:[#allocation16 + $0x2a4] ss:$48 sps:$4 sm:$0xff]   ;;  %v13531_v47 = vld [vmem:[#allocation16 + $0x2a8] ss:$48 sps:$4 sm:$0xff]  }
0x155f   :  { %5845 = vadd.xlane.f32.xlu0 %v5844_v60  ;;  %7780 = vmatpush1.bf16.msra.mxu0 %v13492_v44  ;;  %v13536_v56 = vld [vmem:[#allocation16 + $0x304] ss:$48 sps:$4 sm:$0xff]   ;;  %v13539_v58 = vld [vmem:[#allocation16 + $0x30c] ss:$48 sps:$4 sm:$0xff]   ;;  %v13534_v39 = vld [vmem:[#allocation16 + $0x300] ss:$48 sps:$4 sm:$0xff]  }
0x1560   :  { %v5848_v13 = vadd.f32 %v5847_v21, %v15705_v33  ;;  %v5851_v11 = vadd.f32 %v15707_v40, %v15702_v31  ;;  %7781 = vmatprep.subr.bf16.mxu0 %v13500_v22  ;;  %v13537_v19 = vld [vmem:[#allocation16 + $0x308] ss:$48 sps:$4 sm:$0xff]   ;;  %v13542_v15 = vld [vmem:[#allocation16 + $0x364] ss:$48 sps:$4 sm:$0xff]   ;;  %v13545_v18 = vld [vmem:[#allocation16 + $0x36c] ss:$48 sps:$4 sm:$0xff]  }
0x1561   :  { %7890 = vmatpush1.bf16.msra.mxu1 %v13507_v53  ;;  %v13540_v26 = vld [vmem:[#allocation16 + $0x360] ss:$48 sps:$4 sm:$0xff]   ;;  %v13543_v61 = vld [vmem:[#allocation16 + $0x368] ss:$48 sps:$4 sm:$0xff]  }
0x1562   :  { %v5852_v49 = vadd.f32 %v5851_v11, %v15711_v7  ;;  %7891 = vmatprep.subr.bf16.mxu1 %v13515_v6 }
0x1563   :  { %5849 = vadd.xlane.f32.xlu0 %v5848_v13  ;;  %7782 = vmatpush1.bf16.msra.mxu0 %v13498_v12 }
0x1564   :  { %5853 = vadd.xlane.f32.xlu1 %v5852_v49  ;;  %7783 = vmatprep.subr.bf16.mxu0 %v13506_v3 }
0x1565   :  { %7892 = vmatpush1.bf16.msra.mxu1 %v13513_v32 }
0x1566   :  { %7893 = vmatprep.subr.bf16.mxu1 %v13521_v59 }
0x1567   :  { %7784 = vmatpush1.bf16.msra.mxu0 %v13504_v36 }
0x1568   :  { %7785 = vmatprep.subr.bf16.mxu0 %v13512_v16 }
0x1569   :  { %7894 = vmatpush1.bf16.msra.mxu1 %v13519_v55 }
0x156a   :  { %7895 = vmatprep.subr.bf16.mxu1 %v13527_v25 }
0x156b   :  { %7786 = vmatpush1.bf16.msra.mxu0 %v13510_v1 }
0x156c   :  { %7787 = vmatprep.subr.bf16.mxu0 %v13518_v42 }
0x156d   :  { %7896 = vmatpush1.bf16.msra.mxu1 %v13525_v23 }
0x156e   :  { %7897 = vmatprep.subr.bf16.mxu1 %v13533_v37 }
0x156f   :  { %7788 = vmatpush1.bf16.msra.mxu0 %v13516_v57 }
0x1570   :  { %7789 = vmatprep.subr.bf16.mxu0 %v13524_v45 }
0x1571   :  { %7898 = vmatpush1.bf16.msra.mxu1 %v13531_v47 }
0x1572   :  { %7899 = vmatprep.subr.bf16.mxu1 %v13539_v58  ;;  %v13551_v58 = vld [vmem:[#allocation16 + $0x3cc] ss:$48 sps:$4 sm:$0xff]  }
0x1573   :  { %7790 = vmatpush1.bf16.msra.mxu0 %v13522_v63 }
0x1574   :  { %7791 = vmatprep.subr.bf16.mxu0 %v13530_v35 }
0x1575   :  { %7900 = vmatpush1.bf16.msra.mxu1 %v13537_v19  ;;  %v13549_v19 = vld [vmem:[#allocation16 + $0x3c8] ss:$48 sps:$4 sm:$0xff]  }
0x1576   :  { %7901 = vmatprep.subr.bf16.mxu1 %v13545_v18  ;;  %v13557_v18 = vld [vmem:[#allocation16 + $0x42c] ss:$48 sps:$4 sm:$0xff]  }
0x1577   :  { %7792 = vmatpush1.bf16.msra.mxu0 %v13528_v48 }
0x1578   :  { %7793 = vmatprep.subr.bf16.mxu0 %v13536_v56  ;;  %v13548_v56 = vld [vmem:[#allocation16 + $0x3c4] ss:$48 sps:$4 sm:$0xff]  }
0x1579   :  { %7902 = vmatpush1.bf16.msra.mxu1 %v13543_v61  ;;  %v13555_v61 = vld [vmem:[#allocation16 + $0x428] ss:$48 sps:$4 sm:$0xff]  }
0x157a   :  { %7903 = vmatprep.subr.bf16.mxu1 %v13551_v58 }
0x157b   :  { %7794 = vmatpush1.bf16.msra.mxu0 %v13534_v39  ;;  %v13546_v39 = vld [vmem:[#allocation16 + $0x3c0] ss:$48 sps:$4 sm:$0xff]  }
0x157c   :  { %7795 = vmatprep.subr.bf16.mxu0 %v13542_v15  ;;  %v13554_v15 = vld [vmem:[#allocation16 + $0x424] ss:$48 sps:$4 sm:$0xff]  }
0x157d   :  { %7904 = vmatpush1.bf16.msra.mxu1 %v13549_v19  ;;  %v15779_v19 = vld [vmem:[#allocation14] sm:$0x7] }
0x157e   :  { %7905 = vmatprep.subr.bf16.mxu1 %v13557_v18 }
0x157f   :  { %7796 = vmatpush1.bf16.msra.mxu0 %v13540_v26  ;;  %v13552_v26 = vld [vmem:[#allocation16 + $0x420] ss:$48 sps:$4 sm:$0xff]  }
0x1580   :  { %7797 = vmatprep.subr.bf16.mxu0 %v13548_v56 }
0x1581   :  { %7906 = vmatpush1.bf16.msra.mxu1 %v13555_v61 }
0x1583   :  { %7798 = vmatpush1.bf16.msra.mxu0 %v13546_v39  ;;  %v15777_v39 = vld [vmem:[#allocation13] sm:$0x7] }
0x1584   :  { %7799 = vmatprep.subr.bf16.mxu0 %v13554_v15  ;;  %v5931_v15 = vrot.slane %v15777_v39, %v16141_v24  ;;  %v5927_v18 = vrot.slane %v15777_v39, %v16140_v28 }
0x1587   :  { %7800 = vmatpush1.bf16.msra.mxu0 %v13552_v26 }
0x15ea   :  { %v5842_v41 = vpop.xlane.xlu1 %5841 }
0x15eb   :  { %v5855_v17 = vmul.f32 0.0026041667, %v5842_v41  ;;  %v13560_v41 = vld [vmem:[#allocation16 + $0x484] ss:$48 sps:$4 sm:$0xff]  }
0x15ec   :  { %v5846_v30 = vpop.xlane.xlu0 %5845  ;;  %7801 = vmatprep.subr.bf16.mxu0 %v13560_v41 }
0x15ed   :  { %v15718_v60 = vsub.f32 %v15680_v43, %v5855_v17  ;;  %v15721_v21 = vsub.f32 %v15682_v29, %v5855_v17  ;;  %v5856_v13 = vmul.f32 0.0026041667, %v5846_v30  ;;  %v15724_v11 = vsub.f32 %v15689_v27, %v5855_v17  ;;  %v13563_v17 = vld [vmem:[#allocation16 + $0x48c] ss:$48 sps:$4 sm:$0xff]   ;;  %v13558_v30 = vld [vmem:[#allocation16 + $0x480] ss:$48 sps:$4 sm:$0xff]  }
0x15ee   :  { %7907 = vmatprep.subr.bf16.mxu1 %v13563_v17  ;;  %7802 = vmatpush1.bf16.msra.mxu0 %v13558_v30  ;;  %v5959_v17 = vrot.slane %v15779_v19, %v16141_v24 }
0x15ef   :  { %v15727_v49 = vsub.f32 %v15685_v14, %v5856_v13  ;;  %v15730_v34 = vsub.f32 %v15687_v54, %v5856_v13  ;;  %v15733_v62 = vsub.f32 %v15697_v46, %v5856_v13  ;;  %v5871_v52 = vmul.f32 %v15718_v60, %v15718_v60  ;;  %v13561_v13 = vld [vmem:[#allocation16 + $0x488] ss:$48 sps:$4 sm:$0xff]  }
0x15f0   :  { %v5850_v9 = vpop.xlane.xlu0 %5849  ;;  %v5872_v0 = vmul.f32 %v15721_v21, %v15721_v21  ;;  %v5873_v12 = vmul.f32 %v15724_v11, %v15724_v11  ;;  %7908 = vmatpush1.bf16.msra.mxu1 %v13561_v13  ;;  %v5955_v13 = vrot.slane %v15779_v19, %v16140_v28 }
0x15f1   :  { %v5857_v10 = vmul.f32 0.0026041667, %v5850_v9  ;;  %v5854_v44 = vpop.xlane.xlu1 %5853  ;;  %v5874_v38 = vmul.f32 %v15727_v49, %v15727_v49  ;;  %v5875_v22 = vmul.f32 %v15730_v34, %v15730_v34  ;;  %v5876_v3 = vmul.f32 %v15733_v62, %v15733_v62  ;;  %v13566_v9 = vld [vmem:[#allocation16 + $0x4e4] ss:$48 sps:$4 sm:$0xff]  }
0x15f2   :  { %v5858_v51 = vmul.f32 0.0026041667, %v5854_v44  ;;  %v5883_v5 = vadd.f32 %v5872_v0, %v5871_v52  ;;  %v13564_v52 = vld [vmem:[#allocation16 + $0x4e0] ss:$48 sps:$4 sm:$0xff]   ;;  %v13567_v0 = vld [vmem:[#allocation16 + $0x4e8] ss:$48 sps:$4 sm:$0xff]   ;;  %7803 = vmatprep.subr.bf16.mxu0 %v13566_v9 }
0x15f3   :  { %v15748_v8 = vsub.f32 %v15695_v20, %v5857_v10  ;;  %v15751_v36 = vsub.f32 %v15700_v50, %v5857_v10  ;;  %v15754_v53 = vsub.f32 %v15705_v33, %v5857_v10  ;;  %v5887_v16 = vadd.f32 %v5875_v22, %v5874_v38  ;;  %v13569_v10 = vld [vmem:[#allocation16 + $0x4ec] ss:$48 sps:$4 sm:$0xff]   ;;  %v13572_v44 = vld [vmem:[#allocation16 + $0x544] ss:$48 sps:$4 sm:$0xff]   ;;  %7804 = vmatpush1.bf16.msra.mxu0 %v13564_v52  ;;  %v13570_v22 = vld [vmem:[#allocation16 + $0x540] ss:$48 sps:$4 sm:$0xff]  }
0x15f4   :  { %v15757_v6 = vsub.f32 %v15702_v31, %v5858_v51  ;;  %v15760_v1 = vsub.f32 %v15707_v40, %v5858_v51  ;;  %v15763_v32 = vsub.f32 %v15711_v7, %v5858_v51  ;;  %v5884_v42 = vadd.f32 %v5883_v5, %v5873_v12  ;;  %v13575_v38 = vld [vmem:[#allocation16 + $0x54c] ss:$48 sps:$4 sm:$0xff]   ;;  %7909 = vmatprep.subr.bf16.mxu1 %v13569_v10  ;;  %v13573_v51 = vld [vmem:[#allocation16 + $0x548] ss:$48 sps:$4 sm:$0xff]   ;;  %v13578_v12 = vld [vmem:[#allocation16 + $0x5a4] ss:$48 sps:$4 sm:$0xff]  }
0x15f5   :  { %v5888_v59 = vadd.f32 %v5887_v16, %v5876_v3  ;;  %v5877_v57 = vmul.f32 %v15748_v8, %v15748_v8  ;;  %v5878_v55 = vmul.f32 %v15751_v36, %v15751_v36  ;;  %v5879_v63 = vmul.f32 %v15754_v53, %v15754_v53  ;;  %7910 = vmatpush1.bf16.msra.mxu1 %v13567_v0  ;;  %v13581_v5 = vld [vmem:[#allocation16 + $0x5ac] ss:$48 sps:$4 sm:$0xff]   ;;  %v13576_v3 = vld [vmem:[#allocation16 + $0x5a0] ss:$48 sps:$4 sm:$0xff]   ;;  %v13579_v16 = vld [vmem:[#allocation16 + $0x5a8] ss:$48 sps:$4 sm:$0xff]  }
0x15f6   :  { %5885 = vadd.xlane.f32.xlu0 %v5884_v42  ;;  %v5880_v45 = vmul.f32 %v15757_v6, %v15757_v6  ;;  %v5881_v25 = vmul.f32 %v15760_v1, %v15760_v1  ;;  %v5882_v35 = vmul.f32 %v15763_v32, %v15763_v32  ;;  %7805 = vmatprep.subr.bf16.mxu0 %v13572_v44  ;;  %v13584_v42 = vld [vmem:[#allocation16 + $0x604] ss:$48 sps:$4 sm:$0xff]  }
0x15f7   :  { %5889 = vadd.xlane.f32.xlu1 %v5888_v59  ;;  %v5891_v23 = vadd.f32 %v5878_v55, %v5877_v57  ;;  %7911 = vmatprep.subr.bf16.mxu1 %v13575_v38  ;;  %v13587_v59 = vld [vmem:[#allocation16 + $0x60c] ss:$48 sps:$4 sm:$0xff]  }
0x15f8   :  { %v5895_v37 = vadd.f32 %v5881_v25, %v5880_v45  ;;  %7806 = vmatpush1.bf16.msra.mxu0 %v13570_v22 }
0x15f9   :  { %v5892_v48 = vadd.f32 %v5891_v23, %v5879_v63  ;;  %7912 = vmatpush1.bf16.msra.mxu1 %v13573_v51  ;;  %7807 = vmatprep.subr.bf16.mxu0 %v13578_v12 }
0x15fa   :  { %v5896_v47 = vadd.f32 %v5895_v37, %v5882_v35  ;;  %7913 = vmatprep.subr.bf16.mxu1 %v13581_v5 }
0x15fb   :  { %5893 = vadd.xlane.f32.xlu0 %v5892_v48 }
0x15fc   :  { %5897 = vadd.xlane.f32.xlu1 %v5896_v47  ;;  %7808 = vmatpush1.bf16.msra.mxu0 %v13576_v3 }
0x15fd   :  { %7914 = vmatpush1.bf16.msra.mxu1 %v13579_v16  ;;  %7830 = vmatprep.subr.bf16.mxu0 %v13584_v42 }
0x15fe   :  { %7936 = vmatprep.subr.bf16.mxu1 %v13587_v59  ;;  %v13582_v59 = vld [vmem:[#allocation16 + $0x600] ss:$48 sps:$4 sm:$0xff]  }
0x1683   :  { %v5886_v57 = vpop.xlane.xlu0 %5885 }
0x1684   :  { %v5899_v55 = vmul.f32 0.0026041667, %v5886_v57  ;;  %v5890_v45 = vpop.xlane.xlu1 %5889  ;;  %v13585_v57 = vld [vmem:[#allocation16 + $0x608] ss:$48 sps:$4 sm:$0xff]  }
0x1685   :  { %v5900_v25 = vmul.f32 0.0026041667, %v5890_v45 }
0x1686   :  { %v5903_v63 = vadd.f32 1e-05, %v5899_v55 }
0x1687   :  { %v5904_v23 = vadd.f32 1e-05, %v5900_v25  ;;  %v13590_v25 = vld [vmem:[#allocation16 + $0x664] ss:$48 sps:$4 sm:$0xff]  }
0x1688   :  { %14406 = vrsqrt.f32 %v5903_v63  ;;  %v5894_v35 = vpop.xlane.xlu0 %5893  ;;  %v13593_v63 = vld [vmem:[#allocation16 + $0x66c] ss:$48 sps:$4 sm:$0xff]  }
0x1689   :  { %14408 = vrsqrt.f32 %v5904_v23  ;;  %v5901_v37 = vmul.f32 0.0026041667, %v5894_v35  ;;  %v5898_v48 = vpop.xlane.xlu1 %5897 }
0x168a   :  { %v5902_v47 = vmul.f32 0.0026041667, %v5898_v48 }
0x168b   :  { %v5905_v56 = vadd.f32 1e-05, %v5901_v37  ;;  %v13591_v37 = vld [vmem:[#allocation16 + $0x668] ss:$48 sps:$4 sm:$0xff]  }
0x168c   :  { %v5906_v58 = vadd.f32 1e-05, %v5902_v47  ;;  %v13596_v47 = vld [vmem:[#allocation16 + $0x6c4] ss:$48 sps:$4 sm:$0xff]  }
0x168d   :  { %14410 = vrsqrt.f32 %v5905_v56  ;;  %v13599_v56 = vld [vmem:[#allocation16 + $0x6cc] ss:$48 sps:$4 sm:$0xff]  }
0x168e   :  { %14412 = vrsqrt.f32 %v5906_v58 }
0x1692   :  { %v15785_v26 = vpop.eup %14406 }
0x1693   :  { %v15787_v61 = vpop.eup %14408  ;;  %v5912_v41 = vmul.f32 %v15785_v26, %v15721_v21  ;;  %v5911_v30 = vmul.f32 %v15785_v26, %v15718_v60 }
0x1694   :  { %v5915_v52 = vmul.f32 %v15787_v61, %v15730_v34  ;;  %v5914_v9 = vmul.f32 %v15787_v61, %v15727_v49 }
0x1695   :  { %v5940_v0 = vmul.f32 %v5931_v15, %v5912_v41  ;;  %v5939_v10 = vmul.f32 %v5927_v18, %v5911_v30  ;;  %v13597_v41 = vld [vmem:[#allocation16 + $0x6c8] ss:$48 sps:$4 sm:$0xff]   ;;  %v13602_v30 = vld [vmem:[#allocation16 + $0x724] ss:$48 sps:$4 sm:$0xff]  }
0x1696   :  { %v5943_v44 = vmul.f32 %v5931_v15, %v5915_v52  ;;  %v5942_v38 = vmul.f32 %v5927_v18, %v5914_v9  ;;  %v13605_v52 = vld [vmem:[#allocation16 + $0x72c] ss:$48 sps:$4 sm:$0xff]   ;;  %v13603_v9 = vld [vmem:[#allocation16 + $0x728] ss:$48 sps:$4 sm:$0xff]  }
0x1697   :  { %v15801_v21 = vpop.eup %14410  ;;  %v5968_v22 = vadd.f32 %v5959_v17, %v5940_v0  ;;  %v5967_v51 = vadd.f32 %v5955_v13, %v5939_v10  ;;  %v13608_v0 = vld [vmem:[#allocation16 + $0x784] ss:$48 sps:$4 sm:$0xff]   ;;  %v13611_v10 = vld [vmem:[#allocation16 + $0x78c] ss:$48 sps:$4 sm:$0xff]  }
0x1698   :  { %v15803_v12 = vpop.eup %14412  ;;  %v5971_v60 = vadd.f32 %v5959_v17, %v5943_v44  ;;  %v5970_v5 = vadd.f32 %v5955_v13, %v5942_v38  ;;  %v5918_v3 = vmul.f32 %v15801_v21, %v15751_v36  ;;  %v5917_v34 = vmul.f32 %v15801_v21, %v15748_v8  ;;  %v13606_v44 = vld [vmem:[#allocation16 + $0x780] ss:$48 sps:$4 sm:$0xff]   ;;  %v13609_v38 = vld [vmem:[#allocation16 + $0x788] ss:$48 sps:$4 sm:$0xff]  }
0x1699   :  { %v5921_v49 = vmul.f32 %v15803_v12, %v15760_v1  ;;  %v5920_v16 = vmul.f32 %v15803_v12, %v15757_v6  ;;  %v13588_v1 = vld [vmem:[#allocation16 + $0x660] ss:$48 sps:$4 sm:$0xff]  }
0x169a   :  { %v15813_v42 = vpack.c.bf16 %v5971_v60, %v5968_v22  ;;  %v15815_v55 = vpack.c.bf16 %v5970_v5, %v5967_v51  ;;  %v5946_v45 = vmul.f32 %v5931_v15, %v5918_v3  ;;  %v5945_v36 = vmul.f32 %v5927_v18, %v5917_v34  ;;  %v13614_v22 = vld [vmem:[#allocation16 + $0x7e4] ss:$48 sps:$4 sm:$0xff]   ;;  %v13617_v51 = vld [vmem:[#allocation16 + $0x7ec] ss:$48 sps:$4 sm:$0xff]   ;;  %v13612_v60 = vld [vmem:[#allocation16 + $0x7e0] ss:$48 sps:$4 sm:$0xff]  }
0x169b   :  { %v5949_v23 = vmul.f32 %v5931_v15, %v5921_v49  ;;  %v5948_v35 = vmul.f32 %v5927_v18, %v5920_v16  ;;  %v13594_v18 = vld [vmem:[#allocation16 + $0x6c0] ss:$48 sps:$4 sm:$0xff]   ;;  %v13615_v5 = vld [vmem:[#allocation16 + $0x7e8] ss:$48 sps:$4 sm:$0xff]   ;;  %v13620_v3 = vld [vmem:[#allocation16 + $0x844] ss:$48 sps:$4 sm:$0xff]   ;;  %v5916_v49 = vmul.f32 %v15787_v61, %v15733_v62  ;;  %v5913_v16 = vmul.f32 %v15785_v26, %v15724_v11 }
0x169c   :  { %7809 = vmatprep.mubr.bf16.mxu0 %v15813_v42  ;;  %7915 = vmatprep.mubr.bf16.mxu1 %v15813_v42  ;;  %v5974_v8 = vadd.f32 %v5959_v17, %v5946_v45  ;;  %v5973_v58 = vadd.f32 %v5955_v13, %v5945_v36  ;;  %v13623_v34 = vld [vmem:[#allocation16 + $0x84c] ss:$48 sps:$4 sm:$0xff]   ;;  %v13621_v45 = vld [vmem:[#allocation16 + $0x848] ss:$48 sps:$4 sm:$0xff]   ;;  %v13624_v62 = vld [vmem:[#allocation16 + $0x8a0] ss:$48 sps:$4 sm:$0xff]  }
0x169d   :  { %7810 = vmatmul.mubr.bf16.vlgmr.msra.gmra.mrb[40].mxu0 %v15815_v55  ;;  %7916 = vmatmul.mubr.bf16.vlgmr.msra.gmra.mrb[68].mxu1 %v15815_v55  ;;  %v5977_v6 = vadd.f32 %v5959_v17, %v5949_v23  ;;  %v5976_v15 = vadd.f32 %v5955_v13, %v5948_v35  ;;  %v13600_v13 = vld [vmem:[#allocation16 + $0x720] ss:$48 sps:$4 sm:$0xff]   ;;  %v5963_v35 = vrot.slane %v15779_v19, %v16142_v2  ;;  %v13627_v11 = vld [vmem:[#allocation16 + $0x8a8] ss:$48 sps:$4 sm:$0xff]   ;;  %v13632_v26 = vld [vmem:[#allocation16 + $0x14] ss:$48 sps:$4 sm:$0xff]  }
0x169e   :  { %7831 = vmatpush1.bf16.msra.mxu0 %v13582_v59  ;;  %7937 = vmatpush1.bf16.msra.mxu1 %v13585_v57  ;;  %v5935_v59 = vrot.slane %v15777_v39, %v16142_v2  ;;  %v13618_v57 = vld [vmem:[#allocation16 + $0x840] ss:$48 sps:$4 sm:$0xff]   ;;  %v13635_v61 = vld [vmem:[#allocation16 + $0x1c] ss:$48 sps:$4 sm:$0xff]   ;;  %v13633_v19 = vld [vmem:[#allocation16 + $0x18] ss:$48 sps:$4 sm:$0xff]  }
0x169f   :  { %7832 = vmatprep.subr.bf16.mxu0 %v13590_v25  ;;  %7938 = vmatprep.subr.bf16.mxu1 %v13593_v63  ;;  %v15821_v48 = vpack.c.bf16 %v5977_v6, %v5974_v8  ;;  %v15825_v17 = vpack.c.bf16 %v5976_v15, %v5973_v58  ;;  %v13626_v25 = vld [vmem:[#allocation16 + $0x8a4] ss:$48 sps:$4 sm:$0xff]   ;;  %v13629_v63 = vld [vmem:[#allocation16 + $0x8ac] ss:$48 sps:$4 sm:$0xff]   ;;  %v5919_v8 = vmul.f32 %v15801_v21, %v15754_v53  ;;  %v13636_v53 = vld [vmem:[#allocation16 + $0x70] ss:$48 sps:$4 sm:$0xff]  }
0x16a0   :  { %v5944_v23 = vmul.f32 %v5935_v59, %v5916_v49  ;;  %v5941_v36 = vmul.f32 %v5935_v59, %v5913_v16  ;;  %v5922_v6 = vmul.f32 %v15803_v12, %v15763_v32  ;;  %v13641_v58 = vld [vmem:[#allocation16 + $0x7c] ss:$48 sps:$4 sm:$0xff]   ;;  %v13639_v32 = vld [vmem:[#allocation16 + $0x78] ss:$48 sps:$4 sm:$0xff]   ;;  %v13660_v49 = vld [vmem:[#allocation16 + $0x1f0] ss:$48 sps:$4 sm:$0xff]  }
0x16a1   :  { %7819 = vmatprep.mubr.bf16.mxu0 %v15821_v48  ;;  %7925 = vmatprep.mubr.bf16.mxu1 %v15821_v48  ;;  %v5947_v15 = vmul.f32 %v5935_v59, %v5919_v8  ;;  %v13663_v16 = vld [vmem:[#allocation16 + $0x1f8] ss:$48 sps:$4 sm:$0xff]   ;;  %v13689_v8 = vld [vmem:[#allocation16 + $0x37c] ss:$48 sps:$4 sm:$0xff]  }
0x16a2   :  { %7833 = vmatpush1.bf16.msra.mxu0 %v13588_v1  ;;  %7939 = vmatpush1.bf16.msra.mxu1 %v13591_v37  ;;  %v5972_v39 = vadd.f32 %v5963_v35, %v5944_v23  ;;  %v5969_v1 = vadd.f32 %v5963_v35, %v5941_v36  ;;  %v13630_v37 = vld [vmem:[#allocation16 + $0x10] ss:$48 sps:$4 sm:$0xff]   ;;  %v13677_v23 = vld [vmem:[#allocation16 + $0x2bc] ss:$48 sps:$4 sm:$0xff]  }
0x16a3   :  { %7834 = vmatprep.subr.bf16.mxu0 %v13596_v47  ;;  %7940 = vmatprep.subr.bf16.mxu1 %v13599_v56  ;;  %v13638_v56 = vld [vmem:[#allocation16 + $0x74] ss:$48 sps:$4 sm:$0xff]   ;;  %v5975_v21 = vadd.f32 %v5963_v35, %v5947_v15  ;;  %v13672_v36 = vld [vmem:[#allocation16 + $0x2b0] ss:$48 sps:$4 sm:$0xff]  }
0x16a4   :  { %v15843_v47 = vpack.c.bf16 %v5972_v39, %v5969_v1  ;;  %v13678_v39 = vld [vmem:[#allocation16 + $0x310] ss:$48 sps:$4 sm:$0xff]   ;;  %v13687_v1 = vld [vmem:[#allocation16 + $0x378] ss:$48 sps:$4 sm:$0xff]   ;;  %v13698_v15 = vld [vmem:[#allocation16 + $0x434] ss:$48 sps:$4 sm:$0xff]  }
0x16a5   :  { %7820 = vmatmul.mubr.bf16.gmra.mrb[44].mxu0 %v15825_v17  ;;  %7926 = vmatmul.mubr.bf16.gmra.mrb[72].mxu1 %v15825_v17 }
0x16a6   :  { %7835 = vmatpush1.bf16.msra.mxu0 %v13594_v18  ;;  %7941 = vmatpush1.bf16.msra.mxu1 %v13597_v41  ;;  %v5950_v18 = vmul.f32 %v5935_v59, %v5922_v6  ;;  %v13644_v41 = vld [vmem:[#allocation16 + $0xd4] ss:$48 sps:$4 sm:$0xff]   ;;  %v13684_v6 = vld [vmem:[#allocation16 + $0x370] ss:$48 sps:$4 sm:$0xff]  }
0x16a7   :  { %7836 = vmatprep.subr.bf16.mxu0 %v13602_v30  ;;  %7942 = vmatprep.subr.bf16.mxu1 %v13605_v52  ;;  %v13647_v30 = vld [vmem:[#allocation16 + $0xdc] ss:$48 sps:$4 sm:$0xff]   ;;  %v13642_v52 = vld [vmem:[#allocation16 + $0xd0] ss:$48 sps:$4 sm:$0xff]   ;;  %v13668_v59 = vld [vmem:[#allocation16 + $0x254] ss:$48 sps:$4 sm:$0xff]  }
0x16a8   :  { %7862 = vmatprep.mubr.bf16.mxu0 %v16128_v4  ;;  %7968 = vmatprep.mubr.bf16.mxu1 %v16128_v4  ;;  %v5978_v12 = vadd.f32 %v5963_v35, %v5950_v18  ;;  %v13675_v35 = vld [vmem:[#allocation16 + $0x2b8] ss:$48 sps:$4 sm:$0xff]   ;;  %v13701_v18 = vld [vmem:[#allocation16 + $0x43c] ss:$48 sps:$4 sm:$0xff]  }
0x16aa   :  { %7837 = vmatpush1.bf16.msra.mxu0 %v13600_v13  ;;  %7943 = vmatpush1.bf16.msra.mxu1 %v13603_v9  ;;  %v15849_v13 = vpack.c.bf16 %v5978_v12, %v5975_v21  ;;  %v13645_v9 = vld [vmem:[#allocation16 + $0xd8] ss:$48 sps:$4 sm:$0xff]   ;;  %v13704_v21 = vld [vmem:[#allocation16 + $0x494] ss:$48 sps:$4 sm:$0xff]   ;;  %v13707_v12 = vld [vmem:[#allocation16 + $0x49c] ss:$48 sps:$4 sm:$0xff]  }
0x16ab   :  { %7838 = vmatprep.subr.bf16.mxu0 %v13608_v0  ;;  %7944 = vmatprep.subr.bf16.mxu1 %v13611_v10  ;;  %v13650_v0 = vld [vmem:[#allocation16 + $0x134] ss:$48 sps:$4 sm:$0xff]   ;;  %v13653_v10 = vld [vmem:[#allocation16 + $0x13c] ss:$48 sps:$4 sm:$0xff]  }
0x16ae   :  { %7839 = vmatpush1.bf16.msra.mxu0 %v13606_v44  ;;  %7945 = vmatpush1.bf16.msra.mxu1 %v13609_v38  ;;  %v13648_v44 = vld [vmem:[#allocation16 + $0x130] ss:$48 sps:$4 sm:$0xff]   ;;  %v13651_v38 = vld [vmem:[#allocation16 + $0x138] ss:$48 sps:$4 sm:$0xff]  }
0x16af   :  { %7840 = vmatprep.subr.bf16.mxu0 %v13614_v22  ;;  %7946 = vmatprep.subr.bf16.mxu1 %v13617_v51  ;;  %v13656_v22 = vld [vmem:[#allocation16 + $0x194] ss:$48 sps:$4 sm:$0xff]   ;;  %v13659_v51 = vld [vmem:[#allocation16 + $0x19c] ss:$48 sps:$4 sm:$0xff]  }
0x16b2   :  { %7841 = vmatpush1.bf16.msra.mxu0 %v13612_v60  ;;  %7947 = vmatpush1.bf16.msra.mxu1 %v13615_v5  ;;  %v13654_v60 = vld [vmem:[#allocation16 + $0x190] ss:$48 sps:$4 sm:$0xff]   ;;  %v13657_v5 = vld [vmem:[#allocation16 + $0x198] ss:$48 sps:$4 sm:$0xff]  }
0x16b3   :  { %7842 = vmatprep.subr.bf16.mxu0 %v13620_v3  ;;  %7948 = vmatprep.subr.bf16.mxu1 %v13623_v34  ;;  %v13662_v3 = vld [vmem:[#allocation16 + $0x1f4] ss:$48 sps:$4 sm:$0xff]   ;;  %v13665_v34 = vld [vmem:[#allocation16 + $0x1fc] ss:$48 sps:$4 sm:$0xff]  }
0x16b6   :  { %7843 = vmatpush1.bf16.msra.mxu0 %v13618_v57  ;;  %7949 = vmatpush1.bf16.msra.mxu1 %v13621_v45  ;;  %v13671_v57 = vld [vmem:[#allocation16 + $0x25c] ss:$48 sps:$4 sm:$0xff]   ;;  %v13666_v45 = vld [vmem:[#allocation16 + $0x250] ss:$48 sps:$4 sm:$0xff]  }
0x16b7   :  { %7844 = vmatprep.subr.bf16.mxu0 %v13626_v25  ;;  %7950 = vmatprep.subr.bf16.mxu1 %v13629_v63  ;;  %v13669_v25 = vld [vmem:[#allocation16 + $0x258] ss:$48 sps:$4 sm:$0xff]   ;;  %v13674_v63 = vld [vmem:[#allocation16 + $0x2b4] ss:$48 sps:$4 sm:$0xff]  }
0x16ba   :  { %7845 = vmatpush1.bf16.msra.mxu0 %v13624_v62  ;;  %7951 = vmatpush1.bf16.msra.mxu1 %v13627_v11  ;;  %v13680_v62 = vld [vmem:[#allocation16 + $0x314] ss:$48 sps:$4 sm:$0xff]   ;;  %v13683_v11 = vld [vmem:[#allocation16 + $0x31c] ss:$48 sps:$4 sm:$0xff]  }
0x16bb   :  { %7989 = vmatprep.subr.bf16.mxu0 %v13632_v26  ;;  %8095 = vmatprep.subr.bf16.mxu1 %v13635_v61  ;;  %v13681_v26 = vld [vmem:[#allocation16 + $0x318] ss:$48 sps:$4 sm:$0xff]   ;;  %v13686_v61 = vld [vmem:[#allocation16 + $0x374] ss:$48 sps:$4 sm:$0xff]  }
0x16bd   :  { %7863 = vmatmul.mubr.bf16.vlgmr.msra.gmra.mrb[40].mxu0 %v15843_v47  ;;  %7969 = vmatmul.mubr.bf16.vlgmr.msra.gmra.mrb[68].mxu1 %v15843_v47 }
0x16be   :  { %7990 = vmatpush1.bf16.msra.mxu0 %v13630_v37  ;;  %8096 = vmatpush1.bf16.msra.mxu1 %v13633_v19  ;;  %v13692_v37 = vld [vmem:[#allocation16 + $0x3d4] ss:$48 sps:$4 sm:$0xff]   ;;  %v13695_v19 = vld [vmem:[#allocation16 + $0x3dc] ss:$48 sps:$4 sm:$0xff]  }
0x16bf   :  { %7991 = vmatprep.subr.bf16.mxu0 %v13638_v56  ;;  %8097 = vmatprep.subr.bf16.mxu1 %v13641_v58  ;;  %v13690_v56 = vld [vmem:[#allocation16 + $0x3d0] ss:$48 sps:$4 sm:$0xff]   ;;  %v13693_v58 = vld [vmem:[#allocation16 + $0x3d8] ss:$48 sps:$4 sm:$0xff]  }
0x16c0   :  { %7872 = vmatprep.mubr.bf16.mxu0 %v16128_v4  ;;  %7978 = vmatprep.mubr.bf16.mxu1 %v16128_v4 }
0x16c2   :  { %7992 = vmatpush1.bf16.msra.mxu0 %v13636_v53  ;;  %8098 = vmatpush1.bf16.msra.mxu1 %v13639_v32  ;;  %v13696_v53 = vld [vmem:[#allocation16 + $0x430] ss:$48 sps:$4 sm:$0xff]   ;;  %v13699_v32 = vld [vmem:[#allocation16 + $0x438] ss:$48 sps:$4 sm:$0xff]  }
0x16c3   :  { %7993 = vmatprep.subr.bf16.mxu0 %v13644_v41  ;;  %8099 = vmatprep.subr.bf16.mxu1 %v13647_v30  ;;  %v13702_v41 = vld [vmem:[#allocation16 + $0x490] ss:$48 sps:$4 sm:$0xff]   ;;  %v13705_v30 = vld [vmem:[#allocation16 + $0x498] ss:$48 sps:$4 sm:$0xff]  }
0x16c5   :  { %7873 = vmatmul.mubr.bf16.gmra.mrb[44].mxu0 %v15849_v13  ;;  %7979 = vmatmul.mubr.bf16.gmra.mrb[72].mxu1 %v15849_v13 }
0x16c6   :  { %7994 = vmatpush1.bf16.msra.mxu0 %v13642_v52  ;;  %8021 = vmatprep.mubr.bf16.mxu0 %v15813_v42  ;;  %v13710_v52 = vld [vmem:[#allocation16 + $0x4f4] ss:$48 sps:$4 sm:$0xff]  }
0x16c7   :  { %8100 = vmatpush1.bf16.msra.mxu1 %v13645_v9  ;;  %8127 = vmatprep.mubr.bf16.mxu1 %v15813_v42  ;;  %v13713_v9 = vld [vmem:[#allocation16 + $0x4fc] ss:$48 sps:$4 sm:$0xff]  }
0x16c8   :  { %7995 = vmatprep.subr.bf16.mxu0 %v13650_v0  ;;  %8101 = vmatprep.subr.bf16.mxu1 %v13653_v10  ;;  %v13708_v0 = vld [vmem:[#allocation16 + $0x4f0] ss:$48 sps:$4 sm:$0xff]   ;;  %v13711_v10 = vld [vmem:[#allocation16 + $0x4f8] ss:$48 sps:$4 sm:$0xff]  }
0x16ca   :  { %7996 = vmatpush1.bf16.msra.mxu0 %v13648_v44  ;;  %v13716_v44 = vld [vmem:[#allocation16 + $0x554] ss:$48 sps:$4 sm:$0xff]  }
0x16cb   :  { %8102 = vmatpush1.bf16.msra.mxu1 %v13651_v38  ;;  %7997 = vmatprep.subr.bf16.mxu0 %v13656_v22  ;;  %v13719_v38 = vld [vmem:[#allocation16 + $0x55c] ss:$48 sps:$4 sm:$0xff]   ;;  %v13714_v22 = vld [vmem:[#allocation16 + $0x550] ss:$48 sps:$4 sm:$0xff]  }
0x16cc   :  { %8103 = vmatprep.subr.bf16.mxu1 %v13659_v51  ;;  %v13717_v51 = vld [vmem:[#allocation16 + $0x558] ss:$48 sps:$4 sm:$0xff]  }
0x16ce   :  { %7998 = vmatpush1.bf16.msra.mxu0 %v13654_v60  ;;  %v13722_v60 = vld [vmem:[#allocation16 + $0x5b4] ss:$48 sps:$4 sm:$0xff]  }
0x16cf   :  { %8104 = vmatpush1.bf16.msra.mxu1 %v13657_v5  ;;  %7999 = vmatprep.subr.bf16.mxu0 %v13662_v3  ;;  %v13725_v5 = vld [vmem:[#allocation16 + $0x5bc] ss:$48 sps:$4 sm:$0xff]   ;;  %v13720_v3 = vld [vmem:[#allocation16 + $0x5b0] ss:$48 sps:$4 sm:$0xff]  }
0x16d0   :  { %8105 = vmatprep.subr.bf16.mxu1 %v13665_v34  ;;  %v13723_v34 = vld [vmem:[#allocation16 + $0x5b8] ss:$48 sps:$4 sm:$0xff]  }
0x16d2   :  { %8000 = vmatpush1.bf16.msra.mxu0 %v13660_v49  ;;  %v13728_v49 = vld [vmem:[#allocation16 + $0x614] ss:$48 sps:$4 sm:$0xff]  }
0x16d3   :  { %8106 = vmatpush1.bf16.msra.mxu1 %v13663_v16  ;;  %8001 = vmatprep.subr.bf16.mxu0 %v13668_v59  ;;  %v13731_v16 = vld [vmem:[#allocation16 + $0x61c] ss:$48 sps:$4 sm:$0xff]   ;;  %v13726_v59 = vld [vmem:[#allocation16 + $0x610] ss:$48 sps:$4 sm:$0xff]  }
0x16d4   :  { %8107 = vmatprep.subr.bf16.mxu1 %v13671_v57  ;;  %v13729_v57 = vld [vmem:[#allocation16 + $0x618] ss:$48 sps:$4 sm:$0xff]  }
0x16d6   :  { %8002 = vmatpush1.bf16.msra.mxu0 %v13666_v45  ;;  %v13734_v45 = vld [vmem:[#allocation16 + $0x674] ss:$48 sps:$4 sm:$0xff]  }
0x16d7   :  { %8108 = vmatpush1.bf16.msra.mxu1 %v13669_v25  ;;  %8003 = vmatprep.subr.bf16.mxu0 %v13674_v63  ;;  %v13737_v25 = vld [vmem:[#allocation16 + $0x67c] ss:$48 sps:$4 sm:$0xff]   ;;  %v13732_v63 = vld [vmem:[#allocation16 + $0x670] ss:$48 sps:$4 sm:$0xff]  }
0x16d8   :  { %8109 = vmatprep.subr.bf16.mxu1 %v13677_v23  ;;  %v13735_v23 = vld [vmem:[#allocation16 + $0x678] ss:$48 sps:$4 sm:$0xff]  }
0x16da   :  { %8004 = vmatpush1.bf16.msra.mxu0 %v13672_v36  ;;  %v13740_v36 = vld [vmem:[#allocation16 + $0x6d4] ss:$48 sps:$4 sm:$0xff]  }
0x16db   :  { %8110 = vmatpush1.bf16.msra.mxu1 %v13675_v35  ;;  %8005 = vmatprep.subr.bf16.mxu0 %v13680_v62  ;;  %v13743_v35 = vld [vmem:[#allocation16 + $0x6dc] ss:$48 sps:$4 sm:$0xff]   ;;  %v13738_v62 = vld [vmem:[#allocation16 + $0x6d0] ss:$48 sps:$4 sm:$0xff]  }
0x16dc   :  { %8111 = vmatprep.subr.bf16.mxu1 %v13683_v11  ;;  %v13741_v11 = vld [vmem:[#allocation16 + $0x6d8] ss:$48 sps:$4 sm:$0xff]  }
0x16de   :  { %8006 = vmatpush1.bf16.msra.mxu0 %v13678_v39  ;;  %v13746_v39 = vld [vmem:[#allocation16 + $0x734] ss:$48 sps:$4 sm:$0xff]  }
0x16df   :  { %8112 = vmatpush1.bf16.msra.mxu1 %v13681_v26  ;;  %8007 = vmatprep.subr.bf16.mxu0 %v13686_v61  ;;  %v13749_v26 = vld [vmem:[#allocation16 + $0x73c] ss:$48 sps:$4 sm:$0xff]   ;;  %v13744_v61 = vld [vmem:[#allocation16 + $0x730] ss:$48 sps:$4 sm:$0xff]  }
0x16e0   :  { %8113 = vmatprep.subr.bf16.mxu1 %v13689_v8  ;;  %v13747_v8 = vld [vmem:[#allocation16 + $0x738] ss:$48 sps:$4 sm:$0xff]  }
0x16e2   :  { %8008 = vmatpush1.bf16.msra.mxu0 %v13684_v6  ;;  %v13752_v6 = vld [vmem:[#allocation16 + $0x794] ss:$48 sps:$4 sm:$0xff]  }
0x16e3   :  { %8114 = vmatpush1.bf16.msra.mxu1 %v13687_v1  ;;  %8009 = vmatprep.subr.bf16.mxu0 %v13692_v37  ;;  %v13755_v1 = vld [vmem:[#allocation16 + $0x79c] ss:$48 sps:$4 sm:$0xff]   ;;  %v13750_v37 = vld [vmem:[#allocation16 + $0x790] ss:$48 sps:$4 sm:$0xff]  }
0x16e4   :  { %8115 = vmatprep.subr.bf16.mxu1 %v13695_v19  ;;  %v13753_v19 = vld [vmem:[#allocation16 + $0x798] ss:$48 sps:$4 sm:$0xff]  }
0x16e6   :  { %8010 = vmatpush1.bf16.msra.mxu0 %v13690_v56  ;;  %v13758_v56 = vld [vmem:[#allocation16 + $0x7f4] ss:$48 sps:$4 sm:$0xff]  }
0x16e7   :  { %8116 = vmatpush1.bf16.msra.mxu1 %v13693_v58  ;;  %8011 = vmatprep.subr.bf16.mxu0 %v13698_v15  ;;  %v13761_v58 = vld [vmem:[#allocation16 + $0x7fc] ss:$48 sps:$4 sm:$0xff]   ;;  %v13756_v15 = vld [vmem:[#allocation16 + $0x7f0] ss:$48 sps:$4 sm:$0xff]  }
0x16e8   :  { %8117 = vmatprep.subr.bf16.mxu1 %v13701_v18  ;;  %v13759_v18 = vld [vmem:[#allocation16 + $0x7f8] ss:$48 sps:$4 sm:$0xff]  }
0x16ea   :  { %8012 = vmatpush1.bf16.msra.mxu0 %v13696_v53  ;;  %v13764_v53 = vld [vmem:[#allocation16 + $0x854] ss:$48 sps:$4 sm:$0xff]  }
0x16eb   :  { %8118 = vmatpush1.bf16.msra.mxu1 %v13699_v32  ;;  %8013 = vmatprep.subr.bf16.mxu0 %v13704_v21  ;;  %v13767_v32 = vld [vmem:[#allocation16 + $0x85c] ss:$48 sps:$4 sm:$0xff]   ;;  %v13762_v21 = vld [vmem:[#allocation16 + $0x850] ss:$48 sps:$4 sm:$0xff]  }
0x16ec   :  { %8119 = vmatprep.subr.bf16.mxu1 %v13707_v12  ;;  %v13765_v12 = vld [vmem:[#allocation16 + $0x858] ss:$48 sps:$4 sm:$0xff]  }
0x16ee   :  { %8014 = vmatpush1.bf16.msra.mxu0 %v13702_v41  ;;  %v13770_v41 = vld [vmem:[#allocation16 + $0x8b4] ss:$48 sps:$4 sm:$0xff]  }
0x16ef   :  { %8120 = vmatpush1.bf16.msra.mxu1 %v13705_v30  ;;  %8015 = vmatprep.subr.bf16.mxu0 %v13710_v52  ;;  %v13773_v30 = vld [vmem:[#allocation16 + $0x8bc] ss:$48 sps:$4 sm:$0xff]   ;;  %v13768_v52 = vld [vmem:[#allocation16 + $0x8b0] ss:$48 sps:$4 sm:$0xff]  }
0x16f0   :  { %8121 = vmatprep.subr.bf16.mxu1 %v13713_v9  ;;  %v13771_v9 = vld [vmem:[#allocation16 + $0x8b8] ss:$48 sps:$4 sm:$0xff]  }
0x16f2   :  { %8016 = vmatpush1.bf16.msra.mxu0 %v13708_v0  ;;  %v13776_v0 = vld [vmem:[#allocation16 + $0x24] ss:$48 sps:$4 sm:$0xff]  }
0x16f3   :  { %8122 = vmatpush1.bf16.msra.mxu1 %v13711_v10  ;;  %8017 = vmatprep.subr.bf16.mxu0 %v13716_v44  ;;  %v13779_v10 = vld [vmem:[#allocation16 + $0x2c] ss:$48 sps:$4 sm:$0xff]   ;;  %v13774_v44 = vld [vmem:[#allocation16 + $0x20] ss:$48 sps:$4 sm:$0xff]  }
0x16f4   :  { %8123 = vmatprep.subr.bf16.mxu1 %v13719_v38  ;;  %v13777_v38 = vld [vmem:[#allocation16 + $0x28] ss:$48 sps:$4 sm:$0xff]  }
0x16f6   :  { %8018 = vmatpush1.bf16.msra.mxu0 %v13714_v22  ;;  %v13782_v22 = vld [vmem:[#allocation16 + $0x84] ss:$48 sps:$4 sm:$0xff]  }
0x16f7   :  { %8124 = vmatpush1.bf16.msra.mxu1 %v13717_v51  ;;  %8019 = vmatprep.subr.bf16.mxu0 %v13722_v60  ;;  %v13785_v51 = vld [vmem:[#allocation16 + $0x8c] ss:$48 sps:$4 sm:$0xff]   ;;  %v13780_v60 = vld [vmem:[#allocation16 + $0x80] ss:$48 sps:$4 sm:$0xff]  }
0x16f8   :  { %8125 = vmatprep.subr.bf16.mxu1 %v13725_v5  ;;  %v13783_v5 = vld [vmem:[#allocation16 + $0x88] ss:$48 sps:$4 sm:$0xff]  }
0x16fa   :  { %8020 = vmatpush1.bf16.msra.mxu0 %v13720_v3  ;;  %v13788_v3 = vld [vmem:[#allocation16 + $0xe4] ss:$48 sps:$4 sm:$0xff]  }
0x16fb   :  { %8126 = vmatpush1.bf16.msra.mxu1 %v13723_v34  ;;  %8042 = vmatprep.subr.bf16.mxu0 %v13728_v49  ;;  %v13791_v34 = vld [vmem:[#allocation16 + $0xec] ss:$48 sps:$4 sm:$0xff]   ;;  %v13786_v49 = vld [vmem:[#allocation16 + $0xe0] ss:$48 sps:$4 sm:$0xff]  }
0x16fc   :  { %8148 = vmatprep.subr.bf16.mxu1 %v13731_v16  ;;  %v13789_v16 = vld [vmem:[#allocation16 + $0xe8] ss:$48 sps:$4 sm:$0xff]  }
0x16fd   :  { %8022 = vmatmul.mubr.bf16.vlgmr.msra.gmra.mrb[48].mxu0 %v15815_v55 }
0x16fe   :  { %8128 = vmatmul.mubr.bf16.vlgmr.msra.gmra.mrb[76].mxu1 %v15815_v55  ;;  %8031 = vmatprep.mubr.bf16.mxu0 %v15821_v48 }
0x16ff   :  { %8043 = vmatpush1.bf16.msra.mxu0 %v13726_v59  ;;  %8137 = vmatprep.mubr.bf16.mxu1 %v15821_v48  ;;  %v13794_v59 = vld [vmem:[#allocation16 + $0x144] ss:$48 sps:$4 sm:$0xff]  }
0x1700   :  { %8149 = vmatpush1.bf16.msra.mxu1 %v13729_v57  ;;  %8044 = vmatprep.subr.bf16.mxu0 %v13734_v45  ;;  %v13797_v57 = vld [vmem:[#allocation16 + $0x14c] ss:$48 sps:$4 sm:$0xff]   ;;  %v13792_v45 = vld [vmem:[#allocation16 + $0x140] ss:$48 sps:$4 sm:$0xff]  }
0x1701   :  { %8150 = vmatprep.subr.bf16.mxu1 %v13737_v25  ;;  %v13795_v25 = vld [vmem:[#allocation16 + $0x148] ss:$48 sps:$4 sm:$0xff]  }
0x1703   :  { %8045 = vmatpush1.bf16.msra.mxu0 %v13732_v63  ;;  %v13800_v63 = vld [vmem:[#allocation16 + $0x1a4] ss:$48 sps:$4 sm:$0xff]  }
0x1704   :  { %8151 = vmatpush1.bf16.msra.mxu1 %v13735_v23  ;;  %8046 = vmatprep.subr.bf16.mxu0 %v13740_v36  ;;  %v13803_v23 = vld [vmem:[#allocation16 + $0x1ac] ss:$48 sps:$4 sm:$0xff]   ;;  %v13798_v36 = vld [vmem:[#allocation16 + $0x1a0] ss:$48 sps:$4 sm:$0xff]  }
0x1705   :  { %8032 = vmatmul.mubr.bf16.gmra.mrb[52].mxu0 %v15825_v17  ;;  %8152 = vmatprep.subr.bf16.mxu1 %v13743_v35  ;;  %v13801_v35 = vld [vmem:[#allocation16 + $0x1a8] ss:$48 sps:$4 sm:$0xff]  }
0x1706   :  { %8138 = vmatmul.mubr.bf16.gmra.mrb[80].mxu1 %v15825_v17  ;;  %8074 = vmatprep.mubr.bf16.mxu0 %v16128_v4 }
0x1707   :  { %8047 = vmatpush1.bf16.msra.mxu0 %v13738_v62  ;;  %8180 = vmatprep.mubr.bf16.mxu1 %v16128_v4  ;;  %v13806_v62 = vld [vmem:[#allocation16 + $0x204] ss:$48 sps:$4 sm:$0xff]  }
0x1708   :  { %8153 = vmatpush1.bf16.msra.mxu1 %v13741_v11  ;;  %8048 = vmatprep.subr.bf16.mxu0 %v13746_v39  ;;  %v13809_v11 = vld [vmem:[#allocation16 + $0x20c] ss:$48 sps:$4 sm:$0xff]   ;;  %v13804_v39 = vld [vmem:[#allocation16 + $0x200] ss:$48 sps:$4 sm:$0xff]  }
0x1709   :  { %8154 = vmatprep.subr.bf16.mxu1 %v13749_v26  ;;  %v13807_v26 = vld [vmem:[#allocation16 + $0x208] ss:$48 sps:$4 sm:$0xff]  }
0x170b   :  { %8049 = vmatpush1.bf16.msra.mxu0 %v13744_v61  ;;  %v13812_v61 = vld [vmem:[#allocation16 + $0x264] ss:$48 sps:$4 sm:$0xff]  }
0x170c   :  { %8155 = vmatpush1.bf16.msra.mxu1 %v13747_v8  ;;  %8050 = vmatprep.subr.bf16.mxu0 %v13752_v6  ;;  %v13815_v8 = vld [vmem:[#allocation16 + $0x26c] ss:$48 sps:$4 sm:$0xff]   ;;  %v13813_v6 = vld [vmem:[#allocation16 + $0x268] ss:$48 sps:$4 sm:$0xff]  }
0x170d   :  { %8156 = vmatprep.subr.bf16.mxu1 %v13755_v1  ;;  %v13818_v1 = vld [vmem:[#allocation16 + $0x2c4] ss:$48 sps:$4 sm:$0xff]  }
0x170f   :  { %8051 = vmatpush1.bf16.msra.mxu0 %v13750_v37  ;;  %v13821_v37 = vld [vmem:[#allocation16 + $0x2cc] ss:$48 sps:$4 sm:$0xff]  }
0x1710   :  { %8157 = vmatpush1.bf16.msra.mxu1 %v13753_v19  ;;  %8052 = vmatprep.subr.bf16.mxu0 %v13758_v56  ;;  %v13816_v19 = vld [vmem:[#allocation16 + $0x2c0] ss:$48 sps:$4 sm:$0xff]   ;;  %v13819_v56 = vld [vmem:[#allocation16 + $0x2c8] ss:$48 sps:$4 sm:$0xff]  }
0x1711   :  { %8158 = vmatprep.subr.bf16.mxu1 %v13761_v58  ;;  %v13824_v58 = vld [vmem:[#allocation16 + $0x324] ss:$48 sps:$4 sm:$0xff]  }
0x1713   :  { %8053 = vmatpush1.bf16.msra.mxu0 %v13756_v15  ;;  %v13827_v15 = vld [vmem:[#allocation16 + $0x32c] ss:$48 sps:$4 sm:$0xff]  }
0x1714   :  { %8159 = vmatpush1.bf16.msra.mxu1 %v13759_v18  ;;  %8054 = vmatprep.subr.bf16.mxu0 %v13764_v53  ;;  %v13822_v18 = vld [vmem:[#allocation16 + $0x320] ss:$48 sps:$4 sm:$0xff]   ;;  %v13825_v53 = vld [vmem:[#allocation16 + $0x328] ss:$48 sps:$4 sm:$0xff]  }
0x1715   :  { %8160 = vmatprep.subr.bf16.mxu1 %v13767_v32  ;;  %v13830_v32 = vld [vmem:[#allocation16 + $0x384] ss:$48 sps:$4 sm:$0xff]  }
0x1717   :  { %8055 = vmatpush1.bf16.msra.mxu0 %v13762_v21  ;;  %v13833_v21 = vld [vmem:[#allocation16 + $0x38c] ss:$48 sps:$4 sm:$0xff]  }
0x1718   :  { %8161 = vmatpush1.bf16.msra.mxu1 %v13765_v12  ;;  %8056 = vmatprep.subr.bf16.mxu0 %v13770_v41  ;;  %v13828_v12 = vld [vmem:[#allocation16 + $0x380] ss:$48 sps:$4 sm:$0xff]   ;;  %v13831_v41 = vld [vmem:[#allocation16 + $0x388] ss:$48 sps:$4 sm:$0xff]  }
0x1719   :  { %8162 = vmatprep.subr.bf16.mxu1 %v13773_v30  ;;  %v13836_v30 = vld [vmem:[#allocation16 + $0x3e4] ss:$48 sps:$4 sm:$0xff]  }
0x171b   :  { %8057 = vmatpush1.bf16.msra.mxu0 %v13768_v52  ;;  %v13839_v52 = vld [vmem:[#allocation16 + $0x3ec] ss:$48 sps:$4 sm:$0xff]  }
0x171c   :  { %8163 = vmatpush1.bf16.msra.mxu1 %v13771_v9  ;;  %8201 = vmatprep.subr.bf16.mxu0 %v13776_v0  ;;  %v13834_v9 = vld [vmem:[#allocation16 + $0x3e0] ss:$48 sps:$4 sm:$0xff]   ;;  %v13837_v0 = vld [vmem:[#allocation16 + $0x3e8] ss:$48 sps:$4 sm:$0xff]  }
0x171d   :  { %8307 = vmatprep.subr.bf16.mxu1 %v13779_v10  ;;  %v13842_v10 = vld [vmem:[#allocation16 + $0x444] ss:$48 sps:$4 sm:$0xff]  }
0x171e   :  { %8075 = vmatmul.mubr.bf16.vlgmr.msra.gmra.mrb[48].mxu0 %v15843_v47 }
0x171f   :  { %8181 = vmatmul.mubr.bf16.vlgmr.msra.gmra.mrb[76].mxu1 %v15843_v47  ;;  %8202 = vmatpush1.bf16.msra.mxu0 %v13774_v44  ;;  %v13845_v44 = vld [vmem:[#allocation16 + $0x44c] ss:$48 sps:$4 sm:$0xff]  }
0x1720   :  { %8308 = vmatpush1.bf16.msra.mxu1 %v13777_v38  ;;  %8203 = vmatprep.subr.bf16.mxu0 %v13782_v22  ;;  %v13840_v38 = vld [vmem:[#allocation16 + $0x440] ss:$48 sps:$4 sm:$0xff]   ;;  %v13843_v22 = vld [vmem:[#allocation16 + $0x448] ss:$48 sps:$4 sm:$0xff]  }
0x1721   :  { %8309 = vmatprep.subr.bf16.mxu1 %v13785_v51  ;;  %8084 = vmatprep.mubr.bf16.mxu0 %v16128_v4  ;;  %v13848_v51 = vld [vmem:[#allocation16 + $0x4a4] ss:$48 sps:$4 sm:$0xff]  }
0x1722   :  { %8190 = vmatprep.mubr.bf16.mxu1 %v16128_v4 }
0x1723   :  { %8204 = vmatpush1.bf16.msra.mxu0 %v13780_v60  ;;  %v13851_v60 = vld [vmem:[#allocation16 + $0x4ac] ss:$48 sps:$4 sm:$0xff]  }
0x1724   :  { %8310 = vmatpush1.bf16.msra.mxu1 %v13783_v5  ;;  %8205 = vmatprep.subr.bf16.mxu0 %v13788_v3  ;;  %v13846_v5 = vld [vmem:[#allocation16 + $0x4a0] ss:$48 sps:$4 sm:$0xff]   ;;  %v13849_v3 = vld [vmem:[#allocation16 + $0x4a8] ss:$48 sps:$4 sm:$0xff]  }
0x1725   :  { %8311 = vmatprep.subr.bf16.mxu1 %v13791_v34  ;;  %v13854_v34 = vld [vmem:[#allocation16 + $0x504] ss:$48 sps:$4 sm:$0xff]  }
0x1726   :  { %8085 = vmatmul.mubr.bf16.gmra.mrb[52].mxu0 %v15849_v13 }
0x1727   :  { %8191 = vmatmul.mubr.bf16.gmra.mrb[80].mxu1 %v15849_v13  ;;  %8206 = vmatpush1.bf16.msra.mxu0 %v13786_v49  ;;  %v13857_v49 = vld [vmem:[#allocation16 + $0x50c] ss:$48 sps:$4 sm:$0xff]  }
0x1728   :  { %8233 = vmatprep.mubr.bf16.mxu0 %v15813_v42  ;;  %8312 = vmatpush1.bf16.msra.mxu1 %v13789_v16  ;;  %v13852_v16 = vld [vmem:[#allocation16 + $0x500] ss:$48 sps:$4 sm:$0xff]  }
0x1729   :  { %8339 = vmatprep.mubr.bf16.mxu1 %v15813_v42  ;;  %8207 = vmatprep.subr.bf16.mxu0 %v13794_v59  ;;  %v13810_v42 = vld [vmem:[#allocation16 + $0x260] ss:$48 sps:$4 sm:$0xff]   ;;  %v13855_v59 = vld [vmem:[#allocation16 + $0x508] ss:$48 sps:$4 sm:$0xff]  }
0x172a   :  { %8313 = vmatprep.subr.bf16.mxu1 %v13797_v57  ;;  %v13860_v57 = vld [vmem:[#allocation16 + $0x564] ss:$48 sps:$4 sm:$0xff]  }
0x172b   :  { %8208 = vmatpush1.bf16.msra.mxu0 %v13792_v45  ;;  %v13863_v45 = vld [vmem:[#allocation16 + $0x56c] ss:$48 sps:$4 sm:$0xff]  }
0x172c   :  { %8314 = vmatpush1.bf16.msra.mxu1 %v13795_v25  ;;  %8209 = vmatprep.subr.bf16.mxu0 %v13800_v63  ;;  %v13858_v25 = vld [vmem:[#allocation16 + $0x560] ss:$48 sps:$4 sm:$0xff]   ;;  %v13861_v63 = vld [vmem:[#allocation16 + $0x568] ss:$48 sps:$4 sm:$0xff]  }
0x172d   :  { %8315 = vmatprep.subr.bf16.mxu1 %v13803_v23  ;;  %v13866_v23 = vld [vmem:[#allocation16 + $0x5c4] ss:$48 sps:$4 sm:$0xff]  }
0x172f   :  { %8210 = vmatpush1.bf16.msra.mxu0 %v13798_v36  ;;  %v13869_v36 = vld [vmem:[#allocation16 + $0x5cc] ss:$48 sps:$4 sm:$0xff]  }
0x1730   :  { %8316 = vmatpush1.bf16.msra.mxu1 %v13801_v35  ;;  %8211 = vmatprep.subr.bf16.mxu0 %v13806_v62  ;;  %v13864_v35 = vld [vmem:[#allocation16 + $0x5c0] ss:$48 sps:$4 sm:$0xff]   ;;  %v13867_v62 = vld [vmem:[#allocation16 + $0x5c8] ss:$48 sps:$4 sm:$0xff]  }
0x1731   :  { %8317 = vmatprep.subr.bf16.mxu1 %v13809_v11  ;;  %v13872_v11 = vld [vmem:[#allocation16 + $0x624] ss:$48 sps:$4 sm:$0xff]  }
0x1733   :  { %8212 = vmatpush1.bf16.msra.mxu0 %v13804_v39  ;;  %v13875_v39 = vld [vmem:[#allocation16 + $0x62c] ss:$48 sps:$4 sm:$0xff]  }
0x1734   :  { %8318 = vmatpush1.bf16.msra.mxu1 %v13807_v26  ;;  %8213 = vmatprep.subr.bf16.mxu0 %v13812_v61  ;;  %v13870_v26 = vld [vmem:[#allocation16 + $0x620] ss:$48 sps:$4 sm:$0xff]   ;;  %v13873_v61 = vld [vmem:[#allocation16 + $0x628] ss:$48 sps:$4 sm:$0xff]  }
0x1735   :  { %8319 = vmatprep.subr.bf16.mxu1 %v13815_v8  ;;  %v13878_v8 = vld [vmem:[#allocation16 + $0x684] ss:$48 sps:$4 sm:$0xff]  }
0x1737   :  { %8214 = vmatpush1.bf16.msra.mxu0 %v13810_v42  ;;  %v13881_v42 = vld [vmem:[#allocation16 + $0x68c] ss:$48 sps:$4 sm:$0xff]  }
0x1738   :  { %8320 = vmatpush1.bf16.msra.mxu1 %v13813_v6  ;;  %8215 = vmatprep.subr.bf16.mxu0 %v13818_v1  ;;  %v13876_v6 = vld [vmem:[#allocation16 + $0x680] ss:$48 sps:$4 sm:$0xff]   ;;  %v13879_v1 = vld [vmem:[#allocation16 + $0x688] ss:$48 sps:$4 sm:$0xff]  }
0x1739   :  { %8321 = vmatprep.subr.bf16.mxu1 %v13821_v37  ;;  %v13884_v37 = vld [vmem:[#allocation16 + $0x6e4] ss:$48 sps:$4 sm:$0xff]  }
0x173b   :  { %8216 = vmatpush1.bf16.msra.mxu0 %v13816_v19  ;;  %v13887_v19 = vld [vmem:[#allocation16 + $0x6ec] ss:$48 sps:$4 sm:$0xff]  }
0x173c   :  { %8322 = vmatpush1.bf16.msra.mxu1 %v13819_v56  ;;  %8217 = vmatprep.subr.bf16.mxu0 %v13824_v58  ;;  %v13882_v56 = vld [vmem:[#allocation16 + $0x6e0] ss:$48 sps:$4 sm:$0xff]   ;;  %v13885_v58 = vld [vmem:[#allocation16 + $0x6e8] ss:$48 sps:$4 sm:$0xff]  }
0x173d   :  { %8323 = vmatprep.subr.bf16.mxu1 %v13827_v15  ;;  %v13890_v15 = vld [vmem:[#allocation16 + $0x744] ss:$48 sps:$4 sm:$0xff]  }
0x173f   :  { %8218 = vmatpush1.bf16.msra.mxu0 %v13822_v18  ;;  %v13891_v18 = vld [vmem:[#allocation16 + $0x748] ss:$48 sps:$4 sm:$0xff]  }
0x1740   :  { %8324 = vmatpush1.bf16.msra.mxu1 %v13825_v53  ;;  %8219 = vmatprep.subr.bf16.mxu0 %v13830_v32  ;;  %v13896_v53 = vld [vmem:[#allocation16 + $0x7a4] ss:$48 sps:$4 sm:$0xff]   ;;  %v13899_v32 = vld [vmem:[#allocation16 + $0x7ac] ss:$48 sps:$4 sm:$0xff]  }
0x1741   :  { %8325 = vmatprep.subr.bf16.mxu1 %v13833_v21  ;;  %v13894_v21 = vld [vmem:[#allocation16 + $0x7a0] ss:$48 sps:$4 sm:$0xff]  }
0x1743   :  { %8220 = vmatpush1.bf16.msra.mxu0 %v13828_v12  ;;  %v13897_v12 = vld [vmem:[#allocation16 + $0x7a8] ss:$48 sps:$4 sm:$0xff]  }
0x1744   :  { %8326 = vmatpush1.bf16.msra.mxu1 %v13831_v41  ;;  %8221 = vmatprep.subr.bf16.mxu0 %v13836_v30  ;;  %v13902_v41 = vld [vmem:[#allocation16 + $0x804] ss:$48 sps:$4 sm:$0xff]   ;;  %v13900_v30 = vld [vmem:[#allocation16 + $0x800] ss:$48 sps:$4 sm:$0xff]  }
0x1745   :  { %8327 = vmatprep.subr.bf16.mxu1 %v13839_v52  ;;  %v13903_v52 = vld [vmem:[#allocation16 + $0x808] ss:$48 sps:$4 sm:$0xff]  }
0x1747   :  { %8222 = vmatpush1.bf16.msra.mxu0 %v13834_v9  ;;  %v13908_v9 = vld [vmem:[#allocation16 + $0x864] ss:$48 sps:$4 sm:$0xff]  }
0x1748   :  { %8328 = vmatpush1.bf16.msra.mxu1 %v13837_v0  ;;  %8223 = vmatprep.subr.bf16.mxu0 %v13842_v10  ;;  %v13911_v0 = vld [vmem:[#allocation16 + $0x86c] ss:$48 sps:$4 sm:$0xff]   ;;  %v13906_v10 = vld [vmem:[#allocation16 + $0x860] ss:$48 sps:$4 sm:$0xff]  }
0x1749   :  { %8329 = vmatprep.subr.bf16.mxu1 %v13845_v44  ;;  %v13909_v44 = vld [vmem:[#allocation16 + $0x868] ss:$48 sps:$4 sm:$0xff]  }
0x174b   :  { %8224 = vmatpush1.bf16.msra.mxu0 %v13840_v38  ;;  %v13914_v38 = vld [vmem:[#allocation16 + $0x8c4] ss:$48 sps:$4 sm:$0xff]  }
0x174c   :  { %8330 = vmatpush1.bf16.msra.mxu1 %v13843_v22  ;;  %8225 = vmatprep.subr.bf16.mxu0 %v13848_v51  ;;  %v13917_v22 = vld [vmem:[#allocation16 + $0x8cc] ss:$48 sps:$4 sm:$0xff]   ;;  %v13912_v51 = vld [vmem:[#allocation16 + $0x8c0] ss:$48 sps:$4 sm:$0xff]  }
0x174d   :  { %8331 = vmatprep.subr.bf16.mxu1 %v13851_v60  ;;  %v13915_v60 = vld [vmem:[#allocation16 + $0x8c8] ss:$48 sps:$4 sm:$0xff]  }
0x174f   :  { %8226 = vmatpush1.bf16.msra.mxu0 %v13846_v5  ;;  %v13920_v5 = vld [vmem:[#allocation19 + $0x4] ss:$12 sps:$4 sm:$0xff]  }
0x1750   :  { %8332 = vmatpush1.bf16.msra.mxu1 %v13849_v3  ;;  %8227 = vmatprep.subr.bf16.mxu0 %v13854_v34  ;;  %v13921_v3 = vld [vmem:[#allocation19 + $0xc8] ss:$12 sps:$4 sm:$0xff]   ;;  %v13918_v34 = vld [vmem:[#allocation19] ss:$12 sps:$4 sm:$0xff]  }
0x1751   :  { %8333 = vmatprep.subr.bf16.mxu1 %v13857_v49  ;;  %v13922_v49 = vld [vmem:[#allocation19 + $0x8] ss:$12 sps:$4 sm:$0xff]  }
0x1753   :  { %8228 = vmatpush1.bf16.msra.mxu0 %v13852_v16  ;;  %v13925_v16 = vld [vmem:[#allocation19 + $0x1c] ss:$12 sps:$4 sm:$0xff]  }
0x1754   :  { %8334 = vmatpush1.bf16.msra.mxu1 %v13855_v59  ;;  %8229 = vmatprep.subr.bf16.mxu0 %v13860_v57  ;;  %v13926_v59 = vld [vmem:[#allocation19 + $0xe0] ss:$12 sps:$4 sm:$0xff]   ;;  %v13923_v57 = vld [vmem:[#allocation19 + $0x18] ss:$12 sps:$4 sm:$0xff]  }
0x1755   :  { %8335 = vmatprep.subr.bf16.mxu1 %v13863_v45  ;;  %v13927_v45 = vld [vmem:[#allocation19 + $0x20] ss:$12 sps:$4 sm:$0xff]  }
0x1757   :  { %8230 = vmatpush1.bf16.msra.mxu0 %v13858_v25  ;;  %v13930_v25 = vld [vmem:[#allocation19 + $0x34] ss:$12 sps:$4 sm:$0xff]  }
0x1758   :  { %8336 = vmatpush1.bf16.msra.mxu1 %v13861_v63  ;;  %8231 = vmatprep.subr.bf16.mxu0 %v13866_v23  ;;  %v13931_v63 = vld [vmem:[#allocation19 + $0xf8] ss:$12 sps:$4 sm:$0xff]   ;;  %v13928_v23 = vld [vmem:[#allocation19 + $0x30] ss:$12 sps:$4 sm:$0xff]  }
0x1759   :  { %8337 = vmatprep.subr.bf16.mxu1 %v13869_v36  ;;  %v13932_v36 = vld [vmem:[#allocation19 + $0x38] ss:$12 sps:$4 sm:$0xff]  }
0x175b   :  { %8232 = vmatpush1.bf16.msra.mxu0 %v13864_v35  ;;  %v13935_v35 = vld [vmem:[#allocation19 + $0x4c] ss:$12 sps:$4 sm:$0xff]  }
0x175c   :  { %8338 = vmatpush1.bf16.msra.mxu1 %v13867_v62  ;;  %8254 = vmatprep.subr.bf16.mxu0 %v13872_v11  ;;  %v13933_v62 = vld [vmem:[#allocation19 + $0x48] ss:$12 sps:$4 sm:$0xff]   ;;  %v13937_v11 = vld [vmem:[#allocation19 + $0x50] ss:$12 sps:$4 sm:$0xff]  }
0x175d   :  { %8360 = vmatprep.subr.bf16.mxu1 %v13875_v39  ;;  %v13940_v39 = vld [vmem:[#allocation19 + $0x64] ss:$12 sps:$4 sm:$0xff]  }
0x175e   :  { %8234 = vmatmul.mubr.bf16.vlgmr.msra.gmra.mrb[56].mxu0 %v15815_v55 }
0x175f   :  { %8340 = vmatmul.mubr.bf16.vlgmr.msra.gmra.mrb[84].mxu1 %v15815_v55  ;;  %8243 = vmatprep.mubr.bf16.mxu0 %v15821_v48  ;;  %v13893_v55 = vld [vmem:[#allocation16 + $0x74c] ss:$48 sps:$4 sm:$0xff]  }
0x1760   :  { %8255 = vmatpush1.bf16.msra.mxu0 %v13870_v26  ;;  %8349 = vmatprep.mubr.bf16.mxu1 %v15821_v48  ;;  %v13888_v48 = vld [vmem:[#allocation16 + $0x740] ss:$48 sps:$4 sm:$0xff]  }
0x1761   :  { %8361 = vmatpush1.bf16.msra.mxu1 %v13873_v61  ;;  %8256 = vmatprep.subr.bf16.mxu0 %v13878_v8  ;;  %v15885_v26 = vld [vmem:[#allocation17] sm:$0xff]  ;;  %v16143_v61 = vld [vmem:[#allocation31_spill] sm:$0xff] }
0x1762   :  { %8362 = vmatprep.subr.bf16.mxu1 %v13881_v42  ;;  %v6291_v8 = vsub.s32 3, %v16143_v61  ;;  %v13938_v42 = vld [vmem:[#allocation19 + $0x60] ss:$12 sps:$4 sm:$0xff]  }
0x1764   :  { %8257 = vmatpush1.bf16.msra.mxu0 %v13876_v6  ;;  %v13942_v6 = vld [vmem:[#allocation19 + $0x68] ss:$12 sps:$4 sm:$0xff]  }
0x1765   :  { %8363 = vmatpush1.bf16.msra.mxu1 %v13879_v1  ;;  %8258 = vmatprep.subr.bf16.mxu0 %v13884_v37  ;;  %v15894_v1 = vrot.slane %v15885_v26, %v16142_v2  ;;  %v13945_v37 = vld [vmem:[#allocation19 + $0x7c] ss:$12 sps:$4 sm:$0xff]  }
0x1766   :  { %8244 = vmatmul.mubr.bf16.gmra.mrb[60].mxu0 %v15825_v17  ;;  %8364 = vmatprep.subr.bf16.mxu1 %v13887_v19  ;;  %v15898_v19 = vrot.slane %v15885_v26, %v16141_v24 }
0x1767   :  { %8350 = vmatmul.mubr.bf16.gmra.mrb[88].mxu1 %v15825_v17  ;;  %8286 = vmatprep.mubr.bf16.mxu0 %v16128_v4  ;;  %v13905_v17 = vld [vmem:[#allocation16 + $0x80c] ss:$48 sps:$4 sm:$0xff]  }
0x1768   :  { %8259 = vmatpush1.bf16.msra.mxu0 %v13882_v56  ;;  %8392 = vmatprep.mubr.bf16.mxu1 %v16128_v4  ;;  %v15903_v56 = vrot.slane %v15885_v26, %v6291_v8 }
0x1769   :  { %8365 = vmatpush1.bf16.msra.mxu1 %v13885_v58  ;;  %8260 = vmatprep.subr.bf16.mxu0 %v13890_v15  ;;  %v13946_v58 = vld [vmem:[#allocation19 + $0x140] ss:$12 sps:$4 sm:$0xff]  }
0x176a   :  { %8366 = vmatprep.subr.bf16.mxu1 %v13893_v55 }
0x176c   :  { %8261 = vmatpush1.bf16.msra.mxu0 %v13888_v48  ;;  %v13943_v48 = vld [vmem:[#allocation19 + $0x78] ss:$12 sps:$4 sm:$0xff]  }
0x176d   :  { %8367 = vmatpush1.bf16.msra.mxu1 %v13891_v18  ;;  %8262 = vmatprep.subr.bf16.mxu0 %v13896_v53 }
0x176e   :  { %8368 = vmatprep.subr.bf16.mxu1 %v13899_v32 }
0x1770   :  { %8263 = vmatpush1.bf16.msra.mxu0 %v13894_v21 }
0x1771   :  { %8369 = vmatpush1.bf16.msra.mxu1 %v13897_v12  ;;  %8264 = vmatprep.subr.bf16.mxu0 %v13902_v41  ;;  %v13947_v12 = vld [vmem:[#allocation19 + $0x80] ss:$12 sps:$4 sm:$0xff]  }
0x1772   :  { %8370 = vmatprep.subr.bf16.mxu1 %v13905_v17  ;;  %v13950_v41 = vld [vmem:[#allocation19 + $0x94] ss:$12 sps:$4 sm:$0xff]  }
0x1774   :  { %8265 = vmatpush1.bf16.msra.mxu0 %v13900_v30 }
0x1775   :  { %8371 = vmatpush1.bf16.msra.mxu1 %v13903_v52  ;;  %8266 = vmatprep.subr.bf16.mxu0 %v13908_v9 }
0x1776   :  { %8372 = vmatprep.subr.bf16.mxu1 %v13911_v0  ;;  %v13951_v0 = vld [vmem:[#allocation19 + $0x158] ss:$12 sps:$4 sm:$0xff]  }
0x1778   :  { %8267 = vmatpush1.bf16.msra.mxu0 %v13906_v10 }
0x1779   :  { %8373 = vmatpush1.bf16.msra.mxu1 %v13909_v44  ;;  %8268 = vmatprep.subr.bf16.mxu0 %v13914_v38 }
0x177a   :  { %8374 = vmatprep.subr.bf16.mxu1 %v13917_v22 }
0x177c   :  { %8269 = vmatpush1.bf16.msra.mxu0 %v13912_v51 }
0x177d   :  { %8375 = vmatpush1.bf16.msra.mxu1 %v13915_v60  ;;  %10422 = vmatprep.subr.bf16.mxu0 %v13920_v5  ;;  %v13948_v5 = vld [vmem:[#allocation19 + $0x90] ss:$12 sps:$4 sm:$0xff]  }
0x177e   :  { %12211 = vmatprep.subr.bf16.mxu1 %v13921_v3  ;;  %v13952_v3 = vld [vmem:[#allocation19 + $0x98] ss:$12 sps:$4 sm:$0xff]  }
0x177f   :  { %8287 = vmatmul.mubr.bf16.vlgmr.msra.gmra.mrb[56].mxu0 %v15843_v47 }
0x1780   :  { %8393 = vmatmul.mubr.bf16.vlgmr.msra.gmra.mrb[84].mxu1 %v15843_v47  ;;  %10423 = vmatpush1.bf16.msra.mxu0 %v13918_v34  ;;  %v13936_v47 = vld [vmem:[#allocation19 + $0x110] ss:$12 sps:$4 sm:$0xff]  }
0x1781   :  { %12212 = vmatpush3.bf16.msra.mxu1 %v13922_v49  ;;  %10424 = vmatprep.subr.bf16.mxu0 %v13925_v16 }
0x1782   :  { %12213 = vmatprep.subr.bf16.mxu1 %v13926_v59  ;;  %8296 = vmatprep.mubr.bf16.mxu0 %v16128_v4 }
0x1783   :  { %8402 = vmatprep.mubr.bf16.mxu1 %v16128_v4  ;;  %v13941_v4 = vld [vmem:[#allocation19 + $0x128] ss:$12 sps:$4 sm:$0xff]  }
0x1784   :  { %10425 = vmatpush1.bf16.msra.mxu0 %v13923_v57  ;;  %v13955_v57 = vld [vmem:[#allocation19 + $0xac] ss:$12 sps:$4 sm:$0xff]  }
0x1785   :  { %12214 = vmatpush3.bf16.msra.mxu1 %v13927_v45  ;;  %10426 = vmatprep.subr.bf16.mxu0 %v13930_v25 }
0x1786   :  { %12215 = vmatprep.subr.bf16.mxu1 %v13931_v63 }
0x1787   :  { %8297 = vmatmul.mubr.bf16.gmra.mrb[60].mxu0 %v15849_v13 }
0x1788   :  { %8403 = vmatmul.mubr.bf16.gmra.mrb[88].mxu1 %v15849_v13  ;;  %10427 = vmatpush1.bf16.msra.mxu0 %v13928_v23  ;;  %v15890_v13 = vrot.slane %v15885_v26, %v16140_v28 }
0x1789   :  { %12216 = vmatpush3.bf16.msra.mxu1 %v13932_v36  ;;  %10428 = vmatprep.subr.bf16.mxu0 %v13935_v35  ;;  %v13956_v36 = vld [vmem:[#allocation19 + $0x170] ss:$12 sps:$4 sm:$0xff]  }
0x178a   :  { %12217 = vmatprep.subr.bf16.mxu1 %v13936_v47 }
0x178c   :  { %10429 = vmatpush1.bf16.msra.mxu0 %v13933_v62 }
0x178d   :  { %12218 = vmatpush3.bf16.msra.mxu1 %v13937_v11  ;;  %10430 = vmatprep.subr.bf16.mxu0 %v13940_v39 }
0x178e   :  { %12219 = vmatprep.subr.bf16.mxu1 %v13941_v4 }
0x1790   :  { %10431 = vmatpush1.bf16.msra.mxu0 %v13938_v42  ;;  %v7864_v15 = vpop.f32.mrb[40].mxu0  ;;  %v7970_v55 = vpop.f32.mrb[68].mxu1  ;;  %v13953_v42 = vld [vmem:[#allocation19 + $0xa8] ss:$12 sps:$4 sm:$0xff]  }
0x1791   :  { %12220 = vmatpush3.bf16.msra.mxu1 %v13942_v6  ;;  %v12759_v18 = vadd.f32 %v7864_v15, %v15890_v13  ;;  %v12767_v53 = vadd.f32 %v7970_v55, %v15894_v1  ;;  %v7866_v32 = vpop.f32.mrb[41].mxu0  ;;  %v7972_v21 = vpop.f32.mrb[69].mxu1  ;;  %10432 = vmatprep.subr.bf16.mxu0 %v13945_v37  ;;  %v13957_v55 = vld [vmem:[#allocation19 + $0xb0] ss:$12 sps:$4 sm:$0xff]  }
0x1792   :  { %v12760_v17 = vadd.f32 %v7866_v32, %v15898_v19  ;;  %v12768_v30 = vadd.f32 %v7972_v21, %v15903_v56  ;;  %12221 = vmatprep.subr.bf16.mxu1 %v13946_v58  ;;  %v7868_v52 = vpop.f32.mrb[42].mxu0  ;;  %v7974_v9 = vpop.f32.mrb[70].mxu1 }
0x1793   :  { %v12761_v10 = vadd.f32 %v7868_v52, %v15890_v13  ;;  %v12769_v44 = vadd.f32 %v7974_v9, %v15894_v1  ;;  %v7870_v38 = vpop.f32.mrb[43].mxu0  ;;  %v7976_v22 = vpop.f32.mrb[71].mxu1  ;;  %v8413_v34 = vmax.f32 %v12759_v18, 0.0  ;;  %v8415_v49 = vmax.f32 %v12767_v53, 0.0 }
0x1794   :  { %10433 = vmatpush1.bf16.msra.mxu0 %v13943_v48  ;;  %v12762_v51 = vadd.f32 %v7870_v38, %v15898_v19  ;;  %v12770_v60 = vadd.f32 %v7976_v22, %v15903_v56  ;;  %v8414_v45 = vmax.f32 %v12760_v17, 0.0  ;;  %v8416_v25 = vmax.f32 %v12768_v30, 0.0  ;;  %v13960_v48 = vld [vmem:[#allocation19 + $0xc4] ss:$12 sps:$4 sm:$0xff]  }
0x1795   :  { %v8425_v16 = vmax.f32 %v12761_v10, 0.0  ;;  %v8427_v59 = vmax.f32 %v12769_v44, 0.0  ;;  %12222 = vmatpush3.bf16.msra.mxu1 %v13947_v12  ;;  %10434 = vmatprep.subr.bf16.mxu0 %v13950_v41  ;;  %v13961_v12 = vld [vmem:[#allocation19 + $0x248] ss:$12 sps:$4 sm:$0xff]   ;;  %v13958_v10 = vld [vmem:[#allocation19 + $0xc0] ss:$12 sps:$4 sm:$0xff]  }
0x1796   :  { %v8426_v63 = vmax.f32 %v12762_v51, 0.0  ;;  %v8428_v23 = vmax.f32 %v12770_v60, 0.0  ;;  %12223 = vmatprep.subr.bf16.mxu1 %v13951_v0  ;;  %v13962_v44 = vld [vmem:[#allocation19 + $0x188] ss:$12 sps:$4 sm:$0xff]  }
0x1797   :  { %v15913_v35 = vpack.c.bf16 %v8425_v16, %v8413_v34  ;;  %v15915_v47 = vpack.c.bf16 %v8427_v59, %v8415_v49  ;;  %v13966_v49 = vld [vmem:[#allocation19 + $0x260] ss:$12 sps:$4 sm:$0xff]  }
0x1798   :  { %v8462_v62 = vpack.c.bf16 %v8426_v63, %v8414_v45  ;;  %v15917_v11 = vpack.c.bf16 %v8428_v23, %v8416_v25  ;;  %10435 = vmatpush1.bf16.msra.mxu0 %v13948_v5  ;;  %v7874_v39 = vpop.f32.mrb[44].mxu0  ;;  %v7980_v4 = vpop.f32.mrb[72].mxu1  ;;  %v13965_v5 = vld [vmem:[#allocation19 + $0xdc] ss:$12 sps:$4 sm:$0xff]   ;;  %v13967_v45 = vld [vmem:[#allocation19 + $0x1a0] ss:$12 sps:$4 sm:$0xff]  }
0x1799   :  { %12224 = vmatpush3.bf16.msra.mxu1 %v13952_v3  ;;  %v12763_v6 = vadd.f32 %v7874_v39, %v15890_v13  ;;  %v12771_v37 = vadd.f32 %v7980_v4, %v15894_v1  ;;  %v7876_v58 = vpop.f32.mrb[45].mxu0  ;;  %v7982_v15 = vpop.f32.mrb[73].mxu1  ;;  %10436 = vmatprep.subr.bf16.mxu0 %v13955_v57  ;;  %v13963_v57 = vld [vmem:[#allocation19 + $0xd8] ss:$12 sps:$4 sm:$0xff]   ;;  %v13970_v25 = vld [vmem:[#allocation19 + $0xf4] ss:$12 sps:$4 sm:$0xff]  }
0x179a   :  { %v12764_v18 = vadd.f32 %v7876_v58, %v15898_v19  ;;  %v12772_v53 = vadd.f32 %v7982_v15, %v15903_v56  ;;  %12225 = vmatprep.subr.bf16.mxu1 %v13956_v36  ;;  %v7878_v32 = vpop.f32.mrb[46].mxu0  ;;  %v7984_v21 = vpop.f32.mrb[74].mxu1  ;;  %10454 = vmatprep.mubr.bf16.mxu0 %v8462_v62  ;;  %v13971_v63 = vld [vmem:[#allocation19 + $0x278] ss:$12 sps:$4 sm:$0xff]   ;;  %v13968_v23 = vld [vmem:[#allocation19 + $0xf0] ss:$12 sps:$4 sm:$0xff]  }
0x179b   :  { %v12765_v41 = vadd.f32 %v7878_v32, %v15890_v13  ;;  %v12773_v17 = vadd.f32 %v7984_v21, %v15894_v1  ;;  %10772 = vmatprep.mubr.bf16.mxu1 %v8462_v62  ;;  %v7880_v30 = vpop.f32.mrb[47].mxu0  ;;  %v7986_v52 = vpop.f32.mrb[75].mxu1  ;;  %v8437_v38 = vmax.f32 %v12763_v6, 0.0  ;;  %v8439_v22 = vmax.f32 %v12771_v37, 0.0  ;;  %v13972_v36 = vld [vmem:[#allocation19 + $0x1b8] ss:$12 sps:$4 sm:$0xff]  }
0x179c   :  { %10437 = vmatpush1.bf16.msra.mxu0 %v13953_v42  ;;  %v12766_v9 = vadd.f32 %v7880_v30, %v15898_v19  ;;  %v12774_v0 = vadd.f32 %v7986_v52, %v15903_v56  ;;  %v8438_v13 = vmax.f32 %v12764_v18, 0.0  ;;  %v8440_v3 = vmax.f32 %v12772_v53, 0.0  ;;  %v13975_v62 = vld [vmem:[#allocation19 + $0x10c] ss:$12 sps:$4 sm:$0xff]   ;;  %v13976_v39 = vld [vmem:[#allocation19 + $0x290] ss:$12 sps:$4 sm:$0xff]  }
0x179d   :  { %v8449_v51 = vmax.f32 %v12765_v41, 0.0  ;;  %v8451_v60 = vmax.f32 %v12773_v17, 0.0  ;;  %12226 = vmatpush3.bf16.msra.mxu1 %v13957_v55  ;;  %10438 = vmatprep.subr.bf16.mxu0 %v13960_v48  ;;  %v13973_v4 = vld [vmem:[#allocation19 + $0x108] ss:$12 sps:$4 sm:$0xff]   ;;  %v13977_v42 = vld [vmem:[#allocation19 + $0x1d0] ss:$12 sps:$4 sm:$0xff]  }
0x179e   :  { %v8450_v1 = vmax.f32 %v12766_v9, 0.0  ;;  %v8452_v34 = vmax.f32 %v12774_v0, 0.0  ;;  %12239 = vmatprep.subr.bf16.mxu1 %v13961_v12  ;;  %v13980_v6 = vld [vmem:[#allocation19 + $0x124] ss:$12 sps:$4 sm:$0xff]   ;;  %v13981_v37 = vld [vmem:[#allocation19 + $0x2a8] ss:$12 sps:$4 sm:$0xff]  }
0x179f   :  { %v15927_v16 = vpack.c.bf16 %v8449_v51, %v8437_v38  ;;  %v15929_v19 = vpack.c.bf16 %v8451_v60, %v8439_v22  ;;  %v13978_v58 = vld [vmem:[#allocation19 + $0x120] ss:$12 sps:$4 sm:$0xff]   ;;  %v13982_v15 = vld [vmem:[#allocation19 + $0x1e8] ss:$12 sps:$4 sm:$0xff]   ;;  %v13983_v18 = vld [vmem:[#allocation19 + $0x138] ss:$12 sps:$4 sm:$0xff]  }
0x17a0   :  { %v15931_v56 = vpack.c.bf16 %v8450_v1, %v8438_v13  ;;  %v15933_v59 = vpack.c.bf16 %v8452_v34, %v8440_v3  ;;  %10773 = vmatmul.mubr.bf16.vlgmr.msra.gmra.mrb[92].mxu1 %v15913_v35  ;;  %10439 = vmatpush1.bf16.msra.mxu0 %v13958_v10  ;;  %v13985_v55 = vld [vmem:[#allocation19 + $0x13c] ss:$12 sps:$4 sm:$0xff]   ;;  %v13986_v48 = vld [vmem:[#allocation19 + $0x2c0] ss:$12 sps:$4 sm:$0xff]   ;;  %v13991_v21 = vld [vmem:[#allocation19 + $0x2d8] ss:$12 sps:$4 sm:$0xff]  }
0x17a1   :  { %12240 = vmatpush3.bf16.msra.mxu1 %v13962_v44  ;;  %10440 = vmatprep.subr.bf16.mxu0 %v13965_v5  ;;  %v13987_v53 = vld [vmem:[#allocation19 + $0x200] ss:$12 sps:$4 sm:$0xff]   ;;  %v13988_v12 = vld [vmem:[#allocation19 + $0x150] ss:$12 sps:$4 sm:$0xff]   ;;  %v13992_v41 = vld [vmem:[#allocation19 + $0x218] ss:$12 sps:$4 sm:$0xff]  }
0x17a2   :  { %12241 = vmatprep.subr.bf16.mxu1 %v13966_v49  ;;  %10780 = vmatprep.mubr.bf16.mxu1 %v15931_v56  ;;  %v13990_v32 = vld [vmem:[#allocation19 + $0x154] ss:$12 sps:$4 sm:$0xff]   ;;  %v13995_v17 = vld [vmem:[#allocation19 + $0x16c] ss:$12 sps:$4 sm:$0xff]   ;;  %v13996_v30 = vld [vmem:[#allocation19 + $0x2f0] ss:$12 sps:$4 sm:$0xff]  }
0x17a3   :  { %v13993_v52 = vld [vmem:[#allocation19 + $0x168] ss:$12 sps:$4 sm:$0xff]   ;;  %v13997_v9 = vld [vmem:[#allocation19 + $0x230] ss:$12 sps:$4 sm:$0xff]   ;;  %v13998_v44 = vld [vmem:[#allocation19 + $0x180] ss:$12 sps:$4 sm:$0xff]  }
0x17a4   :  { %10441 = vmatpush1.bf16.msra.mxu0 %v13963_v57  ;;  %v14000_v0 = vld [vmem:[#allocation19 + $0x184] ss:$12 sps:$4 sm:$0xff]   ;;  %v14022_v10 = vld [vmem:[#allocation19 + $0x3c8] ss:$12 sps:$4 sm:$0xff]   ;;  %v14027_v51 = vld [vmem:[#allocation19 + $0x3e0] ss:$12 sps:$4 sm:$0xff]  }
0x17a5   :  { %12242 = vmatpush3.bf16.msra.mxu1 %v13967_v45  ;;  %10442 = vmatprep.subr.bf16.mxu0 %v13970_v25  ;;  %v14003_v38 = vld [vmem:[#allocation19 + $0x19c] ss:$12 sps:$4 sm:$0xff]   ;;  %v14001_v60 = vld [vmem:[#allocation19 + $0x198] ss:$12 sps:$4 sm:$0xff]   ;;  %v14006_v5 = vld [vmem:[#allocation19 + $0x1b4] ss:$12 sps:$4 sm:$0xff]  }
0x17a6   :  { %12243 = vmatprep.subr.bf16.mxu1 %v13971_v63  ;;  %v14023_v22 = vld [vmem:[#allocation19 + $0x308] ss:$12 sps:$4 sm:$0xff]   ;;  %v14028_v13 = vld [vmem:[#allocation19 + $0x320] ss:$12 sps:$4 sm:$0xff]   ;;  %v14032_v3 = vld [vmem:[#allocation19 + $0x3f8] ss:$12 sps:$4 sm:$0xff]  }
0x17a7   :  { %v14004_v1 = vld [vmem:[#allocation19 + $0x1b0] ss:$12 sps:$4 sm:$0xff]   ;;  %v14009_v34 = vld [vmem:[#allocation19 + $0x1cc] ss:$12 sps:$4 sm:$0xff]   ;;  %v14042_v25 = vld [vmem:[#allocation19 + $0x428] ss:$12 sps:$4 sm:$0xff]  }
0x17a8   :  { %10781 = vmatmul.mubr.bf16.gmra.mrb[96].mxu1 %v15927_v16  ;;  %10443 = vmatpush1.bf16.msra.mxu0 %v13968_v23  ;;  %v14037_v49 = vld [vmem:[#allocation19 + $0x410] ss:$12 sps:$4 sm:$0xff]   ;;  %v14010_v63 = vld [vmem:[#allocation19 + $0x1e0] ss:$12 sps:$4 sm:$0xff]  }
0x17a9   :  { %12244 = vmatpush3.bf16.msra.mxu1 %v13972_v36  ;;  %10821 = vmatprep.mubr.bf16.mxu1 %v15917_v11  ;;  %v14012_v57 = vld [vmem:[#allocation19 + $0x1e4] ss:$12 sps:$4 sm:$0xff]   ;;  %v14015_v23 = vld [vmem:[#allocation19 + $0x1fc] ss:$12 sps:$4 sm:$0xff]   ;;  %v14047_v36 = vld [vmem:[#allocation19 + $0x440] ss:$12 sps:$4 sm:$0xff]  }
0x17aa   :  { %10444 = vmatprep.subr.bf16.mxu0 %v13975_v62  ;;  %12245 = vmatprep.subr.bf16.mxu1 %v13976_v39  ;;  %v14038_v45 = vld [vmem:[#allocation19 + $0x350] ss:$12 sps:$4 sm:$0xff]   ;;  %v14013_v62 = vld [vmem:[#allocation19 + $0x1f8] ss:$12 sps:$4 sm:$0xff]   ;;  %v14048_v39 = vld [vmem:[#allocation19 + $0x380] ss:$12 sps:$4 sm:$0xff]  }
0x17ac   :  { %10445 = vmatpush1.bf16.msra.mxu0 %v13973_v4  ;;  %v14052_v4 = vld [vmem:[#allocation19 + $0x458] ss:$12 sps:$4 sm:$0xff]  }
0x17ad   :  { %12246 = vmatpush3.bf16.msra.mxu1 %v13977_v42  ;;  %10446 = vmatprep.subr.bf16.mxu0 %v13980_v6  ;;  %v14016_v42 = vld [vmem:[#allocation19 + $0x210] ss:$12 sps:$4 sm:$0xff]   ;;  %v14021_v6 = vld [vmem:[#allocation19 + $0x22c] ss:$12 sps:$4 sm:$0xff]  }
0x17ae   :  { %12247 = vmatprep.subr.bf16.mxu1 %v13981_v37  ;;  %v14053_v37 = vld [vmem:[#allocation19 + $0x398] ss:$12 sps:$4 sm:$0xff]  }
0x17b0   :  { %10447 = vmatpush1.bf16.msra.mxu0 %v13978_v58  ;;  %v14057_v58 = vld [vmem:[#allocation19 + $0x470] ss:$12 sps:$4 sm:$0xff]  }
0x17b1   :  { %12248 = vmatpush3.bf16.msra.mxu1 %v13982_v15  ;;  %10448 = vmatprep.subr.bf16.mxu0 %v13985_v55  ;;  %v14019_v15 = vld [vmem:[#allocation19 + $0x228] ss:$12 sps:$4 sm:$0xff]   ;;  %v14026_v55 = vld [vmem:[#allocation19 + $0x244] ss:$12 sps:$4 sm:$0xff]  }
0x17b2   :  { %12249 = vmatprep.subr.bf16.mxu1 %v13986_v48  ;;  %v14058_v48 = vld [vmem:[#allocation19 + $0x3b0] ss:$12 sps:$4 sm:$0xff]  }
0x17b4   :  { %10449 = vmatpush1.bf16.msra.mxu0 %v13983_v18  ;;  %v14062_v18 = vld [vmem:[#allocation19 + $0x548] ss:$12 sps:$4 sm:$0xff]  }
0x17b5   :  { %12250 = vmatpush3.bf16.msra.mxu1 %v13987_v53  ;;  %10450 = vmatprep.subr.bf16.mxu0 %v13990_v32  ;;  %v14024_v53 = vld [vmem:[#allocation19 + $0x240] ss:$12 sps:$4 sm:$0xff]   ;;  %v14031_v32 = vld [vmem:[#allocation19 + $0x25c] ss:$12 sps:$4 sm:$0xff]  }
0x17b6   :  { %12251 = vmatprep.subr.bf16.mxu1 %v13991_v21  ;;  %v14029_v21 = vld [vmem:[#allocation19 + $0x258] ss:$12 sps:$4 sm:$0xff]  }
0x17b8   :  { %10451 = vmatpush1.bf16.msra.mxu0 %v13988_v12  ;;  %v14036_v12 = vld [vmem:[#allocation19 + $0x274] ss:$12 sps:$4 sm:$0xff]  }
0x17b9   :  { %12252 = vmatpush3.bf16.msra.mxu1 %v13992_v41  ;;  %10452 = vmatprep.subr.bf16.mxu0 %v13995_v17  ;;  %v14034_v41 = vld [vmem:[#allocation19 + $0x270] ss:$12 sps:$4 sm:$0xff]   ;;  %v14041_v17 = vld [vmem:[#allocation19 + $0x28c] ss:$12 sps:$4 sm:$0xff]  }
0x17ba   :  { %12253 = vmatprep.subr.bf16.mxu1 %v13996_v30  ;;  %v14039_v30 = vld [vmem:[#allocation19 + $0x288] ss:$12 sps:$4 sm:$0xff]  }
0x17bc   :  { %10453 = vmatpush1.bf16.msra.mxu0 %v13993_v52  ;;  %v14046_v52 = vld [vmem:[#allocation19 + $0x2a4] ss:$12 sps:$4 sm:$0xff]  }
0x17bd   :  { %12254 = vmatpush3.bf16.msra.mxu1 %v13997_v9  ;;  %10475 = vmatprep.subr.bf16.mxu0 %v14000_v0  ;;  %v6295_v9 = vsub.s32 4, %v16143_v61  ;;  %v6303_v0 = vsub.s32 6, %v16143_v61 }
0x17be   :  { %12267 = vmatprep.subr.bf16.mxu1 %v14022_v10  ;;  %v6299_v10 = vsub.s32 5, %v16143_v61 }
0x17bf   :  { %10455 = vmatmul.mubr.bf16.vlgmr.msra.gmra.mrb[64].mxu0 %v15913_v35  ;;  %v14033_v35 = vld [vmem:[#allocation19 + $0x338] ss:$12 sps:$4 sm:$0xff]  }
0x17c0   :  { %10822 = vmatmul.mubr.bf16.vlgmr.msra.gmra.mrb[100].mxu1 %v15915_v47  ;;  %10464 = vmatprep.mubr.bf16.mxu0 %v15931_v56  ;;  %v14007_v56 = vld [vmem:[#allocation19 + $0x1c8] ss:$12 sps:$4 sm:$0xff]  }
0x17c1   :  { %10476 = vmatpush1.bf16.msra.mxu0 %v13998_v44  ;;  %10829 = vmatprep.mubr.bf16.mxu1 %v15933_v59  ;;  %v6307_v44 = vsub.s32 7, %v16143_v61  ;;  %v14158_v61 = vld [vmem:[#allocation19 + $0x510] ss:$12 sps:$4 sm:$0xff]  }
0x17c2   :  { %10477 = vmatprep.subr.bf16.mxu0 %v14003_v38  ;;  %12268 = vmatpush3.bf16.msra.mxu1 %v14023_v22  ;;  %v14044_v38 = vld [vmem:[#allocation19 + $0x2a0] ss:$12 sps:$4 sm:$0xff]   ;;  %v6296_v22 = vrot.slane %v15885_v26, %v6295_v9 }
0x17c3   :  { %12269 = vmatprep.subr.bf16.mxu1 %v14027_v51  ;;  %v14051_v51 = vld [vmem:[#allocation19 + $0x2bc] ss:$12 sps:$4 sm:$0xff]  }
0x17c5   :  { %10478 = vmatpush1.bf16.msra.mxu0 %v14001_v60  ;;  %v6304_v60 = vrot.slane %v15885_v26, %v6303_v0 }
0x17c6   :  { %10479 = vmatprep.subr.bf16.mxu0 %v14006_v5  ;;  %12270 = vmatpush3.bf16.msra.mxu1 %v14028_v13  ;;  %v6300_v5 = vrot.slane %v15885_v26, %v6299_v10  ;;  %v15954_v13 = vrot.slane %v15885_v26, %v6307_v44 }
0x17c7   :  { %10465 = vmatmul.mubr.bf16.gmra.mrb[68].mxu0 %v15927_v16  ;;  %12271 = vmatprep.subr.bf16.mxu1 %v14032_v3  ;;  %v14043_v16 = vld [vmem:[#allocation19 + $0x368] ss:$12 sps:$4 sm:$0xff]  }
0x17c8   :  { %10830 = vmatmul.mubr.bf16.gmra.mrb[104].mxu1 %v15929_v19  ;;  %10507 = vmatprep.mubr.bf16.mxu0 %v15917_v11  ;;  %v14018_v11 = vld [vmem:[#allocation19 + $0x214] ss:$12 sps:$4 sm:$0xff]  }
0x17c9   :  { %10480 = vmatpush1.bf16.msra.mxu0 %v14004_v1  ;;  %v14049_v1 = vld [vmem:[#allocation19 + $0x2b8] ss:$12 sps:$4 sm:$0xff]  }
0x17ca   :  { %10481 = vmatprep.subr.bf16.mxu0 %v14009_v34  ;;  %12272 = vmatpush3.bf16.msra.mxu1 %v14033_v35 }
0x17cb   :  { %12273 = vmatprep.subr.bf16.mxu1 %v14037_v49 }
0x17cd   :  { %10482 = vmatpush1.bf16.msra.mxu0 %v14007_v56  ;;  %v14056_v56 = vld [vmem:[#allocation19 + $0x2d4] ss:$12 sps:$4 sm:$0xff]  }
0x17ce   :  { %10483 = vmatprep.subr.bf16.mxu0 %v14012_v57  ;;  %12274 = vmatpush3.bf16.msra.mxu1 %v14038_v45 }
0x17cf   :  { %12275 = vmatprep.subr.bf16.mxu1 %v14042_v25 }
0x17d1   :  { %10484 = vmatpush1.bf16.msra.mxu0 %v14010_v63 }
0x17d2   :  { %10485 = vmatprep.subr.bf16.mxu0 %v14015_v23  ;;  %12276 = vmatpush3.bf16.msra.mxu1 %v14043_v16 }
0x17d3   :  { %12277 = vmatprep.subr.bf16.mxu1 %v14047_v36 }
0x17d5   :  { %10486 = vmatpush1.bf16.msra.mxu0 %v14013_v62 }
0x17d6   :  { %10487 = vmatprep.subr.bf16.mxu0 %v14018_v11  ;;  %12278 = vmatpush3.bf16.msra.mxu1 %v14048_v39 }
0x17d7   :  { %12279 = vmatprep.subr.bf16.mxu1 %v14052_v4  ;;  %v14054_v4 = vld [vmem:[#allocation19 + $0x2d0] ss:$12 sps:$4 sm:$0xff]  }
0x17d9   :  { %10488 = vmatpush1.bf16.msra.mxu0 %v14016_v42 }
0x17da   :  { %10489 = vmatprep.subr.bf16.mxu0 %v14021_v6  ;;  %12280 = vmatpush3.bf16.msra.mxu1 %v14053_v37 }
0x17db   :  { %12281 = vmatprep.subr.bf16.mxu1 %v14057_v58  ;;  %v14061_v58 = vld [vmem:[#allocation19 + $0x2ec] ss:$12 sps:$4 sm:$0xff]  }
0x17dd   :  { %10490 = vmatpush1.bf16.msra.mxu0 %v14019_v15 }
0x17de   :  { %10491 = vmatprep.subr.bf16.mxu0 %v14026_v55  ;;  %12282 = vmatpush3.bf16.msra.mxu1 %v14058_v48 }
0x17df   :  { %12295 = vmatprep.subr.bf16.mxu1 %v14062_v18 }
0x17e1   :  { %10492 = vmatpush1.bf16.msra.mxu0 %v14024_v53 }
0x17e2   :  { %10493 = vmatprep.subr.bf16.mxu0 %v14031_v32 }
0x17e5   :  { %10494 = vmatpush1.bf16.msra.mxu0 %v14029_v21 }
0x17e6   :  { %10495 = vmatprep.subr.bf16.mxu0 %v14036_v12 }
0x17e9   :  { %10496 = vmatpush1.bf16.msra.mxu0 %v14034_v41 }
0x17ea   :  { %10497 = vmatprep.subr.bf16.mxu0 %v14041_v17 }
0x17ed   :  { %10498 = vmatpush1.bf16.msra.mxu0 %v14039_v30  ;;  %v14059_v30 = vld [vmem:[#allocation19 + $0x2e8] ss:$12 sps:$4 sm:$0xff]  }
0x17ee   :  { %10499 = vmatprep.subr.bf16.mxu0 %v14046_v52  ;;  %v14063_v52 = vld [vmem:[#allocation19 + $0x488] ss:$12 sps:$4 sm:$0xff]  }
0x17f1   :  { %10500 = vmatpush1.bf16.msra.mxu0 %v14044_v38  ;;  %v8076_v3 = vpop.f32.mrb[48].mxu0  ;;  %v14066_v38 = vld [vmem:[#allocation19 + $0x304] ss:$12 sps:$4 sm:$0xff]  }
0x17f2   :  { %v12775_v34 = vadd.f32 %v8076_v3, %v6296_v22  ;;  %v8182_v35 = vpop.f32.mrb[76].mxu1  ;;  %v8078_v49 = vpop.f32.mrb[49].mxu0  ;;  %10501 = vmatprep.subr.bf16.mxu0 %v14051_v51  ;;  %v14067_v51 = vld [vmem:[#allocation19 + $0x560] ss:$12 sps:$4 sm:$0xff]  }
0x17f3   :  { %v12783_v57 = vadd.f32 %v8182_v35, %v6304_v60  ;;  %v12776_v45 = vadd.f32 %v8078_v49, %v6300_v5  ;;  %v8184_v25 = vpop.f32.mrb[77].mxu1  ;;  %v8080_v63 = vpop.f32.mrb[50].mxu0 }
0x17f4   :  { %v12784_v23 = vadd.f32 %v8184_v25, %v15954_v13  ;;  %v12777_v16 = vadd.f32 %v8080_v63, %v6296_v22  ;;  %v8186_v36 = vpop.f32.mrb[78].mxu1  ;;  %v8082_v62 = vpop.f32.mrb[51].mxu0  ;;  %v8417_v42 = vmax.f32 %v12775_v34, 0.0 }
0x17f5   :  { %v12785_v11 = vadd.f32 %v8186_v36, %v6304_v60  ;;  %10502 = vmatpush1.bf16.msra.mxu0 %v14049_v1  ;;  %v12778_v26 = vadd.f32 %v8082_v62, %v6300_v5  ;;  %v8188_v39 = vpop.f32.mrb[79].mxu1  ;;  %v8419_v15 = vmax.f32 %v12783_v57, 0.0  ;;  %v8418_v55 = vmax.f32 %v12776_v45, 0.0 }
0x17f6   :  { %v8429_v6 = vmax.f32 %v12777_v16, 0.0  ;;  %v12786_v37 = vadd.f32 %v8188_v39, %v15954_v13  ;;  %10503 = vmatprep.subr.bf16.mxu0 %v14056_v56  ;;  %v8420_v53 = vmax.f32 %v12784_v23, 0.0  ;;  %v14064_v16 = vld [vmem:[#allocation19 + $0x300] ss:$12 sps:$4 sm:$0xff]   ;;  %v14071_v39 = vld [vmem:[#allocation19 + $0x31c] ss:$12 sps:$4 sm:$0xff]  }
0x17f7   :  { %v8431_v48 = vmax.f32 %v12785_v11, 0.0  ;;  %v8430_v18 = vmax.f32 %v12778_v26, 0.0  ;;  %v14068_v26 = vld [vmem:[#allocation19 + $0x4a0] ss:$12 sps:$4 sm:$0xff]  }
0x17f8   :  { %v15958_v32 = vpack.c.bf16 %v8429_v6, %v8417_v42  ;;  %v8432_v21 = vmax.f32 %v12786_v37, 0.0  ;;  %v14072_v37 = vld [vmem:[#allocation19 + $0x578] ss:$12 sps:$4 sm:$0xff]  }
0x17f9   :  { %v15960_v12 = vpack.c.bf16 %v8431_v48, %v8419_v15  ;;  %v15962_v41 = vpack.c.bf16 %v8430_v18, %v8418_v55  ;;  %10504 = vmatpush1.bf16.msra.mxu0 %v14054_v4  ;;  %v8086_v17 = vpop.f32.mrb[52].mxu0  ;;  %v14073_v18 = vld [vmem:[#allocation19 + $0x4b8] ss:$12 sps:$4 sm:$0xff]  }
0x17fa   :  { %v15964_v9 = vpack.c.bf16 %v8432_v21, %v8420_v53  ;;  %v12779_v0 = vadd.f32 %v8086_v17, %v6296_v22  ;;  %v8192_v10 = vpop.f32.mrb[80].mxu1  ;;  %v8088_v44 = vpop.f32.mrb[53].mxu0  ;;  %10505 = vmatprep.subr.bf16.mxu0 %v14061_v58  ;;  %v14076_v53 = vld [vmem:[#allocation19 + $0x334] ss:$12 sps:$4 sm:$0xff]   ;;  %v14077_v21 = vld [vmem:[#allocation19 + $0x590] ss:$12 sps:$4 sm:$0xff]  }
0x17fb   :  { %v12787_v3 = vadd.f32 %v8192_v10, %v6304_v60  ;;  %v12780_v1 = vadd.f32 %v8088_v44, %v6300_v5  ;;  %v8194_v34 = vpop.f32.mrb[81].mxu1  ;;  %v8090_v35 = vpop.f32.mrb[54].mxu0  ;;  %10870 = vmatprep.mubr.bf16.mxu1 %v15962_v41  ;;  %v14081_v17 = vld [vmem:[#allocation19 + $0x34c] ss:$12 sps:$4 sm:$0xff]   ;;  %v14086_v10 = vld [vmem:[#allocation19 + $0x364] ss:$12 sps:$4 sm:$0xff]  }
0x17fc   :  { %v12788_v49 = vadd.f32 %v8194_v34, %v15954_v13  ;;  %v12781_v56 = vadd.f32 %v8090_v35, %v6296_v22  ;;  %v8196_v57 = vpop.f32.mrb[82].mxu1  ;;  %v8092_v45 = vpop.f32.mrb[55].mxu0  ;;  %10871 = vmatmul.mubr.bf16.vlgmr.msra.gmra.mrb[108].mxu1 %v15958_v32  ;;  %v8441_v36 = vmax.f32 %v12779_v0, 0.0  ;;  %v14083_v0 = vld [vmem:[#allocation19 + $0x4e8] ss:$12 sps:$4 sm:$0xff]  }
0x17fd   :  { %v12789_v25 = vadd.f32 %v8196_v57, %v6304_v60  ;;  %10506 = vmatpush1.bf16.msra.mxu0 %v14059_v30  ;;  %v12782_v63 = vadd.f32 %v8092_v45, %v6300_v5  ;;  %v8198_v23 = vpop.f32.mrb[83].mxu1  ;;  %12296 = vmatpush3.bf16.msra.mxu1 %v14063_v52  ;;  %v8443_v4 = vmax.f32 %v12787_v3, 0.0  ;;  %v8442_v22 = vmax.f32 %v12780_v1, 0.0  ;;  %v14082_v30 = vld [vmem:[#allocation19 + $0x5a8] ss:$12 sps:$4 sm:$0xff]  }
0x17fe   :  { %v8453_v62 = vmax.f32 %v12781_v56, 0.0  ;;  %v12790_v11 = vadd.f32 %v8198_v23, %v15954_v13  ;;  %10528 = vmatprep.subr.bf16.mxu0 %v14066_v38  ;;  %12297 = vmatprep.subr.bf16.mxu1 %v14067_v51  ;;  %v8444_v58 = vmax.f32 %v12788_v49, 0.0  ;;  %v14069_v13 = vld [vmem:[#allocation19 + $0x318] ss:$12 sps:$4 sm:$0xff]   ;;  %v14079_v52 = vld [vmem:[#allocation19 + $0x348] ss:$12 sps:$4 sm:$0xff]  }
0x17ff   :  { %v8455_v42 = vmax.f32 %v12789_v25, 0.0  ;;  %v8454_v6 = vmax.f32 %v12782_v63, 0.0  ;;  %v14087_v44 = vld [vmem:[#allocation19 + $0x5c0] ss:$12 sps:$4 sm:$0xff]   ;;  %v14091_v3 = vld [vmem:[#allocation19 + $0x37c] ss:$12 sps:$4 sm:$0xff]  }
0x1800   :  { %v15970_v60 = vpack.c.bf16 %v8453_v62, %v8441_v36  ;;  %v8456_v5 = vmax.f32 %v12790_v11, 0.0  ;;  %10508 = vmatmul.mubr.bf16.vlgmr.msra.gmra.mrb[64].mxu0 %v15915_v47  ;;  %v14074_v47 = vld [vmem:[#allocation19 + $0x330] ss:$12 sps:$4 sm:$0xff]   ;;  %v14084_v38 = vld [vmem:[#allocation19 + $0x360] ss:$12 sps:$4 sm:$0xff]  }
0x1801   :  { %v15973_v15 = vpack.c.bf16 %v8455_v42, %v8443_v4  ;;  %v15975_v55 = vpack.c.bf16 %v8454_v6, %v8442_v22  ;;  %10517 = vmatprep.mubr.bf16.mxu0 %v15933_v59  ;;  %10529 = vmatpush1.bf16.msra.mxu0 %v14064_v16  ;;  %v14078_v59 = vld [vmem:[#allocation19 + $0x4d0] ss:$12 sps:$4 sm:$0xff]   ;;  %v14088_v51 = vld [vmem:[#allocation19 + $0x500] ss:$12 sps:$4 sm:$0xff]   ;;  %v14092_v1 = vld [vmem:[#allocation19 + $0x5d8] ss:$12 sps:$4 sm:$0xff]  }
0x1802   :  { %v15978_v48 = vpack.c.bf16 %v8456_v5, %v8444_v58  ;;  %12298 = vmatpush3.bf16.msra.mxu1 %v14068_v26  ;;  %10530 = vmatprep.subr.bf16.mxu0 %v14071_v39  ;;  %v14096_v34 = vld [vmem:[#allocation19 + $0x394] ss:$12 sps:$4 sm:$0xff]   ;;  %v14097_v35 = vld [vmem:[#allocation19 + $0x5f0] ss:$12 sps:$4 sm:$0xff]   ;;  %v14101_v57 = vld [vmem:[#allocation19 + $0x3ac] ss:$12 sps:$4 sm:$0xff]  }
0x1803   :  { %10878 = vmatprep.mubr.bf16.mxu1 %v15975_v55  ;;  %12299 = vmatprep.subr.bf16.mxu1 %v14072_v37  ;;  %v14094_v49 = vld [vmem:[#allocation19 + $0x390] ss:$12 sps:$4 sm:$0xff]   ;;  %v14126_v45 = vld [vmem:[#allocation19 + $0x6c8] ss:$12 sps:$4 sm:$0xff]   ;;  %v14131_v16 = vld [vmem:[#allocation19 + $0x6e0] ss:$12 sps:$4 sm:$0xff]  }
0x1804   :  { %10879 = vmatmul.mubr.bf16.gmra.mrb[112].mxu1 %v15970_v60  ;;  %v14098_v56 = vld [vmem:[#allocation19 + $0x530] ss:$12 sps:$4 sm:$0xff]   ;;  %v14099_v25 = vld [vmem:[#allocation19 + $0x3a8] ss:$12 sps:$4 sm:$0xff]   ;;  %v14102_v36 = vld [vmem:[#allocation19 + $0x3c0] ss:$12 sps:$4 sm:$0xff]  }
0x1805   :  { %10531 = vmatpush1.bf16.msra.mxu0 %v14069_v13  ;;  %10919 = vmatprep.mubr.bf16.mxu1 %v15964_v9  ;;  %v14104_v63 = vld [vmem:[#allocation19 + $0x3c4] ss:$12 sps:$4 sm:$0xff]   ;;  %v14127_v23 = vld [vmem:[#allocation19 + $0x608] ss:$12 sps:$4 sm:$0xff]   ;;  %v14132_v11 = vld [vmem:[#allocation19 + $0x620] ss:$12 sps:$4 sm:$0xff]  }
0x1806   :  { %12300 = vmatpush3.bf16.msra.mxu1 %v14073_v18  ;;  %10532 = vmatprep.subr.bf16.mxu0 %v14076_v53  ;;  %v14107_v62 = vld [vmem:[#allocation19 + $0x3dc] ss:$12 sps:$4 sm:$0xff]   ;;  %v14136_v26 = vld [vmem:[#allocation19 + $0x6f8] ss:$12 sps:$4 sm:$0xff]   ;;  %v14110_v4 = vld [vmem:[#allocation19 + $0x3f4] ss:$12 sps:$4 sm:$0xff]  }
0x1807   :  { %12301 = vmatprep.subr.bf16.mxu1 %v14077_v21  ;;  %v14105_v39 = vld [vmem:[#allocation19 + $0x3d8] ss:$12 sps:$4 sm:$0xff]   ;;  %v14141_v42 = vld [vmem:[#allocation19 + $0x710] ss:$12 sps:$4 sm:$0xff]   ;;  %v14146_v5 = vld [vmem:[#allocation19 + $0x728] ss:$12 sps:$4 sm:$0xff]  }
0x1808   :  { %10518 = vmatmul.mubr.bf16.gmra.mrb[68].mxu0 %v15929_v19  ;;  %v14089_v19 = vld [vmem:[#allocation19 + $0x378] ss:$12 sps:$4 sm:$0xff]   ;;  %v14108_v6 = vld [vmem:[#allocation19 + $0x3f0] ss:$12 sps:$4 sm:$0xff]   ;;  %v14111_v13 = vld [vmem:[#allocation19 + $0x408] ss:$12 sps:$4 sm:$0xff]  }
0x1809   :  { %10533 = vmatpush1.bf16.msra.mxu0 %v14074_v47  ;;  %10560 = vmatprep.mubr.bf16.mxu0 %v15962_v41  ;;  %v14093_v41 = vld [vmem:[#allocation19 + $0x518] ss:$12 sps:$4 sm:$0xff]   ;;  %v14142_v58 = vld [vmem:[#allocation19 + $0x650] ss:$12 sps:$4 sm:$0xff]   ;;  %v14147_v53 = vld [vmem:[#allocation19 + $0x668] ss:$12 sps:$4 sm:$0xff]  }
0x180a   :  { %12302 = vmatpush3.bf16.msra.mxu1 %v14078_v59  ;;  %10534 = vmatprep.subr.bf16.mxu0 %v14081_v17  ;;  %v14137_v22 = vld [vmem:[#allocation19 + $0x638] ss:$12 sps:$4 sm:$0xff]   ;;  %v14151_v21 = vld [vmem:[#allocation19 + $0x740] ss:$12 sps:$4 sm:$0xff]   ;;  %v14119_v59 = vld [vmem:[#allocation19 + $0x43c] ss:$12 sps:$4 sm:$0xff]  }
0x180b   :  { %12303 = vmatprep.subr.bf16.mxu1 %v14082_v30  ;;  %v14113_v37 = vld [vmem:[#allocation19 + $0x40c] ss:$12 sps:$4 sm:$0xff]   ;;  %v14116_v18 = vld [vmem:[#allocation19 + $0x424] ss:$12 sps:$4 sm:$0xff]  }
0x180c   :  { %v14114_v47 = vld [vmem:[#allocation19 + $0x420] ss:$12 sps:$4 sm:$0xff]   ;;  %v14156_v30 = vld [vmem:[#allocation19 + $0x758] ss:$12 sps:$4 sm:$0xff]  }
0x180d   :  { %10535 = vmatpush1.bf16.msra.mxu0 %v14079_v52  ;;  %v14152_v17 = vld [vmem:[#allocation19 + $0x680] ss:$12 sps:$4 sm:$0xff]   ;;  %v14117_v52 = vld [vmem:[#allocation19 + $0x438] ss:$12 sps:$4 sm:$0xff]  }
0x180e   :  { %12304 = vmatpush3.bf16.msra.mxu1 %v14083_v0  ;;  %10536 = vmatprep.subr.bf16.mxu0 %v14086_v10  ;;  %v14122_v0 = vld [vmem:[#allocation19 + $0x454] ss:$12 sps:$4 sm:$0xff]   ;;  %v14157_v10 = vld [vmem:[#allocation19 + $0x698] ss:$12 sps:$4 sm:$0xff]  }
0x180f   :  { %12305 = vmatprep.subr.bf16.mxu1 %v14087_v44  ;;  %v14161_v44 = vld [vmem:[#allocation19 + $0x770] ss:$12 sps:$4 sm:$0xff]  }
0x1811   :  { %10537 = vmatpush1.bf16.msra.mxu0 %v14084_v38  ;;  %v14120_v38 = vld [vmem:[#allocation19 + $0x450] ss:$12 sps:$4 sm:$0xff]  }
0x1812   :  { %12306 = vmatpush3.bf16.msra.mxu1 %v14088_v51  ;;  %10538 = vmatprep.subr.bf16.mxu0 %v14091_v3  ;;  %v14125_v51 = vld [vmem:[#allocation19 + $0x46c] ss:$12 sps:$4 sm:$0xff]   ;;  %v14162_v3 = vld [vmem:[#allocation19 + $0x6b0] ss:$12 sps:$4 sm:$0xff]  }
0x1813   :  { %12307 = vmatprep.subr.bf16.mxu1 %v14092_v1  ;;  %v14166_v1 = vld [vmem:[#allocation19 + $0x848] ss:$12 sps:$4 sm:$0xff]  }
0x1815   :  { %10539 = vmatpush1.bf16.msra.mxu0 %v14089_v19  ;;  %v14123_v19 = vld [vmem:[#allocation19 + $0x468] ss:$12 sps:$4 sm:$0xff]  }
0x1816   :  { %12308 = vmatpush3.bf16.msra.mxu1 %v14093_v41  ;;  %10540 = vmatprep.subr.bf16.mxu0 %v14096_v34  ;;  %v14130_v41 = vld [vmem:[#allocation19 + $0x484] ss:$12 sps:$4 sm:$0xff]   ;;  %v14128_v34 = vld [vmem:[#allocation19 + $0x480] ss:$12 sps:$4 sm:$0xff]  }
0x1817   :  { %12309 = vmatprep.subr.bf16.mxu1 %v14097_v35  ;;  %v14135_v35 = vld [vmem:[#allocation19 + $0x49c] ss:$12 sps:$4 sm:$0xff]  }
0x1819   :  { %10541 = vmatpush1.bf16.msra.mxu0 %v14094_v49  ;;  %v14133_v49 = vld [vmem:[#allocation19 + $0x498] ss:$12 sps:$4 sm:$0xff]  }
0x181a   :  { %12310 = vmatpush3.bf16.msra.mxu1 %v14098_v56  ;;  %10542 = vmatprep.subr.bf16.mxu0 %v14101_v57  ;;  %v14140_v56 = vld [vmem:[#allocation19 + $0x4b4] ss:$12 sps:$4 sm:$0xff]   ;;  %v14138_v57 = vld [vmem:[#allocation19 + $0x4b0] ss:$12 sps:$4 sm:$0xff]  }
0x181b   :  { %12323 = vmatprep.subr.bf16.mxu1 %v14126_v45  ;;  %v14145_v45 = vld [vmem:[#allocation19 + $0x4cc] ss:$12 sps:$4 sm:$0xff]  }
0x181d   :  { %10543 = vmatpush1.bf16.msra.mxu0 %v14099_v25  ;;  %10920 = vmatmul.mubr.bf16.vlgmr.msra.gmra.mrb[116].mxu1 %v15960_v12  ;;  %v14143_v25 = vld [vmem:[#allocation19 + $0x4c8] ss:$12 sps:$4 sm:$0xff]  }
0x181e   :  { %10927 = vmatprep.mubr.bf16.mxu1 %v15978_v48  ;;  %10544 = vmatprep.subr.bf16.mxu0 %v14104_v63  ;;  %v14150_v63 = vld [vmem:[#allocation19 + $0x4e4] ss:$12 sps:$4 sm:$0xff]  }
0x181f   :  { %12324 = vmatpush3.bf16.msra.mxu1 %v14127_v23  ;;  %v6274_v23 = vld [vmem:[#allocation17 + $0x8] sm:$0xf] }
0x1820   :  { %12325 = vmatprep.subr.bf16.mxu1 %v14131_v16  ;;  %v6312_v16 = vrot.slane %v6274_v23, %v16140_v28 }
0x1821   :  { %10545 = vmatpush1.bf16.msra.mxu0 %v14102_v36  ;;  %v6320_v36 = vrot.slane %v6274_v23, %v16142_v2 }
0x1822   :  { %10546 = vmatprep.subr.bf16.mxu0 %v14107_v62  ;;  %v6316_v62 = vrot.slane %v6274_v23, %v16141_v24 }
0x1823   :  { %12326 = vmatpush3.bf16.msra.mxu1 %v14132_v11 }
0x1824   :  { %12327 = vmatprep.subr.bf16.mxu1 %v14136_v26  ;;  %v14160_v26 = vld [vmem:[#allocation19 + $0x514] ss:$12 sps:$4 sm:$0xff]  }
0x1825   :  { %10547 = vmatpush1.bf16.msra.mxu0 %v14105_v39  ;;  %10928 = vmatmul.mubr.bf16.gmra.mrb[120].mxu1 %v15973_v15 }
0x1826   :  { %10548 = vmatprep.subr.bf16.mxu0 %v14110_v4 }
0x1827   :  { %12328 = vmatpush3.bf16.msra.mxu1 %v14137_v22 }
0x1828   :  { %12329 = vmatprep.subr.bf16.mxu1 %v14141_v42 }
0x1829   :  { %10549 = vmatpush1.bf16.msra.mxu0 %v14108_v6 }
0x182a   :  { %10550 = vmatprep.subr.bf16.mxu0 %v14113_v37 }
0x182b   :  { %12330 = vmatpush3.bf16.msra.mxu1 %v14142_v58 }
0x182c   :  { %12331 = vmatprep.subr.bf16.mxu1 %v14146_v5 }
0x182d   :  { %10551 = vmatpush1.bf16.msra.mxu0 %v14111_v13 }
0x182e   :  { %10552 = vmatprep.subr.bf16.mxu0 %v14116_v18 }
0x182f   :  { %12332 = vmatpush3.bf16.msra.mxu1 %v14147_v53 }
0x1830   :  { %12333 = vmatprep.subr.bf16.mxu1 %v14151_v21 }
0x1831   :  { %10553 = vmatpush1.bf16.msra.mxu0 %v14114_v47 }
0x1832   :  { %10554 = vmatprep.subr.bf16.mxu0 %v14119_v59  ;;  %v14165_v59 = vld [vmem:[#allocation19 + $0x52c] ss:$12 sps:$4 sm:$0xff]  }
0x1833   :  { %12334 = vmatpush3.bf16.msra.mxu1 %v14152_v17 }
0x1834   :  { %12335 = vmatprep.subr.bf16.mxu1 %v14156_v30 }
0x1835   :  { %10555 = vmatpush1.bf16.msra.mxu0 %v14117_v52 }
0x1836   :  { %10556 = vmatprep.subr.bf16.mxu0 %v14122_v0 }
0x1837   :  { %12336 = vmatpush3.bf16.msra.mxu1 %v14157_v10 }
0x1838   :  { %12337 = vmatprep.subr.bf16.mxu1 %v14161_v44 }
0x1839   :  { %10557 = vmatpush1.bf16.msra.mxu0 %v14120_v38 }
0x183a   :  { %10558 = vmatprep.subr.bf16.mxu0 %v14125_v51 }
0x183b   :  { %12338 = vmatpush3.bf16.msra.mxu1 %v14162_v3 }
0x183c   :  { %12351 = vmatprep.subr.bf16.mxu1 %v14166_v1 }
0x183d   :  { %10559 = vmatpush1.bf16.msra.mxu0 %v14123_v19  ;;  %v14163_v19 = vld [vmem:[#allocation19 + $0x528] ss:$12 sps:$4 sm:$0xff]  }
0x183e   :  { %10581 = vmatprep.subr.bf16.mxu0 %v14130_v41 }
0x1840   :  { %10561 = vmatmul.mubr.bf16.vlgmr.msra.gmra.mrb[64].mxu0 %v15958_v32  ;;  %v14148_v32 = vld [vmem:[#allocation19 + $0x4e0] ss:$12 sps:$4 sm:$0xff]  }
0x1841   :  { %10570 = vmatprep.mubr.bf16.mxu0 %v15975_v55  ;;  %10582 = vmatpush1.bf16.msra.mxu0 %v14128_v34  ;;  %v14155_v55 = vld [vmem:[#allocation19 + $0x4fc] ss:$12 sps:$4 sm:$0xff]  }
0x1842   :  { %10583 = vmatprep.subr.bf16.mxu0 %v14135_v35 }
0x1845   :  { %10584 = vmatpush1.bf16.msra.mxu0 %v14133_v49  ;;  %v14167_v49 = vld [vmem:[#allocation19 + $0x788] ss:$12 sps:$4 sm:$0xff]  }
0x1846   :  { %10585 = vmatprep.subr.bf16.mxu0 %v14140_v56  ;;  %v14170_v56 = vld [vmem:[#allocation19 + $0x544] ss:$12 sps:$4 sm:$0xff]  }
0x1848   :  { %10571 = vmatmul.mubr.bf16.gmra.mrb[68].mxu0 %v15970_v60  ;;  %v15997_v60 = vrot.slane %v6274_v23, %v6291_v8  ;;  %v14171_v23 = vld [vmem:[#allocation19 + $0x860] ss:$12 sps:$4 sm:$0xff]  }
0x1849   :  { %10586 = vmatpush1.bf16.msra.mxu0 %v14138_v57  ;;  %10613 = vmatprep.mubr.bf16.mxu0 %v15964_v9  ;;  %v14153_v9 = vld [vmem:[#allocation19 + $0x4f8] ss:$12 sps:$4 sm:$0xff]  }
0x184a   :  { %10587 = vmatprep.subr.bf16.mxu0 %v14145_v45 }
0x184d   :  { %10588 = vmatpush1.bf16.msra.mxu0 %v14143_v25 }
0x184e   :  { %10589 = vmatprep.subr.bf16.mxu0 %v14150_v63 }
0x1851   :  { %10590 = vmatpush1.bf16.msra.mxu0 %v14148_v32 }
0x1852   :  { %v8288_v11 = vpop.f32.mrb[56].mxu0  ;;  %10591 = vmatprep.subr.bf16.mxu0 %v14155_v55 }
0x1853   :  { %v12791_v39 = vadd.f32 %v8288_v11, %v6312_v16  ;;  %v8394_v4 = vpop.f32.mrb[84].mxu1  ;;  %v8290_v22 = vpop.f32.mrb[57].mxu0 }
0x1854   :  { %v12799_v42 = vadd.f32 %v8394_v4, %v6320_v36  ;;  %v12792_v6 = vadd.f32 %v8290_v22, %v6316_v62  ;;  %v8396_v37 = vpop.f32.mrb[85].mxu1  ;;  %v8292_v58 = vpop.f32.mrb[58].mxu0 }
0x1855   :  { %v12800_v5 = vadd.f32 %v8396_v37, %v15997_v60  ;;  %v12793_v13 = vadd.f32 %v8292_v58, %v6312_v16  ;;  %v8398_v18 = vpop.f32.mrb[86].mxu1  ;;  %10592 = vmatpush1.bf16.msra.mxu0 %v14153_v9  ;;  %v8294_v53 = vpop.f32.mrb[59].mxu0  ;;  %v8421_v17 = vmax.f32 %v12791_v39, 0.0 }
0x1856   :  { %v12801_v8 = vadd.f32 %v8398_v18, %v6320_v36  ;;  %v12794_v21 = vadd.f32 %v8294_v53, %v6316_v62  ;;  %v8400_v47 = vpop.f32.mrb[87].mxu1  ;;  %10593 = vmatprep.subr.bf16.mxu0 %v14160_v26  ;;  %v8423_v0 = vmax.f32 %v12799_v42, 0.0  ;;  %v8422_v10 = vmax.f32 %v12792_v6, 0.0  ;;  %v14168_v42 = vld [vmem:[#allocation19 + $0x540] ss:$12 sps:$4 sm:$0xff]  }
0x1857   :  { %v8433_v30 = vmax.f32 %v12793_v13, 0.0  ;;  %v12802_v52 = vadd.f32 %v8400_v47, %v15997_v60  ;;  %v8424_v51 = vmax.f32 %v12800_v5, 0.0  ;;  %v14172_v5 = vld [vmem:[#allocation19 + $0x7a0] ss:$12 sps:$4 sm:$0xff]   ;;  %v14175_v13 = vld [vmem:[#allocation19 + $0x55c] ss:$12 sps:$4 sm:$0xff]  }
0x1858   :  { %v8435_v44 = vmax.f32 %v12801_v8, 0.0  ;;  %v8434_v38 = vmax.f32 %v12794_v21, 0.0  ;;  %v14176_v8 = vld [vmem:[#allocation19 + $0x878] ss:$12 sps:$4 sm:$0xff]  }
0x1859   :  { %v16001_v3 = vpack.c.bf16 %v8433_v30, %v8421_v17  ;;  %v8436_v1 = vmax.f32 %v12802_v52, 0.0  ;;  %10594 = vmatpush1.bf16.msra.mxu0 %v14158_v61 }
0x185a   :  { %v16003_v41 = vpack.c.bf16 %v8435_v44, %v8423_v0  ;;  %v16005_v34 = vpack.c.bf16 %v8434_v38, %v8422_v10  ;;  %v8298_v35 = vpop.f32.mrb[60].mxu0  ;;  %10595 = vmatprep.subr.bf16.mxu0 %v14165_v59  ;;  %v14177_v10 = vld [vmem:[#allocation19 + $0x7b8] ss:$12 sps:$4 sm:$0xff]   ;;  %v14180_v44 = vld [vmem:[#allocation19 + $0x574] ss:$12 sps:$4 sm:$0xff]  }
0x185b   :  { %v16007_v57 = vpack.c.bf16 %v8436_v1, %v8424_v51  ;;  %v12795_v45 = vadd.f32 %v8298_v35, %v6312_v16  ;;  %v8404_v25 = vpop.f32.mrb[88].mxu1  ;;  %v8300_v63 = vpop.f32.mrb[61].mxu0  ;;  %v14181_v38 = vld [vmem:[#allocation19 + $0x890] ss:$12 sps:$4 sm:$0xff]   ;;  %v14186_v35 = vld [vmem:[#allocation19 + $0x8a8] ss:$12 sps:$4 sm:$0xff]  }
0x185c   :  { %v12803_v32 = vadd.f32 %v8404_v25, %v6320_v36  ;;  %v12796_v55 = vadd.f32 %v8300_v63, %v6316_v62  ;;  %v8406_v9 = vpop.f32.mrb[89].mxu1  ;;  %v8302_v11 = vpop.f32.mrb[62].mxu0  ;;  %10968 = vmatprep.mubr.bf16.mxu1 %v16005_v34  ;;  %v14178_v51 = vld [vmem:[#allocation19 + $0x570] ss:$12 sps:$4 sm:$0xff]   ;;  %v14191_v25 = vld [vmem:[#allocation19 + $0x8c0] ss:$12 sps:$4 sm:$0xff]  }
0x185d   :  { %v12804_v26 = vadd.f32 %v8406_v9, %v15997_v60  ;;  %v12797_v39 = vadd.f32 %v8302_v11, %v6312_v16  ;;  %v8408_v4 = vpop.f32.mrb[90].mxu1  ;;  %10596 = vmatpush1.bf16.msra.mxu0 %v14163_v19  ;;  %v8304_v22 = vpop.f32.mrb[63].mxu0  ;;  %10969 = vmatmul.mubr.bf16.vlgmr.msra.gmra.mrb[124].mxu1 %v16001_v3  ;;  %v8445_v18 = vmax.f32 %v12795_v45, 0.0  ;;  %v14182_v1 = vld [vmem:[#allocation19 + $0x7d0] ss:$12 sps:$4 sm:$0xff]  }
0x185e   :  { %v12805_v6 = vadd.f32 %v8408_v4, %v6320_v36  ;;  %v12798_v37 = vadd.f32 %v8304_v22, %v6316_v62  ;;  %v8410_v58 = vpop.f32.mrb[91].mxu1  ;;  %12352 = vmatpush3.bf16.msra.mxu1 %v14167_v49  ;;  %10597 = vmatprep.subr.bf16.mxu0 %v14170_v56  ;;  %v8447_v16 = vmax.f32 %v12803_v32, 0.0  ;;  %v8446_v21 = vmax.f32 %v12796_v55, 0.0  ;;  %v14173_v62 = vld [vmem:[#allocation19 + $0x558] ss:$12 sps:$4 sm:$0xff]  }
0x185f   :  { %v8457_v53 = vmax.f32 %v12797_v39, 0.0  ;;  %v12806_v61 = vadd.f32 %v8410_v58, %v15997_v60  ;;  %12353 = vmatprep.subr.bf16.mxu1 %v14171_v23  ;;  %v8448_v17 = vmax.f32 %v12804_v26, 0.0  ;;  %v14185_v19 = vld [vmem:[#allocation19 + $0x58c] ss:$12 sps:$4 sm:$0xff]   ;;  %v14183_v49 = vld [vmem:[#allocation19 + $0x588] ss:$12 sps:$4 sm:$0xff]  }
0x1860   :  { %v8459_v47 = vmax.f32 %v12805_v6, 0.0  ;;  %v8458_v59 = vmax.f32 %v12798_v37, 0.0  ;;  %v14187_v56 = vld [vmem:[#allocation19 + $0x7e8] ss:$12 sps:$4 sm:$0xff]   ;;  %v14190_v45 = vld [vmem:[#allocation19 + $0x5a4] ss:$12 sps:$4 sm:$0xff]  }
0x1861   :  { %v16013_v30 = vpack.c.bf16 %v8457_v53, %v8445_v18  ;;  %v8460_v36 = vmax.f32 %v12806_v61, 0.0  ;;  %10598 = vmatpush1.bf16.msra.mxu0 %v14168_v42  ;;  %v14188_v63 = vld [vmem:[#allocation19 + $0x5a0] ss:$12 sps:$4 sm:$0xff]   ;;  %v14195_v32 = vld [vmem:[#allocation19 + $0x5bc] ss:$12 sps:$4 sm:$0xff]  }
0x1862   :  { %v16015_v52 = vpack.c.bf16 %v8459_v47, %v8447_v16  ;;  %v16017_v0 = vpack.c.bf16 %v8458_v59, %v8446_v21  ;;  %12354 = vmatpush3.bf16.msra.mxu1 %v14172_v5  ;;  %10599 = vmatprep.subr.bf16.mxu0 %v14175_v13  ;;  %v14192_v23 = vld [vmem:[#allocation19 + $0x800] ss:$12 sps:$4 sm:$0xff]   ;;  %v14196_v55 = vld [vmem:[#allocation19 + $0x8d8] ss:$12 sps:$4 sm:$0xff]   ;;  %v14201_v4 = vld [vmem:[#allocation19 + $0x8f0] ss:$12 sps:$4 sm:$0xff]  }
0x1863   :  { %v16019_v60 = vpack.c.bf16 %v8460_v36, %v8448_v17  ;;  %12355 = vmatprep.subr.bf16.mxu1 %v14176_v8  ;;  %v14193_v9 = vld [vmem:[#allocation19 + $0x5b8] ss:$12 sps:$4 sm:$0xff]   ;;  %v14200_v26 = vld [vmem:[#allocation19 + $0x5d4] ss:$12 sps:$4 sm:$0xff]   ;;  %v14198_v37 = vld [vmem:[#allocation19 + $0x5d0] ss:$12 sps:$4 sm:$0xff]  }
0x1864   :  { %10976 = vmatprep.mubr.bf16.mxu1 %v16017_v0  ;;  %v14197_v11 = vld [vmem:[#allocation19 + $0x818] ss:$12 sps:$4 sm:$0xff]   ;;  %v14202_v5 = vld [vmem:[#allocation19 + $0x830] ss:$12 sps:$4 sm:$0xff]   ;;  %v14203_v53 = vld [vmem:[#allocation19 + $0x5e8] ss:$12 sps:$4 sm:$0xff]  }
0x1865   :  { %10600 = vmatpush1.bf16.msra.mxu0 %v14173_v62  ;;  %10977 = vmatmul.mubr.bf16.gmra.mrb[128].mxu1 %v16013_v30  ;;  %v14205_v13 = vld [vmem:[#allocation19 + $0x5ec] ss:$12 sps:$4 sm:$0xff]   ;;  %v14208_v61 = vld [vmem:[#allocation19 + $0x604] ss:$12 sps:$4 sm:$0xff]   ;;  %v14211_v36 = vld [vmem:[#allocation19 + $0x61c] ss:$12 sps:$4 sm:$0xff]  }
0x1866   :  { %12356 = vmatpush3.bf16.msra.mxu1 %v14177_v10  ;;  %11017 = vmatprep.mubr.bf16.mxu1 %v16007_v57  ;;  %v14206_v59 = vld [vmem:[#allocation19 + $0x600] ss:$12 sps:$4 sm:$0xff]   ;;  %v14209_v10 = vld [vmem:[#allocation19 + $0x618] ss:$12 sps:$4 sm:$0xff]  }
0x1867   :  { %10601 = vmatprep.subr.bf16.mxu0 %v14180_v44  ;;  %12357 = vmatprep.subr.bf16.mxu1 %v14181_v38  ;;  %v14214_v44 = vld [vmem:[#allocation19 + $0x634] ss:$12 sps:$4 sm:$0xff]   ;;  %v14212_v38 = vld [vmem:[#allocation19 + $0x630] ss:$12 sps:$4 sm:$0xff]  }
0x1869   :  { %10602 = vmatpush1.bf16.msra.mxu0 %v14178_v51  ;;  %v14217_v51 = vld [vmem:[#allocation19 + $0x64c] ss:$12 sps:$4 sm:$0xff]  }
0x186a   :  { %12358 = vmatpush3.bf16.msra.mxu1 %v14182_v1  ;;  %10603 = vmatprep.subr.bf16.mxu0 %v14185_v19  ;;  %v14215_v1 = vld [vmem:[#allocation19 + $0x648] ss:$12 sps:$4 sm:$0xff]   ;;  %v16031_v19 = vld [vmem:[#allocation20] sm:$0x7] }
0x186b   :  { %12359 = vmatprep.subr.bf16.mxu1 %v14186_v35  ;;  %v14223_v35 = vld [vmem:[#allocation19 + $0x67c] ss:$12 sps:$4 sm:$0xff]  }
0x186d   :  { %10604 = vmatpush1.bf16.msra.mxu0 %v14183_v49  ;;  %v8882_v49 = vrot.slane %v16031_v19, %v16142_v2  ;;  %v14227_v2 = vld [vmem:[#allocation19 + $0x6a8] ss:$12 sps:$4 sm:$0xff]  }
0x186e   :  { %12360 = vmatpush3.bf16.msra.mxu1 %v14187_v56  ;;  %10605 = vmatprep.subr.bf16.mxu0 %v14190_v45  ;;  %v14221_v56 = vld [vmem:[#allocation19 + $0x678] ss:$12 sps:$4 sm:$0xff]   ;;  %v14226_v45 = vld [vmem:[#allocation19 + $0x694] ss:$12 sps:$4 sm:$0xff]  }
0x186f   :  { %12361 = vmatprep.subr.bf16.mxu1 %v14191_v25 }
0x1871   :  { %10606 = vmatpush1.bf16.msra.mxu0 %v14188_v63 }
0x1872   :  { %12362 = vmatpush3.bf16.msra.mxu1 %v14192_v23  ;;  %10607 = vmatprep.subr.bf16.mxu0 %v14195_v32  ;;  %v14224_v32 = vld [vmem:[#allocation19 + $0x690] ss:$12 sps:$4 sm:$0xff]  }
0x1873   :  { %v12227_v39 = vpop.f32.mrb[92].mxu1  ;;  %12363 = vmatprep.subr.bf16.mxu1 %v14196_v55 }
0x1874   :  { %v12228_v22 = vpop.f32.mrb[93].mxu1 }
0x1875   :  { %v12229_v42 = vadd.f32 %v12228_v22, %v12227_v39  ;;  %10608 = vmatpush1.bf16.msra.mxu0 %v14193_v9  ;;  %v12230_v6 = vpop.f32.mrb[94].mxu1  ;;  %v14229_v9 = vld [vmem:[#allocation19 + $0x6ac] ss:$12 sps:$4 sm:$0xff]   ;;  %v14232_v22 = vld [vmem:[#allocation19 + $0x6c4] ss:$12 sps:$4 sm:$0xff]  }
0x1876   :  { %v12231_v58 = vpop.f32.mrb[95].mxu1  ;;  %12364 = vmatpush3.bf16.msra.mxu1 %v14197_v11  ;;  %10609 = vmatprep.subr.bf16.mxu0 %v14200_v26 }
0x1877   :  { %v12232_v18 = vadd.f32 %v12231_v58, %v12230_v6  ;;  %12365 = vmatprep.subr.bf16.mxu1 %v14201_v4  ;;  %v10775_v63 = vadd.f32 %v12229_v42, %v8882_v49 }
0x1879   :  { %10610 = vmatpush1.bf16.msra.mxu0 %v14198_v37  ;;  %v10778_v11 = vadd.f32 %v12232_v18, %v8882_v49 }
0x187a   :  { %12366 = vmatpush3.bf16.msra.mxu1 %v14202_v5  ;;  %10611 = vmatprep.subr.bf16.mxu0 %v14205_v13  ;;  %v14230_v13 = vld [vmem:[#allocation19 + $0x6c0] ss:$12 sps:$4 sm:$0xff]  }
0x187b   :  { %v12233_v8 = vpop.f32.mrb[96].mxu1 }
0x187c   :  { %v12234_v16 = vpop.f32.mrb[97].mxu1 }
0x187d   :  { %v12235_v21 = vadd.f32 %v12234_v16, %v12233_v8  ;;  %10612 = vmatpush1.bf16.msra.mxu0 %v14203_v53  ;;  %v12236_v47 = vpop.f32.mrb[98].mxu1  ;;  %11018 = vmatmul.mubr.bf16.vlgmr.msra.gmra.mrb[132].mxu1 %v16003_v41 }
0x187e   :  { %v12237_v17 = vpop.f32.mrb[99].mxu1  ;;  %11025 = vmatprep.mubr.bf16.mxu1 %v16019_v60  ;;  %10634 = vmatprep.subr.bf16.mxu0 %v14208_v61  ;;  %v14235_v61 = vld [vmem:[#allocation19 + $0x6dc] ss:$12 sps:$4 sm:$0xff]  }
0x187f   :  { %v12238_v62 = vadd.f32 %v12237_v17, %v12236_v47  ;;  %v10783_v42 = vadd.f32 %v12235_v21, %v8882_v49  ;;  %v14238_v17 = vld [vmem:[#allocation19 + $0x6f4] ss:$12 sps:$4 sm:$0xff]   ;;  %v14241_v21 = vld [vmem:[#allocation19 + $0x70c] ss:$12 sps:$4 sm:$0xff]  }
0x1880   :  { %10614 = vmatmul.mubr.bf16.vlgmr.msra.gmra.mrb[64].mxu0 %v15960_v12  ;;  %v14220_v12 = vld [vmem:[#allocation19 + $0x664] ss:$12 sps:$4 sm:$0xff]  }
0x1881   :  { %10623 = vmatprep.mubr.bf16.mxu0 %v15978_v48  ;;  %10635 = vmatpush1.bf16.msra.mxu0 %v14206_v59  ;;  %v14218_v48 = vld [vmem:[#allocation19 + $0x660] ss:$12 sps:$4 sm:$0xff]   ;;  %v10786_v18 = vadd.f32 %v12238_v62, %v8882_v49  ;;  %v14233_v59 = vld [vmem:[#allocation19 + $0x6d8] ss:$12 sps:$4 sm:$0xff]   ;;  %v14247_v62 = vld [vmem:[#allocation19 + $0x73c] ss:$12 sps:$4 sm:$0xff]  }
0x1882   :  { %10636 = vmatprep.subr.bf16.mxu0 %v14211_v36  ;;  %v14236_v36 = vld [vmem:[#allocation19 + $0x6f0] ss:$12 sps:$4 sm:$0xff]  }
0x1883   :  { %v14256_v49 = vld [vmem:[#allocation19 + $0x784] ss:$12 sps:$4 sm:$0xff]  }
0x1885   :  { %10637 = vmatpush1.bf16.msra.mxu0 %v14209_v10  ;;  %11026 = vmatmul.mubr.bf16.gmra.mrb[136].mxu1 %v16015_v52  ;;  %v14239_v10 = vld [vmem:[#allocation19 + $0x708] ss:$12 sps:$4 sm:$0xff]  }
0x1886   :  { %10638 = vmatprep.subr.bf16.mxu0 %v14214_v44  ;;  %v14244_v44 = vld [vmem:[#allocation19 + $0x724] ss:$12 sps:$4 sm:$0xff]  }
0x1888   :  { %10624 = vmatmul.mubr.bf16.gmra.mrb[68].mxu0 %v15973_v15 }
0x1889   :  { %10639 = vmatpush1.bf16.msra.mxu0 %v14212_v38  ;;  %10666 = vmatprep.mubr.bf16.mxu0 %v16005_v34  ;;  %v14242_v38 = vld [vmem:[#allocation19 + $0x720] ss:$12 sps:$4 sm:$0xff]  }
0x188a   :  { %10640 = vmatprep.subr.bf16.mxu0 %v14217_v51  ;;  %v14245_v51 = vld [vmem:[#allocation19 + $0x738] ss:$12 sps:$4 sm:$0xff]  }
0x188d   :  { %10641 = vmatpush1.bf16.msra.mxu0 %v14215_v1  ;;  %v14250_v1 = vld [vmem:[#allocation19 + $0x754] ss:$12 sps:$4 sm:$0xff]  }
0x188e   :  { %10642 = vmatprep.subr.bf16.mxu0 %v14220_v12  ;;  %v14248_v12 = vld [vmem:[#allocation19 + $0x750] ss:$12 sps:$4 sm:$0xff]  }
0x1891   :  { %10643 = vmatpush1.bf16.msra.mxu0 %v14218_v48  ;;  %v14253_v48 = vld [vmem:[#allocation19 + $0x76c] ss:$12 sps:$4 sm:$0xff]  }
0x1892   :  { %10644 = vmatprep.subr.bf16.mxu0 %v14223_v35  ;;  %v14251_v35 = vld [vmem:[#allocation19 + $0x768] ss:$12 sps:$4 sm:$0xff]  }
0x1893   :  { %v12255_v15 = vpop.f32.mrb[100].mxu1 }
0x1894   :  { %v12256_v25 = vpop.f32.mrb[101].mxu1 }
0x1895   :  { %v12257_v34 = vadd.f32 %v12256_v25, %v12255_v15  ;;  %10645 = vmatpush1.bf16.msra.mxu0 %v14221_v56  ;;  %v12258_v23 = vpop.f32.mrb[102].mxu1  ;;  %v14254_v56 = vld [vmem:[#allocation19 + $0x780] ss:$12 sps:$4 sm:$0xff]   ;;  %v14257_v15 = vld [vmem:[#allocation19 + $0x798] ss:$12 sps:$4 sm:$0xff]  }
0x1896   :  { %v12259_v55 = vpop.f32.mrb[103].mxu1  ;;  %10646 = vmatprep.subr.bf16.mxu0 %v14226_v45  ;;  %v14259_v45 = vld [vmem:[#allocation19 + $0x79c] ss:$12 sps:$4 sm:$0xff]   ;;  %v14262_v25 = vld [vmem:[#allocation19 + $0x7b4] ss:$12 sps:$4 sm:$0xff]  }
0x1897   :  { %v16035_v26 = vadd.f32 %v12257_v34, %v10775_v63  ;;  %v12260_v39 = vadd.f32 %v12259_v55, %v12258_v23  ;;  %v14260_v63 = vld [vmem:[#allocation19 + $0x7b0] ss:$12 sps:$4 sm:$0xff]   ;;  %v14265_v34 = vld [vmem:[#allocation19 + $0x7cc] ss:$12 sps:$4 sm:$0xff]   ;;  %v14263_v23 = vld [vmem:[#allocation19 + $0x7c8] ss:$12 sps:$4 sm:$0xff]  }
0x1899   :  { %v16037_v4 = vadd.f32 %v12260_v39, %v10778_v11  ;;  %10647 = vmatpush1.bf16.msra.mxu0 %v14224_v32  ;;  %v14268_v32 = vld [vmem:[#allocation19 + $0x7e4] ss:$12 sps:$4 sm:$0xff]  }
0x189a   :  { %10648 = vmatprep.subr.bf16.mxu0 %v14229_v9 }
0x189b   :  { %v12261_v6 = vpop.f32.mrb[104].mxu1 }
0x189c   :  { %v12262_v37 = vpop.f32.mrb[105].mxu1 }
0x189d   :  { %v12263_v58 = vadd.f32 %v12262_v37, %v12261_v6  ;;  %10649 = vmatpush1.bf16.msra.mxu0 %v14227_v2  ;;  %v12264_v5 = vpop.f32.mrb[106].mxu1  ;;  %v14269_v2 = vld [vmem:[#allocation19 + $0x7f8] ss:$12 sps:$4 sm:$0xff]   ;;  %v14274_v6 = vld [vmem:[#allocation19 + $0x814] ss:$12 sps:$4 sm:$0xff]  }
0x189e   :  { %v12265_v53 = vpop.f32.mrb[107].mxu1  ;;  %10650 = vmatprep.subr.bf16.mxu0 %v14232_v22 }
0x189f   :  { %v16039_v8 = vadd.f32 %v12263_v58, %v10783_v42  ;;  %v12266_v16 = vadd.f32 %v12265_v53, %v12264_v5  ;;  %v14272_v42 = vld [vmem:[#allocation19 + $0x810] ss:$12 sps:$4 sm:$0xff]   ;;  %v14277_v58 = vld [vmem:[#allocation19 + $0x82c] ss:$12 sps:$4 sm:$0xff]  }
0x18a1   :  { %v16041_v47 = vadd.f32 %v12266_v16, %v10786_v18  ;;  %10651 = vmatpush1.bf16.msra.mxu0 %v14230_v13  ;;  %v14275_v18 = vld [vmem:[#allocation19 + $0x828] ss:$12 sps:$4 sm:$0xff]  }
0x18a2   :  { %10652 = vmatprep.subr.bf16.mxu0 %v14235_v61 }
0x18a5   :  { %10653 = vmatpush1.bf16.msra.mxu0 %v14233_v59  ;;  %v14280_v59 = vld [vmem:[#allocation19 + $0x844] ss:$12 sps:$4 sm:$0xff]  }
0x18a6   :  { %10654 = vmatprep.subr.bf16.mxu0 %v14238_v17 }
0x18a9   :  { %10655 = vmatpush1.bf16.msra.mxu0 %v14236_v36 }
0x18aa   :  { %10656 = vmatprep.subr.bf16.mxu0 %v14241_v21  ;;  %v14283_v21 = vld [vmem:[#allocation19 + $0x85c] ss:$12 sps:$4 sm:$0xff]  }
0x18ad   :  { %10657 = vmatpush1.bf16.msra.mxu0 %v14239_v10  ;;  %v14281_v10 = vld [vmem:[#allocation19 + $0x858] ss:$12 sps:$4 sm:$0xff]  }
0x18ae   :  { %10658 = vmatprep.subr.bf16.mxu0 %v14244_v44  ;;  %v14286_v44 = vld [vmem:[#allocation19 + $0x874] ss:$12 sps:$4 sm:$0xff]  }
0x18b1   :  { %10659 = vmatpush1.bf16.msra.mxu0 %v14242_v38  ;;  %v14284_v38 = vld [vmem:[#allocation19 + $0x870] ss:$12 sps:$4 sm:$0xff]  }
0x18b2   :  { %10660 = vmatprep.subr.bf16.mxu0 %v14247_v62  ;;  %v14289_v62 = vld [vmem:[#allocation19 + $0x88c] ss:$12 sps:$4 sm:$0xff]  }
0x18b5   :  { %10661 = vmatpush1.bf16.msra.mxu0 %v14245_v51  ;;  %v14287_v51 = vld [vmem:[#allocation19 + $0x888] ss:$12 sps:$4 sm:$0xff]  }
0x18b6   :  { %10662 = vmatprep.subr.bf16.mxu0 %v14250_v1  ;;  %v14292_v1 = vld [vmem:[#allocation19 + $0x8a4] ss:$12 sps:$4 sm:$0xff]  }
0x18b9   :  { %10663 = vmatpush1.bf16.msra.mxu0 %v14248_v12 }
0x18ba   :  { %10664 = vmatprep.subr.bf16.mxu0 %v14253_v48 }
0x18bd   :  { %10665 = vmatpush1.bf16.msra.mxu0 %v14251_v35  ;;  %v14293_v35 = vld [vmem:[#allocation19 + $0x8b8] ss:$12 sps:$4 sm:$0xff]  }
0x18be   :  { %10687 = vmatprep.subr.bf16.mxu0 %v14256_v49 }
0x18c0   :  { %10667 = vmatmul.mubr.bf16.vlgmr.msra.gmra.mrb[64].mxu0 %v16001_v3  ;;  %v14266_v3 = vld [vmem:[#allocation19 + $0x7e0] ss:$12 sps:$4 sm:$0xff]  }
0x18c1   :  { %10676 = vmatprep.mubr.bf16.mxu0 %v16017_v0  ;;  %10688 = vmatpush1.bf16.msra.mxu0 %v14254_v56  ;;  %v14271_v0 = vld [vmem:[#allocation19 + $0x7fc] ss:$12 sps:$4 sm:$0xff]  }
0x18c2   :  { %10689 = vmatprep.subr.bf16.mxu0 %v14259_v45  ;;  %v14298_v45 = vld [vmem:[#allocation19 + $0x8d4] ss:$12 sps:$4 sm:$0xff]  }
0x18c5   :  { %10690 = vmatpush1.bf16.msra.mxu0 %v14257_v15 }
0x18c6   :  { %10691 = vmatprep.subr.bf16.mxu0 %v14262_v25 }
0x18c8   :  { %10677 = vmatmul.mubr.bf16.gmra.mrb[68].mxu0 %v16013_v30 }
0x18c9   :  { %10692 = vmatpush1.bf16.msra.mxu0 %v14260_v63  ;;  %10719 = vmatprep.mubr.bf16.mxu0 %v16007_v57 }
0x18ca   :  { %10693 = vmatprep.subr.bf16.mxu0 %v14265_v34  ;;  %v14296_v34 = vld [vmem:[#allocation19 + $0x8d0] ss:$12 sps:$4 sm:$0xff]  }
0x18cd   :  { %10694 = vmatpush1.bf16.msra.mxu0 %v14263_v23 }
0x18ce   :  { %10695 = vmatprep.subr.bf16.mxu0 %v14268_v32  ;;  %v14301_v32 = vld [vmem:[#allocation19 + $0x8ec] ss:$12 sps:$4 sm:$0xff]  }
0x18cf   :  { %v12283_v55 = vpop.f32.mrb[108].mxu1 }
0x18d0   :  { %v12284_v9 = vpop.f32.mrb[109].mxu1 }
0x18d1   :  { %10696 = vmatpush1.bf16.msra.mxu0 %v14266_v3  ;;  %v12285_v11 = vadd.f32 %v12284_v9, %v12283_v55  ;;  %v12286_v39 = vpop.f32.mrb[110].mxu1  ;;  %v14299_v55 = vld [vmem:[#allocation19 + $0x8e8] ss:$12 sps:$4 sm:$0xff]  }
0x18d2   :  { %10697 = vmatprep.subr.bf16.mxu0 %v14271_v0  ;;  %v12287_v22 = vpop.f32.mrb[111].mxu1 }
0x18d3   :  { %v10873_v30 = vadd.f32 %v12285_v11, %v16035_v26  ;;  %v12288_v37 = vadd.f32 %v12287_v22, %v12286_v39 }
0x18d5   :  { %v10876_v57 = vadd.f32 %v12288_v37, %v16037_v4  ;;  %10698 = vmatpush1.bf16.msra.mxu0 %v14269_v2  ;;  %v14278_v4 = vld [vmem:[#allocation19 + $0x840] ss:$12 sps:$4 sm:$0xff]  }
0x18d6   :  { %10699 = vmatprep.subr.bf16.mxu0 %v14274_v6 }
0x18d7   :  { %v12289_v5 = vpop.f32.mrb[112].mxu1 }
0x18d8   :  { %v12290_v13 = vpop.f32.mrb[113].mxu1 }
0x18d9   :  { %10700 = vmatpush1.bf16.msra.mxu0 %v14272_v42  ;;  %v12291_v53 = vadd.f32 %v12290_v13, %v12289_v5  ;;  %v12292_v61 = vpop.f32.mrb[114].mxu1 }
0x18da   :  { %10701 = vmatprep.subr.bf16.mxu0 %v14277_v58  ;;  %v12293_v16 = vpop.f32.mrb[115].mxu1 }
0x18db   :  { %v10881_v17 = vadd.f32 %v12291_v53, %v16039_v8  ;;  %v12294_v36 = vadd.f32 %v12293_v16, %v12292_v61  ;;  %v14290_v8 = vld [vmem:[#allocation19 + $0x8a0] ss:$12 sps:$4 sm:$0xff]  }
0x18dd   :  { %v10884_v26 = vadd.f32 %v12294_v36, %v16041_v47  ;;  %10702 = vmatpush1.bf16.msra.mxu0 %v14275_v18  ;;  %v14295_v47 = vld [vmem:[#allocation19 + $0x8bc] ss:$12 sps:$4 sm:$0xff]  }
0x18de   :  { %10703 = vmatprep.subr.bf16.mxu0 %v14280_v59 }
0x18e1   :  { %10704 = vmatpush1.bf16.msra.mxu0 %v14278_v4 }
0x18e2   :  { %10705 = vmatprep.subr.bf16.mxu0 %v14283_v21 }
0x18e5   :  { %10706 = vmatpush1.bf16.msra.mxu0 %v14281_v10 }
0x18e6   :  { %10707 = vmatprep.subr.bf16.mxu0 %v14286_v44 }
0x18e9   :  { %10708 = vmatpush1.bf16.msra.mxu0 %v14284_v38 }
0x18ea   :  { %10709 = vmatprep.subr.bf16.mxu0 %v14289_v62 }
0x18ed   :  { %10710 = vmatpush1.bf16.msra.mxu0 %v14287_v51 }
0x18ee   :  { %10711 = vmatprep.subr.bf16.mxu0 %v14292_v1 }
0x18f0   :  { %v12311_v12 = vpop.f32.mrb[116].mxu1 }
0x18f1   :  { %10712 = vmatpush1.bf16.msra.mxu0 %v14290_v8  ;;  %v12312_v48 = vpop.f32.mrb[117].mxu1 }
0x18f2   :  { %v12313_v49 = vadd.f32 %v12312_v48, %v12311_v12  ;;  %v12314_v56 = vpop.f32.mrb[118].mxu1  ;;  %10713 = vmatprep.subr.bf16.mxu0 %v14295_v47 }
0x18f3   :  { %v12315_v15 = vpop.f32.mrb[119].mxu1 }
0x18f4   :  { %v10922_v25 = vadd.f32 %v12313_v49, %v10873_v30  ;;  %v12316_v63 = vadd.f32 %v12315_v15, %v12314_v56 }
0x18f5   :  { %10714 = vmatpush1.bf16.msra.mxu0 %v14293_v35 }
0x18f6   :  { %v10925_v23 = vadd.f32 %v12316_v63, %v10876_v57  ;;  %10715 = vmatprep.subr.bf16.mxu0 %v14298_v45 }
0x18f8   :  { %v12317_v3 = vpop.f32.mrb[120].mxu1 }
0x18f9   :  { %10716 = vmatpush1.bf16.msra.mxu0 %v14296_v34  ;;  %v12318_v0 = vpop.f32.mrb[121].mxu1 }
0x18fa   :  { %v12319_v9 = vadd.f32 %v12318_v0, %v12317_v3  ;;  %v12320_v11 = vpop.f32.mrb[122].mxu1  ;;  %10717 = vmatprep.subr.bf16.mxu0 %v14301_v32 }
0x18fb   :  { %v12321_v39 = vpop.f32.mrb[123].mxu1 }
0x18fc   :  { %v10930_v2 = vadd.f32 %v12319_v9, %v10881_v17  ;;  %v12322_v22 = vadd.f32 %v12321_v39, %v12320_v11 }
0x18fd   :  { %10718 = vmatpush1.bf16.msra.mxu0 %v14299_v55 }
0x18fe   :  { %v10933_v6 = vadd.f32 %v12322_v22, %v10884_v26 }
0x1900   :  { %10720 = vmatmul.mubr.bf16.vlgmr.msra.gmra.mrb[64].mxu0 %v16003_v41 }
0x1901   :  { %10729 = vmatprep.mubr.bf16.mxu0 %v16019_v60 }
0x1908   :  { %10730 = vmatmul.mubr.bf16.gmra.mrb[68].mxu0 %v16015_v52 }
0x1930   :  { %v12339_v30 = vpop.f32.mrb[124].mxu1 }
0x1931   :  { %v12340_v37 = vpop.f32.mrb[125].mxu1 }
0x1932   :  { %v12341_v57 = vadd.f32 %v12340_v37, %v12339_v30  ;;  %v12342_v42 = vpop.f32.mrb[126].mxu1 }
0x1933   :  { %v12343_v58 = vpop.f32.mrb[127].mxu1 }
0x1934   :  { %v10971_v5 = vadd.f32 %v12341_v57, %v10922_v25  ;;  %v12344_v13 = vadd.f32 %v12343_v58, %v12342_v42 }
0x1936   :  { %v10974_v53 = vadd.f32 %v12344_v13, %v10925_v23 }
0x1938   :  { %v12345_v61 = vpop.f32.mrb[128].mxu1 }
0x1939   :  { %v12346_v18 = vpop.f32.mrb[129].mxu1 }
0x193a   :  { %v12347_v16 = vadd.f32 %v12346_v18, %v12345_v61  ;;  %v12348_v59 = vpop.f32.mrb[130].mxu1 }
0x193b   :  { %v12349_v17 = vpop.f32.mrb[131].mxu1 }
0x193c   :  { %v10979_v36 = vadd.f32 %v12347_v16, %v10930_v2  ;;  %v12350_v26 = vadd.f32 %v12349_v17, %v12348_v59 }
0x193e   :  { %v10982_v41 = vadd.f32 %v12350_v26, %v10933_v6 }
0x1950   :  { %v12367_v4 = vpop.f32.mrb[132].mxu1 }
0x1951   :  { %v12368_v60 = vpop.f32.mrb[133].mxu1 }
0x1952   :  { %v12369_v21 = vadd.f32 %v12368_v60, %v12367_v4  ;;  %v12370_v52 = vpop.f32.mrb[134].mxu1 }
0x1953   :  { %v12371_v10 = vpop.f32.mrb[135].mxu1 }
0x1954   :  { %v11020_v44 = vadd.f32 %v12369_v21, %v10971_v5  ;;  %v12372_v38 = vadd.f32 %v12371_v10, %v12370_v52 }
0x1956   :  { %v11036_v62 = vadd.f32 %v11020_v44, %v15689_v27  ;;  %v11023_v51 = vadd.f32 %v12372_v38, %v10974_v53  ;;  %v8874_v27 = vrot.slane %v16031_v19, %v16140_v28 }
0x1958   :  { %11048 = vst [vmem:[#allocation22 + $0x10] sm:$0xff] %v11036_v62  ;;  %v11039_v1 = vadd.f32 %v11023_v51, %v15697_v46  ;;  %v12373_v8 = vpop.f32.mrb[136].mxu1  ;;  %v8878_v46 = vrot.slane %v16031_v19, %v16141_v24 }
0x1959   :  { %v12374_v47 = vpop.f32.mrb[137].mxu1 }
0x195a   :  { %11051 = vst [vmem:[#allocation22 + $0x28] sm:$0xff] %v11039_v1  ;;  %v12375_v12 = vadd.f32 %v12374_v47, %v12373_v8  ;;  %v12376_v48 = vpop.f32.mrb[138].mxu1 }
0x195b   :  { %v12377_v35 = vpop.f32.mrb[139].mxu1 }
0x195c   :  { %v11028_v49 = vadd.f32 %v12375_v12, %v10979_v36  ;;  %v12378_v56 = vadd.f32 %v12377_v35, %v12376_v48 }
0x195e   :  { %v11042_v45 = vadd.f32 %v11028_v49, %v15705_v33  ;;  %v11031_v15 = vadd.f32 %v12378_v56, %v10982_v41 }
0x1960   :  { %11054 = vst [vmem:[#allocation22 + $0x40] sm:$0xff] %v11042_v45  ;;  %v11045_v25 = vadd.f32 %v11031_v15, %v15711_v7 }
0x1962   :  { %11057 = vst [vmem:[#allocation22 + $0x58] sm:$0xff] %v11045_v25 }
0x19d3   :  { %v10721_v63 = vpop.f32.mrb[64].mxu0 }
0x19d4   :  { %v12807_v34 = vadd.f32 %v10721_v63, %v8874_v27  ;;  %v10723_v23 = vpop.f32.mrb[65].mxu0 }
0x19d5   :  { %v12808_v32 = vadd.f32 %v10723_v23, %v8878_v46  ;;  %v10725_v3 = vpop.f32.mrb[66].mxu0 }
0x19d6   :  { %v11034_v0 = vadd.f32 %v12807_v34, %v15680_v43  ;;  %v12809_v55 = vadd.f32 %v10725_v3, %v8874_v27  ;;  %v10727_v33 = vpop.f32.mrb[67].mxu0 }
0x19d7   :  { %v11035_v9 = vadd.f32 %v12808_v32, %v15682_v29  ;;  %v12810_v11 = vadd.f32 %v10727_v33, %v8878_v46 }
0x19d8   :  { %11046 = vst [vmem:[#allocation22] sm:$0xff] %v11034_v0  ;;  %v11037_v7 = vadd.f32 %v12809_v55, %v15685_v14 }
0x19d9   :  { %11047 = vst [vmem:[#allocation22 + $0x8] sm:$0xff] %v11035_v9  ;;  %v11038_v28 = vadd.f32 %v12810_v11, %v15687_v54 }
0x19da   :  { %11049 = vst [vmem:[#allocation22 + $0x18] sm:$0xff] %v11037_v7 }
0x19db   :  { %11050 = vst [vmem:[#allocation22 + $0x20] sm:$0xff] %v11038_v28  ;;  %v10731_v24 = vpop.f32.mrb[68].mxu0 }
0x19dc   :  { %v12811_v19 = vadd.f32 %v10731_v24, %v8874_v27  ;;  %v10733_v39 = vpop.f32.mrb[69].mxu0 }
0x19dd   :  { %v12812_v2 = vadd.f32 %v10733_v39, %v8878_v46  ;;  %v10735_v22 = vpop.f32.mrb[70].mxu0 }
0x19de   :  { %v11040_v43 = vadd.f32 %v12811_v19, %v15695_v20  ;;  %v12813_v6 = vadd.f32 %v10735_v22, %v8874_v27  ;;  %v10737_v30 = vpop.f32.mrb[71].mxu0 }
0x19df   :  { %v11041_v29 = vadd.f32 %v12812_v2, %v15700_v50  ;;  %v12814_v37 = vadd.f32 %v10737_v30, %v8878_v46 }
0x19e0   :  { %11052 = vst [vmem:[#allocation22 + $0x30] sm:$0xff] %v11040_v43  ;;  %v11043_v14 = vadd.f32 %v12813_v6, %v15702_v31 }
0x19e1   :  { %11053 = vst [vmem:[#allocation22 + $0x38] sm:$0xff] %v11041_v29  ;;  %v11044_v54 = vadd.f32 %v12814_v37, %v15707_v40 }
0x19e2   :  { %11055 = vst [vmem:[#allocation22 + $0x48] sm:$0xff] %v11043_v14 }
0x19e3   :  { %11056 = vst [vmem:[#allocation22 + $0x50] sm:$0xff] %v11044_v54 }
0x19e4   :  { %14707 = shalt.err (!%p14704_p2)
}
0x19e5   :  { %s14708_s29 = scalar_lea.hbm %s16097_s12, 1536 }
0x19e6   :  { %p14709_p3 = scmp.ne.s32.totalorder %s16097_s12, %s14708_s29  ;;  %p14712_p4 = scmp.lt.u32.totalorder %s14708_s29, %s16097_s12 }
0x19e8   :  { %p14714_p5 = pnand %p14712_p4, %p14709_p3 }
0x19ea   :  { %14717 = shalt.err (!%p14714_p5)
}
0x19eb   :  { %11069 = dma.vmem_to_hbm [thread:$0]  %s11064_s22, 1536, %s16097_s12, [#allocation4], %s14742_s9, %s14742_s9, %s14743_s18  }
0x19ec   :  { %14732 = dma.done.wait [#allocation4], 1536  }
0x19ed   :  { %14733 = vsyncadd [#allocation4], 4294965760 }
0x19ee   :  { %11073 = vsyncpa [#allocation3], 1 }
0x19ef   :  { %11074 = vsyncpa [#allocation6], 1 }
0x19f0   :  { %11075 = vsyncpa [#allocation9], 1 }
0x19f1   :  { %11076 = vsyncpa [#allocation12], 1 }
0x19f2   :  { %11077 = vsyncpa [#allocation15], 1 }
0x19f3   :  { %11078 = vsyncpa [#allocation18], 1 }
0x19f4   :  { %11079 = vsyncpa [#allocation21], 1 }
0x19f5   :  { %11080 = vsyncpa [#allocation4], 1 }

</bundles_post_ra>
